<compile_context>
chip_gen: v5e
topology: v5e:2x2
jax: 0.10.0
libtpu: 0.0.40
codegen_flags: <defaults>
</compile_context>

<pallas_src>
import functools

import jax
import jax.numpy as jnp
from jax.experimental import pallas as pl
from jax.experimental.pallas import tpu as pltpu

IN_EPS = 1e-5   # nn.InstanceNorm2d default eps
LANE = 128


def _round_up(n, m):
    return ((n + m - 1) // m) * m


def _resblock_kernel(x_ref, w1_ref, g1_ref, b1_ref, w2_ref, g2_ref, b2_ref,
                     o_ref, hpad_ref, *, H, W):
    """One batch element: conv3x3 -> IN -> ReLU -> conv3x3 -> IN.

    x_ref:    (H+2, W+2, Cin_p)   bf16, spatially zero-padded input
    w*_ref:   (9, Cin_p, Cout_p)  bf16, tap-major conv weights
    g*/b*:    (1, Cout_p)         f32, InstanceNorm affine params
    o_ref:    (H, W, Cout_p)      f32 output
    hpad_ref: (H+2, W+2, Cout_p)  f32 scratch (zero-padded intermediate)
    """
    Cin = x_ref.shape[-1]
    Cout = o_ref.shape[-1]

    # ---------------- Conv1: 9 shifted-tap MXU matmuls, f32 accumulation -------------
    acc = jnp.zeros((H * W, Cout), jnp.float32)
    for dy in range(3):
        for dx in range(3):
            patch = x_ref[dy:dy + H, dx:dx + W, :].reshape(H * W, Cin)
            acc = acc + jnp.dot(patch, w1_ref[dy * 3 + dx],
                                preferred_element_type=jnp.float32)

    # ---------------- InstanceNorm #1 (per-sample spatial stats) + ReLU --------------
    mean1 = jnp.mean(acc, axis=0, keepdims=True)
    var1 = jnp.mean(jnp.square(acc - mean1), axis=0, keepdims=True)
    y = (acc - mean1) * jax.lax.rsqrt(var1 + IN_EPS) * g1_ref[...] + b1_ref[...]
    y = jnp.maximum(y, 0.0)

    # Zero-padded intermediate (halo for conv2) kept entirely in VMEM.
    # Unconditional zeroing: scratch is per-core, so border must be re-zeroed every step.
    hpad_ref[...] = jnp.zeros_like(hpad_ref)
    hpad_ref[1:H + 1, 1:W + 1, :] = y.reshape(H, W, Cout)

    # ---------------- Conv2 -----------------------------------------------------------
    acc2 = jnp.zeros((H * W, Cout), jnp.float32)
    for dy in range(3):
        for dx in range(3):
            patch = hpad_ref[dy:dy + H, dx:dx + W, :].reshape(H * W, Cout)
            acc2 = acc2 + jnp.dot(patch.astype(jnp.bfloat16), w2_ref[dy * 3 + dx],
                                  preferred_element_type=jnp.float32)

    # ---------------- InstanceNorm #2 --------------------------------------------------
    mean2 = jnp.mean(acc2, axis=0, keepdims=True)
    var2 = jnp.mean(jnp.square(acc2 - mean2), axis=0, keepdims=True)
    out = (acc2 - mean2) * jax.lax.rsqrt(var2 + IN_EPS) * g2_ref[...] + b2_ref[...]

    o_ref[...] = out.reshape(H, W, Cout).astype(o_ref.dtype)


def residual_block_last(x, params):
    """x: (B, C_in, H, W) float32 NCHW. Returns (B, C_out, H, W) float32."""
    w1 = params["conv1_w"]       # (C_out, C_in, 3, 3)  PyTorch OIHW layout
    g1 = params["in1_gamma"]     # (C_out,)
    b1 = params["in1_beta"]      # (C_out,)
    w2 = params["conv2_w"]       # (C_out, C_out, 3, 3)
    g2 = params["in2_gamma"]     # (C_out,)
    b2 = params["in2_beta"]      # (C_out,)

    B, C_in, H, W = x.shape
    C_out = w1.shape[0]
    Cin_p = _round_up(C_in, LANE)
    Cout_p = _round_up(C_out, LANE)

    # Glue: NCHW -> NHWC, zero-pad channels to lane-dense 128 multiples, zero-pad
    # spatial halo (conv padding=1), cast matmul operands to bf16.
    x_nhwc = jnp.transpose(x, (0, 2, 3, 1))
    x_pad = jnp.pad(x_nhwc, ((0, 0), (1, 1), (1, 1), (0, Cin_p - C_in)))
    x_pad = x_pad.astype(jnp.bfloat16)

    def prep_w(w, ci, co, ci_p, co_p):
        wt = jnp.transpose(w, (2, 3, 1, 0))                       # (3, 3, Cin, Cout)
        wt = jnp.pad(wt, ((0, 0), (0, 0), (0, ci_p - ci), (0, co_p - co)))
        return wt.reshape(9, ci_p, co_p).astype(jnp.bfloat16)     # tap-major

    w1_p = prep_w(w1, C_in, C_out, Cin_p, Cout_p)
    w2_p = prep_w(w2, C_out, C_out, Cout_p, Cout_p)

    def prep_vec(v):
        return jnp.pad(v, (0, Cout_p - C_out)).reshape(1, Cout_p).astype(jnp.float32)

    g1_p, b1_p, g2_p, b2_p = map(prep_vec, (g1, b1, g2, b2))

    kernel = functools.partial(_resblock_kernel, H=H, W=W)
    full = lambda shape: pl.BlockSpec(shape, lambda b: (0,) * len(shape))

    out = pl.pallas_call(
        kernel,
        out_shape=jax.ShapeDtypeStruct((B, H, W, Cout_p), jnp.float32),
        grid=(B,),
        in_specs=[
            pl.BlockSpec((None, H + 2, W + 2, Cin_p), lambda b: (b, 0, 0, 0)),
            full((9, Cin_p, Cout_p)),
            full((1, Cout_p)),
            full((1, Cout_p)),
            full((9, Cout_p, Cout_p)),
            full((1, Cout_p)),
            full((1, Cout_p)),
        ],
        out_specs=pl.BlockSpec((None, H, W, Cout_p), lambda b: (b, 0, 0, 0)),
        scratch_shapes=[pltpu.VMEM((H + 2, W + 2, Cout_p), jnp.float32)],
        compiler_params=pltpu.CompilerParams(
            dimension_semantics=("parallel",),
            vmem_limit_bytes=32 * 1024 * 1024),
    )(x_pad, w1_p, g1_p, b1_p, w2_p, g2_p, b2_p)

    # Glue: drop channel padding, NHWC -> NCHW.
    return jnp.transpose(out[..., :C_out], (0, 3, 1, 2))


if __name__ == "__main__":
    key = jax.random.PRNGKey(0)
    B, C_in, C_out, H, W = 2, 64, 64, 16, 16   # small StarGAN-style block
    ks = jax.random.split(key, 8)
    x = jax.random.normal(ks[0], (B, C_in, H, W), jnp.float32)
    params = {
        "conv1_w": 0.05 * jax.random.normal(ks[1], (C_out, C_in, 3, 3), jnp.float32),
        "in1_gamma": 1.0 + 0.1 * jax.random.normal(ks[2], (C_out,), jnp.float32),
        "in1_beta": 0.1 * jax.random.normal(ks[3], (C_out,), jnp.float32),
        "conv2_w": 0.05 * jax.random.normal(ks[4], (C_out, C_out, 3, 3), jnp.float32),
        "in2_gamma": 1.0 + 0.1 * jax.random.normal(ks[5], (C_out,), jnp.float32),
        "in2_beta": 0.1 * jax.random.normal(ks[6], (C_out,), jnp.float32),
    }

    out = jax.block_until_ready(residual_block_last(x, params))
    assert out.shape == (B, C_out, H, W)

    # ---- pure-JAX reference (same bf16 operand rounding as the kernel's MXU path) ----
    def conv3x3(xn, w):  # xn: (B,H,W,Ci) f32; w: (Co,Ci,3,3) f32
        wt = jnp.transpose(w, (2, 3, 1, 0))  # HWIO
        return jax.lax.conv_general_dilated(
            xn, wt, (1, 1), ((1, 1), (1, 1)),
            dimension_numbers=("NHWC", "HWIO", "NHWC"))

    def inorm(y, g, b):
        m = jnp.mean(y, axis=(1, 2), keepdims=True)
        v = jnp.mean(jnp.square(y - m), axis=(1, 2), keepdims=True)
        return (y - m) * jax.lax.rsqrt(v + IN_EPS) * g + b

    bf = lambda a: a.astype(jnp.bfloat16).astype(jnp.float32)
    x_nhwc = jnp.transpose(x, (0, 2, 3, 1))
    h = conv3x3(bf(x_nhwc), bf(params["conv1_w"]))
    h = jnp.maximum(inorm(h, params["in1_gamma"], params["in1_beta"]), 0.0)
    r = conv3x3(bf(h), bf(params["conv2_w"]))
    r = inorm(r, params["in2_gamma"], params["in2_beta"])
    ref = jnp.transpose(r, (0, 3, 1, 2))

    err = float(jnp.max(jnp.abs(out - ref)))
    assert jnp.allclose(out, ref, atol=2e-2, rtol=2e-2), f"max abs err {err}"
    print("KERNEL_OK")
</pallas_src>

<mosaic_0001>
module attributes {stable_mosaic.version = 11 : i64} {
  func.func @_resblock_kernel(%arg0: i32, %arg1: memref<1x18x18x128xbf16, #tpu.memory_space<vmem>>, %arg2: memref<9x128x128xbf16, #tpu.memory_space<vmem>>, %arg3: memref<1x128xf32, #tpu.memory_space<vmem>>, %arg4: memref<1x128xf32, #tpu.memory_space<vmem>>, %arg5: memref<9x128x128xbf16, #tpu.memory_space<vmem>>, %arg6: memref<1x128xf32, #tpu.memory_space<vmem>>, %arg7: memref<1x128xf32, #tpu.memory_space<vmem>>, %arg8: memref<1x16x16x128xf32, #tpu.memory_space<vmem>>, %arg9: memref<18x18x128xf32, #tpu.memory_space<vmem>>) attributes {dimension_semantics = [#tpu.dimension_semantics<parallel>], iteration_bounds = array<i64: 2>, scalar_prefetch = 0 : i64, scratch_operands = 1 : i64, tpu.core_type = #tpu.core_type<tc>, window_params = [{transform_indices = @transform_0, window_bounds = array<i64: 1, 18, 18, 128>}, {pipeline_mode = #tpu.pipeline_mode<synchronous>, transform_indices = @transform_1, window_bounds = array<i64: 9, 128, 128>}, {pipeline_mode = #tpu.pipeline_mode<synchronous>, transform_indices = @transform_2, window_bounds = array<i64: 1, 128>}, {pipeline_mode = #tpu.pipeline_mode<synchronous>, transform_indices = @transform_3, window_bounds = array<i64: 1, 128>}, {pipeline_mode = #tpu.pipeline_mode<synchronous>, transform_indices = @transform_4, window_bounds = array<i64: 9, 128, 128>}, {pipeline_mode = #tpu.pipeline_mode<synchronous>, transform_indices = @transform_5, window_bounds = array<i64: 1, 128>}, {pipeline_mode = #tpu.pipeline_mode<synchronous>, transform_indices = @transform_6, window_bounds = array<i64: 1, 128>}, {transform_indices = @transform_7, window_bounds = array<i64: 1, 16, 16, 128>}]} {
    %cst = arith.constant 0.000000e+00 : f32
    %0 = vector.broadcast %cst : f32 to vector<256x128xf32>
    %c0 = arith.constant 0 : index
    %c0_0 = arith.constant 0 : index
    %c0_1 = arith.constant 0 : index
    %c0_2 = arith.constant 0 : index
    %1 = vector.load %arg1[%c0, %c0_0, %c0_1, %c0_2] : memref<1x18x18x128xbf16, #tpu.memory_space<vmem>>, vector<1x16x16x128xbf16>
    %2 = vector.shape_cast %1 : vector<1x16x16x128xbf16> to vector<16x16x128xbf16>
    %3 = vector.shape_cast %2 : vector<16x16x128xbf16> to vector<256x128xbf16>
    %c0_3 = arith.constant 0 : index
    %c0_4 = arith.constant 0 : index
    %c0_5 = arith.constant 0 : index
    %4 = vector.load %arg2[%c0_3, %c0_4, %c0_5] : memref<9x128x128xbf16, #tpu.memory_space<vmem>>, vector<1x128x128xbf16>
    %5 = vector.shape_cast %4 : vector<1x128x128xbf16> to vector<128x128xbf16>
    %cst_6 = arith.constant dense<0.000000e+00> : vector<256x128xf32>
    %6 = tpu.matmul %3, %5, %cst_6 {dimension_numbers = #tpu.dot_dimension_numbers<[1], [0], [0], [1], [0, 0, 1, 1], [], []>} : vector<256x128xbf16>, vector<128x128xbf16>, vector<256x128xf32> -> vector<256x128xf32>
    %7 = arith.addf %0, %6 : vector<256x128xf32>
    %c0_7 = arith.constant 0 : index
    %c0_8 = arith.constant 0 : index
    %c1 = arith.constant 1 : index
    %c0_9 = arith.constant 0 : index
    %8 = vector.load %arg1[%c0_7, %c0_8, %c1, %c0_9] : memref<1x18x18x128xbf16, #tpu.memory_space<vmem>>, vector<1x16x16x128xbf16>
    %9 = vector.shape_cast %8 : vector<1x16x16x128xbf16> to vector<16x16x128xbf16>
    %10 = vector.shape_cast %9 : vector<16x16x128xbf16> to vector<256x128xbf16>
    %c1_10 = arith.constant 1 : index
    %c0_11 = arith.constant 0 : index
    %c0_12 = arith.constant 0 : index
    %11 = vector.load %arg2[%c1_10, %c0_11, %c0_12] : memref<9x128x128xbf16, #tpu.memory_space<vmem>>, vector<1x128x128xbf16>
    %12 = vector.shape_cast %11 : vector<1x128x128xbf16> to vector<128x128xbf16>
    %cst_13 = arith.constant dense<0.000000e+00> : vector<256x128xf32>
    %13 = tpu.matmul %10, %12, %cst_13 {dimension_numbers = #tpu.dot_dimension_numbers<[1], [0], [0], [1], [0, 0, 1, 1], [], []>} : vector<256x128xbf16>, vector<128x128xbf16>, vector<256x128xf32> -> vector<256x128xf32>
    %14 = arith.addf %7, %13 : vector<256x128xf32>
    %c0_14 = arith.constant 0 : index
    %c0_15 = arith.constant 0 : index
    %c2 = arith.constant 2 : index
    %c0_16 = arith.constant 0 : index
    %15 = vector.load %arg1[%c0_14, %c0_15, %c2, %c0_16] : memref<1x18x18x128xbf16, #tpu.memory_space<vmem>>, vector<1x16x16x128xbf16>
    %16 = vector.shape_cast %15 : vector<1x16x16x128xbf16> to vector<16x16x128xbf16>
    %17 = vector.shape_cast %16 : vector<16x16x128xbf16> to vector<256x128xbf16>
    %c2_17 = arith.constant 2 : index
    %c0_18 = arith.constant 0 : index
    %c0_19 = arith.constant 0 : index
    %18 = vector.load %arg2[%c2_17, %c0_18, %c0_19] : memref<9x128x128xbf16, #tpu.memory_space<vmem>>, vector<1x128x128xbf16>
    %19 = vector.shape_cast %18 : vector<1x128x128xbf16> to vector<128x128xbf16>
    %cst_20 = arith.constant dense<0.000000e+00> : vector<256x128xf32>
    %20 = tpu.matmul %17, %19, %cst_20 {dimension_numbers = #tpu.dot_dimension_numbers<[1], [0], [0], [1], [0, 0, 1, 1], [], []>} : vector<256x128xbf16>, vector<128x128xbf16>, vector<256x128xf32> -> vector<256x128xf32>
    %21 = arith.addf %14, %20 : vector<256x128xf32>
    %c0_21 = arith.constant 0 : index
    %c1_22 = arith.constant 1 : index
    %c0_23 = arith.constant 0 : index
    %c0_24 = arith.constant 0 : index
    %22 = vector.load %arg1[%c0_21, %c1_22, %c0_23, %c0_24] : memref<1x18x18x128xbf16, #tpu.memory_space<vmem>>, vector<1x16x16x128xbf16>
    %23 = vector.shape_cast %22 : vector<1x16x16x128xbf16> to vector<16x16x128xbf16>
    %24 = vector.shape_cast %23 : vector<16x16x128xbf16> to vector<256x128xbf16>
    %c3 = arith.constant 3 : index
    %c0_25 = arith.constant 0 : index
    %c0_26 = arith.constant 0 : index
    %25 = vector.load %arg2[%c3, %c0_25, %c0_26] : memref<9x128x128xbf16, #tpu.memory_space<vmem>>, vector<1x128x128xbf16>
    %26 = vector.shape_cast %25 : vector<1x128x128xbf16> to vector<128x128xbf16>
    %cst_27 = arith.constant dense<0.000000e+00> : vector<256x128xf32>
    %27 = tpu.matmul %24, %26, %cst_27 {dimension_numbers = #tpu.dot_dimension_numbers<[1], [0], [0], [1], [0, 0, 1, 1], [], []>} : vector<256x128xbf16>, vector<128x128xbf16>, vector<256x128xf32> -> vector<256x128xf32>
    %28 = arith.addf %21, %27 : vector<256x128xf32>
    %c0_28 = arith.constant 0 : index
    %c1_29 = arith.constant 1 : index
    %c1_30 = arith.constant 1 : index
    %c0_31 = arith.constant 0 : index
    %29 = vector.load %arg1[%c0_28, %c1_29, %c1_30, %c0_31] : memref<1x18x18x128xbf16, #tpu.memory_space<vmem>>, vector<1x16x16x128xbf16>
    %30 = vector.shape_cast %29 : vector<1x16x16x128xbf16> to vector<16x16x128xbf16>
    %31 = vector.shape_cast %30 : vector<16x16x128xbf16> to vector<256x128xbf16>
    %c4 = arith.constant 4 : index
    %c0_32 = arith.constant 0 : index
    %c0_33 = arith.constant 0 : index
    %32 = vector.load %arg2[%c4, %c0_32, %c0_33] : memref<9x128x128xbf16, #tpu.memory_space<vmem>>, vector<1x128x128xbf16>
    %33 = vector.shape_cast %32 : vector<1x128x128xbf16> to vector<128x128xbf16>
    %cst_34 = arith.constant dense<0.000000e+00> : vector<256x128xf32>
    %34 = tpu.matmul %31, %33, %cst_34 {dimension_numbers = #tpu.dot_dimension_numbers<[1], [0], [0], [1], [0, 0, 1, 1], [], []>} : vector<256x128xbf16>, vector<128x128xbf16>, vector<256x128xf32> -> vector<256x128xf32>
    %35 = arith.addf %28, %34 : vector<256x128xf32>
    %c0_35 = arith.constant 0 : index
    %c1_36 = arith.constant 1 : index
    %c2_37 = arith.constant 2 : index
    %c0_38 = arith.constant 0 : index
    %36 = vector.load %arg1[%c0_35, %c1_36, %c2_37, %c0_38] : memref<1x18x18x128xbf16, #tpu.memory_space<vmem>>, vector<1x16x16x128xbf16>
    %37 = vector.shape_cast %36 : vector<1x16x16x128xbf16> to vector<16x16x128xbf16>
    %38 = vector.shape_cast %37 : vector<16x16x128xbf16> to vector<256x128xbf16>
    %c5 = arith.constant 5 : index
    %c0_39 = arith.constant 0 : index
    %c0_40 = arith.constant 0 : index
    %39 = vector.load %arg2[%c5, %c0_39, %c0_40] : memref<9x128x128xbf16, #tpu.memory_space<vmem>>, vector<1x128x128xbf16>
    %40 = vector.shape_cast %39 : vector<1x128x128xbf16> to vector<128x128xbf16>
    %cst_41 = arith.constant dense<0.000000e+00> : vector<256x128xf32>
    %41 = tpu.matmul %38, %40, %cst_41 {dimension_numbers = #tpu.dot_dimension_numbers<[1], [0], [0], [1], [0, 0, 1, 1], [], []>} : vector<256x128xbf16>, vector<128x128xbf16>, vector<256x128xf32> -> vector<256x128xf32>
    %42 = arith.addf %35, %41 : vector<256x128xf32>
    %c0_42 = arith.constant 0 : index
    %c2_43 = arith.constant 2 : index
    %c0_44 = arith.constant 0 : index
    %c0_45 = arith.constant 0 : index
    %43 = vector.load %arg1[%c0_42, %c2_43, %c0_44, %c0_45] : memref<1x18x18x128xbf16, #tpu.memory_space<vmem>>, vector<1x16x16x128xbf16>
    %44 = vector.shape_cast %43 : vector<1x16x16x128xbf16> to vector<16x16x128xbf16>
    %45 = vector.shape_cast %44 : vector<16x16x128xbf16> to vector<256x128xbf16>
    %c6 = arith.constant 6 : index
    %c0_46 = arith.constant 0 : index
    %c0_47 = arith.constant 0 : index
    %46 = vector.load %arg2[%c6, %c0_46, %c0_47] : memref<9x128x128xbf16, #tpu.memory_space<vmem>>, vector<1x128x128xbf16>
    %47 = vector.shape_cast %46 : vector<1x128x128xbf16> to vector<128x128xbf16>
    %cst_48 = arith.constant dense<0.000000e+00> : vector<256x128xf32>
    %48 = tpu.matmul %45, %47, %cst_48 {dimension_numbers = #tpu.dot_dimension_numbers<[1], [0], [0], [1], [0, 0, 1, 1], [], []>} : vector<256x128xbf16>, vector<128x128xbf16>, vector<256x128xf32> -> vector<256x128xf32>
    %49 = arith.addf %42, %48 : vector<256x128xf32>
    %c0_49 = arith.constant 0 : index
    %c2_50 = arith.constant 2 : index
    %c1_51 = arith.constant 1 : index
    %c0_52 = arith.constant 0 : index
    %50 = vector.load %arg1[%c0_49, %c2_50, %c1_51, %c0_52] : memref<1x18x18x128xbf16, #tpu.memory_space<vmem>>, vector<1x16x16x128xbf16>
    %51 = vector.shape_cast %50 : vector<1x16x16x128xbf16> to vector<16x16x128xbf16>
    %52 = vector.shape_cast %51 : vector<16x16x128xbf16> to vector<256x128xbf16>
    %c7 = arith.constant 7 : index
    %c0_53 = arith.constant 0 : index
    %c0_54 = arith.constant 0 : index
    %53 = vector.load %arg2[%c7, %c0_53, %c0_54] : memref<9x128x128xbf16, #tpu.memory_space<vmem>>, vector<1x128x128xbf16>
    %54 = vector.shape_cast %53 : vector<1x128x128xbf16> to vector<128x128xbf16>
    %cst_55 = arith.constant dense<0.000000e+00> : vector<256x128xf32>
    %55 = tpu.matmul %52, %54, %cst_55 {dimension_numbers = #tpu.dot_dimension_numbers<[1], [0], [0], [1], [0, 0, 1, 1], [], []>} : vector<256x128xbf16>, vector<128x128xbf16>, vector<256x128xf32> -> vector<256x128xf32>
    %56 = arith.addf %49, %55 : vector<256x128xf32>
    %c0_56 = arith.constant 0 : index
    %c2_57 = arith.constant 2 : index
    %c2_58 = arith.constant 2 : index
    %c0_59 = arith.constant 0 : index
    %57 = vector.load %arg1[%c0_56, %c2_57, %c2_58, %c0_59] : memref<1x18x18x128xbf16, #tpu.memory_space<vmem>>, vector<1x16x16x128xbf16>
    %58 = vector.shape_cast %57 : vector<1x16x16x128xbf16> to vector<16x16x128xbf16>
    %59 = vector.shape_cast %58 : vector<16x16x128xbf16> to vector<256x128xbf16>
    %c8 = arith.constant 8 : index
    %c0_60 = arith.constant 0 : index
    %c0_61 = arith.constant 0 : index
    %60 = vector.load %arg2[%c8, %c0_60, %c0_61] : memref<9x128x128xbf16, #tpu.memory_space<vmem>>, vector<1x128x128xbf16>
    %61 = vector.shape_cast %60 : vector<1x128x128xbf16> to vector<128x128xbf16>
    %cst_62 = arith.constant dense<0.000000e+00> : vector<256x128xf32>
    %62 = tpu.matmul %59, %61, %cst_62 {dimension_numbers = #tpu.dot_dimension_numbers<[1], [0], [0], [1], [0, 0, 1, 1], [], []>} : vector<256x128xbf16>, vector<128x128xbf16>, vector<256x128xf32> -> vector<256x128xf32>
    %63 = arith.addf %56, %62 : vector<256x128xf32>
    %cst_63 = arith.constant dense<0.000000e+00> : vector<128xf32>
    %64 = vector.multi_reduction <add>, %63, %cst_63 [0] : vector<256x128xf32> to vector<128xf32>
    %65 = vector.shape_cast %64 : vector<128xf32> to vector<1x128xf32>
    %cst_64 = arith.constant 2.560000e+02 : f32
    %66 = vector.broadcast %cst_64 : f32 to vector<1x128xf32>
    %67 = arith.divf %65, %66 : vector<1x128xf32>
    %68 = vector.broadcast %67 : vector<1x128xf32> to vector<256x128xf32>
    %69 = arith.subf %63, %68 : vector<256x128xf32>
    %70 = arith.mulf %69, %69 : vector<256x128xf32>
    %cst_65 = arith.constant dense<0.000000e+00> : vector<128xf32>
    %71 = vector.multi_reduction <add>, %70, %cst_65 [0] : vector<256x128xf32> to vector<128xf32>
    %72 = vector.shape_cast %71 : vector<128xf32> to vector<1x128xf32>
    %cst_66 = arith.constant 2.560000e+02 : f32
    %73 = vector.broadcast %cst_66 : f32 to vector<1x128xf32>
    %74 = arith.divf %72, %73 : vector<1x128xf32>
    %75 = vector.broadcast %67 : vector<1x128xf32> to vector<256x128xf32>
    %76 = arith.subf %63, %75 : vector<256x128xf32>
    %cst_67 = arith.constant 9.99999974E-6 : f32
    %77 = vector.broadcast %cst_67 : f32 to vector<1x128xf32>
    %78 = arith.addf %74, %77 : vector<1x128xf32>
    %79 = math.rsqrt %78 : vector<1x128xf32>
    %80 = vector.broadcast %79 : vector<1x128xf32> to vector<256x128xf32>
    %81 = arith.mulf %76, %80 : vector<256x128xf32>
    %c0_68 = arith.constant 0 : index
    %c0_69 = arith.constant 0 : index
    %82 = vector.load %arg3[%c0_68, %c0_69] : memref<1x128xf32, #tpu.memory_space<vmem>>, vector<1x128xf32>
    %83 = vector.broadcast %82 : vector<1x128xf32> to vector<256x128xf32>
    %84 = arith.mulf %81, %83 : vector<256x128xf32>
    %c0_70 = arith.constant 0 : index
    %c0_71 = arith.constant 0 : index
    %85 = vector.load %arg4[%c0_70, %c0_71] : memref<1x128xf32, #tpu.memory_space<vmem>>, vector<1x128xf32>
    %86 = vector.broadcast %85 : vector<1x128xf32> to vector<256x128xf32>
    %87 = arith.addf %84, %86 : vector<256x128xf32>
    %cst_72 = arith.constant 0.000000e+00 : f32
    %88 = vector.broadcast %cst_72 : f32 to vector<256x128xf32>
    %89 = arith.maximumf %87, %88 : vector<256x128xf32>
    %cst_73 = arith.constant 0.000000e+00 : f32
    %90 = vector.broadcast %cst_73 : f32 to vector<18x18x128xf32>
    %c0_74 = arith.constant 0 : index
    %c0_75 = arith.constant 0 : index
    %c0_76 = arith.constant 0 : index
    %91 = vector.load %arg9[%c0_74, %c0_75, %c0_76] : memref<18x18x128xf32, #tpu.memory_space<vmem>>, vector<18x18x128xf32>
    tpu.vector_store %arg9[%c0_74, %c0_75, %c0_76], %90 {strides = array<i32>} : memref<18x18x128xf32, #tpu.memory_space<vmem>>, vector<18x18x128xf32>,
    %92 = vector.shape_cast %89 : vector<256x128xf32> to vector<16x16x128xf32>
    %c1_77 = arith.constant 1 : index
    %c1_78 = arith.constant 1 : index
    %c0_79 = arith.constant 0 : index
    %93 = vector.load %arg9[%c1_77, %c1_78, %c0_79] : memref<18x18x128xf32, #tpu.memory_space<vmem>>, vector<16x16x128xf32>
    tpu.vector_store %arg9[%c1_77, %c1_78, %c0_79], %92 {strides = array<i32>} : memref<18x18x128xf32, #tpu.memory_space<vmem>>, vector<16x16x128xf32>,
    %cst_80 = arith.constant 0.000000e+00 : f32
    %94 = vector.broadcast %cst_80 : f32 to vector<256x128xf32>
    %c0_81 = arith.constant 0 : index
    %c0_82 = arith.constant 0 : index
    %c0_83 = arith.constant 0 : index
    %95 = vector.load %arg9[%c0_81, %c0_82, %c0_83] : memref<18x18x128xf32, #tpu.memory_space<vmem>>, vector<16x16x128xf32>
    %96 = vector.shape_cast %95 : vector<16x16x128xf32> to vector<256x128xf32>
    %97 = arith.truncf %96 : vector<256x128xf32> to vector<256x128xbf16>
    %c0_84 = arith.constant 0 : index
    %c0_85 = arith.constant 0 : index
    %c0_86 = arith.constant 0 : index
    %98 = vector.load %arg5[%c0_84, %c0_85, %c0_86] : memref<9x128x128xbf16, #tpu.memory_space<vmem>>, vector<1x128x128xbf16>
    %99 = vector.shape_cast %98 : vector<1x128x128xbf16> to vector<128x128xbf16>
    %cst_87 = arith.constant dense<0.000000e+00> : vector<256x128xf32>
    %100 = tpu.matmul %97, %99, %cst_87 {dimension_numbers = #tpu.dot_dimension_numbers<[1], [0], [0], [1], [0, 0, 1, 1], [], []>} : vector<256x128xbf16>, vector<128x128xbf16>, vector<256x128xf32> -> vector<256x128xf32>
    %101 = arith.addf %94, %100 : vector<256x128xf32>
    %c0_88 = arith.constant 0 : index
    %c1_89 = arith.constant 1 : index
    %c0_90 = arith.constant 0 : index
    %102 = vector.load %arg9[%c0_88, %c1_89, %c0_90] : memref<18x18x128xf32, #tpu.memory_space<vmem>>, vector<16x16x128xf32>
    %103 = vector.shape_cast %102 : vector<16x16x128xf32> to vector<256x128xf32>
    %104 = arith.truncf %103 : vector<256x128xf32> to vector<256x128xbf16>
    %c1_91 = arith.constant 1 : index
    %c0_92 = arith.constant 0 : index
    %c0_93 = arith.constant 0 : index
    %105 = vector.load %arg5[%c1_91, %c0_92, %c0_93] : memref<9x128x128xbf16, #tpu.memory_space<vmem>>, vector<1x128x128xbf16>
    %106 = vector.shape_cast %105 : vector<1x128x128xbf16> to vector<128x128xbf16>
    %cst_94 = arith.constant dense<0.000000e+00> : vector<256x128xf32>
    %107 = tpu.matmul %104, %106, %cst_94 {dimension_numbers = #tpu.dot_dimension_numbers<[1], [0], [0], [1], [0, 0, 1, 1], [], []>} : vector<256x128xbf16>, vector<128x128xbf16>, vector<256x128xf32> -> vector<256x128xf32>
    %108 = arith.addf %101, %107 : vector<256x128xf32>
    %c0_95 = arith.constant 0 : index
    %c2_96 = arith.constant 2 : index
    %c0_97 = arith.constant 0 : index
    %109 = vector.load %arg9[%c0_95, %c2_96, %c0_97] : memref<18x18x128xf32, #tpu.memory_space<vmem>>, vector<16x16x128xf32>
    %110 = vector.shape_cast %109 : vector<16x16x128xf32> to vector<256x128xf32>
    %111 = arith.truncf %110 : vector<256x128xf32> to vector<256x128xbf16>
    %c2_98 = arith.constant 2 : index
    %c0_99 = arith.constant 0 : index
    %c0_100 = arith.constant 0 : index
    %112 = vector.load %arg5[%c2_98, %c0_99, %c0_100] : memref<9x128x128xbf16, #tpu.memory_space<vmem>>, vector<1x128x128xbf16>
    %113 = vector.shape_cast %112 : vector<1x128x128xbf16> to vector<128x128xbf16>
    %cst_101 = arith.constant dense<0.000000e+00> : vector<256x128xf32>
    %114 = tpu.matmul %111, %113, %cst_101 {dimension_numbers = #tpu.dot_dimension_numbers<[1], [0], [0], [1], [0, 0, 1, 1], [], []>} : vector<256x128xbf16>, vector<128x128xbf16>, vector<256x128xf32> -> vector<256x128xf32>
    %115 = arith.addf %108, %114 : vector<256x128xf32>
    %c1_102 = arith.constant 1 : index
    %c0_103 = arith.constant 0 : index
    %c0_104 = arith.constant 0 : index
    %116 = vector.load %arg9[%c1_102, %c0_103, %c0_104] : memref<18x18x128xf32, #tpu.memory_space<vmem>>, vector<16x16x128xf32>
    %117 = vector.shape_cast %116 : vector<16x16x128xf32> to vector<256x128xf32>
    %118 = arith.truncf %117 : vector<256x128xf32> to vector<256x128xbf16>
    %c3_105 = arith.constant 3 : index
    %c0_106 = arith.constant 0 : index
    %c0_107 = arith.constant 0 : index
    %119 = vector.load %arg5[%c3_105, %c0_106, %c0_107] : memref<9x128x128xbf16, #tpu.memory_space<vmem>>, vector<1x128x128xbf16>
    %120 = vector.shape_cast %119 : vector<1x128x128xbf16> to vector<128x128xbf16>
    %cst_108 = arith.constant dense<0.000000e+00> : vector<256x128xf32>
    %121 = tpu.matmul %118, %120, %cst_108 {dimension_numbers = #tpu.dot_dimension_numbers<[1], [0], [0], [1], [0, 0, 1, 1], [], []>} : vector<256x128xbf16>, vector<128x128xbf16>, vector<256x128xf32> -> vector<256x128xf32>
    %122 = arith.addf %115, %121 : vector<256x128xf32>
    %c1_109 = arith.constant 1 : index
    %c1_110 = arith.constant 1 : index
    %c0_111 = arith.constant 0 : index
    %123 = vector.load %arg9[%c1_109, %c1_110, %c0_111] : memref<18x18x128xf32, #tpu.memory_space<vmem>>, vector<16x16x128xf32>
    %124 = vector.shape_cast %123 : vector<16x16x128xf32> to vector<256x128xf32>
    %125 = arith.truncf %124 : vector<256x128xf32> to vector<256x128xbf16>
    %c4_112 = arith.constant 4 : index
    %c0_113 = arith.constant 0 : index
    %c0_114 = arith.constant 0 : index
    %126 = vector.load %arg5[%c4_112, %c0_113, %c0_114] : memref<9x128x128xbf16, #tpu.memory_space<vmem>>, vector<1x128x128xbf16>
    %127 = vector.shape_cast %126 : vector<1x128x128xbf16> to vector<128x128xbf16>
    %cst_115 = arith.constant dense<0.000000e+00> : vector<256x128xf32>
    %128 = tpu.matmul %125, %127, %cst_115 {dimension_numbers = #tpu.dot_dimension_numbers<[1], [0], [0], [1], [0, 0, 1, 1], [], []>} : vector<256x128xbf16>, vector<128x128xbf16>, vector<256x128xf32> -> vector<256x128xf32>
    %129 = arith.addf %122, %128 : vector<256x128xf32>
    %c1_116 = arith.constant 1 : index
    %c2_117 = arith.constant 2 : index
    %c0_118 = arith.constant 0 : index
    %130 = vector.load %arg9[%c1_116, %c2_117, %c0_118] : memref<18x18x128xf32, #tpu.memory_space<vmem>>, vector<16x16x128xf32>
    %131 = vector.shape_cast %130 : vector<16x16x128xf32> to vector<256x128xf32>
    %132 = arith.truncf %131 : vector<256x128xf32> to vector<256x128xbf16>
    %c5_119 = arith.constant 5 : index
    %c0_120 = arith.constant 0 : index
    %c0_121 = arith.constant 0 : index
    %133 = vector.load %arg5[%c5_119, %c0_120, %c0_121] : memref<9x128x128xbf16, #tpu.memory_space<vmem>>, vector<1x128x128xbf16>
    %134 = vector.shape_cast %133 : vector<1x128x128xbf16> to vector<128x128xbf16>
    %cst_122 = arith.constant dense<0.000000e+00> : vector<256x128xf32>
    %135 = tpu.matmul %132, %134, %cst_122 {dimension_numbers = #tpu.dot_dimension_numbers<[1], [0], [0], [1], [0, 0, 1, 1], [], []>} : vector<256x128xbf16>, vector<128x128xbf16>, vector<256x128xf32> -> vector<256x128xf32>
    %136 = arith.addf %129, %135 : vector<256x128xf32>
    %c2_123 = arith.constant 2 : index
    %c0_124 = arith.constant 0 : index
    %c0_125 = arith.constant 0 : index
    %137 = vector.load %arg9[%c2_123, %c0_124, %c0_125] : memref<18x18x128xf32, #tpu.memory_space<vmem>>, vector<16x16x128xf32>
    %138 = vector.shape_cast %137 : vector<16x16x128xf32> to vector<256x128xf32>
    %139 = arith.truncf %138 : vector<256x128xf32> to vector<256x128xbf16>
    %c6_126 = arith.constant 6 : index
    %c0_127 = arith.constant 0 : index
    %c0_128 = arith.constant 0 : index
    %140 = vector.load %arg5[%c6_126, %c0_127, %c0_128] : memref<9x128x128xbf16, #tpu.memory_space<vmem>>, vector<1x128x128xbf16>
    %141 = vector.shape_cast %140 : vector<1x128x128xbf16> to vector<128x128xbf16>
    %cst_129 = arith.constant dense<0.000000e+00> : vector<256x128xf32>
    %142 = tpu.matmul %139, %141, %cst_129 {dimension_numbers = #tpu.dot_dimension_numbers<[1], [0], [0], [1], [0, 0, 1, 1], [], []>} : vector<256x128xbf16>, vector<128x128xbf16>, vector<256x128xf32> -> vector<256x128xf32>
    %143 = arith.addf %136, %142 : vector<256x128xf32>
    %c2_130 = arith.constant 2 : index
    %c1_131 = arith.constant 1 : index
    %c0_132 = arith.constant 0 : index
    %144 = vector.load %arg9[%c2_130, %c1_131, %c0_132] : memref<18x18x128xf32, #tpu.memory_space<vmem>>, vector<16x16x128xf32>
    %145 = vector.shape_cast %144 : vector<16x16x128xf32> to vector<256x128xf32>
    %146 = arith.truncf %145 : vector<256x128xf32> to vector<256x128xbf16>
    %c7_133 = arith.constant 7 : index
    %c0_134 = arith.constant 0 : index
    %c0_135 = arith.constant 0 : index
    %147 = vector.load %arg5[%c7_133, %c0_134, %c0_135] : memref<9x128x128xbf16, #tpu.memory_space<vmem>>, vector<1x128x128xbf16>
    %148 = vector.shape_cast %147 : vector<1x128x128xbf16> to vector<128x128xbf16>
    %cst_136 = arith.constant dense<0.000000e+00> : vector<256x128xf32>
    %149 = tpu.matmul %146, %148, %cst_136 {dimension_numbers = #tpu.dot_dimension_numbers<[1], [0], [0], [1], [0, 0, 1, 1], [], []>} : vector<256x128xbf16>, vector<128x128xbf16>, vector<256x128xf32> -> vector<256x128xf32>
    %150 = arith.addf %143, %149 : vector<256x128xf32>
    %c2_137 = arith.constant 2 : index
    %c2_138 = arith.constant 2 : index
    %c0_139 = arith.constant 0 : index
    %151 = vector.load %arg9[%c2_137, %c2_138, %c0_139] : memref<18x18x128xf32, #tpu.memory_space<vmem>>, vector<16x16x128xf32>
    %152 = vector.shape_cast %151 : vector<16x16x128xf32> to vector<256x128xf32>
    %153 = arith.truncf %152 : vector<256x128xf32> to vector<256x128xbf16>
    %c8_140 = arith.constant 8 : index
    %c0_141 = arith.constant 0 : index
    %c0_142 = arith.constant 0 : index
    %154 = vector.load %arg5[%c8_140, %c0_141, %c0_142] : memref<9x128x128xbf16, #tpu.memory_space<vmem>>, vector<1x128x128xbf16>
    %155 = vector.shape_cast %154 : vector<1x128x128xbf16> to vector<128x128xbf16>
    %cst_143 = arith.constant dense<0.000000e+00> : vector<256x128xf32>
    %156 = tpu.matmul %153, %155, %cst_143 {dimension_numbers = #tpu.dot_dimension_numbers<[1], [0], [0], [1], [0, 0, 1, 1], [], []>} : vector<256x128xbf16>, vector<128x128xbf16>, vector<256x128xf32> -> vector<256x128xf32>
    %157 = arith.addf %150, %156 : vector<256x128xf32>
    %cst_144 = arith.constant dense<0.000000e+00> : vector<128xf32>
    %158 = vector.multi_reduction <add>, %157, %cst_144 [0] : vector<256x128xf32> to vector<128xf32>
    %159 = vector.shape_cast %158 : vector<128xf32> to vector<1x128xf32>
    %cst_145 = arith.constant 2.560000e+02 : f32
    %160 = vector.broadcast %cst_145 : f32 to vector<1x128xf32>
    %161 = arith.divf %159, %160 : vector<1x128xf32>
    %162 = vector.broadcast %161 : vector<1x128xf32> to vector<256x128xf32>
    %163 = arith.subf %157, %162 : vector<256x128xf32>
    %164 = arith.mulf %163, %163 : vector<256x128xf32>
    %cst_146 = arith.constant dense<0.000000e+00> : vector<128xf32>
    %165 = vector.multi_reduction <add>, %164, %cst_146 [0] : vector<256x128xf32> to vector<128xf32>
    %166 = vector.shape_cast %165 : vector<128xf32> to vector<1x128xf32>
    %cst_147 = arith.constant 2.560000e+02 : f32
    %167 = vector.broadcast %cst_147 : f32 to vector<1x128xf32>
    %168 = arith.divf %166, %167 : vector<1x128xf32>
    %169 = vector.broadcast %161 : vector<1x128xf32> to vector<256x128xf32>
    %170 = arith.subf %157, %169 : vector<256x128xf32>
    %cst_148 = arith.constant 9.99999974E-6 : f32
    %171 = vector.broadcast %cst_148 : f32 to vector<1x128xf32>
    %172 = arith.addf %168, %171 : vector<1x128xf32>
    %173 = math.rsqrt %172 : vector<1x128xf32>
    %174 = vector.broadcast %173 : vector<1x128xf32> to vector<256x128xf32>
    %175 = arith.mulf %170, %174 : vector<256x128xf32>
    %c0_149 = arith.constant 0 : index
    %c0_150 = arith.constant 0 : index
    %176 = vector.load %arg6[%c0_149, %c0_150] : memref<1x128xf32, #tpu.memory_space<vmem>>, vector<1x128xf32>
    %177 = vector.broadcast %176 : vector<1x128xf32> to vector<256x128xf32>
    %178 = arith.mulf %175, %177 : vector<256x128xf32>
    %c0_151 = arith.constant 0 : index
    %c0_152 = arith.constant 0 : index
    %179 = vector.load %arg7[%c0_151, %c0_152] : memref<1x128xf32, #tpu.memory_space<vmem>>, vector<1x128xf32>
    %180 = vector.broadcast %179 : vector<1x128xf32> to vector<256x128xf32>
    %181 = arith.addf %178, %180 : vector<256x128xf32>
    %182 = vector.shape_cast %181 : vector<256x128xf32> to vector<16x16x128xf32>
    %c0_153 = arith.constant 0 : index
    %c0_154 = arith.constant 0 : index
    %c0_155 = arith.constant 0 : index
    %c0_156 = arith.constant 0 : index
    %183 = vector.load %arg8[%c0_153, %c0_154, %c0_155, %c0_156] : memref<1x16x16x128xf32, #tpu.memory_space<vmem>>, vector<1x16x16x128xf32>
    %184 = vector.shape_cast %183 : vector<1x16x16x128xf32> to vector<16x16x128xf32>
    %185 = vector.shape_cast %182 : vector<16x16x128xf32> to vector<1x16x16x128xf32>
    tpu.vector_store %arg8[%c0_153, %c0_154, %c0_155, %c0_156], %185 {strides = array<i32>} : memref<1x16x16x128xf32, #tpu.memory_space<vmem>>, vector<1x16x16x128xf32>,
    return
  }
  func.func @transform_0(%arg0: i32) -> (i32, i32, i32, i32) {
    %c0_i32 = arith.constant 0 : i32
    %c0_i32_0 = arith.constant 0 : i32
    %c0_i32_1 = arith.constant 0 : i32
    %c0_i32_2 = arith.constant 0 : i32
    return %arg0, %c0_i32, %c0_i32_0, %c0_i32_1 : i32, i32, i32, i32
  }
  func.func @transform_1(%arg0: i32) -> (i32, i32, i32) {
    %c0_i32 = arith.constant 0 : i32
    %c0_i32_0 = arith.constant 0 : i32
    %c0_i32_1 = arith.constant 0 : i32
    %c0_i32_2 = arith.constant 0 : i32
    return %c0_i32, %c0_i32_0, %c0_i32_1 : i32, i32, i32
  }
  func.func @transform_2(%arg0: i32) -> (i32, i32) {
    %c0_i32 = arith.constant 0 : i32
    %c0_i32_0 = arith.constant 0 : i32
    %c0_i32_1 = arith.constant 0 : i32
    return %c0_i32, %c0_i32_0 : i32, i32
  }
  func.func @transform_3(%arg0: i32) -> (i32, i32) {
    %c0_i32 = arith.constant 0 : i32
    %c0_i32_0 = arith.constant 0 : i32
    %c0_i32_1 = arith.constant 0 : i32
    return %c0_i32, %c0_i32_0 : i32, i32
  }
  func.func @transform_4(%arg0: i32) -> (i32, i32, i32) {
    %c0_i32 = arith.constant 0 : i32
    %c0_i32_0 = arith.constant 0 : i32
    %c0_i32_1 = arith.constant 0 : i32
    %c0_i32_2 = arith.constant 0 : i32
    return %c0_i32, %c0_i32_0, %c0_i32_1 : i32, i32, i32
  }
  func.func @transform_5(%arg0: i32) -> (i32, i32) {
    %c0_i32 = arith.constant 0 : i32
    %c0_i32_0 = arith.constant 0 : i32
    %c0_i32_1 = arith.constant 0 : i32
    return %c0_i32, %c0_i32_0 : i32, i32
  }
  func.func @transform_6(%arg0: i32) -> (i32, i32) {
    %c0_i32 = arith.constant 0 : i32
    %c0_i32_0 = arith.constant 0 : i32
    %c0_i32_1 = arith.constant 0 : i32
    return %c0_i32, %c0_i32_0 : i32, i32
  }
  func.func @transform_7(%arg0: i32) -> (i32, i32, i32, i32) {
    %c0_i32 = arith.constant 0 : i32
    %c0_i32_0 = arith.constant 0 : i32
    %c0_i32_1 = arith.constant 0 : i32
    %c0_i32_2 = arith.constant 0 : i32
    return %arg0, %c0_i32, %c0_i32_0, %c0_i32_1 : i32, i32, i32, i32
  }
}

</mosaic_0001>

<bundles_post_ra>
// kernel: tpu_custom_call.1
= control target key start
LH: loop header
LB: loop body
LE: loop exit
PB: predicated region body
PF: predicated region fallthrough
CT: control target
= control target key end

     0   :  { %12 = vsyncpa [#allocation4], 0  ;;  %s11651_s0 = inlined_call_operand.vmem [shape: bf16[2,18,18,128], index: 0, kind: input, shape index: {}]   ;;  %s11652_s1 = inlined_call_operand.vmem [shape: bf16[9,128,128], index: 1, kind: input, shape index: {}]   ;;  %s11653_s2 = inlined_call_operand.vmem [shape: f32[1,128], index: 2, kind: input, shape index: {}]   ;;  %s11654_s3 = inlined_call_operand.vmem [shape: f32[1,128], index: 3, kind: input, shape index: {}]   ;;  %s11655_s4 = inlined_call_operand.hbm [shape: bf16[9,128,128], index: 4, kind: input, shape index: {}]   ;;  %s11656_s5 = inlined_call_operand.vmem [shape: f32[1,128], index: 5, kind: input, shape index: {}]   ;;  %s11657_s6 = inlined_call_operand.vmem [shape: f32[1,128], index: 6, kind: input, shape index: {}]   ;;  %s11658_s7 = inlined_call_operand.hbm [shape: f32[2,16,16,128], index: 7, kind: output, shape index: {}]  }
   0x1   :  { %13 = vsyncpa [#allocation5], 0 }
   0x2   :  { %15 = vsyncpa [#allocation5 + $0x1], 0  ;;  %s8844_s24 = smov 0   ;;  %s8846_s25 = smov 0  }
   0x3   :  { %s8848_s26 = smov 0   ;;  %s8850_s27 = smov 0  }
   0x4 LB: > { %s8865_s28 = sadd.s32 4294967295, %s8795_s27   ;;  %s7255_s29 = sadd.s32 4294967294, %s8795_s27   ;;  %s8795_s27 = sphi %s8850_s27, %s11725_s27   ;;  %s8791_s26 = sphi %s8848_s26, %s11724_s26   ;;  %s8787_s25 = sphi %s8846_s25, %s11723_s25   ;;  %s8783_s24 = sphi %s8844_s24, %s11722_s24  }
   0x5   : > { %s8869_s30 = sadd.s32 1, %s8795_s27   ;;  %s180_s8 = sadd.s32 1, %s8791_s26 }
   0x6   : > { %s177_s9 = ssub.s32 %s8795_s27, %s8869_s30  ;;  %p190_p0 = scmp.ne.s32.totalorder %s8791_s26, %s8787_s25 }
   0x7   : > { %p178_p1 = scmp.eq.s32.totalorder %s177_s9, 0  ;;  %p191_p2 = scmp.eq.s32.totalorder %s8865_s28, 1 }
   0x8   : > { %p196_p3 = scmp.ne.s32.totalorder %s8787_s25, %s8783_s24  ;;  %p197_p4 = scmp.eq.s32.totalorder %s7255_s29, 1 }
   0x9   : > { %s8880_s10 = scalar_select %p178_p1, %s8791_s26, %s180_s8  }
   0xa   : > { %p8882_p5 = por %p191_p2, %p190_p0  ;;  %p8886_p6 = por %p197_p4, %p196_p3 }
   0xb   : > { %p7256_p7 = scmp.ge.s32.totalorder %s8795_s27, 1  ;;  %p204_p8 = scmp.lt.s32.totalorder %s8795_s27, 3 }
   0xc   : > { %p8628_p9 = scmp.eq.s32.totalorder %s8865_s28, 0  ;;  %s224_s15 = sshll.u32 %s11655_s4, 4  ;;  %s225_s15 = int_to_ptr.hbm [resolvable:$true] %s224_s15 }
   0xd   : > { %p205_p10 = pnand %p7256_p7, %p204_p8  ;;  %s8797_s16 = smov [#allocation3]  }
   0xe   : > { %s226_s17 = sshll.u32 %s8797_s16, 4  ;;  %s8798_s18 = smov 64   ;;  %s227_s17 = int_to_ptr.vmem [resolvable:$true] %s226_s17 }
   0xf   : > { %p8620_p11 = pneg %p205_p10  ;;  %s8799_s19 = smov 4  }
  0x10   : > { %256 = sbr.rel (%p205_p10) target bundleno = 2020 (0x7e4), region = 48 }
  0x11   : > { %p8621_p12 = pnand %p8628_p9, %p8620_p11 }
  0x13   : > { %8623 = dma.hbm_to_vmem [thread:$0]  (!%p8621_p12), %s225_s15, 9216, %s227_s17, [#allocation4], %s8798_s18, %s8798_s18, %s8799_s19  }
  0x15   : > { %8774 = dma.done.wait (%p8628_p9), [#allocation4], 9216  }
  0x16   : > { %8776 = vsyncadd (%p8628_p9), [#allocation4], 4294958080  ;;  %p289_p13 = scmp.lt.s32.totalorder %s8865_s28, 1  ;;  %v8435_v0 = vld [vmem:[%s11652_s1 + $0x78] sm:$0xff]  ;;  %v8434_v2 = vld [vmem:[%s11652_s1 + $0x70] sm:$0xff]  ;;  %vm1244_vm3 = vcmask 1042432  }
  0x17   : > { %v8427_v1 = vld [vmem:[%s11652_s1 + $0x38] sm:$0xff]  ;;  %8597 = vmatpush.bf16.msra.mxu2 %v8435_v0  ;;  %v8426_v3 = vld [vmem:[%s11652_s1 + $0x30] sm:$0xff]  ;;  %874 = vmatpush.bf16.msra.mxu0 %v8435_v0  ;;  %v8433_v6 = vld [vmem:[%s11652_s1 + $0x68] sm:$0xff]  ;;  %vm358_vm0 = vsmask.f32 3328  ;;  %vm1245_vm4 = vcmask 1046532  }
  0x18   : > { %s290_s20 = scalar_select %p289_p13, %s8865_s28, 1  ;;  %8605 = vmatpush.bf16.msra.mxu3 %v8427_v1  ;;  %1107 = vmatpush.bf16.msra.mxu1 %v8427_v1  ;;  %v8425_v7 = vld [vmem:[%s11652_s1 + $0x28] sm:$0xff]  ;;  %v8432_v22 = vld [vmem:[%s11652_s1 + $0x60] sm:$0xff]  ;;  %v8431_v33 = vld [vmem:[%s11652_s1 + $0x58] sm:$0xff]  ;;  %vm359_vm1 = vsmask.f32 7440 }
  0x19   : > { %v8424_v23 = vld [vmem:[%s11652_s1 + $0x20] sm:$0xff]  ;;  %v8423_v34 = vld [vmem:[%s11652_s1 + $0x18] sm:$0xff]  ;;  %vm8958_vm2 = vmor %vm358_vm0, %vm359_vm1  ;;  %s286_s14 = sand.u32 1, %s8787_s25   ;;  %s8596_s23 = sshll.u32 %s8865_s28, 8 }
  0x1a   : > { %s8613_s21 = smul.u32 216, %s290_s20  ;;  %v8430_v43 = vld [vmem:[%s11652_s1 + $0x50] sm:$0xff]  ;;  %v8429_v57 = vld [vmem:[%s11652_s1 + $0x48] sm:$0xff]  ;;  %vm9274_vm5 = vmor %vm1244_vm3, %vm1245_vm4  ;;  %s7261_s17 = sshll.u32 %s286_s14, 8 }
  0x1b   : > { %8598 = vmatpush.bf16.msra.mxu2 %v8434_v2  ;;  %875 = vmatpush.bf16.msra.mxu0 %v8434_v2  ;;  %v8422_v44 = vld [vmem:[%s11652_s1 + $0x10] sm:$0xff]  ;;  %v8421_v58 = vld [vmem:[%s11652_s1 + $0x8] sm:$0xff]  ;;  %s11459_s22 = scalar_lea.vmem [#allocation6], %s7261_s17  ;;  %s7177_s29 = scalar_lea.hbm %s11658_s7, %s8596_s23 }
  0x1c   : > { %s8919_s18 = scalar_lea.vmem %s11651_s0, %s8613_s21  ;;  %8606 = vmatpush.bf16.msra.mxu3 %v8426_v3  ;;  %1108 = vmatpush.bf16.msra.mxu1 %v8426_v3  ;;  %s7180_s8 = sshll.u32 %s7177_s29, 4  ;;  %s7181_s8 = int_to_ptr.hbm [resolvable:$true] %s7180_s8 }
  0x1d   : > { %v310_v4 = vld [vmem:[%s8919_s18 + $0x60] sm:$0xf]  ;;  %v311_v5 = vld [vmem:[%s8919_s18 + $0x64] sm:$0xf]  ;;  %v350_v17 = vld [vmem:[%s8919_s18 + $0x68] sm:$0x1] }
  0x1e   : > { %v554_v8 = vshrl.u32 %v310_v4, 16  ;;  %v557_v9 = vshll.u32 %v310_v4, 16  ;;  %v563_v10 = vshll.u32 %v311_v5, 16  ;;  %v567_v11 = vshrl.u32 %v311_v5, 16  ;;  %v294_v12 = vld [vmem:[%s8919_s18] sm:$0xf] }
  0x1f   : > { %v8933_v16 = vld [vmem:[%s8919_s18 + $0x4] sm:$0xf]  ;;  %v362_v19 = vshrl.u32 %v294_v12, 16  ;;  %v365_v20 = vshll.u32 %v294_v12, 16  ;;  %8599 = vmatpush.bf16.msra.mxu2 %v8433_v6  ;;  %876 = vmatpush.bf16.msra.mxu0 %v8433_v6  ;;  %v573_v28 = vshll.u32 %v350_v17, 16  ;;  %v8443_v17 = vld [vmem:[%s11652_s1 + $0xb8] sm:$0xff] }
  0x20   : > { %v556_v13 = vrot.slane %v554_v8, 4  ;;  %v559_v14 = vrot.slane %v557_v9, 5  ;;  %v8930_v15 = vrot.slane %v563_v10, 5  ;;  %v569_v18 = vrot.slane %v567_v11, 4  ;;  %8607 = vmatpush.bf16.msra.mxu3 %v8425_v7  ;;  %1109 = vmatpush.bf16.msra.mxu1 %v8425_v7  ;;  %v8947_v29 = vld [vmem:[%s8919_s18 + $0x8] sm:$0x1] }
  0x21   : > { %v371_v21 = vshll.u32 %v8933_v16, 16  ;;  %v375_v24 = vshrl.u32 %v8933_v16, 16  ;;  %v364_v25 = vrot.slane %v362_v19, 4  ;;  %v367_v26 = vrot.slane %v365_v20, 5  ;;  %v312_v42 = vld [vmem:[%s8919_s18 + $0x6c] sm:$0xf] }
  0x22   : > { %v560_v31 = vor.u32 %v559_v14, %v556_v13  ;;  %v570_v32 = vor.u32 %v569_v18, %v8930_v15  ;;  %v381_v37 = vshll.u32 %v8947_v29, 16  ;;  %v575_v38 = vrot.slane %v573_v28, 5  ;;  %v313_v45 = vld [vmem:[%s8919_s18 + $0x70] sm:$0xf]  ;;  %v296_v49 = vld [vmem:[%s8919_s18 + $0xc] sm:$0xf] }
  0x23   : > { %v8944_v27 = vrot.slane %v371_v21, 5  ;;  %v377_v30 = vrot.slane %v375_v24, 4  ;;  %8600 = vmatpush.bf16.msra.mxu2 %v8432_v22  ;;  %877 = vmatpush.bf16.msra.mxu0 %v8432_v22  ;;  %v368_v35 = vor.u32 %v367_v26, %v364_v25  ;;  %v578_v50 = vshrl.u32 %v312_v42, 16  ;;  %v8972_v52 = vld [vmem:[%s8919_s18 + $0x10] sm:$0xf]  ;;  %v8428_v8 = vld [vmem:[%s11652_s1 + $0x40] sm:$0xff] }
  0x24   : > { %8608 = vmatpush.bf16.msra.mxu3 %v8424_v23  ;;  %1110 = vmatpush.bf16.msra.mxu1 %v8424_v23  ;;  %v561_v40 = vrot.slane %v560_v31, 4  ;;  %v571_v41 = vrot.slane %v570_v32, 4  ;;  %v383_v48 = vrot.slane %v381_v37, 5  ;;  %v581_v51 = vshll.u32 %v312_v42, 16  ;;  %v351_v3 = vld [vmem:[%s8919_s18 + $0x74] sm:$0x1] }
  0x25   : > { %v378_v36 = vor.u32 %v377_v30, %v8944_v27  ;;  %v369_v46 = vrot.slane %v368_v35, 4  ;;  %v587_v55 = vshll.u32 %v313_v45, 16  ;;  %v591_v56 = vshrl.u32 %v313_v45, 16  ;;  %v8420_v9 = vld [vmem:[%s11652_s1] sm:$0xff]  ;;  %v8467_v18 = vld [vmem:[%s11652_s1 + $0xf8] sm:$0xff]  ;;  %v8442_v35 = vld [vmem:[%s11652_s1 + $0xb0] sm:$0xff] }
  0x26   : > { %v566_v53 = vsel %vm8958_vm2, %v561_v40, %v8930_v15  ;;  %v576_v54 = vsel %vm8958_vm2, %v571_v41, %v575_v38  ;;  %v386_v59 = vshrl.u32 %v296_v49, 16  ;;  %v389_v60 = vshll.u32 %v296_v49, 16  ;;  %v9010_v20 = vld [vmem:[%s8919_s18 + $0x14] sm:$0x1]  ;;  %v8412_v22 = vld [vmem:[%s8919_s18 + $0x60] sm:$0xff]  ;;  %v8475_v30 = vld [vmem:[%s11652_s1 + $0x138] sm:$0xff] }
  0x27   : > { %8601 = vmatpush.bf16.msra.mxu2 %v8431_v33  ;;  %878 = vmatpush.bf16.msra.mxu0 %v8431_v33  ;;  %v379_v47 = vrot.slane %v378_v36, 4  ;;  %v374_v61 = vsel %vm8958_vm2, %v369_v46, %v8944_v27  ;;  %v395_v63 = vshll.u32 %v8972_v52, 16  ;;  %v399_v0 = vshrl.u32 %v8972_v52, 16  ;;  %v8404_v26 = vld [vmem:[%s8919_s18] sm:$0xff]  ;;  %v314_v28 = vld [vmem:[%s8919_s18 + $0x78] sm:$0xf] }
  0x28   : > { %8609 = vmatpush.bf16.msra.mxu3 %v8423_v34  ;;  %1111 = vmatpush.bf16.msra.mxu1 %v8423_v34  ;;  %v778_v1 = vunpack.c.l.b16 %v566_v53  ;;  %v779_v2 = vunpack.c.l.b16 %v576_v54  ;;  %v580_v4 = vrot.slane %v578_v50, 4  ;;  %v583_v5 = vrot.slane %v581_v51, 5  ;;  %v315_v33 = vld [vmem:[%s8919_s18 + $0x7c] sm:$0xf]  ;;  %v8466_v36 = vld [vmem:[%s11652_s1 + $0xf0] sm:$0xff]  ;;  %v8441_v49 = vld [vmem:[%s11652_s1 + $0xa8] sm:$0xff] }
  0x29   : > { %v384_v62 = vsel %vm8958_vm2, %v379_v47, %v383_v48  ;;  %v8993_v6 = vrot.slane %v587_v55, 5  ;;  %v593_v7 = vrot.slane %v591_v56, 4  ;;  %v762_v10 = vunpack.c.l.b16 %v374_v61  ;;  %v8474_v47 = vld [vmem:[%s11652_s1 + $0x130] sm:$0xff]  ;;  %v298_v48 = vld [vmem:[%s8919_s18 + $0x18] sm:$0xf]  ;;  %v8465_v51 = vld [vmem:[%s11652_s1 + $0xe8] sm:$0xff] }
  0x2a   : > { %v763_v11 = vunpack.c.l.b16 %v384_v62  ;;  %v388_v12 = vrot.slane %v386_v59, 4  ;;  %v391_v13 = vrot.slane %v389_v60, 5  ;;  %v9001_v14 = vrot.slane %v395_v63, 5  ;;  %v9036_v50 = vld [vmem:[%s8919_s18 + $0x1c] sm:$0xf]  ;;  %v8499_v39 = vld [vmem:[%s8919_s18 + $0xcc] sm:$0xff] }
  0x2b   : > { %8602 = vmatpush.bf16.msra.mxu2 %v8430_v43  ;;  %879 = vmatpush.bf16.msra.mxu0 %v8430_v43  ;;  %v401_v15 = vrot.slane %v399_v0, 4  ;;  %v597_v19 = vshll.u32 %v351_v3, 16  ;;  %v802_v21 = vpack.c.b16 %v779_v2, %v778_v1  ;;  %v584_v23 = vor.u32 %v583_v5, %v580_v4  ;;  %v8473_v2 = vld [vmem:[%s11652_s1 + $0x128] sm:$0xff]  ;;  %s7166_s9 = scalar_lea.sflag [#allocation5], %s286_s14  ;;  %s8743_s13 = sshra.s32 %s7181_s8, 4  ;;  %s8744_s13 = int_to_ptr.hbm [resolvable:$true] %s8743_s13 }
  0x2c   : > { %8610 = vmatpush.bf16.msra.mxu3 %v8422_v44  ;;  %1112 = vmatpush.bf16.msra.mxu1 %v8422_v44  ;;  %v594_v24 = vor.u32 %v593_v7, %v8993_v6  ;;  %v794_v25 = vpack.c.b16 %v763_v11, %v762_v10  ;;  %v392_v27 = vor.u32 %v391_v13, %v388_v12  ;;  %v405_v32 = vshll.u32 %v9010_v20, 16  ;;  %s8745_s15 = scalar_lea.hbm %s8744_s13, 256  ;;  %s8749_s19 = scalar_lea.hbm %s11658_s7, 512 }
  0x2d   : > { %v402_v31 = vor.u32 %v401_v15, %v9001_v14  ;;  %v599_v34 = vrot.slane %v597_v19, 5  ;;  %v585_v37 = vrot.slane %v584_v23, 4  ;;  %v602_v40 = vshrl.u32 %v314_v28, 16  ;;  %v8405_v19 = vld [vmem:[%s8919_s18 + $0xc] sm:$0xff]  ;;  %p8746_p0 = scmp.ne.s32.totalorder %s8744_s13, %s8745_s15  ;;  %p8750_p3 = scmp.lt.s32.totalorder %s8744_s13, %s11658_s7 }
  0x2e   : > { %v595_v38 = vrot.slane %v594_v24, 4  ;;  %v605_v41 = vshll.u32 %v314_v28, 16  ;;  %v393_v42 = vrot.slane %v392_v27, 4  ;;  %v611_v43 = vshll.u32 %v315_v33, 16  ;;  %v316_v27 = vld [vmem:[%s8919_s18 + $0x84] sm:$0xf]  ;;  %p8751_p4 = scmp.lt.s32.totalorder %s8749_s19, %s8745_s15 }
  0x2f   : > { %8603 = vmatpush.bf16.msra.mxu2 %v8429_v57  ;;  %880 = vmatpush.bf16.msra.mxu0 %v8429_v57  ;;  %v615_v44 = vshrl.u32 %v315_v33, 16  ;;  %v403_v45 = vrot.slane %v402_v31, 4  ;;  %v407_v46 = vrot.slane %v405_v32, 5  ;;  %v590_v53 = vsel %vm8958_vm2, %v585_v37, %v8993_v6  ;;  %v317_v28 = vld [vmem:[%s8919_s18 + $0x88] sm:$0xf]  ;;  %p8747_p1 = pnand %p8746_p0, %p8882_p5 }
  0x30   : > { %8611 = vmatpush.bf16.msra.mxu3 %v8421_v58  ;;  %1113 = vmatpush.bf16.msra.mxu1 %v8421_v58  ;;  %v600_v54 = vsel %vm8958_vm2, %v595_v38, %v599_v34  ;;  %v604_v55 = vrot.slane %v602_v40, 4  ;;  %v607_v56 = vrot.slane %v605_v41, 5  ;;  %v398_v57 = vsel %vm8958_vm2, %v393_v42, %v9001_v14  ;;  %v352_v58 = vld [vmem:[%s8919_s18 + $0x80] sm:$0x1]  ;;  %v300_v31 = vld [vmem:[%s8919_s18 + $0x24] sm:$0xf]  ;;  %p8752_p7 = por %p8751_p4, %p8750_p3 }
  0x31   : > { %v613_v59 = vrot.slane %v611_v43, 5  ;;  %v617_v60 = vrot.slane %v615_v44, 4  ;;  %v410_v61 = vshrl.u32 %v298_v48, 16  ;;  %v408_v62 = vsel %vm8958_vm2, %v403_v45, %v407_v46  ;;  %v9058_v14 = vld [vmem:[%s8919_s18 + $0x20] sm:$0x1]  ;;  %p8748_p2 = pneg %p8747_p1 }
  0x32   : > { %v413_v63 = vshll.u32 %v298_v48, 16  ;;  %v419_v0 = vshll.u32 %v9036_v50, 16  ;;  %v423_v1 = vshrl.u32 %v9036_v50, 16  ;;  %v780_v3 = vunpack.c.l.b16 %v590_v53  ;;  %v9072_v33 = vld [vmem:[%s8919_s18 + $0x28] sm:$0xf]  ;;  %v8464_v34 = vld [vmem:[%s11652_s1 + $0xe0] sm:$0xff] }
  0x33   : > { %8604 = vmatpush.bf16.msra.mxu2 %v8428_v8  ;;  %881 = vmatpush.bf16.msra.mxu0 %v8428_v8  ;;  %v781_v4 = vunpack.c.l.b16 %v600_v54  ;;  %v621_v5 = vshll.u32 %v352_v58, 16  ;;  %v764_v6 = vunpack.c.l.b16 %v398_v57  ;;  %v765_v7 = vunpack.c.l.b16 %v408_v62  ;;  %p8753_p8 = pnand %p8752_p7, %p8748_p2 }
  0x34   : > { %8612 = vmatpush.bf16.msra.mxu3 %v8420_v9  ;;  %1114 = vmatpush.bf16.msra.mxu1 %v8420_v9  ;;  %v608_v8 = vor.u32 %v607_v56, %v604_v55  ;;  %v412_v9 = vrot.slane %v410_v61, 4  ;;  %v618_v10 = vor.u32 %v617_v60, %v613_v59  ;;  %v415_v11 = vrot.slane %v413_v63, 5 }
  0x35   : > { %v421_v12 = vrot.slane %v419_v0, 5  ;;  %v425_v13 = vrot.slane %v423_v1, 4  ;;  %v803_v15 = vpack.c.b16 %v781_v4, %v780_v3  ;;  %v626_v41 = vshrl.u32 %v316_v27, 16 }
  0x36   : > { %922 = vmatmul.bf16.vlgmr.msra.gmra.mxu2 %v802_v21  ;;  %882 = vmatmul.bf16.vlgmr.msra.gmra.mxu0 %v794_v25  ;;  %v609_v21 = vrot.slane %v608_v8, 4  ;;  %v619_v23 = vrot.slane %v618_v10, 4  ;;  %v416_v24 = vor.u32 %v415_v11, %v412_v9  ;;  %v629_v42 = vshll.u32 %v316_v27, 16 }
  0x37   : > { %1488 = vmatpush.bf16.msrb.mxu2 %v8443_v17  ;;  %1155 = vmatmul.bf16.vlgmr.msra.gmra.mxu3 %v8412_v22  ;;  %v8413_v17 = vld [vmem:[%s8919_s18 + $0x6c] sm:$0xff]  ;;  %v623_v22 = vrot.slane %v621_v5, 5  ;;  %v426_v25 = vor.u32 %v425_v13, %v421_v12  ;;  %v635_v43 = vshll.u32 %v317_v28, 16  ;;  %v639_v44 = vshrl.u32 %v317_v28, 16 }
  0x38   : > { %1803 = vmatpush.bf16.msrb.mxu3 %v8467_v18  ;;  %1115 = vmatmul.bf16.vlgmr.msra.gmra.mxu1 %v8404_v26  ;;  %v795_v18 = vpack.c.b16 %v765_v7, %v764_v6  ;;  %v429_v26 = vshll.u32 %v9058_v14, 16  ;;  %v614_v32 = vsel %vm8958_vm2, %v609_v21, %v613_v59  ;;  %v417_v37 = vrot.slane %v416_v24, 4  ;;  %v353_v59 = vld [vmem:[%s8919_s18 + $0x8c] sm:$0x1]  ;;  %v8414_v6 = vld [vmem:[%s8919_s18 + $0x78] sm:$0xff] }
  0x39   : > { %2485 = vmatpush.bf16.msrb.mxu0 %v8475_v30  ;;  %v8440_v30 = vld [vmem:[%s11652_s1 + $0xa0] sm:$0xff]  ;;  %v427_v38 = vrot.slane %v426_v25, 4  ;;  %v434_v45 = vshrl.u32 %v300_v31, 16  ;;  %v437_v46 = vshll.u32 %v300_v31, 16  ;;  %v447_v48 = vshrl.u32 %v9072_v33, 16  ;;  %v8439_v24 = vld [vmem:[%s11652_s1 + $0x98] sm:$0xff] }
  0x3a   : > { %v431_v40 = vrot.slane %v429_v26, 5  ;;  %v422_v53 = vsel %vm8958_vm2, %v417_v37, %v421_v12  ;;  %v628_v55 = vrot.slane %v626_v41, 4  ;;  %v631_v56 = vrot.slane %v629_v42, 5  ;;  %v8406_v12 = vld [vmem:[%s8919_s18 + $0x18] sm:$0xff]  ;;  %v318_v13 = vld [vmem:[%s8919_s18 + $0x90] sm:$0xf] }
  0x3b   : > { %1489 = vmatpush.bf16.msrb.mxu2 %v8442_v35  ;;  %v8472_v35 = vld [vmem:[%s11652_s1 + $0x120] sm:$0xff]  ;;  %v637_v57 = vrot.slane %v635_v43, 5  ;;  %v641_v58 = vrot.slane %v639_v44, 4  ;;  %v436_v60 = vrot.slane %v434_v45, 4  ;;  %v439_v61 = vrot.slane %v437_v46, 5  ;;  %v8471_v31 = vld [vmem:[%s11652_s1 + $0x118] sm:$0xff] }
  0x3c   : > { %1804 = vmatpush.bf16.msrb.mxu3 %v8466_v36  ;;  %v624_v36 = vsel %vm8958_vm2, %v619_v23, %v623_v22  ;;  %v432_v54 = vsel %vm8958_vm2, %v427_v38, %v431_v40  ;;  %v449_v63 = vrot.slane %v447_v48, 4  ;;  %v766_v0 = vunpack.c.l.b16 %v422_v53  ;;  %v354_v44 = vld [vmem:[%s8919_s18 + $0x98] sm:$0x1] }
  0x3d   : > { %2486 = vmatpush.bf16.msrb.mxu0 %v8474_v47  ;;  %v443_v47 = vshll.u32 %v9072_v33, 16  ;;  %v767_v1 = vunpack.c.l.b16 %v432_v54  ;;  %v632_v4 = vor.u32 %v631_v56, %v628_v55  ;;  %v645_v5 = vshll.u32 %v353_v59, 16 }
  0x3e   : > { %v642_v7 = vor.u32 %v641_v58, %v637_v57  ;;  %v440_v8 = vor.u32 %v439_v61, %v436_v60  ;;  %v650_v25 = vshrl.u32 %v318_v13, 16  ;;  %v653_v26 = vshll.u32 %v318_v13, 16  ;;  %v304_v13 = vld [vmem:[%s8919_s18 + $0x3c] sm:$0xf] }
  0x3f   : > { %1490 = vmatpush.bf16.msrb.mxu2 %v8441_v49  ;;  %v782_v49 = vunpack.c.l.b16 %v614_v32  ;;  %v445_v62 = vrot.slane %v443_v47, 5  ;;  %v796_v11 = vpack.c.b16 %v767_v1, %v766_v0  ;;  %v302_v32 = vld [vmem:[%s8919_s18 + $0x30] sm:$0xf]  ;;  %v8415_v0 = vld [vmem:[%s8919_s18 + $0x84] sm:$0xff] }
  0x40   : > { %1805 = vmatpush.bf16.msrb.mxu3 %v8465_v51  ;;  %v783_v51 = vunpack.c.l.b16 %v624_v36  ;;  %v441_v21 = vrot.slane %v440_v8, 4  ;;  %v652_v40 = vrot.slane %v650_v25, 4  ;;  %v655_v41 = vrot.slane %v653_v26, 5 }
  0x41   : > { %2487 = vmatpush.bf16.msrb.mxu0 %v8473_v2  ;;  %v9090_v2 = vld [vmem:[%s8919_s18 + $0x2c] sm:$0x1]  ;;  %v450_v9 = vor.u32 %v449_v63, %v445_v62  ;;  %v458_v45 = vshrl.u32 %v302_v32, 16  ;;  %v461_v46 = vshll.u32 %v302_v32, 16 }
  0x42   : > { %v804_v3 = vpack.c.b16 %v783_v51, %v782_v49  ;;  %v453_v10 = vshll.u32 %v9090_v2, 16  ;;  %v446_v37 = vsel %vm8958_vm2, %v441_v21, %v445_v62  ;;  %v656_v55 = vor.u32 %v655_v41, %v652_v40  ;;  %v9122_v62 = vld [vmem:[%s8919_s18 + $0x38] sm:$0x1] }
  0x43   : > { %1491 = vmatpush.bf16.msrb.mxu2 %v8440_v30  ;;  %v451_v22 = vrot.slane %v450_v9, 4  ;;  %v8463_v30 = vld [vmem:[%s11652_s1 + $0xd8] sm:$0xff]  ;;  %v768_v53 = vunpack.c.l.b16 %v446_v37  ;;  %v460_v58 = vrot.slane %v458_v45, 4  ;;  %v463_v59 = vrot.slane %v461_v46, 5  ;;  %v355_v45 = vld [vmem:[%s8919_s18 + $0xa4] sm:$0x1] }
  0x44   : > { %1806 = vmatpush.bf16.msrb.mxu3 %v8464_v34  ;;  %v455_v23 = vrot.slane %v453_v10, 5  ;;  %v9108_v34 = vld [vmem:[%s8919_s18 + $0x34] sm:$0xf]  ;;  %v477_v9 = vshll.u32 %v9122_v62, 16  ;;  %v320_v10 = vld [vmem:[%s8919_s18 + $0x9c] sm:$0xf] }
  0x45   : > { %2488 = vmatpush.bf16.msrb.mxu0 %v8472_v35  ;;  %v467_v47 = vshll.u32 %v9108_v34, 16  ;;  %v471_v48 = vshrl.u32 %v9108_v34, 16  ;;  %v674_v25 = vshrl.u32 %v320_v10, 16  ;;  %v677_v26 = vshll.u32 %v320_v10, 16 }
  0x46   : > { %927 = vmatmul.bf16.gmra.mxu2 %v803_v15  ;;  %887 = vmatmul.bf16.gmra.mxu0 %v795_v18  ;;  %v319_v15 = vld [vmem:[%s8919_s18 + $0x94] sm:$0xf]  ;;  %v647_v18 = vrot.slane %v645_v5, 5  ;;  %v456_v38 = vsel %vm8958_vm2, %v451_v22, %v455_v23 }
  0x47   : > { %1160 = vmatmul.bf16.gmra.mxu3 %v8413_v17  ;;  %v633_v17 = vrot.slane %v632_v4, 4  ;;  %v659_v27 = vshll.u32 %v319_v15, 16  ;;  %v663_v28 = vshrl.u32 %v319_v15, 16  ;;  %1492 = vmatpush.bf16.msrb.mxu2 %v8439_v24  ;;  %v769_v54 = vunpack.c.l.b16 %v456_v38 }
  0x48   : > { %1120 = vmatmul.bf16.gmra.mxu1 %v8405_v19  ;;  %v643_v19 = vrot.slane %v642_v7, 4  ;;  %1807 = vmatpush.bf16.msrb.mxu3 %v8463_v30  ;;  %v469_v60 = vrot.slane %v467_v47, 5  ;;  %v473_v61 = vrot.slane %v471_v48, 4  ;;  %v657_v4 = vrot.slane %v656_v55, 4 }
  0x49   : > { %2489 = vmatpush.bf16.msrb.mxu0 %v8471_v31  ;;  %v638_v35 = vsel %vm8958_vm2, %v633_v17, %v637_v57  ;;  %v661_v42 = vrot.slane %v659_v27, 5  ;;  %v665_v43 = vrot.slane %v663_v28, 4  ;;  %v669_v57 = vshll.u32 %v354_v44, 16  ;;  %v9136_v17 = vld [vmem:[%s8919_s18 + $0x40] sm:$0xf] }
  0x4a   : > { %v648_v36 = vsel %vm8958_vm2, %v643_v19, %v647_v18  ;;  %v784_v49 = vunpack.c.l.b16 %v638_v35  ;;  %v797_v1 = vpack.c.b16 %v769_v54, %v768_v53  ;;  %v464_v7 = vor.u32 %v463_v59, %v460_v58  ;;  %v8462_v18 = vld [vmem:[%s11652_s1 + $0xd0] sm:$0xff]  ;;  %v9154_v54 = vld [vmem:[%s8919_s18 + $0x44] sm:$0x1] }
  0x4b   : > { %v785_v51 = vunpack.c.l.b16 %v648_v36  ;;  %v666_v56 = vor.u32 %v665_v43, %v661_v42  ;;  %v671_v5 = vrot.slane %v669_v57, 5  ;;  %v474_v8 = vor.u32 %v473_v61, %v469_v60  ;;  %v8470_v19 = vld [vmem:[%s11652_s1 + $0x110] sm:$0xff] }
  0x4c   : > { %v662_v15 = vsel %vm8958_vm2, %v657_v4, %v661_v42  ;;  %v465_v22 = vrot.slane %v464_v7, 4  ;;  %v479_v24 = vrot.slane %v477_v9, 5  ;;  %1808 = vmatpush.bf16.msrb.mxu3 %v8462_v18  ;;  %v482_v30 = vshrl.u32 %v304_v13, 16  ;;  %v8416_v59 = vld [vmem:[%s8919_s18 + $0x90] sm:$0xff]  ;;  %v323_v4 = vld [vmem:[%s8919_s18 + $0xac] sm:$0xf] }
  0x4d   : > { %v805_v63 = vpack.c.b16 %v785_v51, %v784_v49  ;;  %v475_v23 = vrot.slane %v474_v8, 4  ;;  %2490 = vmatpush.bf16.msrb.mxu0 %v8470_v19  ;;  %v485_v31 = vshll.u32 %v304_v13, 16  ;;  %v491_v32 = vshll.u32 %v9136_v17, 16  ;;  %v8461_v19 = vld [vmem:[%s11652_s1 + $0xc8] sm:$0xff] }
  0x4e   : > { %v495_v35 = vshrl.u32 %v9136_v17, 16  ;;  %v786_v36 = vunpack.c.l.b16 %v662_v15  ;;  %v470_v38 = vsel %vm8958_vm2, %v465_v22, %v469_v60  ;;  %v676_v41 = vrot.slane %v674_v25, 4  ;;  %v8483_v22 = vld [vmem:[%s11652_s1 + $0x178] sm:$0xff] }
  0x4f   : > { %v480_v40 = vsel %vm8958_vm2, %v475_v23, %v479_v24  ;;  %v679_v42 = vrot.slane %v677_v26, 5  ;;  %v484_v46 = vrot.slane %v482_v30, 4  ;;  %v487_v47 = vrot.slane %v485_v31, 5  ;;  %v306_v23 = vld [vmem:[%s8919_s18 + $0x48] sm:$0xf]  ;;  %2911 = vmatpush.bf16.msrb.mxu1 %v8483_v22  ;;  %v8468_v22 = vld [vmem:[%s11652_s1 + $0x100] sm:$0xff] }
  0x50   : > { %v493_v48 = vrot.slane %v491_v32, 5  ;;  %v497_v49 = vrot.slane %v495_v35, 4  ;;  %v770_v51 = vunpack.c.l.b16 %v470_v38  ;;  %v771_v53 = vunpack.c.l.b16 %v480_v40  ;;  %v9175_v24 = vld [vmem:[%s8919_s18 + $0x4c] sm:$0xf]  ;;  %1809 = vmatpush.bf16.msrb.mxu3 %v8461_v19 }
  0x51   : > { %v680_v55 = vor.u32 %v679_v42, %v676_v41  ;;  %v693_v57 = vshll.u32 %v355_v45, 16  ;;  %v488_v60 = vor.u32 %v487_v47, %v484_v46  ;;  %v707_v15 = vshll.u32 %v323_v4, 16 }
  0x52   : > { %v498_v61 = vor.u32 %v497_v49, %v493_v48  ;;  %v711_v18 = vshrl.u32 %v323_v4, 16  ;;  %v509_v38 = vshll.u32 %v306_v23, 16  ;;  %v515_v40 = vshll.u32 %v9175_v24, 16 }
  0x53   : > { %v695_v7 = vrot.slane %v693_v57, 5  ;;  %v489_v8 = vrot.slane %v488_v60, 4  ;;  %v709_v32 = vrot.slane %v707_v15, 5  ;;  %v519_v41 = vshrl.u32 %v9175_v24, 16  ;;  %v8409_v60 = vld [vmem:[%s8919_s18 + $0x3c] sm:$0xff] }
  0x54   : > { %v499_v9 = vrot.slane %v498_v61, 4  ;;  %v713_v35 = vrot.slane %v711_v18, 4 }
  0x56   : > { %932 = vmatmul.bf16.gmra.mxu2 %v804_v3  ;;  %892 = vmatmul.bf16.gmra.mxu0 %v796_v11  ;;  %v8407_v3 = vld [vmem:[%s8919_s18 + $0x24] sm:$0xff]  ;;  %v321_v11 = vld [vmem:[%s8919_s18 + $0xa0] sm:$0xf]  ;;  %v714_v47 = vor.u32 %v713_v35, %v709_v32 }
  0x57   : > { %1165 = vmatmul.bf16.gmra.mxu3 %v8414_v6  ;;  %v667_v6 = vrot.slane %v666_v56, 4  ;;  %v683_v27 = vshll.u32 %v321_v11, 16  ;;  %v687_v28 = vshrl.u32 %v321_v11, 16 }
  0x58   : > { %1125 = vmatmul.bf16.gmra.mxu1 %v8406_v12  ;;  %v8438_v12 = vld [vmem:[%s11652_s1 + $0x90] sm:$0xff] }
  0x59   : > { %v672_v21 = vsel %vm8958_vm2, %v667_v6, %v671_v5  ;;  %1493 = vmatpush.bf16.msrb.mxu2 %v8438_v12  ;;  %v685_v43 = vrot.slane %v683_v27, 5  ;;  %v689_v44 = vrot.slane %v687_v28, 4  ;;  %v681_v5 = vrot.slane %v680_v55, 4  ;;  %v8437_v12 = vld [vmem:[%s11652_s1 + $0x88] sm:$0xff] }
  0x5a   : > { %v787_v37 = vunpack.c.l.b16 %v672_v21  ;;  %v8469_v21 = vld [vmem:[%s11652_s1 + $0x108] sm:$0xff]  ;;  %v494_v27 = vsel %vm8958_vm2, %v489_v8, %v493_v48  ;;  %v521_v55 = vrot.slane %v519_v41, 4  ;;  %v8436_v8 = vld [vmem:[%s11652_s1 + $0x80] sm:$0xff] }
  0x5b   : > { %v690_v56 = vor.u32 %v689_v44, %v685_v43  ;;  %2491 = vmatpush.bf16.msrb.mxu0 %v8469_v21  ;;  %v686_v25 = vsel %vm8958_vm2, %v681_v5, %v685_v43  ;;  %v772_v44 = vunpack.c.l.b16 %v494_v27  ;;  %v8482_v5 = vld [vmem:[%s11652_s1 + $0x170] sm:$0xff]  ;;  %v8481_v21 = vld [vmem:[%s11652_s1 + $0x168] sm:$0xff] }
  0x5c   : > { %v806_v58 = vpack.c.b16 %v787_v37, %v786_v36  ;;  %v356_v36 = vld [vmem:[%s8919_s18 + $0xb0] sm:$0x1]  ;;  %v506_v37 = vshrl.u32 %v306_v23, 16  ;;  %v788_v42 = vunpack.c.l.b16 %v686_v25  ;;  %2912 = vmatpush.bf16.msrb.mxu1 %v8482_v5  ;;  %v8410_v5 = vld [vmem:[%s8919_s18 + $0x48] sm:$0xff] }
  0x5d   : > { %v691_v6 = vrot.slane %v690_v56, 4  ;;  %1494 = vmatpush.bf16.msrb.mxu2 %v8437_v12  ;;  %v717_v48 = vshll.u32 %v356_v36, 16  ;;  %v9189_v56 = vld [vmem:[%s8919_s18 + $0x50] sm:$0x1]  ;;  %v8460_v12 = vld [vmem:[%s11652_s1 + $0xc0] sm:$0xff] }
  0x5e   : > { %v508_v49 = vrot.slane %v506_v37, 4  ;;  %v525_v4 = vshll.u32 %v9189_v56, 16  ;;  %1810 = vmatpush.bf16.msrb.mxu3 %v8460_v12 }
  0x5f   : > { %v696_v26 = vsel %vm8958_vm2, %v691_v6, %v695_v7  ;;  %v324_v6 = vld [vmem:[%s8919_s18 + $0xb4] sm:$0xf]  ;;  %v325_v7 = vld [vmem:[%s8919_s18 + $0xb8] sm:$0xf]  ;;  %2492 = vmatpush.bf16.msrb.mxu0 %v8468_v22 }
  0x60   : > { %v789_v43 = vunpack.c.l.b16 %v696_v26  ;;  %v527_v19 = vrot.slane %v525_v4, 5  ;;  %v722_v23 = vshrl.u32 %v324_v6, 16  ;;  %v725_v25 = vshll.u32 %v324_v6, 16  ;;  %2913 = vmatpush.bf16.msrb.mxu1 %v8481_v21  ;;  %v8477_v21 = vld [vmem:[%s11652_s1 + $0x148] sm:$0xff] }
  0x61   : > { %1495 = vmatpush.bf16.msrb.mxu2 %v8436_v8  ;;  %v731_v26 = vshll.u32 %v325_v7, 16  ;;  %v735_v27 = vshrl.u32 %v325_v7, 16  ;;  %v8478_v8 = vld [vmem:[%s11652_s1 + $0x150] sm:$0xff] }
  0x62   : > { %v807_v57 = vpack.c.b16 %v789_v43, %v788_v42  ;;  %v724_v41 = vrot.slane %v722_v23, 4  ;;  %v727_v42 = vrot.slane %v725_v25, 5 }
  0x63   : > { %v733_v43 = vrot.slane %v731_v26, 5 }
  0x66   : > { %937 = vmatmul.bf16.gmra.mxu2 %v805_v63  ;;  %897 = vmatmul.bf16.gmra.mxu0 %v797_v1  ;;  %v501_v63 = vshll.u32 %v9154_v54, 16  ;;  %v8408_v1 = vld [vmem:[%s8919_s18 + $0x30] sm:$0xff] }
  0x67   : > { %1170 = vmatmul.bf16.gmra.mxu3 %v8415_v0  ;;  %v798_v0 = vpack.c.b16 %v771_v53, %v770_v51  ;;  %v511_v51 = vrot.slane %v509_v38, 5  ;;  %v517_v53 = vrot.slane %v515_v40, 5  ;;  %v8480_v40 = vld [vmem:[%s11652_s1 + $0x160] sm:$0xff] }
  0x68   : > { %1130 = vmatmul.bf16.gmra.mxu1 %v8407_v3  ;;  %v322_v3 = vld [vmem:[%s8919_s18 + $0xa8] sm:$0xf]  ;;  %v503_v10 = vrot.slane %v501_v63, 5  ;;  %v719_v63 = vrot.slane %v717_v48, 5 }
  0x69   : > { %v698_v11 = vshrl.u32 %v322_v3, 16  ;;  %v701_v13 = vshll.u32 %v322_v3, 16  ;;  %v522_v3 = vor.u32 %v521_v55, %v517_v53  ;;  %v9226_v55 = vld [vmem:[%s8919_s18 + $0x5c] sm:$0x1]  ;;  %2914 = vmatpush.bf16.msrb.mxu1 %v8480_v40 }
  0x6a   : > { %v504_v28 = vsel %vm8958_vm2, %v499_v9, %v503_v10  ;;  %v308_v10 = vld [vmem:[%s8919_s18 + $0x54] sm:$0xf] }
  0x6b   : > { %v700_v30 = vrot.slane %v698_v11, 4  ;;  %v703_v31 = vrot.slane %v701_v13, 5  ;;  %v773_v45 = vunpack.c.l.b16 %v504_v28  ;;  %v309_v11 = vld [vmem:[%s8919_s18 + $0x58] sm:$0xf]  ;;  %v523_v18 = vrot.slane %v522_v3, 4 }
  0x6c   : > { %v530_v28 = vshrl.u32 %v308_v10, 16  ;;  %v549_v3 = vshll.u32 %v9226_v55, 16 }
  0x6d   : > { %v704_v46 = vor.u32 %v703_v31, %v700_v30  ;;  %v533_v30 = vshll.u32 %v308_v10, 16  ;;  %v539_v31 = vshll.u32 %v309_v11, 16  ;;  %v528_v38 = vsel %vm8958_vm2, %v523_v18, %v527_v19  ;;  %v7615_v18 = vld [vmem:[%s8919_s18 + $0xc] sm:$0xf]  ;;  %v9245_v19 = vld [vmem:[%s8919_s18 + $0x10] sm:$0xf] }
  0x6e   : > { %v551_v12 = vrot.slane %v549_v3, 5 }
  0x6f   : > { %v705_v61 = vrot.slane %v704_v46, 4  ;;  %v532_v46 = vrot.slane %v530_v28, 4  ;;  %v541_v48 = vrot.slane %v539_v31, 5  ;;  %v1976_v28 = vshll.u32 %v7615_v18, 16 }
  0x70   : > { %v1986_v31 = vshrl.u32 %v9245_v19, 16 }
  0x71   : > { %v710_v9 = vsel %vm8958_vm2, %v705_v61, %v709_v32  ;;  %v543_v32 = vshrl.u32 %v309_v11, 16  ;;  %v8418_v61 = vld [vmem:[%s8919_s18 + $0xa8] sm:$0xff] }
  0x72   : > { %v790_v35 = vunpack.c.l.b16 %v710_v9 }
  0x76   : > { %942 = vmatmul.bf16.gmra.mxu2 %v806_v58  ;;  %902 = vmatmul.bf16.gmra.mxu0 %v798_v0  ;;  %v8417_v58 = vld [vmem:[%s8919_s18 + $0x9c] sm:$0xff]  ;;  %v715_v0 = vrot.slane %v714_v47, 4  ;;  %v535_v47 = vrot.slane %v533_v30, 5  ;;  %v1982_v30 = vshll.u32 %v9245_v19, 16 }
  0x77   : > { %1175 = vmatmul.bf16.gmra.mxu3 %v8416_v59  ;;  %v799_v59 = vpack.c.b16 %v773_v45, %v772_v44  ;;  %v737_v44 = vrot.slane %v735_v27, 4  ;;  %v357_v45 = vld [vmem:[%s8919_s18 + $0xbc] sm:$0x1]  ;;  %v1973_v27 = vshrl.u32 %v7615_v18, 16 }
  0x78   : > { %1135 = vmatmul.bf16.gmra.mxu1 %v8408_v1  ;;  %v512_v1 = vor.u32 %v511_v51, %v508_v49  ;;  %v720_v13 = vsel %vm8958_vm2, %v715_v0, %v719_v63  ;;  %v545_v49 = vrot.slane %v543_v32, 4  ;;  %v536_v0 = vor.u32 %v535_v47, %v532_v46  ;;  %v8476_v32 = vld [vmem:[%s11652_s1 + $0x140] sm:$0xff]  ;;  %v7617_v46 = vld [vmem:[%s8919_s18 + $0x14] sm:$0x1] }
  0x79   : > { %v791_v36 = vunpack.c.l.b16 %v720_v13  ;;  %v738_v63 = vor.u32 %v737_v44, %v733_v43  ;;  %v8507_v13 = vld [vmem:[%s11652_s1 + $0x1b8] sm:$0xff]  ;;  %v1988_v44 = vrot.slane %v1986_v31, 4 }
  0x7a   : > { %v513_v15 = vrot.slane %v512_v1, 4  ;;  %v546_v1 = vor.u32 %v545_v49, %v541_v48  ;;  %v537_v10 = vrot.slane %v536_v0, 4  ;;  %3226 = vmatpush.bf16.msra.mxu2 %v8507_v13  ;;  %v7711_v0 = vld [vmem:[%s8919_s18 + $0xc] sm:$0xe] }
  0x7b   : > { %v739_v9 = vrot.slane %v738_v63, 4 }
  0x7c   : > { %v518_v37 = vsel %vm8958_vm2, %v513_v15, %v517_v53  ;;  %v775_v53 = vunpack.c.l.b16 %v528_v38  ;;  %v547_v11 = vrot.slane %v546_v1, 4  ;;  %v8515_v15 = vld [vmem:[%s11652_s1 + $0x1f8] sm:$0xff]  ;;  %v542_v25 = vsel %vm8958_vm2, %v537_v10, %v541_v48 }
  0x7d   : > { %v774_v51 = vunpack.c.l.b16 %v518_v37  ;;  %3908 = vmatpush.bf16.msra.mxu3 %v8515_v15  ;;  %v776_v38 = vunpack.c.l.b16 %v542_v25  ;;  %v8419_v48 = vld [vmem:[%s8919_s18 + $0xb4] sm:$0xff]  ;;  %v2675_v10 = vrot.slane %v7617_v46, 5 }
  0x7e   : > { %v552_v26 = vsel %vm8958_vm2, %v547_v11, %v551_v12 }
  0x7f   : > { %v800_v4 = vpack.c.b16 %v775_v53, %v774_v51  ;;  %v777_v40 = vunpack.c.l.b16 %v552_v26  ;;  %v1196_v51 = vld [vmem:[%s8919_s18] sm:$0xe]  ;;  %v8411_v53 = vld [vmem:[%s8919_s18 + $0x54] sm:$0xff] }
  0x81   : > { %v801_v49 = vpack.c.b16 %v777_v40, %v776_v38  ;;  %v7620_v38 = vld [vmem:[%s8919_s18 + $0x20] sm:$0x1]  ;;  %v1256_v40 = vrot.slane %v8972_v52, 5  ;;  %v1259_v52 = vrot.slane %v9010_v20, 5  ;;  %v9313_v20 = vld [vmem:[%s8919_s18 + $0x28] sm:$0xf] }
  0x86   : > { %947 = vmatmul.bf16.gmra.mxu2 %v807_v57  ;;  %907 = vmatmul.bf16.gmra.mxu0 %v799_v59  ;;  %v8479_v57 = vld [vmem:[%s11652_s1 + $0x158] sm:$0xff]  ;;  %v728_v59 = vor.u32 %v727_v42, %v724_v41  ;;  %v1975_v41 = vrot.slane %v1973_v27, 4  ;;  %v1978_v42 = vrot.slane %v1976_v28, 5 }
  0x87   : > { %1180 = vmatmul.bf16.gmra.mxu3 %v8417_v58  ;;  %v808_v58 = vpack.c.b16 %v791_v36, %v790_v35  ;;  %2915 = vmatpush.bf16.msrb.mxu1 %v8479_v57  ;;  %v8523_v35 = vld [vmem:[%s11652_s1 + $0x238] sm:$0xff] }
  0x88   : > { %1140 = vmatmul.bf16.gmra.mxu1 %v8409_v60  ;;  %v741_v60 = vshll.u32 %v357_v45, 16  ;;  %v729_v6 = vrot.slane %v728_v59, 4  ;;  %4334 = vmatpush.bf16.msra.mxu0 %v8523_v35  ;;  %v1249_v45 = vrot.slane %v8933_v16, 5  ;;  %v1979_v57 = vor.u32 %v1978_v42, %v1975_v41  ;;  %v8444_v42 = vld [vmem:[%s8919_s18 + $0xc] sm:$0xff] }
  0x89   : > { %v1992_v59 = vshll.u32 %v7617_v46, 16  ;;  %v1252_v16 = vrot.slane %v8947_v29, 5  ;;  %v2016_v46 = vshll.u32 %v7620_v38, 16 }
  0x8a   : > { %v743_v7 = vrot.slane %v741_v60, 5  ;;  %v734_v22 = vsel %vm8958_vm2, %v729_v6, %v733_v43  ;;  %v1984_v43 = vrot.slane %v1982_v30, 5  ;;  %v2672_v60 = vrot.slane %v9245_v19, 5  ;;  %v9280_v6 = vld [vmem:[%s8919_s18 + $0x1c] sm:$0xf] }
  0x8b   : > { %2916 = vmatpush.bf16.msrb.mxu1 %v8478_v8  ;;  %v792_v36 = vunpack.c.l.b16 %v734_v22  ;;  %v1251_v63 = vrot.slane %v1249_v45, 4  ;;  %v1980_v3 = vrot.slane %v1979_v57, 4  ;;  %v7727_v8 = vrot.slane %v7711_v0, 9  ;;  %v8506_v0 = vld [vmem:[%s11652_s1 + $0x1b0] sm:$0xff] }
  0x8c   : > { %v744_v23 = vsel %vm8958_vm2, %v739_v9, %v743_v7  ;;  %v1994_v7 = vrot.slane %v1992_v59, 5  ;;  %v2674_v9 = vrot.slane %v2672_v60, 4  ;;  %v2006_v15 = vshll.u32 %v9280_v6, 16  ;;  %3227 = vmatpush.bf16.msra.mxu2 %v8506_v0 }
  0x8d   : > { %v793_v37 = vunpack.c.l.b16 %v744_v23  ;;  %v1253_v11 = vsel %vm9274_vm5, %v1251_v63, %v1252_v16  ;;  %v2010_v18 = vshrl.u32 %v9280_v6, 16  ;;  %v1985_v19 = vsel %vm8958_vm2, %v1980_v3, %v1984_v43 }
  0x8e   : > { %v2673_v22 = vsel %vm9274_vm5, %v7727_v8, %v2672_v60  ;;  %v2676_v23 = vsel %vm9274_vm5, %v2674_v9, %v2675_v10  ;;  %v1377_v26 = vunpack.c.l.b16 %v1253_v11  ;;  %v2008_v30 = vrot.slane %v2006_v15, 5 }
  0x8f   : > { %2917 = vmatpush.bf16.msrb.mxu1 %v8477_v21  ;;  %v809_v47 = vpack.c.b16 %v793_v37, %v792_v36  ;;  %v2012_v31 = vrot.slane %v2010_v18, 4  ;;  %v2799_v36 = vunpack.c.l.b16 %v2673_v22  ;;  %v2800_v37 = vunpack.c.l.b16 %v2676_v23 }
  0x90   : > { %v2679_v57 = vrot.slane %v9280_v6, 5  ;;  %v1258_v60 = vrot.slane %v1256_v40, 4  ;;  %v2018_v16 = vrot.slane %v2016_v46, 5  ;;  %v2034_v22 = vshrl.u32 %v9313_v20, 16 }
  0x92   : > { %v2681_v6 = vrot.slane %v2679_v57, 4 }
  0x93   : > { %2918 = vmatpush.bf16.msrb.mxu1 %v8476_v32  ;;  %v2373_v32 = vunpack.c.l.b16 %v1985_v19 }
  0x96   : > { %952 = vmatmul.bf16.gmra.mxu2 %v808_v58  ;;  %912 = vmatmul.bf16.gmra.mxu0 %v800_v4  ;;  %v1989_v58 = vor.u32 %v1988_v44, %v1984_v43  ;;  %v1197_v43 = vld [vmem:[%s8919_s18 + $0xc] sm:$0xe] }
  0x97   : > { %1185 = vmatmul.bf16.gmra.mxu3 %v8418_v61  ;;  %v7407_v61 = vrot.slane %v1196_v51, 9  ;;  %v7408_v59 = vrot.slane %v1197_v43, 9  ;;  %v7623_v43 = vld [vmem:[%s8919_s18 + $0x2c] sm:$0x1] }
  0x98   : > { %1145 = vmatmul.bf16.gmra.mxu1 %v8410_v5  ;;  %v1990_v4 = vrot.slane %v1989_v58, 4  ;;  %v7618_v5 = vld [vmem:[%s8919_s18 + $0x18] sm:$0xf] }
  0x99   : > { %v1250_v29 = vsel %vm9274_vm5, %v7407_v61, %v1249_v45  ;;  %v1997_v12 = vshrl.u32 %v7618_v5, 16  ;;  %v2000_v13 = vshll.u32 %v7618_v5, 16  ;;  %v2013_v45 = vor.u32 %v2012_v31, %v2008_v30  ;;  %v8514_v5 = vld [vmem:[%s11652_s1 + $0x1f0] sm:$0xff] }
  0x9a   : > { %v1995_v21 = vsel %vm8958_vm2, %v1990_v4, %v1994_v7  ;;  %v1376_v25 = vunpack.c.l.b16 %v1250_v29  ;;  %v7621_v4 = vld [vmem:[%s8919_s18 + $0x24] sm:$0xf]  ;;  %v2682_v7 = vrot.slane %v7620_v38, 5  ;;  %v1257_v10 = vsel %vm9274_vm5, %v7408_v59, %v1256_v40  ;;  %3909 = vmatpush.bf16.msra.mxu3 %v8514_v5  ;;  %v8522_v31 = vld [vmem:[%s11652_s1 + $0x230] sm:$0xff] }
  0x9b   : > { %v1999_v27 = vrot.slane %v1997_v12, 4  ;;  %v2002_v28 = vrot.slane %v2000_v13, 5  ;;  %v2374_v35 = vunpack.c.l.b16 %v1995_v21  ;;  %v2014_v63 = vrot.slane %v2013_v45, 4  ;;  %4335 = vmatpush.bf16.msra.mxu0 %v8522_v31 }
  0x9c   : > { %v1408_v41 = vpack.c.b16 %v1377_v26, %v1376_v25  ;;  %v1260_v29 = vsel %vm9274_vm5, %v1258_v60, %v1259_v52  ;;  %v2021_v15 = vshrl.u32 %v7621_v4, 16  ;;  %v2024_v19 = vshll.u32 %v7621_v4, 16 }
  0x9d   : > { %v2003_v44 = vor.u32 %v2002_v28, %v1999_v27  ;;  %v2019_v13 = vsel %vm8958_vm2, %v2014_v63, %v2018_v16  ;;  %v2030_v21 = vshll.u32 %v9313_v20, 16  ;;  %v2683_v26 = vsel %vm9274_vm5, %v2681_v6, %v2682_v7 }
  0x9e   : > { %v1378_v28 = vunpack.c.l.b16 %v1257_v10  ;;  %v2802_v38 = vunpack.c.l.b16 %v2683_v26  ;;  %v2026_v40 = vrot.slane %v2024_v19, 5  ;;  %v2040_v52 = vshll.u32 %v7623_v43, 16 }
  0x9f   : > { %v2004_v61 = vrot.slane %v2003_v44, 4  ;;  %v2686_v16 = vrot.slane %v9313_v20, 5  ;;  %v7624_v20 = vld [vmem:[%s8919_s18 + $0x30] sm:$0xf] }
  0xa1   : > { %v2009_v12 = vsel %vm8958_vm2, %v2004_v61, %v2008_v30  ;;  %v1379_v30 = vunpack.c.l.b16 %v1260_v29  ;;  %v2688_v10 = vrot.slane %v2686_v16, 4  ;;  %v2689_v29 = vrot.slane %v7623_v43, 5 }
  0xa3   : > { %v2690_v31 = vsel %vm9274_vm5, %v2688_v10, %v2689_v29 }
  0xa4   : > { %v2804_v43 = vunpack.c.l.b16 %v2690_v31 }
  0xa6   : > { %957 = vmatmul.bf16.gmra.mxu2 %v809_v47  ;;  %917 = vmatmul.bf16.gmra.mxu0 %v801_v49  ;;  %v2405_v47 = vpack.c.b16 %v2374_v35, %v2373_v32  ;;  %v2375_v32 = vunpack.c.l.b16 %v2009_v12  ;;  %v2376_v35 = vunpack.c.l.b16 %v2019_v13 }
  0xa7   : > { %1190 = vmatmul.bf16.gmra.mxu3 %v8419_v48  ;;  %v2831_v48 = vpack.c.b16 %v2800_v37, %v2799_v36  ;;  %v2023_v37 = vrot.slane %v2021_v15, 4  ;;  %v9349_v15 = vld [vmem:[%s8919_s18 + $0x34] sm:$0xf] }
  0xa8   : > { %1150 = vmatmul.bf16.gmra.mxu1 %v8411_v53  ;;  %v7712_v53 = vld [vmem:[%s8919_s18 + $0x18] sm:$0xe] }
  0xa9   : > { %v7728_v3 = vrot.slane %v7712_v53, 9  ;;  %v2027_v59 = vor.u32 %v2026_v40, %v2023_v37 }
  0xab   : > { %v2680_v18 = vsel %vm9274_vm5, %v7728_v3, %v2679_v57  ;;  %v1198_v57 = vld [vmem:[%s8919_s18 + $0x18] sm:$0xe]  ;;  %v7713_v3 = vld [vmem:[%s8919_s18 + $0x24] sm:$0xe]  ;;  %v2028_v6 = vrot.slane %v2027_v59, 4 }
  0xac   : > { %v2801_v36 = vunpack.c.l.b16 %v2680_v18  ;;  %v7409_v4 = vrot.slane %v1198_v57, 9 }
  0xae   : > { %v2832_v53 = vpack.c.b16 %v2802_v38, %v2801_v36 }
  0xb3   : > { %v883_v49 = vpop.f32.mrf.mxu0 }
  0xb5   : > { %v1116_v51 = vpop.f32.mrf.mxu1 }
  0xb6   : > { %v9302_v58 = vadd.f32 %v1116_v51, %v883_v49  ;;  %1496 = vmatmul.bf16.vlgmr.msrb.gmra.mxu2 %v1408_v41  ;;  %2493 = vmatmul.bf16.vlgmr.msrb.gmra.mxu0 %v2405_v47  ;;  %v2032_v41 = vrot.slane %v2030_v21, 5  ;;  %v1409_v47 = vpack.c.b16 %v1379_v30, %v1378_v28  ;;  %v2406_v49 = vpack.c.b16 %v2376_v35, %v2375_v32 }
  0xb7   : > { %1811 = vmatmul.bf16.vlgmr.msrb.gmra.mxu3 %v8444_v42  ;;  %v2036_v42 = vrot.slane %v2034_v22, 4  ;;  %v1263_v51 = vrot.slane %v9036_v50, 5  ;;  %v1266_v50 = vrot.slane %v9058_v14, 5  ;;  %v2054_v32 = vshll.u32 %v9349_v15, 16 }
  0xb8   : > { %2919 = vmatmul.bf16.vlgmr.msrb.gmra.mxu1 %v2831_v48  ;;  %v8445_v48 = vld [vmem:[%s8919_s18 + $0x18] sm:$0xff]  ;;  %v2033_v21 = vsel %vm8958_vm2, %v2028_v6, %v2032_v41  ;;  %v2058_v35 = vshrl.u32 %v9349_v15, 16 }
  0xb9   : > { %v923_v8 = vpop.f32.mrf.mxu2  ;;  %v2037_v60 = vor.u32 %v2036_v42, %v2032_v41  ;;  %v1265_v5 = vrot.slane %v1263_v51, 4  ;;  %v1264_v19 = vsel %vm9274_vm5, %v7409_v4, %v1263_v51  ;;  %v2377_v40 = vunpack.c.l.b16 %v2033_v21 }
  0xba   : > { %v1156_v9 = vpop.f32.mrf.mxu3  ;;  %v1380_v37 = vunpack.c.l.b16 %v1264_v19 }
  0xbb   : > { %v9319_v11 = vadd.f32 %v1156_v9, %v923_v8  ;;  %v885_v23 = vpop.f32.mrf.mxu0  ;;  %v2038_v7 = vrot.slane %v2037_v60, 4  ;;  %v2042_v8 = vrot.slane %v2040_v52, 5  ;;  %v7729_v9 = vrot.slane %v7713_v3, 9  ;;  %v8446_v60 = vld [vmem:[%s8919_s18 + $0x24] sm:$0xff] }
  0xbc   : > { %v1267_v14 = vsel %vm9274_vm5, %v1265_v5, %v1266_v50  ;;  %v1270_v52 = vrot.slane %v9072_v33, 5  ;;  %v8505_v33 = vld [vmem:[%s11652_s1 + $0x1a8] sm:$0xff] }
  0xbd   : > { %v1118_v25 = vpop.f32.mrf.mxu1  ;;  %v2043_v22 = vsel %vm8958_vm2, %v2038_v7, %v2042_v8  ;;  %v2687_v30 = vsel %vm9274_vm5, %v7729_v9, %v2686_v16  ;;  %v1381_v38 = vunpack.c.l.b16 %v1267_v14  ;;  %v1199_v16 = vld [vmem:[%s8919_s18 + $0x24] sm:$0xe]  ;;  %v2693_v7 = vrot.slane %v9349_v15, 5  ;;  %v7714_v9 = vld [vmem:[%s8919_s18 + $0x30] sm:$0xe]  ;;  %v8513_v15 = vld [vmem:[%s11652_s1 + $0x1e8] sm:$0xff]  ;;  %3228 = vmatpush.bf16.msra.mxu2 %v8505_v33 }
  0xbe   : > { %v9331_v27 = vadd.f32 %v1118_v25, %v885_v23  ;;  %v2045_v23 = vshrl.u32 %v7624_v20, 16  ;;  %v2048_v25 = vshll.u32 %v7624_v20, 16  ;;  %v2378_v41 = vunpack.c.l.b16 %v2043_v22  ;;  %v7627_v20 = vld [vmem:[%s8919_s18 + $0x3c] sm:$0xf]  ;;  %v9385_v14 = vld [vmem:[%s8919_s18 + $0x40] sm:$0xf]  ;;  %3910 = vmatpush.bf16.msra.mxu3 %v8513_v15 }
  0xbf   : > { %v2803_v42 = vunpack.c.l.b16 %v2687_v30  ;;  %v1410_v59 = vpack.c.b16 %v1381_v38, %v1380_v37  ;;  %v7410_v10 = vrot.slane %v1199_v16, 9  ;;  %v1272_v29 = vrot.slane %v1270_v52, 4  ;;  %v8447_v33 = vld [vmem:[%s8919_s18 + $0x30] sm:$0xff] }
  0xc0   : > { %v7730_v22 = vrot.slane %v7714_v9, 9  ;;  %v2069_v30 = vshrl.u32 %v7627_v20, 16  ;;  %v2072_v31 = vshll.u32 %v7627_v20, 16  ;;  %v2700_v15 = vrot.slane %v9385_v14, 5 }
  0xc1   : > { %v925_v44 = vpop.f32.mrf.mxu2  ;;  %v1271_v37 = vsel %vm9274_vm5, %v7410_v10, %v1270_v52 }
  0xc2   : > { %v1158_v45 = vpop.f32.mrf.mxu3 }
  0xc3   : > { %v9337_v46 = vadd.f32 %v1158_v45, %v925_v44  ;;  %v888_v61 = vpop.f32.mrf.mxu0  ;;  %v2047_v44 = vrot.slane %v2045_v23, 4  ;;  %v2050_v45 = vrot.slane %v2048_v25, 5  ;;  %v2695_v23 = vrot.slane %v2693_v7, 4 }
  0xc5   : > { %v1121_v63 = vpop.f32.mrf.mxu1  ;;  %v2051_v3 = vor.u32 %v2050_v45, %v2047_v44  ;;  %v2694_v44 = vsel %vm9274_vm5, %v7730_v22, %v2693_v7  ;;  %v1277_v7 = vrot.slane %v9108_v34, 5 }
  0xc6   : > { %v9343_v0 = vadd.f32 %v1121_v63, %v888_v61  ;;  %1501 = vmatmul.bf16.gmra.mxu2 %v1409_v47  ;;  %2498 = vmatmul.bf16.gmra.mxu0 %v2406_v49  ;;  %v7626_v47 = vld [vmem:[%s8919_s18 + $0x38] sm:$0x1]  ;;  %v2060_v49 = vrot.slane %v2058_v35, 4  ;;  %v2407_v61 = vpack.c.b16 %v2378_v41, %v2377_v40  ;;  %v2833_v63 = vpack.c.b16 %v2804_v43, %v2803_v42 }
  0xc7   : > { %1816 = vmatmul.bf16.gmra.mxu3 %v8445_v48  ;;  %v2056_v48 = vrot.slane %v2054_v32, 5  ;;  %v2064_v4 = vshll.u32 %v7626_v47, 16  ;;  %v2696_v25 = vrot.slane %v7626_v47, 5  ;;  %v2082_v35 = vshrl.u32 %v9385_v14, 16 }
  0xc8   : > { %2924 = vmatmul.bf16.gmra.mxu1 %v2832_v53  ;;  %v2805_v16 = vunpack.c.l.b16 %v2694_v44  ;;  %v1279_v34 = vrot.slane %v1277_v7, 4 }
  0xc9   : > { %v928_v12 = vpop.f32.mrf.mxu2  ;;  %v2061_v6 = vor.u32 %v2060_v49, %v2056_v48  ;;  %v2066_v19 = vrot.slane %v2064_v4, 5  ;;  %v2697_v45 = vsel %vm9274_vm5, %v2695_v23, %v2696_v25  ;;  %v2071_v49 = vrot.slane %v2069_v30, 4  ;;  %v7629_v4 = vld [vmem:[%s8919_s18 + $0x44] sm:$0x1]  ;;  %v7715_v25 = vld [vmem:[%s8919_s18 + $0x3c] sm:$0xe] }
  0xca   : > { %v1161_v13 = vpop.f32.mrf.mxu3  ;;  %v2084_v52 = vrot.slane %v2082_v35, 4  ;;  %v7731_v35 = vrot.slane %v7715_v25, 9  ;;  %v1284_v25 = vrot.slane %v9136_v17, 5  ;;  %v1287_v17 = vrot.slane %v9154_v54, 5 }
  0xcb   : > { %v9351_v18 = vadd.f32 %v1161_v13, %v928_v12  ;;  %v890_v26 = vpop.f32.mrf.mxu0  ;;  %v1273_v12 = vrot.slane %v9090_v2, 5  ;;  %v2052_v13 = vrot.slane %v2051_v3, 4  ;;  %v2062_v21 = vrot.slane %v2061_v6, 4  ;;  %v1200_v6 = vld [vmem:[%s8919_s18 + $0x30] sm:$0xe] }
  0xcc   : > { %v2078_v2 = vshll.u32 %v9385_v14, 16  ;;  %v2806_v3 = vunpack.c.l.b16 %v2697_v45  ;;  %v7411_v23 = vrot.slane %v1200_v6, 9  ;;  %v2702_v14 = vrot.slane %v2700_v15, 4 }
  0xcd   : > { %v1123_v28 = vpop.f32.mrf.mxu1  ;;  %v1274_v38 = vsel %vm9274_vm5, %v1272_v29, %v1273_v12  ;;  %v2057_v42 = vsel %vm8958_vm2, %v2052_v13, %v2056_v48  ;;  %v2067_v43 = vsel %vm8958_vm2, %v2062_v21, %v2066_v19  ;;  %v1382_v48 = vunpack.c.l.b16 %v1271_v37 }
  0xce   : > { %v9367_v36 = vadd.f32 %v1123_v28, %v890_v26  ;;  %v2088_v12 = vshll.u32 %v7629_v4, 16  ;;  %v2834_v19 = vpack.c.b16 %v2806_v3, %v2805_v16  ;;  %v2703_v37 = vrot.slane %v7629_v4, 5 }
  0xd1   : > { %v930_v51 = vpop.f32.mrf.mxu2 }
  0xd2   : > { %v1163_v53 = vpop.f32.mrf.mxu3 }
  0xd3   : > { %v9370_v57 = vadd.f32 %v1163_v53, %v930_v51  ;;  %v893_v5 = vpop.f32.mrf.mxu0  ;;  %v2074_v51 = vrot.slane %v2072_v31, 5  ;;  %v8521_v53 = vld [vmem:[%s11652_s1 + $0x228] sm:$0xff] }
  0xd4   : > { %4336 = vmatpush.bf16.msra.mxu0 %v8521_v53 }
  0xd5   : > { %v1126_v50 = vpop.f32.mrf.mxu1  ;;  %v2075_v9 = vor.u32 %v2074_v51, %v2071_v49 }
  0xd6   : > { %v9376_v8 = vadd.f32 %v1126_v50, %v893_v5  ;;  %1506 = vmatmul.bf16.gmra.mxu2 %v1410_v59  ;;  %2503 = vmatmul.bf16.gmra.mxu0 %v2407_v61  ;;  %v1383_v59 = vunpack.c.l.b16 %v1274_v38  ;;  %v2379_v61 = vunpack.c.l.b16 %v2057_v42  ;;  %v7630_v38 = vld [vmem:[%s8919_s18 + $0x48] sm:$0xf] }
  0xd7   : > { %1821 = vmatmul.bf16.gmra.mxu3 %v8446_v60  ;;  %v2080_v60 = vrot.slane %v2078_v2, 5  ;;  %v2076_v30 = vrot.slane %v2075_v9, 4  ;;  %v2090_v2 = vrot.slane %v2088_v12, 5  ;;  %v2093_v51 = vshrl.u32 %v7630_v38, 16  ;;  %v7632_v12 = vld [vmem:[%s8919_s18 + $0x50] sm:$0x1] }
  0xd8   : > { %2929 = vmatmul.bf16.gmra.mxu1 %v2833_v63  ;;  %v2380_v63 = vunpack.c.l.b16 %v2067_v43  ;;  %v1411_v29 = vpack.c.b16 %v1383_v59, %v1382_v48  ;;  %v1278_v43 = vsel %vm9274_vm5, %v7411_v23, %v1277_v7  ;;  %v2096_v53 = vshll.u32 %v7630_v38, 16 }
  0xd9   : > { %v933_v26 = vpop.f32.mrf.mxu2  ;;  %v2085_v20 = vor.u32 %v2084_v52, %v2080_v60  ;;  %v2081_v44 = vsel %vm8958_vm2, %v2076_v30, %v2080_v60  ;;  %v2701_v48 = vsel %vm9274_vm5, %v7731_v35, %v2700_v15  ;;  %v2704_v59 = vsel %vm9274_vm5, %v2702_v14, %v2703_v37 }
  0xda   : > { %v1166_v28 = vpop.f32.mrf.mxu3  ;;  %v2408_v13 = vpack.c.b16 %v2380_v63, %v2379_v61  ;;  %v1384_v3 = vunpack.c.l.b16 %v1278_v43  ;;  %v2807_v6 = vunpack.c.l.b16 %v2701_v48  ;;  %v2808_v7 = vunpack.c.l.b16 %v2704_v59 }
  0xdb   : > { %v9390_v32 = vadd.f32 %v1166_v28, %v933_v26  ;;  %v895_v40 = vpop.f32.mrf.mxu0  ;;  %v1280_v28 = vrot.slane %v9122_v62, 5  ;;  %v2086_v31 = vrot.slane %v2085_v20, 4  ;;  %v2095_v9 = vrot.slane %v2093_v51, 4  ;;  %v8512_v51 = vld [vmem:[%s11652_s1 + $0x1e0] sm:$0xff] }
  0xdc   : > { %v1286_v43 = vrot.slane %v1284_v25, 4  ;;  %v2710_v59 = vrot.slane %v7632_v12, 5  ;;  %3911 = vmatpush.bf16.msra.mxu3 %v8512_v51  ;;  %v1291_v51 = vrot.slane %v9175_v24, 5  ;;  %v1294_v24 = vrot.slane %v9189_v56, 5 }
  0xdd   : > { %v1128_v41 = vpop.f32.mrf.mxu1  ;;  %v1281_v62 = vsel %vm9274_vm5, %v1279_v34, %v1280_v28  ;;  %v2091_v49 = vsel %vm8958_vm2, %v2086_v31, %v2090_v2  ;;  %v2835_v34 = vpack.c.b16 %v2808_v7, %v2807_v6  ;;  %v1201_v28 = vld [vmem:[%s8919_s18 + $0x3c] sm:$0xe]  ;;  %v2112_v2 = vshll.u32 %v7632_v12, 16 }
  0xde   : > { %v9406_v47 = vadd.f32 %v1128_v41, %v895_v40  ;;  %v9424_v40 = vld [vmem:[%s8919_s18 + $0x4c] sm:$0xf]  ;;  %v1385_v4 = vunpack.c.l.b16 %v1281_v62  ;;  %v8504_v62 = vld [vmem:[%s11652_s1 + $0x1a0] sm:$0xff] }
  0xdf   : > { %v2102_v52 = vshll.u32 %v9424_v40, 16  ;;  %v2106_v61 = vshrl.u32 %v9424_v40, 16  ;;  %v2707_v37 = vrot.slane %v9424_v40, 5  ;;  %v2114_v40 = vrot.slane %v2112_v2, 5  ;;  %3229 = vmatpush.bf16.msra.mxu2 %v8504_v62  ;;  %v8449_v62 = vld [vmem:[%s8919_s18 + $0x48] sm:$0xff] }
  0xe1   : > { %v935_v5 = vpop.f32.mrf.mxu2  ;;  %v2108_v20 = vrot.slane %v2106_v61, 4  ;;  %v2709_v48 = vrot.slane %v2707_v37, 4 }
  0xe2   : > { %v1168_v50 = vpop.f32.mrf.mxu3 }
  0xe3   : > { %v9414_v10 = vadd.f32 %v1168_v50, %v935_v5  ;;  %v898_v21 = vpop.f32.mrf.mxu0  ;;  %v2381_v5 = vunpack.c.l.b16 %v2081_v44  ;;  %v2382_v50 = vunpack.c.l.b16 %v2091_v49  ;;  %v2711_v12 = vsel %vm9274_vm5, %v2709_v48, %v2710_v59 }
  0xe5   : > { %v1131_v22 = vpop.f32.mrf.mxu1  ;;  %v2409_v23 = vpack.c.b16 %v2382_v50, %v2381_v5 }
  0xe6   : > { %v9419_v26 = vadd.f32 %v1131_v22, %v898_v21  ;;  %1511 = vmatmul.bf16.gmra.mxu2 %v1411_v29  ;;  %2508 = vmatmul.bf16.gmra.mxu0 %v2408_v13  ;;  %v2098_v29 = vrot.slane %v2096_v53, 5  ;;  %v1412_v21 = vpack.c.b16 %v1385_v4, %v1384_v3  ;;  %v8448_v22 = vld [vmem:[%s8919_s18 + $0x3c] sm:$0xff]  ;;  %v1288_v4 = vsel %vm9274_vm5, %v1286_v43, %v1287_v17 }
  0xe7   : > { %1826 = vmatmul.bf16.gmra.mxu3 %v8447_v33  ;;  %v2104_v33 = vrot.slane %v2102_v52, 5  ;;  %v7633_v52 = vld [vmem:[%s8919_s18 + $0x54] sm:$0xf] }
  0xe8   : > { %2934 = vmatmul.bf16.gmra.mxu1 %v2834_v19  ;;  %v2099_v30 = vor.u32 %v2098_v29, %v2095_v9  ;;  %v2117_v6 = vshrl.u32 %v7633_v52, 16  ;;  %v2120_v7 = vshll.u32 %v7633_v52, 16 }
  0xe9   : > { %v938_v41 = vpop.f32.mrf.mxu2  ;;  %v2109_v31 = vor.u32 %v2108_v20, %v2104_v33 }
  0xea   : > { %v1171_v42 = vpop.f32.mrf.mxu3  ;;  %v2100_v44 = vrot.slane %v2099_v30, 4  ;;  %v2810_v30 = vunpack.c.l.b16 %v2711_v12  ;;  %v2122_v2 = vrot.slane %v2120_v7, 5 }
  0xeb   : > { %v9432_v45 = vadd.f32 %v1171_v42, %v938_v41  ;;  %v900_v63 = vpop.f32.mrf.mxu0  ;;  %v7716_v41 = vld [vmem:[%s8919_s18 + $0x48] sm:$0xe]  ;;  %v7412_v42 = vrot.slane %v1201_v28, 9  ;;  %v2110_v49 = vrot.slane %v2109_v31, 4  ;;  %v2119_v31 = vrot.slane %v2117_v6, 4 }
  0xec   : > { %v7732_v53 = vrot.slane %v7716_v41, 9  ;;  %v2105_v5 = vsel %vm8958_vm2, %v2100_v44, %v2104_v33  ;;  %v8520_v33 = vld [vmem:[%s11652_s1 + $0x220] sm:$0xff]  ;;  %v1293_v6 = vrot.slane %v1291_v51, 4 }
  0xed   : > { %v1133_v60 = vpop.f32.mrf.mxu1  ;;  %v1285_v3 = vsel %vm9274_vm5, %v7412_v42, %v1284_v25  ;;  %v2115_v50 = vsel %vm8958_vm2, %v2110_v49, %v2114_v40  ;;  %v2383_v25 = vunpack.c.l.b16 %v2105_v5  ;;  %4337 = vmatpush.bf16.msra.mxu0 %v8520_v33  ;;  %v1202_v40 = vld [vmem:[%s8919_s18 + $0x48] sm:$0xe] }
  0xee   : > { %v9442_v16 = vadd.f32 %v1133_v60, %v900_v63  ;;  %v9463_v63 = vld [vmem:[%s8919_s18 + $0x58] sm:$0xf]  ;;  %v2708_v20 = vsel %vm9274_vm5, %v7732_v53, %v2707_v37  ;;  %v2123_v53 = vor.u32 %v2122_v2, %v2119_v31  ;;  %v7413_v5 = vrot.slane %v1202_v40, 9 }
  0xef   : > { %v2809_v28 = vunpack.c.l.b16 %v2708_v20 }
  0xf0   : > { %v2124_v7 = vrot.slane %v2123_v53, 4  ;;  %v1292_v56 = vsel %vm9274_vm5, %v7413_v5, %v1291_v51  ;;  %v1203_v5 = vld [vmem:[%s8919_s18 + $0x54] sm:$0xe] }
  0xf1   : > { %v940_v13 = vpop.f32.mrf.mxu2  ;;  %v2836_v49 = vpack.c.b16 %v2810_v30, %v2809_v28  ;;  %v1295_v30 = vsel %vm9274_vm5, %v1293_v6, %v1294_v24 }
  0xf2   : > { %v1173_v19 = vpop.f32.mrf.mxu3  ;;  %v1389_v40 = vunpack.c.l.b16 %v1295_v30 }
  0xf3   : > { %v9445_v15 = vadd.f32 %v1173_v19, %v940_v13  ;;  %v903_v35 = vpop.f32.mrf.mxu0  ;;  %v2126_v13 = vshll.u32 %v9463_v63, 16  ;;  %v2130_v19 = vshrl.u32 %v9463_v63, 16 }
  0xf5   : > { %v1136_v14 = vpop.f32.mrf.mxu1  ;;  %v2132_v37 = vrot.slane %v2130_v19, 4 }
  0xf6   : > { %v9451_v38 = vadd.f32 %v1136_v14, %v903_v35  ;;  %1516 = vmatmul.bf16.gmra.mxu2 %v1412_v21  ;;  %2513 = vmatmul.bf16.gmra.mxu0 %v2409_v23  ;;  %v1387_v23 = vunpack.c.l.b16 %v1288_v4  ;;  %v7635_v35 = vld [vmem:[%s8919_s18 + $0x5c] sm:$0x1]  ;;  %v2128_v14 = vrot.slane %v2126_v13, 5  ;;  %v7717_v4 = vld [vmem:[%s8919_s18 + $0x54] sm:$0xe] }
  0xf7   : > { %1831 = vmatmul.bf16.gmra.mxu3 %v8448_v22  ;;  %v1386_v22 = vunpack.c.l.b16 %v1285_v3  ;;  %v2136_v48 = vshll.u32 %v7635_v35, 16  ;;  %v7733_v12 = vrot.slane %v7717_v4, 9 }
  0xf8   : > { %2939 = vmatmul.bf16.gmra.mxu1 %v2835_v34  ;;  %v2384_v34 = vunpack.c.l.b16 %v2115_v50  ;;  %v7636_v50 = vld [vmem:[%s8919_s18 + $0x60] sm:$0xf] }
  0xf9   : > { %v943_v61 = vpop.f32.mrf.mxu2  ;;  %v1413_v17 = vpack.c.b16 %v1387_v23, %v1386_v22  ;;  %v2141_v22 = vshrl.u32 %v7636_v50, 16  ;;  %v2144_v23 = vshll.u32 %v7636_v50, 16  ;;  %v8680_v50 = vld [vmem:[%s8919_s18 + $0x58] sm:$0xf] }
  0xfa   : > { %v1176_v54 = vpop.f32.mrf.mxu3  ;;  %v2410_v44 = vpack.c.b16 %v2384_v34, %v2383_v25  ;;  %v1298_v6 = vrot.slane %v8680_v50, 5 }
  0xfb   : > { %v9465_v60 = vadd.f32 %v1176_v54, %v943_v61  ;;  %v905_v9 = vpop.f32.mrf.mxu0  ;;  %v2133_v61 = vor.u32 %v2132_v37, %v2128_v14  ;;  %v2714_v54 = vrot.slane %v9463_v63, 5  ;;  %v2717_v63 = vrot.slane %v7635_v35, 5 }
  0xfc   : > { %v2129_v35 = vsel %vm8958_vm2, %v2124_v7, %v2128_v14  ;;  %v1300_v30 = vrot.slane %v1298_v6, 4 }
  0xfd   : > { %v1138_v29 = vpop.f32.mrf.mxu1  ;;  %v2134_v20 = vrot.slane %v2133_v61, 4  ;;  %v2716_v13 = vrot.slane %v2714_v54, 4  ;;  %v2385_v53 = vunpack.c.l.b16 %v2129_v35  ;;  %v7638_v61 = vld [vmem:[%s8919_s18 + $0x68] sm:$0x1] }
  0xfe   : > { %v9481_v21 = vadd.f32 %v1138_v29, %v905_v9  ;;  %v2138_v9 = vrot.slane %v2136_v48, 5  ;;  %v9499_v29 = vld [vmem:[%s8919_s18 + $0x64] sm:$0xf] }
  0xff   : > { %v2150_v34 = vshll.u32 %v9499_v29, 16  ;;  %v2154_v28 = vshrl.u32 %v9499_v29, 16 }
 0x100   : > { %v2139_v37 = vsel %vm8958_vm2, %v2134_v20, %v2138_v9  ;;  %v8450_v20 = vld [vmem:[%s8919_s18 + $0x54] sm:$0xff] }
 0x101   : > { %v945_v41 = vpop.f32.mrf.mxu2  ;;  %v2152_v51 = vrot.slane %v2150_v34, 5  ;;  %v2156_v14 = vrot.slane %v2154_v28, 4  ;;  %v2386_v48 = vunpack.c.l.b16 %v2139_v37  ;;  %v7414_v34 = vrot.slane %v1203_v5, 9  ;;  %v7718_v28 = vld [vmem:[%s8919_s18 + $0x60] sm:$0xe] }
 0x102   : > { %v1178_v42 = vpop.f32.mrf.mxu3 }
 0x103   : > { %v9487_v43 = vadd.f32 %v1178_v42, %v945_v41  ;;  %v908_v59 = vpop.f32.mrf.mxu0  ;;  %v2715_v41 = vsel %vm9274_vm5, %v7733_v12, %v2714_v54  ;;  %v2718_v42 = vsel %vm9274_vm5, %v2716_v13, %v2717_v63  ;;  %v2157_v12 = vor.u32 %v2156_v14, %v2152_v51 }
 0x104   : > { %v2160_v13 = vshll.u32 %v7638_v61, 16  ;;  %v2411_v63 = vpack.c.b16 %v2386_v48, %v2385_v53  ;;  %v1299_v53 = vsel %vm9274_vm5, %v7414_v34, %v1298_v6 }
 0x105   : > { %v1141_v52 = vpop.f32.mrf.mxu1  ;;  %v2158_v35 = vrot.slane %v2157_v12, 4  ;;  %v1390_v12 = vunpack.c.l.b16 %v1299_v53 }
 0x106   : > { %v9493_v3 = vadd.f32 %v1141_v52, %v908_v59  ;;  %1521 = vmatmul.bf16.gmra.mxu2 %v1413_v17  ;;  %2518 = vmatmul.bf16.gmra.mxu0 %v2410_v44  ;;  %v2146_v44 = vrot.slane %v2144_v23, 5  ;;  %v2811_v59 = vunpack.c.l.b16 %v2715_v41  ;;  %v2812_v52 = vunpack.c.l.b16 %v2718_v42 }
 0x107   : > { %1836 = vmatmul.bf16.gmra.mxu3 %v8449_v62  ;;  %v2143_v62 = vrot.slane %v2141_v22, 4  ;;  %v2162_v37 = vrot.slane %v2160_v13, 5  ;;  %v7734_v41 = vrot.slane %v7718_v28, 9 }
 0x108   : > { %2944 = vmatmul.bf16.gmra.mxu1 %v2836_v49  ;;  %v1388_v49 = vunpack.c.l.b16 %v1292_v56 }
 0x109   : > { %v948_v19 = vpop.f32.mrf.mxu2  ;;  %v2147_v24 = vor.u32 %v2146_v44, %v2143_v62  ;;  %v2724_v62 = vrot.slane %v7638_v61, 5  ;;  %v7639_v44 = vld [vmem:[%s8919_s18 + $0x6c] sm:$0xf]  ;;  %v2163_v61 = vsel %vm8958_vm2, %v2158_v35, %v2162_v37 }
 0x10a   : > { %v1181_v33 = vpop.f32.mrf.mxu3  ;;  %v1414_v9 = vpack.c.b16 %v1389_v40, %v1388_v49  ;;  %v8511_v49 = vld [vmem:[%s11652_s1 + $0x1d8] sm:$0xff] }
 0x10b   : > { %v9501_v25 = vadd.f32 %v1181_v33, %v948_v19  ;;  %v910_v31 = vpop.f32.mrf.mxu0  ;;  %v2837_v19 = vpack.c.b16 %v2812_v52, %v2811_v59  ;;  %v2721_v33 = vrot.slane %v9499_v29, 5  ;;  %v8503_v29 = vld [vmem:[%s11652_s1 + $0x198] sm:$0xff]  ;;  %3912 = vmatpush.bf16.msra.mxu3 %v8511_v49  ;;  %v8681_v49 = vld [vmem:[%s8919_s18 + $0x64] sm:$0xf] }
 0x10c   : > { %3230 = vmatpush.bf16.msra.mxu2 %v8503_v29 }
 0x10d   : > { %v1143_v2 = vpop.f32.mrf.mxu1  ;;  %v2723_v42 = vrot.slane %v2721_v33, 4  ;;  %v2722_v5 = vsel %vm9274_vm5, %v7734_v41, %v2721_v33 }
 0x10e   : > { %v9517_v17 = vadd.f32 %v1143_v2, %v910_v31  ;;  %v1301_v31 = vrot.slane %v9226_v55, 5  ;;  %v2148_v2 = vrot.slane %v2147_v24, 4  ;;  %v9538_v55 = vld [vmem:[%s8919_s18 + $0x70] sm:$0xf]  ;;  %v2813_v33 = vunpack.c.l.b16 %v2722_v5 }
 0x10f   : > { %v2725_v50 = vsel %vm9274_vm5, %v2723_v42, %v2724_v62  ;;  %v2174_v6 = vshll.u32 %v9538_v55, 16  ;;  %v2178_v24 = vshrl.u32 %v9538_v55, 16  ;;  %v8451_v42 = vld [vmem:[%s8919_s18 + $0x60] sm:$0xff] }
 0x110   : > { %v1302_v48 = vsel %vm9274_vm5, %v1300_v30, %v1301_v31  ;;  %v2153_v59 = vsel %vm8958_vm2, %v2148_v2, %v2152_v51  ;;  %v7641_v31 = vld [vmem:[%s8919_s18 + $0x74] sm:$0x1]  ;;  %v8519_v2 = vld [vmem:[%s11652_s1 + $0x218] sm:$0xff] }
 0x111   : > { %v950_v54 = vpop.f32.mrf.mxu2  ;;  %v1391_v13 = vunpack.c.l.b16 %v1302_v48  ;;  %v2176_v28 = vrot.slane %v2174_v6, 5  ;;  %v2180_v30 = vrot.slane %v2178_v24, 4  ;;  %4338 = vmatpush.bf16.msra.mxu0 %v8519_v2  ;;  %v7719_v6 = vld [vmem:[%s8919_s18 + $0x6c] sm:$0xe] }
 0x112   : > { %v1183_v4 = vpop.f32.mrf.mxu3 }
 0x113   : > { %v9522_v7 = vadd.f32 %v1183_v4, %v950_v54  ;;  %v913_v22 = vpop.f32.mrf.mxu0  ;;  %v2165_v54 = vshrl.u32 %v7639_v44, 16  ;;  %v2168_v4 = vshll.u32 %v7639_v44, 16  ;;  %v1415_v41 = vpack.c.b16 %v1391_v13, %v1390_v12  ;;  %v1204_v44 = vld [vmem:[%s8919_s18 + $0x60] sm:$0xe] }
 0x114   : > { %v2181_v48 = vor.u32 %v2180_v30, %v2176_v28 }
 0x115   : > { %v1146_v23 = vpop.f32.mrf.mxu1  ;;  %v2170_v34 = vrot.slane %v2168_v4, 5  ;;  %v2728_v4 = vrot.slane %v9538_v55, 5  ;;  %v9574_v55 = vld [vmem:[%s8919_s18 + $0x7c] sm:$0xf] }
 0x116   : > { %v9527_v56 = vadd.f32 %v1146_v23, %v913_v22  ;;  %1526 = vmatmul.bf16.gmra.mxu2 %v1414_v9  ;;  %2523 = vmatmul.bf16.gmra.mxu0 %v2411_v63  ;;  %v2387_v63 = vunpack.c.l.b16 %v2153_v59  ;;  %v2814_v22 = vunpack.c.l.b16 %v2725_v50  ;;  %v2167_v23 = vrot.slane %v2165_v54, 4 }
 0x117   : > { %1841 = vmatmul.bf16.gmra.mxu3 %v8450_v20  ;;  %v2184_v59 = vshll.u32 %v7641_v31, 16  ;;  %v7415_v50 = vrot.slane %v1204_v44, 9  ;;  %v2182_v13 = vrot.slane %v2181_v48, 4  ;;  %v2198_v44 = vshll.u32 %v9574_v55, 16 }
 0x118   : > { %2949 = vmatmul.bf16.gmra.mxu1 %v2837_v19  ;;  %v2388_v19 = vunpack.c.l.b16 %v2163_v61  ;;  %v2171_v53 = vor.u32 %v2170_v34, %v2167_v23  ;;  %v2731_v23 = vrot.slane %v7641_v31, 5 }
 0x119   : > { %v953_v40 = vpop.f32.mrf.mxu2 }
 0x11a   : > { %v1186_v14 = vpop.f32.mrf.mxu3  ;;  %v2412_v62 = vpack.c.b16 %v2388_v19, %v2387_v63  ;;  %v2172_v12 = vrot.slane %v2171_v53, 4  ;;  %v2186_v63 = vrot.slane %v2184_v59, 5  ;;  %v7642_v19 = vld [vmem:[%s8919_s18 + $0x78] sm:$0xf] }
 0x11b   : > { %v9546_v52 = vadd.f32 %v1186_v14, %v953_v40  ;;  %v915_v51 = vpop.f32.mrf.mxu0  ;;  %v1305_v40 = vrot.slane %v8681_v49, 5  ;;  %v2838_v14 = vpack.c.b16 %v2814_v22, %v2813_v33  ;;  %v7735_v33 = vrot.slane %v7719_v6, 9 }
 0x11c   : > { %v2730_v22 = vrot.slane %v2728_v4, 4  ;;  %v2187_v31 = vsel %vm8958_vm2, %v2182_v13, %v2186_v63  ;;  %v2202_v49 = vshrl.u32 %v9574_v55, 16  ;;  %v7644_v63 = vld [vmem:[%s8919_s18 + $0x80] sm:$0x1] }
 0x11d   : > { %v1148_v9 = vpop.f32.mrf.mxu1  ;;  %v1307_v24 = vrot.slane %v1305_v40, 4  ;;  %v1306_v2 = vsel %vm9274_vm5, %v7415_v50, %v1305_v40  ;;  %v2729_v53 = vsel %vm9274_vm5, %v7735_v33, %v2728_v4  ;;  %v2390_v50 = vunpack.c.l.b16 %v2187_v31  ;;  %v8683_v33 = vld [vmem:[%s8919_s18 + $0x70] sm:$0xf] }
 0x11e   : > { %v9556_v20 = vadd.f32 %v1148_v9, %v915_v51  ;;  %v8682_v51 = vld [vmem:[%s8919_s18 + $0x68] sm:$0x1]  ;;  %v2732_v48 = vsel %vm9274_vm5, %v2730_v22, %v2731_v23  ;;  %v2204_v13 = vrot.slane %v2202_v49, 4  ;;  %v1312_v22 = vrot.slane %v8683_v33, 5 }
 0x11f   : > { %v1308_v9 = vrot.slane %v8682_v51, 5  ;;  %v2815_v51 = vunpack.c.l.b16 %v2729_v53  ;;  %v2208_v31 = vshll.u32 %v7644_v63, 16  ;;  %v2735_v49 = vrot.slane %v9574_v55, 5 }
 0x120   : > { %v1314_v53 = vrot.slane %v1312_v22, 4 }
 0x121   : > { %v955_v35 = vpop.f32.mrf.mxu2  ;;  %v2737_v55 = vrot.slane %v2735_v49, 4 }
 0x122   : > { %v1188_v37 = vpop.f32.mrf.mxu3 }
 0x123   : > { %v9562_v29 = vadd.f32 %v1188_v37, %v955_v35  ;;  %v918_v61 = vpop.f32.mrf.mxu0  ;;  %v1309_v37 = vsel %vm9274_vm5, %v1307_v24, %v1308_v9  ;;  %v2816_v9 = vunpack.c.l.b16 %v2732_v48  ;;  %v8684_v48 = vld [vmem:[%s8919_s18 + $0x74] sm:$0x1] }
 0x125   : > { %v1151_v54 = vpop.f32.mrf.mxu1 }
 0x126   : > { %v9568_v5 = vadd.f32 %v1151_v54, %v918_v61  ;;  %1531 = vmatmul.bf16.gmra.mxu2 %v1415_v41  ;;  %2528 = vmatmul.bf16.gmra.mxu0 %v2412_v62  ;;  %v2189_v41 = vshrl.u32 %v7642_v19, 16  ;;  %v2177_v62 = vsel %vm8958_vm2, %v2172_v12, %v2176_v28  ;;  %v1392_v28 = vunpack.c.l.b16 %v1306_v2  ;;  %v1205_v2 = vld [vmem:[%s8919_s18 + $0x6c] sm:$0xe] }
 0x127   : > { %1846 = vmatmul.bf16.gmra.mxu3 %v8451_v42  ;;  %v2192_v42 = vshll.u32 %v7642_v19, 16  ;;  %v1393_v61 = vunpack.c.l.b16 %v1309_v37  ;;  %v2389_v54 = vunpack.c.l.b16 %v2177_v62  ;;  %v2200_v12 = vrot.slane %v2198_v44, 5 }
 0x128   : > { %2954 = vmatmul.bf16.gmra.mxu1 %v2838_v14  ;;  %v2191_v6 = vrot.slane %v2189_v41, 4  ;;  %v2839_v41 = vpack.c.b16 %v2816_v9, %v2815_v51  ;;  %v2738_v51 = vrot.slane %v7644_v63, 5  ;;  %v9608_v9 = vld [vmem:[%s8919_s18 + $0x88] sm:$0xf] }
 0x129   : > { %v958_v34 = vpop.f32.mrf.mxu2  ;;  %v2194_v24 = vrot.slane %v2192_v42, 5  ;;  %v2413_v62 = vpack.c.b16 %v2390_v50, %v2389_v54  ;;  %v2205_v42 = vor.u32 %v2204_v13, %v2200_v12  ;;  %v2210_v50 = vrot.slane %v2208_v31, 5  ;;  %v8510_v13 = vld [vmem:[%s11652_s1 + $0x1d0] sm:$0xff] }
 0x12a   : > { %v1191_v30 = vpop.f32.mrf.mxu3  ;;  %3913 = vmatpush.bf16.msra.mxu3 %v8510_v13  ;;  %v2222_v31 = vshll.u32 %v9608_v9, 16 }
 0x12b   : > { %v9578_v35 = vadd.f32 %v1191_v30, %v958_v34  ;;  %v920_v14 = vpop.f32.mrf.mxu0  ;;  %v1416_v34 = vpack.c.b16 %v1393_v61, %v1392_v28  ;;  %v8452_v30 = vld [vmem:[%s8919_s18 + $0x6c] sm:$0xff]  ;;  %v2195_v37 = vor.u32 %v2194_v24, %v2191_v6  ;;  %v2206_v54 = vrot.slane %v2205_v42, 4  ;;  %v7645_v6 = vld [vmem:[%s8919_s18 + $0x84] sm:$0xf] }
 0x12c   : > { %v8502_v61 = vld [vmem:[%s11652_s1 + $0x190] sm:$0xff] }
 0x12d   : > { %11674 = vst [vmem:[#allocation9_spill] sm:$0xff] %v9578_v35  ;;  %v1153_v40 = vpop.f32.mrf.mxu1  ;;  %v2196_v28 = vrot.slane %v2195_v37, 4  ;;  %3231 = vmatpush.bf16.msra.mxu2 %v8502_v61  ;;  %v2211_v42 = vsel %vm8958_vm2, %v2206_v54, %v2210_v50 }
 0x12e   : > { %v9592_v59 = vadd.f32 %v1153_v40, %v920_v14  ;;  %v7416_v40 = vrot.slane %v1205_v2, 9  ;;  %v2392_v54 = vunpack.c.l.b16 %v2211_v42 }
 0x12f   : > { %v2201_v63 = vsel %vm8958_vm2, %v2196_v28, %v2200_v12  ;;  %v2739_v12 = vsel %vm9274_vm5, %v2737_v55, %v2738_v51 }
 0x130   : > { %v2391_v28 = vunpack.c.l.b16 %v2201_v63 }
 0x131   : > { %v960_v4 = vpop.f32.mrf.mxu2 }
 0x132   : > { %v1193_v19 = vpop.f32.mrf.mxu3 }
 0x133   : > { %v9596_v23 = vadd.f32 %v1193_v19, %v960_v4  ;;  %v2494_v14 = vpop.f32.mrf.mxu0  ;;  %v1315_v4 = vrot.slane %v8684_v48, 5  ;;  %v7720_v19 = vld [vmem:[%s8919_s18 + $0x78] sm:$0xe]  ;;  %v2226_v48 = vshrl.u32 %v9608_v9, 16 }
 0x134   : > { %v7736_v24 = vrot.slane %v7720_v19, 9 }
 0x135   : > { %11675 = vst [vmem:[#allocation10_spill] sm:$0xff] %v9596_v23  ;;  %v2920_v44 = vpop.f32.mrf.mxu1  ;;  %v1316_v2 = vsel %vm9274_vm5, %v1314_v53, %v1315_v4 }
 0x136   : > { %1536 = vmatmul.bf16.gmra.mxu2 %v1416_v34  ;;  %2533 = vmatmul.bf16.gmra.mxu0 %v2413_v62  ;;  %v2213_v62 = vshrl.u32 %v7645_v6, 16  ;;  %v1395_v4 = vunpack.c.l.b16 %v1316_v2 }
 0x137   : > { %1851 = vmatmul.bf16.gmra.mxu3 %v8452_v30  ;;  %v1313_v30 = vsel %vm9274_vm5, %v7416_v40, %v1312_v22 }
 0x138   : > { %2959 = vmatmul.bf16.gmra.mxu1 %v2839_v41  ;;  %v2216_v41 = vshll.u32 %v7645_v6, 16  ;;  %v1394_v53 = vunpack.c.l.b16 %v1313_v30  ;;  %v2215_v50 = vrot.slane %v2213_v62, 4  ;;  %v8685_v30 = vld [vmem:[%s8919_s18 + $0x7c] sm:$0xf] }
 0x139   : > { %v1497_v33 = vpop.f32.mrf.mxu2  ;;  %v8453_v62 = vld [vmem:[%s8919_s18 + $0x78] sm:$0xff] }
 0x13a   : > { %v1812_v34 = vpop.f32.mrf.mxu3  ;;  %v1577_v37 = vadd.f32 %v1497_v33, %v9302_v58  ;;  %v2736_v58 = vsel %vm9274_vm5, %v7736_v24, %v2735_v49  ;;  %v2218_v6 = vrot.slane %v2216_v41, 5  ;;  %v2818_v33 = vunpack.c.l.b16 %v2739_v12  ;;  %v7647_v49 = vld [vmem:[%s8919_s18 + $0x8c] sm:$0x1]  ;;  %v8518_v24 = vld [vmem:[%s11652_s1 + $0x210] sm:$0xff]  ;;  %v1206_v41 = vld [vmem:[%s8919_s18 + $0x78] sm:$0xe] }
 0x13b   : > { %v2496_v22 = vpop.f32.mrf.mxu0  ;;  %v2817_v13 = vunpack.c.l.b16 %v2736_v58  ;;  %v1417_v63 = vpack.c.b16 %v1395_v4, %v1394_v53  ;;  %4339 = vmatpush.bf16.msra.mxu0 %v8518_v24  ;;  %v7721_v4 = vld [vmem:[%s8919_s18 + $0x84] sm:$0xe] }
 0x13c   : > { %v1892_v19 = vadd.f32 %v1812_v34, %v1577_v37  ;;  %v2224_v34 = vrot.slane %v2222_v31, 5  ;;  %v2228_v37 = vrot.slane %v2226_v48, 4  ;;  %v2219_v42 = vor.u32 %v2218_v6, %v2215_v50 }
 0x13d   : > { %v2922_v40 = vpop.f32.mrf.mxu1  ;;  %v2840_v31 = vpack.c.b16 %v2818_v33, %v2817_v13  ;;  %v7648_v13 = vld [vmem:[%s8919_s18 + $0x90] sm:$0xf] }
 0x13e   : > { %v2574_v61 = vadd.f32 %v2494_v14, %v1892_v19  ;;  %v1319_v14 = vrot.slane %v8685_v30, 5  ;;  %v2229_v48 = vor.u32 %v2228_v37, %v2224_v34  ;;  %v2232_v19 = vshll.u32 %v7647_v49, 16 }
 0x13f   : > { %v7417_v30 = vrot.slane %v1206_v41, 9  ;;  %v2220_v6 = vrot.slane %v2219_v42, 4  ;;  %v7737_v37 = vrot.slane %v7721_v4, 9  ;;  %v2240_v42 = vshll.u32 %v7648_v13, 16 }
 0x140   : > { %v9628_v23 = vadd.f32 %v2920_v44, %v2574_v61  ;;  %v2414_v44 = vpack.c.b16 %v2392_v54, %v2391_v28  ;;  %v1321_v35 = vrot.slane %v1319_v14, 4  ;;  %v2230_v28 = vrot.slane %v2229_v48, 4 }
 0x141   : > { %v1499_v55 = vpop.f32.mrf.mxu2  ;;  %v2234_v54 = vrot.slane %v2232_v19, 5  ;;  %v2225_v41 = vsel %vm8958_vm2, %v2220_v6, %v2224_v34 }
 0x142   : > { %11676 = vst [vmem:[#allocation11_spill] sm:$0xff] %v9628_v23  ;;  %v1814_v51 = vpop.f32.mrf.mxu3  ;;  %v1578_v2 = vadd.f32 %v1499_v55, %v9331_v27  ;;  %v2742_v23 = vrot.slane %v9608_v9, 5  ;;  %v8686_v27 = vld [vmem:[%s8919_s18 + $0x80] sm:$0x1]  ;;  %v2745_v9 = vrot.slane %v7647_v49, 5 }
 0x143   : > { %v2499_v12 = vpop.f32.mrf.mxu0  ;;  %v1322_v53 = vrot.slane %v8686_v27, 5  ;;  %v9645_v55 = vld [vmem:[%s8919_s18 + $0x94] sm:$0xf]  ;;  %v2235_v49 = vsel %vm8958_vm2, %v2230_v28, %v2234_v54 }
 0x144   : > { %v1893_v58 = vadd.f32 %v1814_v51, %v1578_v2  ;;  %v2744_v24 = vrot.slane %v2742_v23, 4 }
 0x145   : > { %v2925_v61 = vpop.f32.mrf.mxu1 }
 0x146   : > { %1541 = vmatmul.bf16.gmra.mxu2 %v1417_v63  ;;  %v2575_v50 = vadd.f32 %v2496_v22, %v1893_v58  ;;  %2538 = vmatmul.bf16.gmra.mxu0 %v2414_v44  ;;  %v1320_v63 = vsel %vm9274_vm5, %v7417_v30, %v1319_v14  ;;  %v1323_v22 = vsel %vm9274_vm5, %v1321_v35, %v1322_v53  ;;  %v2246_v44 = vshll.u32 %v9645_v55, 16 }
 0x147   : > { %1856 = vmatmul.bf16.gmra.mxu3 %v8453_v62  ;;  %v2743_v35 = vsel %vm9274_vm5, %v7737_v37, %v2742_v23  ;;  %v1396_v34 = vunpack.c.l.b16 %v1320_v63  ;;  %v1397_v58 = vunpack.c.l.b16 %v1323_v22  ;;  %v2393_v30 = vunpack.c.l.b16 %v2225_v41  ;;  %v7650_v23 = vld [vmem:[%s8919_s18 + $0x98] sm:$0x1]  ;;  %v8454_v22 = vld [vmem:[%s8919_s18 + $0x84] sm:$0xff] }
 0x148   : > { %2964 = vmatmul.bf16.gmra.mxu1 %v2840_v31  ;;  %v9642_v33 = vadd.f32 %v2922_v40, %v2575_v50  ;;  %v2237_v40 = vshrl.u32 %v7648_v13, 16  ;;  %v2250_v31 = vshrl.u32 %v9645_v55, 16  ;;  %v2394_v53 = vunpack.c.l.b16 %v2235_v49 }
 0x149   : > { %v1502_v51 = vpop.f32.mrf.mxu2  ;;  %v2242_v50 = vrot.slane %v2240_v42, 5  ;;  %v2819_v6 = vunpack.c.l.b16 %v2743_v35  ;;  %v2248_v54 = vrot.slane %v2246_v44, 5  ;;  %v2256_v44 = vshll.u32 %v7650_v23, 16 }
 0x14a   : > { %v1817_v2 = vpop.f32.mrf.mxu3  ;;  %v1579_v62 = vadd.f32 %v1502_v51, %v9343_v0  ;;  %v2746_v0 = vsel %vm9274_vm5, %v2744_v24, %v2745_v9  ;;  %v2239_v4 = vrot.slane %v2237_v40, 4  ;;  %v2252_v13 = vrot.slane %v2250_v31, 4  ;;  %v8687_v24 = vld [vmem:[%s8919_s18 + $0x88] sm:$0xf] }
 0x14b   : > { %v2501_v19 = vpop.f32.mrf.mxu0  ;;  %v2820_v28 = vunpack.c.l.b16 %v2746_v0  ;;  %v1326_v9 = vrot.slane %v8687_v24, 5  ;;  %v2415_v40 = vpack.c.b16 %v2394_v53, %v2393_v30  ;;  %v2749_v35 = vrot.slane %v9645_v55, 5  ;;  %v8688_v24 = vld [vmem:[%s8919_s18 + $0x8c] sm:$0x1] }
 0x14c   : > { %v1894_v48 = vadd.f32 %v1817_v2, %v1579_v62  ;;  %v1207_v62 = vld [vmem:[%s8919_s18 + $0x84] sm:$0xe]  ;;  %v2243_v41 = vor.u32 %v2242_v50, %v2239_v4  ;;  %v2253_v49 = vor.u32 %v2252_v13, %v2248_v54  ;;  %v8501_v30 = vld [vmem:[%s11652_s1 + $0x188] sm:$0xff]  ;;  %v2258_v4 = vrot.slane %v2256_v44, 5  ;;  %v7651_v50 = vld [vmem:[%s8919_s18 + $0x9c] sm:$0xf] }
 0x14d   : > { %v2927_v14 = vpop.f32.mrf.mxu1  ;;  %v2841_v42 = vpack.c.b16 %v2820_v28, %v2819_v6  ;;  %v7418_v0 = vrot.slane %v1207_v62, 9  ;;  %v2751_v28 = vrot.slane %v2749_v35, 4  ;;  %v2752_v13 = vrot.slane %v7650_v23, 5  ;;  %3232 = vmatpush.bf16.msra.mxu2 %v8501_v30 }
 0x14e   : > { %v2576_v27 = vadd.f32 %v2499_v12, %v1894_v48  ;;  %v1418_v12 = vpack.c.b16 %v1397_v58, %v1396_v34  ;;  %v2244_v58 = vrot.slane %v2243_v41, 4  ;;  %v2254_v53 = vrot.slane %v2253_v49, 4 }
 0x14f   : > { %v2261_v62 = vshrl.u32 %v7651_v50, 16  ;;  %v2264_v41 = vshll.u32 %v7651_v50, 16 }
 0x150   : > { %v9662_v51 = vadd.f32 %v2925_v61, %v2576_v27  ;;  %v1328_v27 = vrot.slane %v1326_v9, 4  ;;  %v2249_v23 = vsel %vm8958_vm2, %v2244_v58, %v2248_v54  ;;  %v2753_v54 = vsel %vm9274_vm5, %v2751_v28, %v2752_v13 }
 0x151   : > { %v1504_v37 = vpop.f32.mrf.mxu2  ;;  %v2266_v58 = vrot.slane %v2264_v41, 5 }
 0x152   : > { %11677 = vst [vmem:[#allocation12_spill] sm:$0xff] %v9662_v51  ;;  %v1819_v2 = vpop.f32.mrf.mxu3  ;;  %v1580_v63 = vadd.f32 %v1504_v37, %v9367_v36  ;;  %v1329_v51 = vrot.slane %v8688_v24, 5  ;;  %v7722_v36 = vld [vmem:[%s8919_s18 + $0x90] sm:$0xe]  ;;  %v9679_v37 = vld [vmem:[%s8919_s18 + $0xa0] sm:$0xf] }
 0x153   : > { %v2504_v61 = vpop.f32.mrf.mxu0  ;;  %v7738_v6 = vrot.slane %v7722_v36, 9  ;;  %v2274_v49 = vshrl.u32 %v9679_v37, 16 }
 0x154   : > { %v1895_v31 = vadd.f32 %v1819_v2, %v1580_v63 }
 0x155   : > { %v2930_v48 = vpop.f32.mrf.mxu1  ;;  %v2276_v50 = vrot.slane %v2274_v49, 4 }
 0x156   : > { %1546 = vmatmul.bf16.gmra.mxu2 %v1418_v12  ;;  %v2577_v34 = vadd.f32 %v2501_v19, %v1895_v31  ;;  %2543 = vmatmul.bf16.gmra.mxu0 %v2415_v40  ;;  %v8509_v19 = vld [vmem:[%s11652_s1 + $0x1c8] sm:$0xff]  ;;  %v1327_v12 = vsel %vm9274_vm5, %v7418_v0, %v1326_v9  ;;  %v2259_v40 = vsel %vm8958_vm2, %v2254_v53, %v2258_v4  ;;  %v2822_v53 = vunpack.c.l.b16 %v2753_v54 }
 0x157   : > { %1861 = vmatmul.bf16.gmra.mxu3 %v8454_v22  ;;  %v1330_v22 = vsel %vm9274_vm5, %v1328_v27, %v1329_v51  ;;  %v1398_v51 = vunpack.c.l.b16 %v1327_v12  ;;  %v2395_v27 = vunpack.c.l.b16 %v2249_v23  ;;  %v2396_v36 = vunpack.c.l.b16 %v2259_v40 }
 0x158   : > { %2969 = vmatmul.bf16.gmra.mxu1 %v2841_v42  ;;  %v9676_v55 = vadd.f32 %v2927_v14, %v2577_v34  ;;  %3914 = vmatpush.bf16.msra.mxu3 %v8509_v19  ;;  %v2270_v42 = vshll.u32 %v9679_v37, 16  ;;  %v1399_v0 = vunpack.c.l.b16 %v1330_v22  ;;  %v2263_v34 = vrot.slane %v2261_v62, 4  ;;  %v8455_v22 = vld [vmem:[%s8919_s18 + $0x90] sm:$0xff] }
 0x159   : > { %v1507_v2 = vpop.f32.mrf.mxu2 }
 0x15a   : > { %v1822_v63 = vpop.f32.mrf.mxu3  ;;  %v1581_v14 = vadd.f32 %v1507_v2, %v9376_v8  ;;  %v2750_v8 = vsel %vm9274_vm5, %v7738_v6, %v2749_v35  ;;  %v2272_v4 = vrot.slane %v2270_v42, 5  ;;  %v7653_v35 = vld [vmem:[%s8919_s18 + $0xa4] sm:$0x1]  ;;  %v8517_v6 = vld [vmem:[%s11652_s1 + $0x208] sm:$0xff]  ;;  %v8689_v2 = vld [vmem:[%s8919_s18 + $0x94] sm:$0xf]  ;;  %v1419_v12 = vpack.c.b16 %v1399_v0, %v1398_v51 }
 0x15b   : > { %v2506_v9 = vpop.f32.mrf.mxu0  ;;  %v2821_v30 = vunpack.c.l.b16 %v2750_v8  ;;  %v2267_v23 = vor.u32 %v2266_v58, %v2263_v34  ;;  %4340 = vmatpush.bf16.msra.mxu0 %v8517_v6  ;;  %v2280_v40 = vshll.u32 %v7653_v35, 16  ;;  %v2756_v8 = vrot.slane %v9679_v37, 5  ;;  %v7723_v0 = vld [vmem:[%s8919_s18 + $0x9c] sm:$0xe] }
 0x15c   : > { %v1896_v44 = vadd.f32 %v1822_v63, %v1581_v14  ;;  %v1208_v14 = vld [vmem:[%s8919_s18 + $0x90] sm:$0xe]  ;;  %v2277_v41 = vor.u32 %v2276_v50, %v2272_v4  ;;  %v7739_v50 = vrot.slane %v7723_v0, 9  ;;  %v2759_v37 = vrot.slane %v7653_v35, 5 }
 0x15d   : > { %v2932_v31 = vpop.f32.mrf.mxu1  ;;  %v2842_v62 = vpack.c.b16 %v2822_v53, %v2821_v30  ;;  %v7419_v54 = vrot.slane %v1208_v14, 9  ;;  %v2268_v58 = vrot.slane %v2267_v23, 4  ;;  %v7654_v30 = vld [vmem:[%s8919_s18 + $0xa8] sm:$0xf]  ;;  %v2758_v6 = vrot.slane %v2756_v8, 4 }
 0x15e   : > { %v2578_v24 = vadd.f32 %v2504_v61, %v1896_v44  ;;  %v1333_v61 = vrot.slane %v8689_v2, 5  ;;  %v2288_v14 = vshll.u32 %v7654_v30, 16 }
 0x160   : > { %v9699_v19 = vadd.f32 %v2930_v48, %v2578_v24  ;;  %v2416_v48 = vpack.c.b16 %v2396_v36, %v2395_v27  ;;  %v1335_v24 = vrot.slane %v1333_v61, 4  ;;  %v2278_v27 = vrot.slane %v2277_v41, 4 }
 0x161   : > { %v1509_v28 = vpop.f32.mrf.mxu2  ;;  %v2282_v36 = vrot.slane %v2280_v40, 5  ;;  %v2757_v40 = vsel %vm9274_vm5, %v7739_v50, %v2756_v8  ;;  %v2290_v0 = vrot.slane %v2288_v14, 5  ;;  %v7656_v8 = vld [vmem:[%s8919_s18 + $0xb0] sm:$0x1] }
 0x162   : > { %v1824_v13 = vpop.f32.mrf.mxu3  ;;  %v1582_v63 = vadd.f32 %v1509_v28, %v9406_v47  ;;  %v8690_v47 = vld [vmem:[%s8919_s18 + $0x98] sm:$0x1]  ;;  %v9716_v28 = vld [vmem:[%s8919_s18 + $0xac] sm:$0xf] }
 0x163   : > { %v2509_v49 = vpop.f32.mrf.mxu0  ;;  %v1336_v51 = vrot.slane %v8690_v47, 5  ;;  %v2283_v35 = vsel %vm8958_vm2, %v2278_v27, %v2282_v36  ;;  %v2294_v23 = vshll.u32 %v9716_v28, 16 }
 0x164   : > { %v1897_v42 = vadd.f32 %v1824_v13, %v1582_v63  ;;  %v1334_v63 = vsel %vm9274_vm5, %v7419_v54, %v1333_v61  ;;  %v2398_v47 = vunpack.c.l.b16 %v2283_v35  ;;  %v2304_v35 = vshll.u32 %v7656_v8, 16 }
 0x165   : > { %v2935_v44 = vpop.f32.mrf.mxu1  ;;  %v2296_v27 = vrot.slane %v2294_v23, 5 }
 0x166   : > { %1551 = vmatmul.bf16.gmra.mxu2 %v1419_v12  ;;  %v2579_v34 = vadd.f32 %v2506_v9, %v1897_v42  ;;  %2548 = vmatmul.bf16.gmra.mxu0 %v2416_v48  ;;  %v1337_v9 = vsel %vm9274_vm5, %v1335_v24, %v1336_v51  ;;  %v2298_v48 = vshrl.u32 %v9716_v28, 16 }
 0x167   : > { %1866 = vmatmul.bf16.gmra.mxu3 %v8455_v22  ;;  %v2273_v22 = vsel %vm8958_vm2, %v2268_v58, %v2272_v4  ;;  %v1400_v4 = vunpack.c.l.b16 %v1334_v63  ;;  %v1401_v42 = vunpack.c.l.b16 %v1337_v9  ;;  %v8456_v63 = vld [vmem:[%s8919_s18 + $0x9c] sm:$0xff] }
 0x168   : > { %2974 = vmatmul.bf16.gmra.mxu1 %v2842_v62  ;;  %v9713_v53 = vadd.f32 %v2932_v31, %v2579_v34  ;;  %v2285_v31 = vshrl.u32 %v7654_v30, 16  ;;  %v2397_v54 = vunpack.c.l.b16 %v2273_v22  ;;  %v2823_v34 = vunpack.c.l.b16 %v2757_v40  ;;  %v1209_v9 = vld [vmem:[%s8919_s18 + $0x9c] sm:$0xe] }
 0x169   : > { %v1512_v13 = vpop.f32.mrf.mxu2  ;;  %v2300_v36 = vrot.slane %v2298_v48, 4  ;;  %v7420_v40 = vrot.slane %v1209_v9, 9 }
 0x16a   : > { %v1827_v2 = vpop.f32.mrf.mxu3  ;;  %v1583_v12 = vadd.f32 %v1512_v13, %v9419_v26  ;;  %v2760_v26 = vsel %vm9274_vm5, %v2758_v6, %v2759_v37  ;;  %v2287_v51 = vrot.slane %v2285_v31, 4  ;;  %v8691_v6 = vld [vmem:[%s8919_s18 + $0xa0] sm:$0xf]  ;;  %v2417_v22 = vpack.c.b16 %v2398_v47, %v2397_v54 }
 0x16b   : > { %v2511_v41 = vpop.f32.mrf.mxu0  ;;  %v2824_v58 = vunpack.c.l.b16 %v2760_v26  ;;  %v1340_v37 = vrot.slane %v8691_v6, 5  ;;  %v2301_v14 = vor.u32 %v2300_v36, %v2296_v27  ;;  %v8500_v54 = vld [vmem:[%s11652_s1 + $0x180] sm:$0xff]  ;;  %v2766_v36 = vrot.slane %v7656_v8, 5 }
 0x16c   : > { %v1898_v62 = vadd.f32 %v1827_v2, %v1583_v12  ;;  %v2291_v12 = vor.u32 %v2290_v0, %v2287_v51  ;;  %v2306_v51 = vrot.slane %v2304_v35, 5  ;;  %v7657_v0 = vld [vmem:[%s8919_s18 + $0xb4] sm:$0xf]  ;;  %3233 = vmatpush.bf16.msra.mxu2 %v8500_v54 }
 0x16d   : > { %v2937_v61 = vpop.f32.mrf.mxu1  ;;  %v2843_v31 = vpack.c.b16 %v2824_v58, %v2823_v34  ;;  %v1342_v26 = vrot.slane %v1340_v37, 4  ;;  %v2302_v47 = vrot.slane %v2301_v14, 4  ;;  %v2309_v9 = vshrl.u32 %v7657_v0, 16 }
 0x16e   : > { %v2580_v24 = vadd.f32 %v2509_v49, %v1898_v62  ;;  %v1420_v49 = vpack.c.b16 %v1401_v42, %v1400_v4  ;;  %v2763_v62 = vrot.slane %v9716_v28, 5  ;;  %v2292_v42 = vrot.slane %v2291_v12, 4 }
 0x16f   : > { %v2312_v12 = vshll.u32 %v7657_v0, 16 }
 0x170   : > { %v9733_v30 = vadd.f32 %v2935_v44, %v2580_v24  ;;  %v8692_v24 = vld [vmem:[%s8919_s18 + $0xa4] sm:$0x1]  ;;  %v2765_v58 = vrot.slane %v2763_v62, 4  ;;  %v2297_v8 = vsel %vm8958_vm2, %v2292_v42, %v2296_v27 }
 0x171   : > { %v1514_v50 = vpop.f32.mrf.mxu2  ;;  %v1343_v6 = vrot.slane %v8692_v24, 5  ;;  %v2399_v24 = vunpack.c.l.b16 %v2297_v8  ;;  %v2314_v42 = vrot.slane %v2312_v12, 5 }
 0x172   : > { %v1829_v13 = vpop.f32.mrf.mxu3  ;;  %v1584_v2 = vadd.f32 %v1514_v50, %v9442_v16  ;;  %v7724_v16 = vld [vmem:[%s8919_s18 + $0xa8] sm:$0xe]  ;;  %v9750_v50 = vld [vmem:[%s8919_s18 + $0xb8] sm:$0xf]  ;;  %v2767_v27 = vsel %vm9274_vm5, %v2765_v58, %v2766_v36 }
 0x173   : > { %v2514_v44 = vpop.f32.mrf.mxu0  ;;  %v7740_v34 = vrot.slane %v7724_v16, 9  ;;  %v2322_v14 = vshrl.u32 %v9750_v50, 16 }
 0x174   : > { %v1899_v23 = vadd.f32 %v1829_v13, %v1584_v2 }
 0x175   : > { %v2940_v48 = vpop.f32.mrf.mxu1  ;;  %v2324_v0 = vrot.slane %v2322_v14, 4 }
 0x176   : > { %1556 = vmatmul.bf16.gmra.mxu2 %v1420_v49  ;;  %v2581_v4 = vadd.f32 %v2511_v41, %v1899_v23  ;;  %2553 = vmatmul.bf16.gmra.mxu0 %v2417_v22  ;;  %v8508_v41 = vld [vmem:[%s11652_s1 + $0x1c0] sm:$0xff]  ;;  %v1341_v49 = vsel %vm9274_vm5, %v7420_v40, %v1340_v37  ;;  %v2307_v22 = vsel %vm8958_vm2, %v2302_v47, %v2306_v51  ;;  %v2826_v47 = vunpack.c.l.b16 %v2767_v27  ;;  %v7725_v27 = vld [vmem:[%s8919_s18 + $0xb4] sm:$0xe] }
 0x177   : > { %1871 = vmatmul.bf16.gmra.mxu3 %v8456_v63  ;;  %v1344_v63 = vsel %vm9274_vm5, %v1342_v26, %v1343_v6  ;;  %v1402_v40 = vunpack.c.l.b16 %v1341_v49  ;;  %v2400_v16 = vunpack.c.l.b16 %v2307_v22  ;;  %v1210_v49 = vld [vmem:[%s8919_s18 + $0xa8] sm:$0xe] }
 0x178   : > { %2979 = vmatmul.bf16.gmra.mxu1 %v2843_v31  ;;  %v9747_v28 = vadd.f32 %v2937_v61, %v2581_v4  ;;  %3915 = vmatpush.bf16.msra.mxu3 %v8508_v41  ;;  %v2318_v31 = vshll.u32 %v9750_v50, 16  ;;  %v1403_v26 = vunpack.c.l.b16 %v1344_v63  ;;  %v2311_v4 = vrot.slane %v2309_v9, 4  ;;  %v8693_v63 = vld [vmem:[%s8919_s18 + $0xac] sm:$0xf] }
 0x179   : > { %v1517_v13 = vpop.f32.mrf.mxu2 }
 0x17a   : > { %v1832_v2 = vpop.f32.mrf.mxu3  ;;  %v1585_v61 = vadd.f32 %v1517_v13, %v9451_v38  ;;  %v2764_v38 = vsel %vm9274_vm5, %v7740_v34, %v2763_v62  ;;  %v2320_v51 = vrot.slane %v2318_v31, 5  ;;  %v7659_v62 = vld [vmem:[%s8919_s18 + $0xbc] sm:$0x1]  ;;  %v8516_v34 = vld [vmem:[%s11652_s1 + $0x200] sm:$0xff]  ;;  %v1421_v13 = vpack.c.b16 %v1403_v26, %v1402_v40 }
 0x17b   : > { %v2516_v37 = vpop.f32.mrf.mxu0  ;;  %v2825_v54 = vunpack.c.l.b16 %v2764_v38  ;;  %v2315_v8 = vor.u32 %v2314_v42, %v2311_v4  ;;  %4341 = vmatpush.bf16.msra.mxu0 %v8516_v34  ;;  %v2328_v22 = vshll.u32 %v7659_v62, 16  ;;  %v2770_v38 = vrot.slane %v9750_v50, 5  ;;  %v9789_v50 = vld [vmem:[%s8919_s18 + $0xc4] sm:$0xf] }
 0x17c   : > { %v1900_v35 = vadd.f32 %v1832_v2, %v1585_v61  ;;  %v8457_v2 = vld [vmem:[%s8919_s18 + $0xa8] sm:$0xff]  ;;  %v1347_v61 = vrot.slane %v8693_v63, 5  ;;  %v2325_v12 = vor.u32 %v2324_v0, %v2320_v51  ;;  %v2773_v34 = vrot.slane %v7659_v62, 5 }
 0x17d   : > { %v9766_v23 = vpop.f32.mrf.mxu1  ;;  %v2844_v9 = vpack.c.b16 %v2826_v47, %v2825_v54  ;;  %v2330_v42 = vrot.slane %v2328_v22, 5  ;;  %v7660_v54 = vld [vmem:[%s8919_s18 + $0xc0] sm:$0xf]  ;;  %v7741_v47 = vrot.slane %v7725_v27, 9  ;;  %v2772_v0 = vrot.slane %v2770_v38, 4 }
 0x17e   : > { %v2582_v6 = vadd.f32 %v2514_v44, %v1900_v35  ;;  %v1349_v26 = vrot.slane %v1347_v61, 4  ;;  %v2333_v63 = vshrl.u32 %v7660_v54, 16  ;;  %v2336_v62 = vshll.u32 %v7660_v54, 16 }
 0x180   : > { %v9772_v41 = vadd.f32 %v2940_v48, %v2582_v6  ;;  %v2418_v48 = vpack.c.b16 %v2400_v16, %v2399_v24  ;;  %v8694_v6 = vld [vmem:[%s8919_s18 + $0xb0] sm:$0x1]  ;;  %v2316_v24 = vrot.slane %v2315_v8, 4  ;;  %v2326_v16 = vrot.slane %v2325_v12, 4 }
 0x181   : > { %v1519_v58 = vpop.f32.mrf.mxu2  ;;  %v1350_v4 = vrot.slane %v8694_v6, 5  ;;  %v2342_v8 = vshll.u32 %v9789_v50, 16  ;;  %v2774_v12 = vsel %vm9274_vm5, %v2772_v0, %v2773_v34 }
 0x182   : > { %v1834_v36 = vpop.f32.mrf.mxu3  ;;  %v1586_v44 = vadd.f32 %v1519_v58, %v9481_v21  ;;  %v7421_v21 = vrot.slane %v1210_v49, 9  ;;  %v2331_v49 = vsel %vm8958_vm2, %v2326_v16, %v2330_v42  ;;  %v2338_v16 = vrot.slane %v2336_v62, 5 }
 0x183   : > { %v2519_v14 = vpop.f32.mrf.mxu0  ;;  %v2344_v54 = vrot.slane %v2342_v8, 5 }
 0x184   : > { %v1901_v31 = vadd.f32 %v1834_v36, %v1586_v44 }
 0x185   : > { %v2945_v35 = vpop.f32.mrf.mxu1 }
 0x186   : > { %1561 = vmatmul.bf16.gmra.mxu2 %v1421_v13  ;;  %v9784_v40 = vadd.f32 %v2516_v37, %v1901_v31  ;;  %2558 = vmatmul.bf16.gmra.mxu0 %v2418_v48  ;;  %v1348_v37 = vsel %vm9274_vm5, %v7421_v21, %v1347_v61  ;;  %v1351_v13 = vsel %vm9274_vm5, %v1349_v26, %v1350_v4  ;;  %v2402_v26 = vunpack.c.l.b16 %v2331_v49 }
 0x187   : > { %1876 = vmatmul.bf16.gmra.mxu3 %v8457_v2  ;;  %v2321_v2 = vsel %vm8958_vm2, %v2316_v24, %v2320_v51  ;;  %v2771_v61 = vsel %vm9274_vm5, %v7741_v47, %v2770_v38  ;;  %v2346_v51 = vshrl.u32 %v9789_v50, 16  ;;  %v1404_v22 = vunpack.c.l.b16 %v1348_v37  ;;  %v7662_v38 = vld [vmem:[%s8919_s18 + $0xc8] sm:$0x1] }
 0x188   : > { %2984 = vmatmul.bf16.gmra.mxu1 %v2844_v9  ;;  %v1405_v21 = vunpack.c.l.b16 %v1351_v13  ;;  %v2401_v27 = vunpack.c.l.b16 %v2321_v2  ;;  %v2827_v6 = vunpack.c.l.b16 %v2771_v61  ;;  %v2828_v4 = vunpack.c.l.b16 %v2774_v12  ;;  %v1211_v13 = vld [vmem:[%s8919_s18 + $0xb4] sm:$0xe]  ;;  %v8695_v2 = vld [vmem:[%s8919_s18 + $0xb8] sm:$0xf] }
 0x189   : > { %v1522_v58 = vpop.f32.mrf.mxu2  ;;  %v2335_v24 = vrot.slane %v2333_v63, 4  ;;  %v2348_v47 = vrot.slane %v2346_v51, 4  ;;  %v1354_v49 = vrot.slane %v8695_v2, 5  ;;  %v2777_v12 = vrot.slane %v9789_v50, 5  ;;  %v7726_v51 = vld [vmem:[%s8919_s18 + $0xc0] sm:$0xe] }
 0x18a   : > { %v1837_v36 = vpop.f32.mrf.mxu3  ;;  %v1587_v44 = vadd.f32 %v1522_v58, %v9493_v3  ;;  %v1422_v58 = vpack.c.b16 %v1405_v21, %v1404_v22  ;;  %v2845_v37 = vpack.c.b16 %v2828_v4, %v2827_v6  ;;  %v7422_v22 = vrot.slane %v1211_v13, 9  ;;  %v9821_v21 = vld [vmem:[%s8919_s18 + $0x1c] sm:$0xf] }
 0x18b   : > { %v2521_v9 = vpop.f32.mrf.mxu0  ;;  %v2339_v63 = vor.u32 %v2338_v16, %v2335_v24  ;;  %v2349_v61 = vor.u32 %v2348_v47, %v2344_v54  ;;  %v7742_v47 = vrot.slane %v7726_v51, 9  ;;  %v2780_v50 = vrot.slane %v7662_v38, 5 }
 0x18c   : > { %v1902_v48 = vadd.f32 %v1837_v36, %v1587_v44  ;;  %v8458_v36 = vld [vmem:[%s8919_s18 + $0xb4] sm:$0xff]  ;;  %v2419_v44 = vpack.c.b16 %v2402_v26, %v2401_v27  ;;  %v1356_v27 = vrot.slane %v1354_v49, 4  ;;  %v8696_v26 = vld [vmem:[%s8919_s18 + $0xbc] sm:$0x1]  ;;  %v3409_v13 = vshrl.u32 %v9821_v21, 16 }
 0x18d   : > { %v9801_v3 = vpop.f32.mrf.mxu1  ;;  %v1357_v6 = vrot.slane %v8696_v26, 5  ;;  %v2340_v4 = vrot.slane %v2339_v63, 4  ;;  %v2350_v16 = vrot.slane %v2349_v61, 4 }
 0x18e   : > { %v2584_v31 = vadd.f32 %v2519_v14, %v1902_v48 }
 0x18f   : > { %v1358_v2 = vsel %vm9274_vm5, %v1356_v27, %v1357_v6  ;;  %v3411_v27 = vrot.slane %v3409_v13, 4 }
 0x190   : > { %v9808_v42 = vadd.f32 %v2945_v35, %v2584_v31  ;;  %v2352_v35 = vshll.u32 %v7662_v38, 16  ;;  %v7935_v31 = vld [vmem:[%s8919_s18 + $0x18] sm:$0xf]  ;;  %v2345_v38 = vsel %vm8958_vm2, %v2340_v4, %v2344_v54  ;;  %v1407_v6 = vunpack.c.l.b16 %v1358_v2  ;;  %v7937_v4 = vld [vmem:[%s8919_s18 + $0x20] sm:$0x1] }
 0x191   : > { %v1524_v0 = vpop.f32.mrf.mxu2  ;;  %v8031_v2 = vld [vmem:[%s8919_s18 + $0x18] sm:$0xe] }
 0x192   : > { %v1839_v34 = vpop.f32.mrf.mxu3  ;;  %v1588_v14 = vadd.f32 %v1524_v0, %v9517_v17  ;;  %v2354_v24 = vrot.slane %v2352_v35, 5  ;;  %v2779_v0 = vrot.slane %v2777_v12, 4 }
 0x193   : > { %v2524_v8 = vpop.f32.mrf.mxu0 }
 0x194   : > { %v1903_v62 = vadd.f32 %v1839_v34, %v1588_v14  ;;  %v2355_v61 = vsel %vm8958_vm2, %v2350_v16, %v2354_v24 }
 0x195   : > { %v2950_v48 = vpop.f32.mrf.mxu1 }
 0x196   : > { %1566 = vmatmul.bf16.gmra.mxu2 %v1422_v58  ;;  %v9817_v17 = vadd.f32 %v2521_v9, %v1903_v62  ;;  %2563 = vmatmul.bf16.gmra.mxu0 %v2419_v44  ;;  %v3396_v58 = vshrl.u32 %v7935_v31, 16  ;;  %v3399_v9 = vshll.u32 %v7935_v31, 16 }
 0x197   : > { %1881 = vmatmul.bf16.gmra.mxu3 %v8458_v36  ;;  %v3405_v36 = vshll.u32 %v9821_v21, 16 }
 0x198   : > { %2989 = vmatmul.bf16.gmra.mxu1 %v2845_v37  ;;  %v1355_v37 = vsel %vm9274_vm5, %v7422_v22, %v1354_v49  ;;  %v2781_v49 = vsel %vm9274_vm5, %v2779_v0, %v2780_v50  ;;  %v3398_v51 = vrot.slane %v3396_v58, 4  ;;  %v3401_v22 = vrot.slane %v3399_v9, 5 }
 0x199   : > { %v1527_v34 = vpop.f32.mrf.mxu2  ;;  %v3407_v31 = vrot.slane %v3405_v36, 5  ;;  %v1406_v54 = vunpack.c.l.b16 %v1355_v37  ;;  %v2830_v24 = vunpack.c.l.b16 %v2781_v49  ;;  %v3415_v50 = vshll.u32 %v7937_v4, 16 }
 0x19a   : > { %v1842_v14 = vpop.f32.mrf.mxu3  ;;  %v1589_v44 = vadd.f32 %v1527_v34, %v9527_v56  ;;  %v2778_v56 = vsel %vm9274_vm5, %v7742_v47, %v2777_v12  ;;  %v2403_v34 = vunpack.c.l.b16 %v2345_v38  ;;  %v4095_v36 = vrot.slane %v9821_v21, 5  ;;  %v7938_v21 = vld [vmem:[%s8919_s18 + $0x24] sm:$0xf] }
 0x19b   : > { %v2526_v35 = vpop.f32.mrf.mxu0  ;;  %v3412_v0 = vor.u32 %v3411_v27, %v3407_v31  ;;  %v1423_v9 = vpack.c.b16 %v1407_v6, %v1406_v54  ;;  %v3417_v49 = vrot.slane %v3415_v50, 5  ;;  %v4098_v27 = vrot.slane %v7937_v4, 5 }
 0x19c   : > { %v1904_v63 = vadd.f32 %v1842_v14, %v1589_v44  ;;  %v2404_v14 = vunpack.c.l.b16 %v2355_v61  ;;  %v2829_v44 = vunpack.c.l.b16 %v2778_v56 }
 0x19d   : > { %v9833_v62 = vpop.f32.mrf.mxu1  ;;  %v3413_v56 = vrot.slane %v3412_v0, 4 }
 0x19e   : > { %11678 = vst [vmem:[#allocation13_spill] sm:$0xff] %v9833_v62  ;;  %v2586_v26 = vadd.f32 %v2524_v8, %v1904_v63  ;;  %v3402_v62 = vor.u32 %v3401_v22, %v3398_v51  ;;  %v8459_v8 = vld [vmem:[%s8919_s18 + $0xc0] sm:$0xff]  ;;  %v2420_v13 = vpack.c.b16 %v2404_v14, %v2403_v34  ;;  %v2846_v37 = vpack.c.b16 %v2830_v24, %v2829_v44 }
 0x19f   : > { %v4097_v22 = vrot.slane %v4095_v36, 4  ;;  %v3418_v14 = vsel %vm8958_vm2, %v3413_v56, %v3417_v49  ;;  %v3420_v44 = vshrl.u32 %v7938_v21, 16  ;;  %v3423_v24 = vshll.u32 %v7938_v21, 16  ;;  %v7940_v56 = vld [vmem:[%s8919_s18 + $0x2c] sm:$0x1] }
 0x1a0   : > { %v9842_v16 = vadd.f32 %v2950_v48, %v2586_v26  ;;  %v3403_v61 = vrot.slane %v3402_v62, 4  ;;  %v9852_v26 = vld [vmem:[%s8919_s18 + $0x28] sm:$0xf] }
 0x1a1   : > { %v1529_v12 = vpop.f32.mrf.mxu2  ;;  %v4099_v4 = vsel %vm9274_vm5, %v4097_v22, %v4098_v27  ;;  %v8484_v27 = vld [vmem:[%s8919_s18 + $0x18] sm:$0xff] }
 0x1a2   : > { %v1844_v47 = vpop.f32.mrf.mxu3  ;;  %v1590_v58 = vadd.f32 %v1529_v12, %v9556_v20  ;;  %v8047_v20 = vrot.slane %v8031_v2, 9  ;;  %v3408_v34 = vsel %vm8958_vm2, %v3403_v61, %v3407_v31  ;;  %v3429_v12 = vshll.u32 %v9852_v26, 16 }
 0x1a3   : > { %v2529_v63 = vpop.f32.mrf.mxu0  ;;  %v3796_v50 = vunpack.c.l.b16 %v3408_v34  ;;  %v3439_v34 = vshll.u32 %v7940_v56, 16 }
 0x1a4   : > { %v1905_v38 = vadd.f32 %v1844_v47, %v1590_v58  ;;  %v3433_v47 = vshrl.u32 %v9852_v26, 16  ;;  %v3431_v2 = vrot.slane %v3429_v12, 5  ;;  %v9878_v12 = vld [vmem:[%s8919_s18 + $0x34] sm:$0xf] }
 0x1a5   : > { %v2955_v48 = vpop.f32.mrf.mxu1 }
 0x1a6   : > { %1571 = vmatmul.bf16.gmra.mxu2 %v1423_v9  ;;  %v9848_v51 = vadd.f32 %v2526_v35, %v1905_v38  ;;  %2568 = vmatmul.bf16.gmra.mxu0 %v2420_v13  ;;  %v4096_v35 = vsel %vm9274_vm5, %v8047_v20, %v4095_v36  ;;  %v3797_v9 = vunpack.c.l.b16 %v3418_v14  ;;  %v4223_v36 = vunpack.c.l.b16 %v4099_v4 }
 0x1a7   : > { %1886 = vmatmul.bf16.gmra.mxu3 %v8459_v8  ;;  %v4222_v8 = vunpack.c.l.b16 %v4096_v35  ;;  %v3422_v13 = vrot.slane %v3420_v44, 4  ;;  %v3435_v38 = vrot.slane %v3433_v47, 4  ;;  %v4102_v4 = vrot.slane %v9852_v26, 5 }
 0x1a8   : > { %2994 = vmatmul.bf16.gmra.mxu1 %v2846_v37  ;;  %v3425_v37 = vrot.slane %v3423_v24, 5  ;;  %v3828_v21 = vpack.c.b16 %v3797_v9, %v3796_v50  ;;  %v7941_v24 = vld [vmem:[%s8919_s18 + $0x30] sm:$0xf]  ;;  %v4105_v9 = vrot.slane %v7940_v56, 5  ;;  %v3453_v26 = vshll.u32 %v9878_v12, 16 }
 0x1a9   : > { %v1532_v54 = vpop.f32.mrf.mxu2 }
 0x1aa   : > { %v1847_v6 = vpop.f32.mrf.mxu3  ;;  %v1591_v62 = vadd.f32 %v1532_v54, %v9568_v5  ;;  %v3426_v54 = vor.u32 %v3425_v37, %v3422_v13  ;;  %v3444_v13 = vshrl.u32 %v7941_v24, 16  ;;  %v3447_v37 = vshll.u32 %v7941_v24, 16  ;;  %v7943_v24 = vld [vmem:[%s8919_s18 + $0x38] sm:$0x1] }
 0x1ab   : > { %v2531_v31 = vpop.f32.mrf.mxu0 }
 0x1ac   : > { %v1906_v0 = vadd.f32 %v1847_v6, %v1591_v62  ;;  %v3436_v6 = vor.u32 %v3435_v38, %v3431_v2  ;;  %v3457_v38 = vshrl.u32 %v9878_v12, 16 }
 0x1ad   : > { %v9865_v5 = vpop.f32.mrf.mxu1 }
 0x1ae   : > { %v2588_v58 = vadd.f32 %v2529_v63, %v1906_v0  ;;  %v4254_v63 = vpack.c.b16 %v4223_v36, %v4222_v8  ;;  %v3437_v47 = vrot.slane %v3436_v6, 4  ;;  %v3441_v0 = vrot.slane %v3439_v34, 5 }
 0x1af   : > { %v3455_v6 = vrot.slane %v3453_v26, 5  ;;  %v3459_v34 = vrot.slane %v3457_v38, 4  ;;  %v8033_v38 = vld [vmem:[%s8919_s18 + $0x30] sm:$0xe] }
 0x1b0   : > { %v9867_v61 = vadd.f32 %v2955_v48, %v2588_v58  ;;  %v8032_v48 = vld [vmem:[%s8919_s18 + $0x24] sm:$0xe]  ;;  %v4104_v58 = vrot.slane %v4102_v4, 4 }
 0x1b1   : > { %v1534_v49 = vpop.f32.mrf.mxu2  ;;  %v8048_v50 = vrot.slane %v8032_v48, 9 }
 0x1b2   : > { %v1849_v20 = vpop.f32.mrf.mxu3  ;;  %v1592_v22 = vadd.f32 %v1534_v49, %v9592_v59  ;;  %v3427_v59 = vrot.slane %v3426_v54, 4  ;;  %v3449_v54 = vrot.slane %v3447_v37, 5 }
 0x1b3   : > { %v2534_v14 = vpop.f32.mrf.mxu0  ;;  %v4103_v56 = vsel %vm9274_vm5, %v8048_v50, %v4102_v4 }
 0x1b4   : > { %v1907_v62 = vadd.f32 %v1849_v20, %v1592_v22  ;;  %v3432_v49 = vsel %vm8958_vm2, %v3427_v59, %v3431_v2  ;;  %v3442_v20 = vsel %vm8958_vm2, %v3437_v47, %v3441_v0  ;;  %v4224_v59 = vunpack.c.l.b16 %v4103_v56 }
 0x1b5   : > { %v2960_v35 = vpop.f32.mrf.mxu1  ;;  %v3799_v48 = vunpack.c.l.b16 %v3442_v20 }
 0x1b6   : > { %3234 = vmatmul.bf16.vlgmr.msra.gmra.mxu2 %v8484_v27  ;;  %v9874_v44 = vadd.f32 %v2531_v31, %v1907_v62  ;;  %4342 = vmatmul.bf16.vlgmr.msra.gmra.mxu0 %v4254_v63  ;;  %v3446_v63 = vrot.slane %v3444_v13, 4  ;;  %v3798_v62 = vunpack.c.l.b16 %v3432_v49  ;;  %v8485_v13 = vld [vmem:[%s8919_s18 + $0x24] sm:$0xff] }
 0x1b7   : > { %3916 = vmatmul.bf16.vlgmr.msra.gmra.mxu3 %v3828_v21  ;;  %v4106_v21 = vsel %vm9274_vm5, %v4104_v58, %v4105_v9  ;;  %v3460_v58 = vor.u32 %v3459_v34, %v3455_v6  ;;  %v3463_v9 = vshll.u32 %v7943_v24, 16  ;;  %v7944_v34 = vld [vmem:[%s8919_s18 + $0x3c] sm:$0xf] }
 0x1b8   : > { %v4225_v47 = vunpack.c.l.b16 %v4106_v21  ;;  %v3829_v37 = vpack.c.b16 %v3799_v48, %v3798_v62  ;;  %v8049_v21 = vrot.slane %v8033_v38, 9 }
 0x1b9   : > { %v1537_v8 = vpop.f32.mrf.mxu2 }
 0x1ba   : > { %v1852_v36 = vpop.f32.mrf.mxu3  ;;  %v1593_v31 = vadd.f32 %v1537_v8, %v9319_v11  ;;  %v3450_v8 = vor.u32 %v3449_v54, %v3446_v63  ;;  %v4255_v26 = vpack.c.b16 %v4225_v47, %v4224_v59 }
 0x1bb   : > { %v2536_v27 = vpop.f32.mrf.mxu0 }
 0x1bc   : > { %v1908_v22 = vadd.f32 %v1852_v36, %v1593_v31  ;;  %v3451_v20 = vrot.slane %v3450_v8, 4 }
 0x1bd   : > { %v9891_v2 = vpop.f32.mrf.mxu1 }
 0x1be   : > { %v2590_v11 = vadd.f32 %v2534_v14, %v1908_v22  ;;  %v4109_v14 = vrot.slane %v9878_v12, 5  ;;  %v3465_v22 = vrot.slane %v3463_v9, 5  ;;  %v9904_v12 = vld [vmem:[%s8919_s18 + $0x40] sm:$0xf]  ;;  %v3456_v48 = vsel %vm8958_vm2, %v3451_v20, %v3455_v6 }
 0x1bf   : > { %v3477_v8 = vshll.u32 %v9904_v12, 16 }
 0x1c0   : > { %v9894_v0 = vadd.f32 %v2960_v35, %v2590_v11  ;;  %v3461_v35 = vrot.slane %v3460_v58, 4  ;;  %v4111_v63 = vrot.slane %v4109_v14, 4  ;;  %v3481_v58 = vshrl.u32 %v9904_v12, 16 }
 0x1c1   : > { %v1539_v4 = vpop.f32.mrf.mxu2 }
 0x1c2   : > { %v1854_v50 = vpop.f32.mrf.mxu3  ;;  %v1594_v36 = vadd.f32 %v1539_v4, %v9337_v46  ;;  %v4112_v46 = vrot.slane %v7943_v24, 5  ;;  %v3466_v47 = vsel %vm8958_vm2, %v3461_v35, %v3465_v22  ;;  %v3468_v4 = vshrl.u32 %v7944_v34, 16  ;;  %v7946_v22 = vld [vmem:[%s8919_s18 + $0x44] sm:$0x1] }
 0x1c3   : > { %v2539_v49 = vpop.f32.mrf.mxu0  ;;  %v3483_v20 = vrot.slane %v3481_v58, 4 }
 0x1c4   : > { %v1909_v31 = vadd.f32 %v1854_v50, %v1594_v36  ;;  %v4113_v24 = vsel %vm9274_vm5, %v4111_v63, %v4112_v46  ;;  %v3471_v50 = vshll.u32 %v7944_v34, 16  ;;  %v3470_v38 = vrot.slane %v3468_v4, 4  ;;  %v8486_v34 = vld [vmem:[%s8919_s18 + $0x30] sm:$0xff]  ;;  %v8034_v4 = vld [vmem:[%s8919_s18 + $0x3c] sm:$0xe] }
 0x1c5   : > { %v2965_v54 = vpop.f32.mrf.mxu1 }
 0x1c6   : > { %3239 = vmatmul.bf16.gmra.mxu2 %v8485_v13  ;;  %v9900_v56 = vadd.f32 %v2536_v27, %v1909_v31  ;;  %4347 = vmatmul.bf16.gmra.mxu0 %v4255_v26  ;;  %v4110_v27 = vsel %vm9274_vm5, %v8049_v21, %v4109_v14  ;;  %v3801_v13 = vunpack.c.l.b16 %v3466_v47  ;;  %v4227_v26 = vunpack.c.l.b16 %v4113_v24 }
 0x1c7   : > { %3921 = vmatmul.bf16.gmra.mxu3 %v3829_v37  ;;  %v4226_v37 = vunpack.c.l.b16 %v4110_v27  ;;  %v3473_v14 = vrot.slane %v3471_v50, 5  ;;  %v3479_v31 = vrot.slane %v3477_v8, 5  ;;  %v3487_v47 = vshll.u32 %v7946_v22, 16  ;;  %v7947_v8 = vld [vmem:[%s8919_s18 + $0x48] sm:$0xf] }
 0x1c9   : > { %v1542_v11 = vpop.f32.mrf.mxu2 }
 0x1ca   : > { %v1857_v62 = vpop.f32.mrf.mxu3  ;;  %v1595_v59 = vadd.f32 %v1542_v11, %v9351_v18  ;;  %v3800_v18 = vunpack.c.l.b16 %v3456_v48  ;;  %v3474_v48 = vor.u32 %v3473_v14, %v3470_v38  ;;  %v3492_v14 = vshrl.u32 %v7947_v8, 16 }
 0x1cb   : > { %v2541_v6 = vpop.f32.mrf.mxu0 }
 0x1cc   : > { %v1910_v9 = vadd.f32 %v1857_v62, %v1595_v59  ;;  %v3830_v11 = vpack.c.b16 %v3801_v13, %v3800_v18  ;;  %v4256_v62 = vpack.c.b16 %v4227_v26, %v4226_v37  ;;  %v3484_v59 = vor.u32 %v3483_v20, %v3479_v31 }
 0x1cd   : > { %v3475_v58 = vrot.slane %v3474_v48, 4  ;;  %v3489_v18 = vrot.slane %v3487_v47, 5  ;;  %v4119_v37 = vrot.slane %v7946_v22, 5  ;;  %v3495_v20 = vshll.u32 %v7947_v8, 16 }
 0x1ce   : > { %v2592_v36 = vadd.f32 %v2539_v49, %v1910_v9  ;;  %v9922_v49 = vpop.f32.mrf.mxu1  ;;  %v3485_v9 = vrot.slane %v3484_v59, 4  ;;  %v3494_v59 = vrot.slane %v3492_v14, 4  ;;  %v8487_v14 = vld [vmem:[%s8919_s18 + $0x3c] sm:$0xff] }
 0x1cf   : > { %v3497_v47 = vrot.slane %v3495_v20, 5 }
 0x1d0   : > { %v9917_v35 = vadd.f32 %v2965_v54, %v2592_v36  ;;  %v4116_v54 = vrot.slane %v9904_v12, 5  ;;  %v8050_v36 = vrot.slane %v8034_v4, 9 }
 0x1d1   : > { %v1544_v21 = vpop.f32.mrf.mxu2 }
 0x1d2   : > { %v1859_v63 = vpop.f32.mrf.mxu3  ;;  %v1596_v46 = vadd.f32 %v1544_v21, %v9370_v57  ;;  %v9930_v57 = vld [vmem:[%s8919_s18 + $0x4c] sm:$0xf]  ;;  %v4118_v13 = vrot.slane %v4116_v54, 4  ;;  %v4117_v22 = vsel %vm9274_vm5, %v8050_v36, %v4116_v54  ;;  %v3498_v36 = vor.u32 %v3497_v47, %v3494_v59 }
 0x1d3   : > { %v2544_v24 = vpop.f32.mrf.mxu0  ;;  %v3501_v12 = vshll.u32 %v9930_v57, 16  ;;  %v3505_v21 = vshrl.u32 %v9930_v57, 16 }
 0x1d4   : > { %v1911_v27 = vadd.f32 %v1859_v63, %v1596_v46  ;;  %v3480_v63 = vsel %vm8958_vm2, %v3475_v58, %v3479_v31  ;;  %v3490_v46 = vsel %vm8958_vm2, %v3485_v9, %v3489_v18  ;;  %v7949_v58 = vld [vmem:[%s8919_s18 + $0x50] sm:$0x1]  ;;  %v4228_v9 = vunpack.c.l.b16 %v4117_v22 }
 0x1d5   : > { %v3802_v8 = vunpack.c.l.b16 %v3480_v63  ;;  %v3803_v31 = vunpack.c.l.b16 %v3490_v46 }
 0x1d6   : > { %3244 = vmatmul.bf16.gmra.mxu2 %v8486_v34  ;;  %v9926_v50 = vadd.f32 %v2541_v6, %v1911_v27  ;;  %4352 = vmatmul.bf16.gmra.mxu0 %v4256_v62  ;;  %v4120_v62 = vsel %vm9274_vm5, %v4118_v13, %v4119_v37  ;;  %v2970_v48 = vpop.f32.mrf.mxu1  ;;  %v3503_v27 = vrot.slane %v3501_v12, 5  ;;  %v3511_v13 = vshll.u32 %v7949_v58, 16 }
 0x1d7   : > { %3926 = vmatmul.bf16.gmra.mxu3 %v3830_v11  ;;  %v4229_v18 = vunpack.c.l.b16 %v4120_v62  ;;  %v3831_v20 = vpack.c.b16 %v3803_v31, %v3802_v8 }
 0x1d8   : > { %v3513_v62 = vrot.slane %v3511_v13, 5 }
 0x1d9   : > { %v1547_v26 = vpop.f32.mrf.mxu2  ;;  %v4257_v12 = vpack.c.b16 %v4229_v18, %v4228_v9 }
 0x1da   : > { %v1862_v38 = vpop.f32.mrf.mxu3  ;;  %v1597_v6 = vadd.f32 %v1547_v26, %v9390_v32  ;;  %v3507_v32 = vrot.slane %v3505_v21, 4  ;;  %v8035_v21 = vld [vmem:[%s8919_s18 + $0x48] sm:$0xe] }
 0x1db   : > { %v2546_v11 = vpop.f32.mrf.mxu0  ;;  %v8051_v59 = vrot.slane %v8035_v21, 9 }
 0x1dc   : > { %v1912_v34 = vadd.f32 %v1862_v38, %v1597_v6  ;;  %v3508_v6 = vor.u32 %v3507_v32, %v3503_v27  ;;  %v7950_v32 = vld [vmem:[%s8919_s18 + $0x54] sm:$0xf] }
 0x1de   : > { %v2594_v4 = vadd.f32 %v2544_v24, %v1912_v34  ;;  %v4123_v24 = vrot.slane %v9930_v57, 5  ;;  %v3499_v34 = vrot.slane %v3498_v36, 4  ;;  %v3509_v22 = vrot.slane %v3508_v6, 4 }
 0x1e0   : > { %v9944_v26 = vadd.f32 %v2970_v48, %v2594_v4  ;;  %v4125_v47 = vrot.slane %v4123_v24, 4  ;;  %v7951_v4 = vld [vmem:[%s8919_s18 + $0x58] sm:$0xf]  ;;  %v3504_v31 = vsel %vm8958_vm2, %v3499_v34, %v3503_v27  ;;  %v3514_v18 = vsel %vm8958_vm2, %v3509_v22, %v3513_v62  ;;  %v7952_v22 = vld [vmem:[%s8919_s18 + $0x5c] sm:$0x1] }
 0x1e1   : > { %v1549_v38 = vpop.f32.mrf.mxu2  ;;  %v3525_v36 = vshll.u32 %v7951_v4, 16  ;;  %v3529_v6 = vshrl.u32 %v7951_v4, 16  ;;  %v3804_v27 = vunpack.c.l.b16 %v3504_v31  ;;  %v3535_v31 = vshll.u32 %v7952_v22, 16 }
 0x1e2   : > { %v1864_v54 = vpop.f32.mrf.mxu3  ;;  %v1598_v37 = vadd.f32 %v1549_v38, %v9414_v10  ;;  %v4126_v10 = vrot.slane %v7949_v58, 5  ;;  %v3516_v58 = vshrl.u32 %v7950_v32, 16 }
 0x1e3   : > { %v2549_v46 = vpop.f32.mrf.mxu0  ;;  %v3531_v34 = vrot.slane %v3529_v6, 4 }
 0x1e4   : > { %v1913_v63 = vadd.f32 %v1864_v54, %v1598_v37  ;;  %v4127_v38 = vsel %vm9274_vm5, %v4125_v47, %v4126_v10  ;;  %v3519_v54 = vshll.u32 %v7950_v32, 16  ;;  %v3518_v21 = vrot.slane %v3516_v58, 4  ;;  %v8488_v10 = vld [vmem:[%s8919_s18 + $0x48] sm:$0xff] }
 0x1e6   : > { %3249 = vmatmul.bf16.gmra.mxu2 %v8487_v14  ;;  %v9950_v48 = vadd.f32 %v2546_v11, %v1913_v63  ;;  %4357 = vmatmul.bf16.gmra.mxu0 %v4257_v12  ;;  %v4124_v11 = vsel %vm9274_vm5, %v8051_v59, %v4123_v24  ;;  %v4231_v12 = vunpack.c.l.b16 %v4127_v38  ;;  %v3521_v63 = vrot.slane %v3519_v54, 5  ;;  %v8036_v38 = vld [vmem:[%s8919_s18 + $0x54] sm:$0xe]  ;;  %v7953_v54 = vld [vmem:[%s8919_s18 + $0x60] sm:$0xf] }
 0x1e7   : > { %3931 = vmatmul.bf16.gmra.mxu3 %v3831_v20  ;;  %v4230_v20 = vunpack.c.l.b16 %v4124_v11  ;;  %v3527_v24 = vrot.slane %v3525_v36, 5  ;;  %v4130_v11 = vrot.slane %v7951_v4, 5  ;;  %v9973_v36 = vld [vmem:[%s8919_s18 + $0x64] sm:$0xf] }
 0x1e8   : > { %v3549_v4 = vshll.u32 %v9973_v36, 16 }
 0x1e9   : > { %v1552_v8 = vpop.f32.mrf.mxu2 }
 0x1ea   : > { %v1867_v57 = vpop.f32.mrf.mxu3  ;;  %v1599_v9 = vadd.f32 %v1552_v8, %v9432_v45  ;;  %v3805_v45 = vunpack.c.l.b16 %v3514_v18  ;;  %v4258_v8 = vpack.c.b16 %v4231_v12, %v4230_v20  ;;  %v4133_v20 = vrot.slane %v7952_v22, 5 }
 0x1eb   : > { %v2551_v37 = vpop.f32.mrf.mxu0 }
 0x1ec   : > { %v1914_v13 = vadd.f32 %v1867_v57, %v1599_v9  ;;  %v3832_v32 = vpack.c.b16 %v3805_v45, %v3804_v27  ;;  %v3532_v57 = vor.u32 %v3531_v34, %v3527_v24  ;;  %v8052_v27 = vrot.slane %v8036_v38, 9 }
 0x1ed   : > { %v4132_v45 = vrot.slane %v4130_v11, 4  ;;  %v3543_v34 = vshll.u32 %v7953_v54, 16 }
 0x1ee   : > { %v9963_v14 = vadd.f32 %v2549_v46, %v1914_v13  ;;  %v3522_v46 = vor.u32 %v3521_v63, %v3518_v21  ;;  %v3537_v13 = vrot.slane %v3535_v31, 5  ;;  %v3540_v63 = vshrl.u32 %v7953_v54, 16  ;;  %v7955_v54 = vld [vmem:[%s8919_s18 + $0x68] sm:$0x1] }
 0x1ef   : > { %v4131_v22 = vsel %vm9274_vm5, %v8052_v27, %v4130_v11  ;;  %v3551_v31 = vrot.slane %v3549_v4, 5  ;;  %v3559_v27 = vshll.u32 %v7955_v54, 16  ;;  %v8037_v4 = vld [vmem:[%s8919_s18 + $0x60] sm:$0xe] }
 0x1f0   : > { %v3523_v6 = vrot.slane %v3522_v46, 4  ;;  %v3542_v46 = vrot.slane %v3540_v63, 4 }
 0x1f1   : > { %v1554_v62 = vpop.f32.mrf.mxu2 }
 0x1f2   : > { %v1869_v59 = vpop.f32.mrf.mxu3  ;;  %v1600_v47 = vadd.f32 %v1554_v62, %v9445_v15  ;;  %v3533_v15 = vrot.slane %v3532_v57, 4  ;;  %v3545_v57 = vrot.slane %v3543_v34, 5  ;;  %v4137_v34 = vrot.slane %v9973_v36, 5 }
 0x1f3   : > { %v2554_v18 = vpop.f32.mrf.mxu0 }
 0x1f4   : > { %v1915_v9 = vadd.f32 %v1869_v59, %v1600_v47  ;;  %v3528_v59 = vsel %vm8958_vm2, %v3523_v6, %v3527_v24  ;;  %v3538_v47 = vsel %vm8958_vm2, %v3533_v15, %v3537_v13  ;;  %v4232_v6 = vunpack.c.l.b16 %v4131_v22 }
 0x1f5   : > { %v3806_v24 = vunpack.c.l.b16 %v3528_v59  ;;  %v3807_v38 = vunpack.c.l.b16 %v3538_v47 }
 0x1f6   : > { %3254 = vmatmul.bf16.gmra.mxu2 %v8488_v10  ;;  %v9969_v58 = vadd.f32 %v2551_v37, %v1915_v9  ;;  %4362 = vmatmul.bf16.gmra.mxu0 %v4258_v8  ;;  %v3553_v37 = vshrl.u32 %v9973_v36, 16  ;;  %v4134_v8 = vsel %vm9274_vm5, %v4132_v45, %v4133_v20  ;;  %v8489_v20 = vld [vmem:[%s8919_s18 + $0x54] sm:$0xff] }
 0x1f7   : > { %3936 = vmatmul.bf16.gmra.mxu3 %v3832_v32  ;;  %v4233_v15 = vunpack.c.l.b16 %v4134_v8  ;;  %v3833_v63 = vpack.c.b16 %v3807_v38, %v3806_v24  ;;  %v8053_v8 = vrot.slane %v8037_v4, 9 }
 0x1f8   : > { %v3555_v9 = vrot.slane %v3553_v37, 4 }
 0x1f9   : > { %v1557_v12 = vpop.f32.mrf.mxu2 }
 0x1fa   : > { %v1872_v21 = vpop.f32.mrf.mxu3  ;;  %v1601_v62 = vadd.f32 %v1557_v12, %v9465_v60  ;;  %v3556_v11 = vor.u32 %v3555_v9, %v3551_v31  ;;  %v7957_v9 = vld [vmem:[%s8919_s18 + $0x70] sm:$0xf] }
 0x1fb   : > { %v2556_v32 = vpop.f32.mrf.mxu0 }
 0x1fc   : > { %v1916_v10 = vadd.f32 %v1872_v21, %v1601_v62  ;;  %v3546_v21 = vor.u32 %v3545_v57, %v3542_v46  ;;  %v3557_v47 = vrot.slane %v3556_v11, 4  ;;  %v4139_v46 = vrot.slane %v4137_v34, 4  ;;  %v7956_v57 = vld [vmem:[%s8919_s18 + $0x6c] sm:$0xf] }
 0x1fd   : > { %v3577_v11 = vshrl.u32 %v7957_v9, 16 }
 0x1fe   : > { %v9986_v60 = vadd.f32 %v2554_v18, %v1916_v10  ;;  %v4259_v18 = vpack.c.b16 %v4233_v15, %v4232_v6  ;;  %v3547_v59 = vrot.slane %v3546_v21, 4  ;;  %v3561_v10 = vrot.slane %v3559_v27, 5 }
 0x1ff   : > { %v3573_v21 = vshll.u32 %v7957_v9, 16 }
 0x200   : > { %11679 = vst [vmem:[#allocation14_spill] sm:$0xff] %v9986_v60  ;;  %v3552_v38 = vsel %vm8958_vm2, %v3547_v59, %v3551_v31  ;;  %v3562_v15 = vsel %vm8958_vm2, %v3557_v47, %v3561_v10  ;;  %v3579_v59 = vrot.slane %v3577_v11, 4  ;;  %v7958_v47 = vld [vmem:[%s8919_s18 + $0x74] sm:$0x1] }
 0x201   : > { %v1559_v13 = vpop.f32.mrf.mxu2  ;;  %v3808_v31 = vunpack.c.l.b16 %v3552_v38  ;;  %v3583_v38 = vshll.u32 %v7958_v47, 16 }
 0x202   : > { %v1874_v12 = vpop.f32.mrf.mxu3  ;;  %v1602_v45 = vadd.f32 %v1559_v13, %v9487_v43  ;;  %v4140_v43 = vrot.slane %v7955_v54, 5  ;;  %v3564_v54 = vshrl.u32 %v7956_v57, 16 }
 0x203   : > { %v2559_v62 = vpop.f32.mrf.mxu0 }
 0x204   : > { %v1917_v37 = vadd.f32 %v1874_v12, %v1602_v45  ;;  %v4141_v13 = vsel %vm9274_vm5, %v4139_v46, %v4140_v43  ;;  %v3567_v12 = vshll.u32 %v7956_v57, 16  ;;  %v3566_v4 = vrot.slane %v3564_v54, 4  ;;  %v8490_v43 = vld [vmem:[%s8919_s18 + $0x60] sm:$0xff] }
 0x206   : > { %3259 = vmatmul.bf16.gmra.mxu2 %v8489_v20  ;;  %v9993_v22 = vadd.f32 %v2556_v32, %v1917_v37  ;;  %4367 = vmatmul.bf16.gmra.mxu0 %v4259_v18  ;;  %v4138_v32 = vsel %vm9274_vm5, %v8053_v8, %v4137_v34  ;;  %v4235_v18 = vunpack.c.l.b16 %v4141_v13  ;;  %v3569_v37 = vrot.slane %v3567_v12, 5  ;;  %v8038_v13 = vld [vmem:[%s8919_s18 + $0x6c] sm:$0xe]  ;;  %v7959_v12 = vld [vmem:[%s8919_s18 + $0x78] sm:$0xf] }
 0x207   : > { %3941 = vmatmul.bf16.gmra.mxu3 %v3833_v63  ;;  %v4234_v63 = vunpack.c.l.b16 %v4138_v32  ;;  %v3575_v34 = vrot.slane %v3573_v21, 5  ;;  %v4144_v32 = vrot.slane %v7957_v9, 5  ;;  %v10016_v21 = vld [vmem:[%s8919_s18 + $0x7c] sm:$0xf] }
 0x208   : > { %11680 = vst [vmem:[#allocation15_spill] sm:$0xff] %v9993_v22  ;;  %v3597_v9 = vshll.u32 %v10016_v21, 16 }
 0x209   : > { %v1562_v24 = vpop.f32.mrf.mxu2 }
 0x20a   : > { %v1877_v36 = vpop.f32.mrf.mxu3  ;;  %v1603_v6 = vadd.f32 %v1562_v24, %v9501_v25  ;;  %v3809_v25 = vunpack.c.l.b16 %v3562_v15  ;;  %v4260_v24 = vpack.c.b16 %v4235_v18, %v4234_v63  ;;  %v4147_v63 = vrot.slane %v7958_v47, 5 }
 0x20b   : > { %v2561_v45 = vpop.f32.mrf.mxu0 }
 0x20c   : > { %v1918_v27 = vadd.f32 %v1877_v36, %v1603_v6  ;;  %v3834_v57 = vpack.c.b16 %v3809_v25, %v3808_v31  ;;  %v3580_v36 = vor.u32 %v3579_v59, %v3575_v34  ;;  %v8054_v31 = vrot.slane %v8038_v13, 9 }
 0x20d   : > { %v4146_v25 = vrot.slane %v4144_v32, 4  ;;  %v3591_v59 = vshll.u32 %v7959_v12, 16 }
 0x20e   : > { %v10006_v20 = vadd.f32 %v2559_v62, %v1918_v27  ;;  %v3570_v62 = vor.u32 %v3569_v37, %v3566_v4  ;;  %v3585_v27 = vrot.slane %v3583_v38, 5  ;;  %v3588_v37 = vshrl.u32 %v7959_v12, 16  ;;  %v7961_v12 = vld [vmem:[%s8919_s18 + $0x80] sm:$0x1] }
 0x20f   : > { %v4145_v47 = vsel %vm9274_vm5, %v8054_v31, %v4144_v32  ;;  %v3599_v38 = vrot.slane %v3597_v9, 5 }
 0x210   : > { %11681 = vst [vmem:[#allocation16_spill] sm:$0xff] %v10006_v20  ;;  %v3571_v11 = vrot.slane %v3570_v62, 4  ;;  %v3590_v62 = vrot.slane %v3588_v37, 4 }
 0x211   : > { %v1564_v10 = vpop.f32.mrf.mxu2 }
 0x212   : > { %v1879_v8 = vpop.f32.mrf.mxu3  ;;  %v1604_v46 = vadd.f32 %v1564_v10, %v9522_v7  ;;  %v3581_v7 = vrot.slane %v3580_v36, 4  ;;  %v3593_v36 = vrot.slane %v3591_v59, 5  ;;  %v4151_v59 = vrot.slane %v10016_v21, 5 }
 0x213   : > { %v2564_v15 = vpop.f32.mrf.mxu0 }
 0x214   : > { %v1919_v6 = vadd.f32 %v1879_v8, %v1604_v46  ;;  %v3576_v8 = vsel %vm8958_vm2, %v3571_v11, %v3575_v34  ;;  %v3586_v46 = vsel %vm8958_vm2, %v3581_v7, %v3585_v27  ;;  %v4236_v11 = vunpack.c.l.b16 %v4145_v47 }
 0x215   : > { %v3811_v34 = vunpack.c.l.b16 %v3586_v46  ;;  %v8800_v27 = vmov 0.0  }
 0x216   : > { %3264 = vmatmul.bf16.gmra.mxu2 %v8490_v43  ;;  %v10012_v54 = vadd.f32 %v2561_v45, %v1919_v6  ;;  %4372 = vmatmul.bf16.gmra.mxu0 %v4260_v24  ;;  %v3601_v45 = vshrl.u32 %v10016_v21, 16  ;;  %v4148_v24 = vsel %vm9274_vm5, %v4146_v25, %v4147_v63  ;;  %4752 = vst [vmem:[#allocation2 + $0x18] sm:$0xff] %v8800_v27 }
 0x217   : > { %3946 = vmatmul.bf16.gmra.mxu3 %v3834_v57  ;;  %v4237_v7 = vunpack.c.l.b16 %v4148_v24  ;;  %4753 = vst [vmem:[#allocation2 + $0x20] sm:$0xff] %v8800_v27  ;;  %v3594_v25 = vor.u32 %v3593_v36, %v3590_v62  ;;  %v4153_v24 = vrot.slane %v4151_v59, 4  ;;  %v4154_v62 = vrot.slane %v7961_v12, 5  ;;  %v7962_v36 = vld [vmem:[%s8919_s18 + $0x84] sm:$0xf] }
 0x218   : > { %11682 = vst [vmem:[#allocation17_spill] sm:$0xff] %v10012_v54  ;;  %v3603_v6 = vrot.slane %v3601_v45, 4  ;;  %v8039_v45 = vld [vmem:[%s8919_s18 + $0x78] sm:$0xe] }
 0x219   : > { %v1567_v18 = vpop.f32.mrf.mxu2  ;;  %4749 = vst [vmem:[#allocation2] sm:$0xff] %v8800_v27  ;;  %v4261_v9 = vpack.c.b16 %v4237_v7, %v4236_v11  ;;  %v3595_v46 = vrot.slane %v3594_v25, 4  ;;  %v8055_v21 = vrot.slane %v8039_v45, 9  ;;  %v3612_v25 = vshrl.u32 %v7962_v36, 16 }
 0x21a   : > { %v1882_v4 = vpop.f32.mrf.mxu3  ;;  %v1605_v10 = vadd.f32 %v1567_v18, %v9546_v52  ;;  %v3810_v52 = vunpack.c.l.b16 %v3576_v8  ;;  %v3604_v63 = vor.u32 %v3603_v6, %v3599_v38  ;;  %v3607_v18 = vshll.u32 %v7961_v12, 16  ;;  %4750 = vst [vmem:[#allocation2 + $0x8] sm:$0xff] %v8800_v27  ;;  %v10050_v6 = vld [vmem:[%s8919_s18 + $0x88] sm:$0xf] }
 0x21b   : > { %v2566_v57 = vpop.f32.mrf.mxu0  ;;  %4751 = vst [vmem:[#allocation2 + $0x10] sm:$0x3] %v8800_v27  ;;  %v3600_v11 = vsel %vm8958_vm2, %v3595_v46, %v3599_v38  ;;  %v3621_v38 = vshll.u32 %v10050_v6, 16  ;;  %v3614_v46 = vrot.slane %v3612_v25, 4 }
 0x21c   : > { %v1920_v43 = vadd.f32 %v1882_v4, %v1605_v10  ;;  %v8491_v4 = vld [vmem:[%s8919_s18 + $0x6c] sm:$0xff]  ;;  %v3835_v37 = vpack.c.b16 %v3811_v34, %v3810_v52  ;;  %4754 = vst [vmem:[#allocation2 + $0x28] sm:$0x3] %v8800_v27  ;;  %v3609_v47 = vrot.slane %v3607_v18, 5  ;;  %v3625_v18 = vshrl.u32 %v10050_v6, 16 }
 0x21d   : > { %4755 = vst [vmem:[#allocation2 + $0x30] sm:$0xff] %v8800_v27 }
 0x21e   : > { %v10029_v13 = vadd.f32 %v2564_v15, %v1920_v43  ;;  %v3605_v43 = vrot.slane %v3604_v63, 4  ;;  %4756 = vst [vmem:[#allocation2 + $0x38] sm:$0xff] %v8800_v27  ;;  %v3615_v63 = vshll.u32 %v7962_v36, 16 }
 0x21f   : > { %4757 = vst [vmem:[#allocation2 + $0x40] sm:$0x3] %v8800_v27 }
 0x220   : > { %11683 = vst [vmem:[#allocation18_spill] sm:$0xff] %v10029_v13  ;;  %v3610_v12 = vsel %vm8958_vm2, %v3605_v43, %v3609_v47  ;;  %v3617_v43 = vrot.slane %v3615_v63, 5  ;;  %v3623_v47 = vrot.slane %v3621_v38, 5  ;;  %v4158_v63 = vrot.slane %v10050_v6, 5  ;;  %v8040_v38 = vld [vmem:[%s8919_s18 + $0x84] sm:$0xe] }
 0x221   : > { %v1569_v32 = vpop.f32.mrf.mxu2  ;;  %4758 = vst [vmem:[#allocation2 + $0x48] sm:$0xff] %v8800_v27  ;;  %v8056_v6 = vrot.slane %v8040_v38, 9 }
 0x222   : > { %v1884_v31 = vpop.f32.mrf.mxu3  ;;  %v1606_v15 = vadd.f32 %v1569_v32, %v9562_v29  ;;  %4759 = vst [vmem:[#allocation2 + $0x50] sm:$0xff] %v8800_v27  ;;  %v4152_v32 = vsel %vm9274_vm5, %v8055_v21, %v4151_v59  ;;  %v3627_v21 = vrot.slane %v3625_v18, 4 }
 0x223   : > { %v2569_v8 = vpop.f32.mrf.mxu0  ;;  %4760 = vst [vmem:[#allocation2 + $0x58] sm:$0x3] %v8800_v27  ;;  %v4238_v45 = vunpack.c.l.b16 %v4152_v32 }
 0x224   : > { %v1921_v10 = vadd.f32 %v1884_v31, %v1606_v15  ;;  %v4155_v31 = vsel %vm9274_vm5, %v4153_v24, %v4154_v62  ;;  %4761 = vst [vmem:[#allocation2 + $0x60] sm:$0xff] %v8800_v27  ;;  %v7964_v24 = vld [vmem:[%s8919_s18 + $0x8c] sm:$0x1] }
 0x225   : > { %4762 = vst [vmem:[#allocation2 + $0x68] sm:$0xff] %v8800_v27  ;;  %v3631_v32 = vshll.u32 %v7964_v24, 16 }
 0x226   : > { %3269 = vmatmul.bf16.gmra.mxu2 %v8491_v4  ;;  %v10043_v29 = vadd.f32 %v2566_v57, %v1921_v10  ;;  %4377 = vmatmul.bf16.gmra.mxu0 %v4261_v9  ;;  %v11685_v57 = vld [vmem:[#allocation9_spill] sm:$0xff]  ;;  %4763 = vst [vmem:[#allocation2 + $0x70] sm:$0x3] %v8800_v27  ;;  %v3813_v9 = vunpack.c.l.b16 %v3610_v12  ;;  %v4239_v10 = vunpack.c.l.b16 %v4155_v31  ;;  %v3628_v12 = vor.u32 %v3627_v21, %v3623_v47 }
 0x227   : > { %3951 = vmatmul.bf16.gmra.mxu3 %v3835_v37  ;;  %v3812_v37 = vunpack.c.l.b16 %v3600_v11  ;;  %4764 = vst [vmem:[#allocation2 + $0x78] sm:$0xff] %v8800_v27 }
 0x228   : > { %11684 = vst [vmem:[#allocation19_spill] sm:$0xff] %v10043_v29 }
 0x229   : > { %v1572_v52 = vpop.f32.mrf.mxu2  ;;  %4765 = vst [vmem:[#allocation2 + $0x80] sm:$0xff] %v8800_v27  ;;  %v3836_v11 = vpack.c.b16 %v3813_v9, %v3812_v37  ;;  %v10088_v37 = vld [vmem:[%s8919_s18 + $0x94] sm:$0xf] }
 0x22a   : > { %v1887_v34 = vpop.f32.mrf.mxu3  ;;  %v1607_v7 = vadd.f32 %v1572_v52, %v11685_v57  ;;  %4766 = vst [vmem:[#allocation2 + $0x88] sm:$0x3] %v8800_v27  ;;  %v4262_v57 = vpack.c.b16 %v4239_v10, %v4238_v45  ;;  %v3629_v45 = vrot.slane %v3628_v12, 4  ;;  %v3633_v10 = vrot.slane %v3631_v32, 5 }
 0x22b   : > { %v2571_v4 = vpop.f32.mrf.mxu0  ;;  %4767 = vst [vmem:[#allocation2 + $0x90] sm:$0xff] %v8800_v27  ;;  %v4159_v32 = vsel %vm9274_vm5, %v8056_v6, %v4158_v63 }
 0x22c   : > { %v1922_v15 = vadd.f32 %v1887_v34, %v1607_v7  ;;  %v8492_v34 = vld [vmem:[%s8919_s18 + $0x78] sm:$0xff]  ;;  %4768 = vst [vmem:[#allocation2 + $0x98] sm:$0xff] %v8800_v27  ;;  %v3618_v7 = vor.u32 %v3617_v43, %v3614_v46  ;;  %v4160_v46 = vrot.slane %v4158_v63, 4  ;;  %v4161_v43 = vrot.slane %v7964_v24, 5 }
 0x22d   : > { %4769 = vst [vmem:[#allocation2 + $0xa0] sm:$0x3] %v8800_v27  ;;  %v3634_v24 = vsel %vm8958_vm2, %v3629_v45, %v3633_v10  ;;  %v4240_v63 = vunpack.c.l.b16 %v4159_v32 }
 0x22e   : > { %v10068_v59 = vadd.f32 %v2569_v8, %v1922_v15  ;;  %v11687_v8 = vld [vmem:[#allocation10_spill] sm:$0xff]  ;;  %4770 = vst [vmem:[#allocation2 + $0xa8] sm:$0xff] %v8800_v27  ;;  %v7965_v15 = vld [vmem:[%s8919_s18 + $0x90] sm:$0xf]  ;;  %v3619_v9 = vrot.slane %v3618_v7, 4  ;;  %v3815_v10 = vunpack.c.l.b16 %v3634_v24 }
 0x22f   : > { %4771 = vst [vmem:[#allocation2 + $0xb0] sm:$0xff] %v8800_v27  ;;  %v8041_v24 = vld [vmem:[%s8919_s18 + $0x90] sm:$0xe] }
 0x230   : > { %11686 = vst [vmem:[#allocation9_spill] sm:$0xff] %v10068_v59 }
 0x231   : > { %v1574_v62 = vpop.f32.mrf.mxu2  ;;  %4772 = vst [vmem:[#allocation2 + $0xb8] sm:$0x3] %v8800_v27 }
 0x232   : > { %v1889_v36 = vpop.f32.mrf.mxu3  ;;  %v1608_v52 = vadd.f32 %v1574_v62, %v11687_v8  ;;  %4773 = vst [vmem:[#allocation2 + $0xc0] sm:$0xff] %v8800_v27  ;;  %v3645_v8 = vshll.u32 %v10088_v37, 16 }
 0x233   : > { %v4343_v25 = vpop.f32.mrf.mxu0  ;;  %4774 = vst [vmem:[#allocation2 + $0xc8] sm:$0xff] %v8800_v27 }
 0x234   : > { %v1923_v31 = vadd.f32 %v1889_v36, %v1608_v52  ;;  %4775 = vst [vmem:[#allocation2 + $0xd0] sm:$0x3] %v8800_v27  ;;  %v3639_v36 = vshll.u32 %v7965_v15, 16  ;;  %v3649_v52 = vshrl.u32 %v10088_v37, 16 }
 0x235   : > { %4776 = vst [vmem:[#allocation2 + $0xd8] sm:$0xff] %v8800_v27 }
 0x236   : > { %3274 = vmatmul.bf16.gmra.mxu2 %v8492_v34  ;;  %v10083_v18 = vadd.f32 %v2571_v4, %v1923_v31  ;;  %4382 = vmatmul.bf16.gmra.mxu0 %v4262_v57  ;;  %v3636_v4 = vshrl.u32 %v7965_v15, 16  ;;  %v11689_v34 = vld [vmem:[#allocation11_spill] sm:$0xff]  ;;  %4777 = vst [vmem:[#allocation2 + $0xe0] sm:$0xff] %v8800_v27  ;;  %v3624_v57 = vsel %vm8958_vm2, %v3619_v9, %v3623_v47  ;;  %v3641_v15 = vrot.slane %v3639_v36, 5 }
 0x237   : > { %3956 = vmatmul.bf16.gmra.mxu3 %v3836_v11  ;;  %4778 = vst [vmem:[#allocation2 + $0xe8] sm:$0x3] %v8800_v27  ;;  %v4162_v31 = vsel %vm9274_vm5, %v4160_v46, %v4161_v43  ;;  %v3651_v47 = vrot.slane %v3649_v52, 4  ;;  %v3814_v45 = vunpack.c.l.b16 %v3624_v57  ;;  %v8493_v52 = vld [vmem:[%s8919_s18 + $0x84] sm:$0xff] }
 0x238   : > { %11688 = vst [vmem:[#allocation10_spill] sm:$0xff] %v10083_v18  ;;  %v3638_v38 = vrot.slane %v3636_v4, 4  ;;  %v4241_v6 = vunpack.c.l.b16 %v4162_v31 }
 0x239   : > { %v3235_v21 = vpop.f32.mrf.mxu2  ;;  %4779 = vst [vmem:[#allocation2 + $0xf0] sm:$0xff] %v8800_v27 }
 0x23a   : > { %v3917_v62 = vpop.f32.mrf.mxu3  ;;  %v3315_v11 = vadd.f32 %v3235_v21, %v11689_v34  ;;  %v3647_v21 = vrot.slane %v3645_v8, 5  ;;  %4780 = vst [vmem:[#allocation2 + $0xf8] sm:$0xff] %v8800_v27  ;;  %v3642_v4 = vor.u32 %v3641_v15, %v3638_v38  ;;  %v3837_v34 = vpack.c.b16 %v3815_v10, %v3814_v45  ;;  %v7968_v10 = vld [vmem:[%s8919_s18 + $0x9c] sm:$0xf] }
 0x23b   : > { %v4345_v12 = vpop.f32.mrf.mxu0  ;;  %4781 = vst [vmem:[#allocation2 + $0x100] sm:$0x3] %v8800_v27  ;;  %v4263_v57 = vpack.c.b16 %v4241_v6, %v4240_v63  ;;  %v10130_v63 = vld [vmem:[%s8919_s18 + $0xa0] sm:$0xf] }
 0x23c   : > { %v3997_v7 = vadd.f32 %v3917_v62, %v3315_v11  ;;  %v7967_v62 = vld [vmem:[%s8919_s18 + $0x98] sm:$0x1]  ;;  %4782 = vst [vmem:[#allocation2 + $0x108] sm:$0xff] %v8800_v27  ;;  %v4165_v11 = vrot.slane %v10088_v37, 5  ;;  %v3643_v31 = vrot.slane %v3642_v4, 4  ;;  %v8057_v37 = vrot.slane %v8041_v24, 9 }
 0x23d   : > { %4783 = vst [vmem:[#allocation2 + $0x110] sm:$0xff] %v8800_v27  ;;  %v3655_v36 = vshll.u32 %v7967_v62, 16  ;;  %v4168_v45 = vrot.slane %v7967_v62, 5 }
 0x23e   : > { %v10108_v9 = vadd.f32 %v4343_v25, %v3997_v7  ;;  %v3652_v25 = vor.u32 %v3651_v47, %v3647_v21  ;;  %4784 = vst [vmem:[#allocation2 + $0x118] sm:$0x3] %v8800_v27  ;;  %v4167_v47 = vrot.slane %v4165_v11, 4 }
 0x23f   : > { %4785 = vst [vmem:[#allocation2 + $0x120] sm:$0xff] %v8800_v27  ;;  %v3657_v15 = vrot.slane %v3655_v36, 5 }
 0x240   : > { %11690 = vst [vmem:[#allocation11_spill] sm:$0xff] %v10108_v9  ;;  %v3653_v38 = vrot.slane %v3652_v25, 4  ;;  %v4166_v25 = vsel %vm9274_vm5, %v8057_v37, %v4165_v11  ;;  %v4169_v36 = vsel %vm9274_vm5, %v4167_v47, %v4168_v45 }
 0x241   : > { %v3237_v46 = vpop.f32.mrf.mxu2  ;;  %4786 = vst [vmem:[#allocation2 + $0x128] sm:$0xff] %v8800_v27 }
 0x242   : > { %v3919_v43 = vpop.f32.mrf.mxu3  ;;  %v3316_v8 = vadd.f32 %v3237_v46, %v9642_v33  ;;  %4787 = vst [vmem:[#allocation2 + $0x130] sm:$0x3] %v8800_v27  ;;  %v3658_v62 = vsel %vm8958_vm2, %v3653_v38, %v3657_v15  ;;  %v4242_v38 = vunpack.c.l.b16 %v4166_v25  ;;  %v4243_v15 = vunpack.c.l.b16 %v4169_v36 }
 0x243   : > { %v4348_v32 = vpop.f32.mrf.mxu0  ;;  %4788 = vst [vmem:[#allocation2 + $0x138] sm:$0xff] %v8800_v27 }
 0x244   : > { %v3998_v7 = vadd.f32 %v3919_v43, %v3316_v8  ;;  %4789 = vst [vmem:[#allocation2 + $0x140] sm:$0xff] %v8800_v27  ;;  %v11692_v43 = vld [vmem:[#allocation12_spill] sm:$0xff]  ;;  %v3660_v8 = vshrl.u32 %v7968_v10, 16 }
 0x245   : > { %4790 = vst [vmem:[#allocation2 + $0x148] sm:$0x3] %v8800_v27 }
 0x246   : > { %v10124_v33 = vadd.f32 %v4345_v12, %v3998_v7  ;;  %3279 = vmatmul.bf16.gmra.mxu2 %v8493_v52  ;;  %4387 = vmatmul.bf16.gmra.mxu0 %v4263_v57  ;;  %4791 = vst [vmem:[#allocation2 + $0x150] sm:$0xff] %v8800_v27  ;;  %v3648_v12 = vsel %vm8958_vm2, %v3643_v31, %v3647_v21  ;;  %v3663_v52 = vshll.u32 %v7968_v10, 16  ;;  %v3673_v21 = vshrl.u32 %v10130_v63, 16 }
 0x247   : > { %3961 = vmatmul.bf16.gmra.mxu3 %v3837_v34  ;;  %4792 = vst [vmem:[#allocation2 + $0x158] sm:$0xff] %v8800_v27  ;;  %v3669_v34 = vshll.u32 %v10130_v63, 16  ;;  %v3816_v7 = vunpack.c.l.b16 %v3648_v12  ;;  %v3817_v31 = vunpack.c.l.b16 %v3658_v62  ;;  %v3662_v37 = vrot.slane %v3660_v8, 4 }
 0x248   : > { %11691 = vst [vmem:[#allocation20_spill] sm:$0xff] %v10124_v33  ;;  %v3665_v47 = vrot.slane %v3663_v52, 5  ;;  %v3675_v10 = vrot.slane %v3673_v21, 4  ;;  %v4264_v62 = vpack.c.b16 %v4243_v15, %v4242_v38  ;;  %v4172_v21 = vrot.slane %v10130_v63, 5 }
 0x249   : > { %v3240_v6 = vpop.f32.mrf.mxu2  ;;  %4793 = vst [vmem:[#allocation2 + $0x160] sm:$0x3] %v8800_v27  ;;  %v3671_v45 = vrot.slane %v3669_v34, 5 }
 0x24a   : > { %v3922_v46 = vpop.f32.mrf.mxu3  ;;  %v3317_v4 = vadd.f32 %v3240_v6, %v11692_v43  ;;  %4794 = vst [vmem:[#allocation2 + $0x168] sm:$0xff] %v8800_v27  ;;  %v7970_v6 = vld [vmem:[%s8919_s18 + $0xa4] sm:$0x1]  ;;  %v8494_v43 = vld [vmem:[%s8919_s18 + $0x90] sm:$0xff]  ;;  %v3666_v25 = vor.u32 %v3665_v47, %v3662_v37  ;;  %v4174_v37 = vrot.slane %v4172_v21, 4 }
 0x24b   : > { %v4350_v24 = vpop.f32.mrf.mxu0  ;;  %4795 = vst [vmem:[#allocation2 + $0x170] sm:$0xff] %v8800_v27  ;;  %v3676_v36 = vor.u32 %v3675_v10, %v3671_v45  ;;  %v3679_v8 = vshll.u32 %v7970_v6, 16  ;;  %v4175_v47 = vrot.slane %v7970_v6, 5 }
 0x24c   : > { %v3999_v57 = vadd.f32 %v3922_v46, %v3317_v4  ;;  %4796 = vst [vmem:[#allocation2 + $0x178] sm:$0x3] %v8800_v27  ;;  %v3838_v4 = vpack.c.b16 %v3817_v31, %v3816_v7  ;;  %v3667_v7 = vrot.slane %v3666_v25, 4 }
 0x24d   : > { %4797 = vst [vmem:[#allocation2 + $0x180] sm:$0xff] %v8800_v27  ;;  %v3677_v31 = vrot.slane %v3676_v36, 4  ;;  %v3681_v38 = vrot.slane %v3679_v8, 5  ;;  %v4176_v8 = vsel %vm9274_vm5, %v4174_v37, %v4175_v47  ;;  %v8495_v47 = vld [vmem:[%s8919_s18 + $0x9c] sm:$0xff] }
 0x24e   : > { %v10149_v11 = vadd.f32 %v4348_v32, %v3999_v57  ;;  %4798 = vst [vmem:[#allocation2 + $0x188] sm:$0xff] %v8800_v27  ;;  %v8042_v57 = vld [vmem:[%s8919_s18 + $0x9c] sm:$0xe] }
 0x24f   : > { %4799 = vst [vmem:[#allocation2 + $0x190] sm:$0x3] %v8800_v27  ;;  %v8058_v15 = vrot.slane %v8042_v57, 9 }
 0x250   : > { %4800 = vst [vmem:[#allocation2 + $0x198] sm:$0xff] %v8800_v27 }
 0x251   : > { %v3242_v46 = vpop.f32.mrf.mxu2  ;;  %4801 = vst [vmem:[#allocation2 + $0x1a0] sm:$0xff] %v8800_v27  ;;  %v4173_v6 = vsel %vm9274_vm5, %v8058_v15, %v4172_v21 }
 0x252   : > { %v3924_v12 = vpop.f32.mrf.mxu3  ;;  %v3318_v32 = vadd.f32 %v3242_v46, %v9676_v55  ;;  %4802 = vst [vmem:[#allocation2 + $0x1a8] sm:$0x3] %v8800_v27  ;;  %v7971_v55 = vld [vmem:[%s8919_s18 + $0xa8] sm:$0xf]  ;;  %v10166_v46 = vld [vmem:[%s8919_s18 + $0xac] sm:$0xf] }
 0x253   : > { %v4353_v34 = vpop.f32.mrf.mxu0  ;;  %v3693_v63 = vshll.u32 %v10166_v46, 16 }
 0x254   : > { %v4000_v52 = vadd.f32 %v3924_v12, %v3318_v32  ;;  %v3684_v12 = vshrl.u32 %v7971_v55, 16  ;;  %v3687_v32 = vshll.u32 %v7971_v55, 16 }
 0x255   : > { %v3695_v55 = vrot.slane %v3693_v63, 5  ;;  %v8043_v63 = vld [vmem:[%s8919_s18 + $0xa8] sm:$0xe] }
 0x256   : > { %v10162_v18 = vadd.f32 %v4350_v24, %v4000_v52  ;;  %3284 = vmatmul.bf16.gmra.mxu2 %v8494_v43  ;;  %4392 = vmatmul.bf16.gmra.mxu0 %v4264_v62  ;;  %v3697_v24 = vshrl.u32 %v10166_v46, 16  ;;  %v3682_v62 = vsel %vm8958_vm2, %v3677_v31, %v3681_v38  ;;  %v3686_v52 = vrot.slane %v3684_v12, 4 }
 0x257   : > { %3966 = vmatmul.bf16.gmra.mxu3 %v3838_v4  ;;  %v3672_v4 = vsel %vm8958_vm2, %v3667_v7, %v3671_v45  ;;  %v3689_v57 = vrot.slane %v3687_v32, 5  ;;  %v3819_v7 = vunpack.c.l.b16 %v3682_v62  ;;  %v4244_v31 = vunpack.c.l.b16 %v4173_v6 }
 0x258   : > { %11693 = vst [vmem:[#allocation12_spill] sm:$0xff] %v10162_v18  ;;  %v3699_v59 = vrot.slane %v3697_v24, 4  ;;  %v3818_v45 = vunpack.c.l.b16 %v3672_v4  ;;  %v4245_v38 = vunpack.c.l.b16 %v4176_v8  ;;  %v4179_v32 = vrot.slane %v10166_v46, 5 }
 0x259   : > { %v3245_v27 = vpop.f32.mrf.mxu2  ;;  %v3690_v29 = vor.u32 %v3689_v57, %v3686_v52  ;;  %v7974_v57 = vld [vmem:[%s8919_s18 + $0xb4] sm:$0xf] }
 0x25a   : > { %v3927_v10 = vpop.f32.mrf.mxu3  ;;  %v3319_v43 = vadd.f32 %v3245_v27, %v9699_v19  ;;  %v7973_v27 = vld [vmem:[%s8919_s18 + $0xb0] sm:$0x1]  ;;  %v3700_v21 = vor.u32 %v3699_v59, %v3695_v55  ;;  %v3839_v12 = vpack.c.b16 %v3819_v7, %v3818_v45  ;;  %v8059_v59 = vrot.slane %v8043_v63, 9  ;;  %v7975_v45 = vld [vmem:[%s8919_s18 + $0xb8] sm:$0xf] }
 0x25b   : > { %v4355_v36 = vpop.f32.mrf.mxu0  ;;  %v3703_v15 = vshll.u32 %v7973_v27, 16  ;;  %v3691_v62 = vrot.slane %v3690_v29, 4  ;;  %v4181_v52 = vrot.slane %v4179_v32, 4 }
 0x25c   : > { %v4001_v25 = vadd.f32 %v3927_v10, %v3319_v43 }
 0x25d   : > { %v3705_v6 = vrot.slane %v3703_v15, 5  ;;  %v3721_v15 = vshrl.u32 %v7975_v45, 16 }
 0x25e   : > { %v10179_v19 = vadd.f32 %v4353_v34, %v4001_v25  ;;  %v4265_v34 = vpack.c.b16 %v4245_v38, %v4244_v31  ;;  %v3701_v25 = vrot.slane %v3700_v21, 4  ;;  %v3696_v31 = vsel %vm8958_vm2, %v3691_v62, %v3695_v55 }
 0x25f   : > { %v3717_v21 = vshll.u32 %v7975_v45, 16  ;;  %v3820_v55 = vunpack.c.l.b16 %v3696_v31 }
 0x260   : > { %v3706_v29 = vsel %vm8958_vm2, %v3701_v25, %v3705_v6  ;;  %v3723_v25 = vrot.slane %v3721_v15, 4  ;;  %v7976_v6 = vld [vmem:[%s8919_s18 + $0xbc] sm:$0x1]  ;;  %v7978_v15 = vld [vmem:[%s8919_s18 + $0xc4] sm:$0xf] }
 0x261   : > { %v3247_v10 = vpop.f32.mrf.mxu2 }
 0x262   : > { %v3929_v43 = vpop.f32.mrf.mxu3  ;;  %v3320_v37 = vadd.f32 %v3247_v10, %v9713_v53  ;;  %v4182_v53 = vrot.slane %v7973_v27, 5  ;;  %v3708_v27 = vshrl.u32 %v7974_v57, 16 }
 0x263   : > { %v4358_v4 = vpop.f32.mrf.mxu0 }
 0x264   : > { %v4002_v24 = vadd.f32 %v3929_v43, %v3320_v37  ;;  %v4183_v10 = vsel %vm9274_vm5, %v4181_v52, %v4182_v53  ;;  %v3711_v43 = vshll.u32 %v7974_v57, 16  ;;  %v8496_v57 = vld [vmem:[%s8919_s18 + $0xa8] sm:$0xff] }
 0x265   : > { %v4247_v63 = vunpack.c.l.b16 %v4183_v10  ;;  %v4186_v10 = vrot.slane %v7975_v45, 5  ;;  %v3745_v45 = vshrl.u32 %v7978_v15, 16 }
 0x266   : > { %v10186_v8 = vadd.f32 %v4355_v36, %v4002_v24  ;;  %3289 = vmatmul.bf16.gmra.mxu2 %v8495_v47  ;;  %4397 = vmatmul.bf16.gmra.mxu0 %v4265_v34  ;;  %v4180_v36 = vsel %vm9274_vm5, %v8059_v59, %v4179_v32  ;;  %v3710_v24 = vrot.slane %v3708_v27, 4  ;;  %v3713_v62 = vrot.slane %v3711_v43, 5  ;;  %v8044_v27 = vld [vmem:[%s8919_s18 + $0xb4] sm:$0xe] }
 0x267   : > { %3971 = vmatmul.bf16.gmra.mxu3 %v3839_v12  ;;  %v4246_v34 = vunpack.c.l.b16 %v4180_v36  ;;  %v3719_v32 = vrot.slane %v3717_v21, 5  ;;  %v7977_v21 = vld [vmem:[%s8919_s18 + $0xc0] sm:$0xf] }
 0x269   : > { %v3250_v7 = vpop.f32.mrf.mxu2  ;;  %v3724_v31 = vor.u32 %v3723_v25, %v3719_v32  ;;  %v3741_v25 = vshll.u32 %v7978_v15, 16 }
 0x26a   : > { %v3932_v46 = vpop.f32.mrf.mxu3  ;;  %v3321_v38 = vadd.f32 %v3250_v7, %v9733_v30  ;;  %v3821_v30 = vunpack.c.l.b16 %v3706_v29 }
 0x26b   : > { %v4360_v47 = vpop.f32.mrf.mxu0  ;;  %v3725_v13 = vrot.slane %v3724_v31, 4 }
 0x26c   : > { %v4003_v37 = vadd.f32 %v3932_v46, %v3321_v38  ;;  %v3840_v7 = vpack.c.b16 %v3821_v30, %v3820_v55  ;;  %v4266_v46 = vpack.c.b16 %v4247_v63, %v4246_v34  ;;  %v3727_v38 = vshll.u32 %v7976_v6, 16 }
 0x26d   : > { %v4188_v55 = vrot.slane %v4186_v10, 4  ;;  %v4189_v30 = vrot.slane %v7976_v6, 5 }
 0x26e   : > { %v10199_v12 = vadd.f32 %v4358_v4, %v4003_v37  ;;  %v3714_v4 = vor.u32 %v3713_v62, %v3710_v24  ;;  %v3732_v24 = vshrl.u32 %v7977_v21, 16  ;;  %v3735_v62 = vshll.u32 %v7977_v21, 16 }
 0x270   : > { %v3715_v37 = vrot.slane %v3714_v4, 4  ;;  %v3734_v4 = vrot.slane %v3732_v24, 4  ;;  %v3737_v31 = vrot.slane %v3735_v62, 5  ;;  %v4193_v24 = vrot.slane %v7978_v15, 5 }
 0x271   : > { %v3252_v59 = vpop.f32.mrf.mxu2 }
 0x272   : > { %v3934_v52 = vpop.f32.mrf.mxu3  ;;  %v3322_v53 = vadd.f32 %v3252_v59, %v9747_v28  ;;  %v3729_v28 = vrot.slane %v3727_v38, 5  ;;  %v8060_v59 = vrot.slane %v8044_v27, 9  ;;  %v3747_v38 = vrot.slane %v3745_v45, 4 }
 0x273   : > { %v4363_v36 = vpop.f32.mrf.mxu0 }
 0x274   : > { %v4004_v29 = vadd.f32 %v3934_v52, %v3322_v53  ;;  %v3720_v52 = vsel %vm8958_vm2, %v3715_v37, %v3719_v32  ;;  %v3730_v53 = vsel %vm8958_vm2, %v3725_v13, %v3729_v28  ;;  %v4187_v6 = vsel %vm9274_vm5, %v8060_v59, %v4186_v10  ;;  %v7979_v37 = vld [vmem:[%s8919_s18 + $0xc8] sm:$0x1] }
 0x275   : > { %v3822_v32 = vunpack.c.l.b16 %v3720_v52  ;;  %v3823_v27 = vunpack.c.l.b16 %v3730_v53  ;;  %v4248_v13 = vunpack.c.l.b16 %v4187_v6  ;;  %v3738_v10 = vor.u32 %v3737_v31, %v3734_v4  ;;  %v7981_v4 = vld [vmem:[%s8919_s18 + $0xd0] sm:$0xf] }
 0x276   : > { %v10205_v43 = vadd.f32 %v4360_v47, %v4004_v29  ;;  %3294 = vmatmul.bf16.gmra.mxu2 %v8496_v57  ;;  %4402 = vmatmul.bf16.gmra.mxu0 %v4266_v46  ;;  %v4190_v46 = vsel %vm9274_vm5, %v4188_v55, %v4189_v30  ;;  %v3751_v30 = vshll.u32 %v7979_v37, 16  ;;  %v4196_v6 = vrot.slane %v7979_v37, 5 }
 0x277   : > { %3976 = vmatmul.bf16.gmra.mxu3 %v3840_v7  ;;  %v4249_v21 = vunpack.c.l.b16 %v4190_v46  ;;  %v3841_v55 = vpack.c.b16 %v3823_v27, %v3822_v32  ;;  %v3739_v45 = vrot.slane %v3738_v10, 4  ;;  %v7980_v46 = vld [vmem:[%s8919_s18 + $0xcc] sm:$0xf] }
 0x278   : > { %v3753_v52 = vrot.slane %v3751_v30, 5  ;;  %v3756_v37 = vshrl.u32 %v7980_v46, 16  ;;  %v3759_v10 = vshll.u32 %v7980_v46, 16 }
 0x279   : > { %v3255_v34 = vpop.f32.mrf.mxu2  ;;  %v4267_v62 = vpack.c.b16 %v4249_v21, %v4248_v13 }
 0x27a   : > { %v3937_v63 = vpop.f32.mrf.mxu3  ;;  %v3323_v47 = vadd.f32 %v3255_v34, %v9772_v41  ;;  %v3743_v41 = vrot.slane %v3741_v25, 5 }
 0x27b   : > { %v10214_v7 = vpop.f32.mrf.mxu0 }
 0x27c   : > { %v4005_v57 = vadd.f32 %v3937_v63, %v3323_v47  ;;  %v3748_v59 = vor.u32 %v3747_v38, %v3743_v41  ;;  %v8497_v63 = vld [vmem:[%s8919_s18 + $0xb4] sm:$0xff]  ;;  %v3744_v32 = vsel %vm8958_vm2, %v3739_v45, %v3743_v41 }
 0x27d   : > { %v3824_v41 = vunpack.c.l.b16 %v3744_v32 }
 0x27e   : > { %v10220_v29 = vadd.f32 %v4363_v36, %v4005_v57  ;;  %v8045_v36 = vld [vmem:[%s8919_s18 + $0xc0] sm:$0xe]  ;;  %v3749_v47 = vrot.slane %v3748_v59, 4  ;;  %v4195_v57 = vrot.slane %v4193_v24, 4  ;;  %v3765_v59 = vshll.u32 %v7981_v4, 16 }
 0x27f   : > { %v8061_v53 = vrot.slane %v8045_v36, 9 }
 0x280   : > { %v3754_v27 = vsel %vm8958_vm2, %v3749_v47, %v3753_v52  ;;  %v4197_v21 = vsel %vm9274_vm5, %v4195_v57, %v4196_v6  ;;  %v3758_v47 = vrot.slane %v3756_v37, 4  ;;  %v3767_v52 = vrot.slane %v3765_v59, 5  ;;  %v7982_v57 = vld [vmem:[%s8919_s18 + $0xd4] sm:$0x1]  ;;  %v8539_v6 = vld [vmem:[#allocation3 + $0x78] sm:$0xff] }
 0x281   : > { %v10223_v28 = vpop.f32.mrf.mxu2  ;;  %v4194_v13 = vsel %vm9274_vm5, %v8061_v53, %v4193_v24  ;;  %v4251_v45 = vunpack.c.l.b16 %v4197_v21  ;;  %v3761_v24 = vrot.slane %v3759_v10, 5  ;;  %5013 = vmatpush.bf16.msra.mxu1 %v8539_v6  ;;  %v4200_v21 = vrot.slane %v7981_v4, 5  ;;  %v8046_v37 = vld [vmem:[%s8919_s18 + $0xcc] sm:$0xe] }
 0x282   : > { %v10225_v34 = vpop.f32.mrf.mxu3  ;;  %v4250_v36 = vunpack.c.l.b16 %v4194_v13  ;;  %v8062_v54 = vrot.slane %v8046_v37, 9  ;;  %v4203_v22 = vrot.slane %v7982_v57, 5 }
 0x283   : > { %v4368_v25 = vpop.f32.mrf.mxu0  ;;  %v4202_v20 = vrot.slane %v4200_v21, 4 }
 0x284   : > { %v4268_v32 = vpack.c.b16 %v4251_v45, %v4250_v36 }
 0x286   : > { %3299 = vmatmul.bf16.gmra.mxu2 %v8497_v63  ;;  %4407 = vmatmul.bf16.gmra.mxu0 %v4267_v62  ;;  %v3769_v63 = vshrl.u32 %v7981_v4, 16  ;;  %v3825_v62 = vunpack.c.l.b16 %v3754_v27  ;;  %v3775_v27 = vshll.u32 %v7982_v57, 16 }
 0x287   : > { %3981 = vmatmul.bf16.gmra.mxu3 %v3841_v55 }
 0x288   : > { %v3771_v53 = vrot.slane %v3769_v63, 4  ;;  %v3777_v63 = vrot.slane %v3775_v27, 5 }
 0x289   : > { %v3260_v31 = vpop.f32.mrf.mxu2 }
 0x28a   : > { %v3942_v38 = vpop.f32.mrf.mxu3  ;;  %v3325_v15 = vadd.f32 %v3260_v31, %v9808_v42 }
 0x28b   : > { %v10240_v30 = vpop.f32.mrf.mxu0 }
 0x28c   : > { %v4007_v55 = vadd.f32 %v3942_v38, %v3325_v15  ;;  %v8498_v38 = vld [vmem:[%s8919_s18 + $0xc0] sm:$0xff]  ;;  %v3842_v15 = vpack.c.b16 %v3825_v62, %v3824_v41  ;;  %s7178_s18 = sshll.u32 %s11459_s22, 4  ;;  %s7179_s18 = int_to_ptr.vmem [resolvable:$true] %s7178_s18 }
 0x28e   : > { %v10242_v42 = vadd.f32 %v4368_v25, %v4007_v55  ;;  %v3762_v25 = vor.u32 %v3761_v24, %v3758_v47  ;;  %v3772_v55 = vor.u32 %v3771_v53, %v3767_v52  ;;  %v4201_v24 = vsel %vm9274_vm5, %v8062_v54, %v4200_v21  ;;  %v8538_v21 = vld [vmem:[#allocation3 + $0x70] sm:$0xff] }
 0x28f   : > { %v4204_v53 = vsel %vm9274_vm5, %v4202_v20, %v4203_v22  ;;  %5014 = vmatpush.bf16.msra.mxu1 %v8538_v21 }
 0x290   : > { %v3763_v10 = vrot.slane %v3762_v25, 4  ;;  %v3773_v59 = vrot.slane %v3772_v55, 4 }
 0x291   : > { %v10245_v46 = vpop.f32.mrf.mxu2 }
 0x292   : > { %v10247_v31 = vpop.f32.mrf.mxu3  ;;  %v3768_v36 = vsel %vm8958_vm2, %v3763_v10, %v3767_v52  ;;  %v3778_v4 = vsel %vm8958_vm2, %v3773_v59, %v3777_v63 }
 0x293   : > { %v4373_v13 = vpop.f32.mrf.mxu0  ;;  %v3826_v6 = vunpack.c.l.b16 %v3768_v36 }
 0x296   : > { %3304 = vmatmul.bf16.gmra.mxu2 %v8498_v38  ;;  %4412 = vmatmul.bf16.gmra.mxu0 %v4268_v32  ;;  %v3827_v38 = vunpack.c.l.b16 %v3778_v4 }
 0x297   : > { %3986 = vmatmul.bf16.gmra.mxu3 %v3842_v15 }
 0x298   : > { %v3843_v32 = vpack.c.b16 %v3827_v38, %v3826_v6  ;;  %v10287_v6 = vpop.f32.mrf.mxu1 }
 0x299   : > { %v3265_v60 = vpop.f32.mrf.mxu2 }
 0x29a   : > { %v3947_v41 = vpop.f32.mrf.mxu3  ;;  %v3327_v62 = vadd.f32 %v3265_v60, %v9842_v16  ;;  %v4252_v16 = vunpack.c.l.b16 %v4201_v24  ;;  %v4253_v60 = vunpack.c.l.b16 %v4204_v53 }
 0x29b   : > { %v10256_v47 = vpop.f32.mrf.mxu0 }
 0x29c   : > { %v4009_v45 = vadd.f32 %v3947_v41, %v3327_v62  ;;  %v4269_v25 = vpack.c.b16 %v4253_v60, %v4252_v16 }
 0x29e   : > { %v10262_v57 = vadd.f32 %v4373_v13, %v4009_v45 }
 0x2a1   : > { %v10264_v15 = vpop.f32.mrf.mxu2 }
 0x2a2   : > { %v10266_v52 = vpop.f32.mrf.mxu3 }
 0x2a3   : > { %v4378_v55 = vpop.f32.mrf.mxu0 }
 0x2a6   : > { %3309 = vmatmul.bf16.gmra.mxu2 %v8499_v39  ;;  %4417 = vmatmul.bf16.gmra.mxu0 %v4269_v25  ;;  %v8537_v25 = vld [vmem:[#allocation3 + $0x68] sm:$0xff] }
 0x2a7   : > { %3991 = vmatmul.bf16.gmra.mxu3 %v3843_v32  ;;  %5015 = vmatpush.bf16.msra.mxu1 %v8537_v25 }
 0x2a9   : > { %v3270_v54 = vpop.f32.mrf.mxu2 }
 0x2aa   : > { %v3952_v1 = vpop.f32.mrf.mxu3  ;;  %v3329_v22 = vadd.f32 %v3270_v54, %v9867_v61 }
 0x2ab   : > { %v10270_v27 = vpop.f32.mrf.mxu0 }
 0x2ac   : > { %v4011_v20 = vadd.f32 %v3952_v1, %v3329_v22  ;;  %v10296_v1 = vpop.f32.mrf.mxu1 }
 0x2ae   : > { %v10272_v13 = vadd.f32 %v4378_v55, %v4011_v20 }
 0x2b1   : > { %v10274_v37 = vpop.f32.mrf.mxu2 }
 0x2b2   : > { %v10276_v10 = vpop.f32.mrf.mxu3 }
 0x2b3   : > { %v4383_v59 = vpop.f32.mrf.mxu0 }
 0x2b9   : > { %v3275_v63 = vpop.f32.mrf.mxu2 }
 0x2ba   : > { %v3957_v41 = vpop.f32.mrf.mxu3  ;;  %v3331_v62 = vadd.f32 %v3275_v63, %v9894_v0  ;;  %v10299_v63 = vpop.f32.mrf.mxu1 }
 0x2bb   : > { %v10279_v4 = vpop.f32.mrf.mxu0 }
 0x2bc   : > { %v4013_v36 = vadd.f32 %v3957_v41, %v3331_v62 }
 0x2be   : > { %v10281_v61 = vadd.f32 %v4383_v59, %v4013_v36 }
 0x2c1   : > { %v10283_v45 = vpop.f32.mrf.mxu2 }
 0x2c2   : > { %v10285_v24 = vpop.f32.mrf.mxu3 }
 0x2c3   : > { %v4388_v53 = vpop.f32.mrf.mxu0 }
 0x2c9   : > { %v3280_v38 = vpop.f32.mrf.mxu2 }
 0x2ca   : > { %v3962_v16 = vpop.f32.mrf.mxu3  ;;  %v3333_v60 = vadd.f32 %v3280_v38, %v9917_v35  ;;  %v4455_v38 = vadd.f32 %v10124_v33, %v10108_v9 }
 0x2cb   : > { %v10290_v32 = vpop.f32.mrf.mxu0 }
 0x2cc   : > { %v4015_v39 = vadd.f32 %v3962_v16, %v3333_v60  ;;  %v3009_v60 = vadd.f32 %v9766_v23, %v9784_v40 }
 0x2ce   : > { %v10292_v0 = vadd.f32 %v4388_v53, %v4015_v39  ;;  %v2980_v39 = vpop.f32.mrf.mxu1 }
 0x2d1   : > { %v3282_v55 = vpop.f32.mrf.mxu2 }
 0x2d2   : > { %v10294_v54 = vpop.f32.mrf.mxu3 }
 0x2d3   : > { %v4393_v22 = vpop.f32.mrf.mxu0 }
 0x2d9   : > { %v3285_v20 = vpop.f32.mrf.mxu2 }
 0x2da   : > { %v3967_v21 = vpop.f32.mrf.mxu3  ;;  %v3335_v59 = vadd.f32 %v3285_v20, %v9944_v26  ;;  %v4456_v26 = vadd.f32 %v4455_v38, %v10149_v11  ;;  %v3324_v20 = vadd.f32 %v10223_v28, %v3009_v60  ;;  %v11694_v38 = vld [vmem:[#allocation13_spill] sm:$0xff]  ;;  %v2982_v60 = vpop.f32.mrf.mxu1 }
 0x2db   : > { %v10301_v41 = vpop.f32.mrf.mxu0 }
 0x2dc   : > { %v4017_v35 = vadd.f32 %v3967_v21, %v3335_v59  ;;  %v4457_v25 = vadd.f32 %v4456_v26, %v10162_v18  ;;  %v3011_v59 = vadd.f32 %v9801_v3, %v9817_v17  ;;  %v4006_v9 = vadd.f32 %v10225_v34, %v3324_v20  ;;  %v8536_v34 = vld [vmem:[#allocation3 + $0x60] sm:$0xff] }
 0x2dd   : > { %v3013_v26 = vadd.f32 %v11694_v38, %v9848_v51  ;;  %5016 = vmatpush.bf16.msra.mxu1 %v8536_v34 }
 0x2de   : > { %v10303_v62 = vadd.f32 %v4393_v22, %v4017_v35  ;;  %v4458_v35 = vadd.f32 %v4457_v25, %v10179_v19  ;;  %v3326_v23 = vadd.f32 %v10245_v46, %v3011_v59  ;;  %v10329_v3 = vadd.f32 %v10214_v7, %v4006_v9 }
 0x2df   : > { %v3328_v25 = vadd.f32 %v10264_v15, %v3013_v26  ;;  %v3015_v59 = vadd.f32 %v9865_v5, %v9874_v44  ;;  %v3017_v15 = vadd.f32 %v9891_v2, %v9900_v56 }
 0x2e0   : > { %v4459_v33 = vadd.f32 %v4458_v35, %v10186_v8  ;;  %v4008_v17 = vadd.f32 %v10247_v31, %v3326_v23 }
 0x2e1   : > { %v3287_v36 = vpop.f32.mrf.mxu2  ;;  %v4010_v9 = vadd.f32 %v10266_v52, %v3328_v25  ;;  %v3330_v7 = vadd.f32 %v10274_v37, %v3015_v59  ;;  %v3019_v52 = vadd.f32 %v9922_v49, %v9926_v50  ;;  %v3022_v49 = vadd.f32 %v10296_v1, %v9963_v14 }
 0x2e2   : > { %v10305_v53 = vpop.f32.mrf.mxu3  ;;  %v4460_v28 = vadd.f32 %v4459_v33, %v10199_v12  ;;  %v10338_v35 = vadd.f32 %v10240_v30, %v4008_v17  ;;  %v3332_v30 = vadd.f32 %v10283_v45, %v3017_v15  ;;  %v2985_v37 = vpop.f32.mrf.mxu1  ;;  %v11696_v15 = vld [vmem:[#allocation15_spill] sm:$0xff] }
 0x2e3   : > { %v10309_v16 = vpop.f32.mrf.mxu0  ;;  %v10347_v44 = vadd.f32 %v10256_v47, %v4010_v9  ;;  %v3334_v17 = vadd.f32 %v3282_v55, %v3019_v52  ;;  %v3023_v55 = vadd.f32 %v10299_v63, %v9969_v58 }
 0x2e4   : > { %v4461_v18 = vadd.f32 %v4460_v28, %v10205_v43  ;;  %v4014_v47 = vadd.f32 %v10285_v24, %v3332_v30 }
 0x2e6   : > { %v4462_v51 = vadd.f32 %v4461_v18, %v10220_v29  ;;  %v4012_v18 = vadd.f32 %v10276_v10, %v3330_v7  ;;  %v3021_v10 = vadd.f32 %v10287_v6, %v9950_v48  ;;  %v10366_v34 = vadd.f32 %v10279_v4, %v4014_v47 }
 0x2e8   : > { %v4463_v33 = vadd.f32 %v4462_v51, %v10329_v3  ;;  %v10356_v56 = vadd.f32 %v10270_v27, %v4012_v18  ;;  %v4016_v27 = vadd.f32 %v10294_v54, %v3334_v17  ;;  %v3336_v59 = vadd.f32 %v3287_v36, %v3021_v10  ;;  %v11697_v18 = vld [vmem:[#allocation16_spill] sm:$0xff] }
 0x2e9   : > { %v3290_v22 = vpop.f32.mrf.mxu2 }
 0x2ea   : > { %v3972_v21 = vpop.f32.mrf.mxu3  ;;  %v4464_v23 = vadd.f32 %v4463_v33, %v10242_v42  ;;  %v3337_v6 = vadd.f32 %v3290_v22, %v3022_v49  ;;  %v11695_v33 = vld [vmem:[#allocation14_spill] sm:$0xff]  ;;  %v2987_v7 = vpop.f32.mrf.mxu1  ;;  %v10375_v1 = vadd.f32 %v10290_v32, %v4016_v27  ;;  %v4018_v4 = vadd.f32 %v10305_v53, %v3336_v59  ;;  %v11698_v49 = vld [vmem:[#allocation17_spill] sm:$0xff] }
 0x2eb   : > { %v10322_v40 = vpop.f32.mrf.mxu0  ;;  %v3024_v9 = vadd.f32 %v2980_v39, %v11695_v33  ;;  %v3026_v22 = vadd.f32 %v2985_v37, %v11697_v18 }
 0x2ec   : > { %v4465_v5 = vadd.f32 %v4464_v23, %v10338_v35  ;;  %v3025_v23 = vadd.f32 %v2982_v60, %v11696_v15  ;;  %v4019_v58 = vadd.f32 %v3972_v21, %v3337_v6  ;;  %v10383_v30 = vadd.f32 %v10301_v41, %v4018_v4 }
 0x2ee   : > { %v4466_v28 = vadd.f32 %v4465_v5, %v10262_v57 }
 0x2f0   : > { %v4467_v2 = vadd.f32 %v4466_v28, %v10347_v44 }
 0x2f1   : > { %v3292_v20 = vpop.f32.mrf.mxu2 }
 0x2f2   : > { %v3974_v46 = vpop.f32.mrf.mxu3  ;;  %v4468_v45 = vadd.f32 %v4467_v2, %v10272_v13  ;;  %v3338_v54 = vadd.f32 %v3292_v20, %v3023_v55  ;;  %v10387_v20 = vadd.f32 %v10309_v16, %v4019_v58  ;;  %v2990_v41 = vpop.f32.mrf.mxu1 }
 0x2f3   : > { %v4403_v31 = vpop.f32.mrf.mxu0 }
 0x2f4   : > { %v4469_v50 = vadd.f32 %v4468_v45, %v10356_v56  ;;  %v4020_v52 = vadd.f32 %v3974_v46, %v3338_v54 }
 0x2f6   : > { %v4470_v48 = vadd.f32 %v4469_v50, %v10281_v61  ;;  %v3027_v50 = vadd.f32 %v2987_v7, %v11698_v49 }
 0x2f8   : > { %v4471_v14 = vadd.f32 %v4470_v48, %v10366_v34 }
 0x2f9   : > { %v3295_v38 = vpop.f32.mrf.mxu2 }
 0x2fa   : > { %v3977_v26 = vpop.f32.mrf.mxu3  ;;  %v4472_v5 = vadd.f32 %v4471_v14, %v10292_v0  ;;  %v3339_v63 = vadd.f32 %v3295_v38, %v3024_v9  ;;  %v10391_v38 = vadd.f32 %v10322_v40, %v4020_v52  ;;  %v11699_v14 = vld [vmem:[#allocation18_spill] sm:$0xff]  ;;  %v2992_v4 = vpop.f32.mrf.mxu1 }
 0x2fb   : > { %v4405_v25 = vpop.f32.mrf.mxu0  ;;  %v3028_v7 = vadd.f32 %v2990_v41, %v11699_v14 }
 0x2fc   : > { %v4473_v39 = vadd.f32 %v4472_v5, %v10375_v1  ;;  %v4021_v60 = vadd.f32 %v3977_v26, %v3339_v63  ;;  %v8535_v26 = vld [vmem:[#allocation3 + $0x58] sm:$0xff]  ;;  %v11700_v63 = vld [vmem:[#allocation19_spill] sm:$0xff] }
 0x2fd   : > { %5017 = vmatpush.bf16.msra.mxu1 %v8535_v26  ;;  %v3029_v18 = vadd.f32 %v2992_v4, %v11700_v63  ;;  %v11702_v26 = vld [vmem:[#allocation10_spill] sm:$0xff] }
 0x2fe   : > { %v4474_v53 = vadd.f32 %v4473_v39, %v10303_v62  ;;  %v10394_v10 = vadd.f32 %v4403_v31, %v4021_v60  ;;  %v11701_v60 = vld [vmem:[#allocation9_spill] sm:$0xff] }
 0x300   : > { %v4475_v21 = vadd.f32 %v4474_v53, %v10383_v30 }
 0x301   : > { %v3297_v51 = vpop.f32.mrf.mxu2 }
 0x302   : > { %v3979_v24 = vpop.f32.mrf.mxu3  ;;  %v3340_v32 = vadd.f32 %v3297_v51, %v3025_v23  ;;  %v4476_v46 = vadd.f32 %v4475_v21, %v10387_v20 }
 0x303   : > { %v4408_v36 = vpop.f32.mrf.mxu0 }
 0x304   : > { %v4022_v37 = vadd.f32 %v3979_v24, %v3340_v32  ;;  %v4477_v16 = vadd.f32 %v4476_v46, %v10391_v38 }
 0x306   : > { %v10398_v27 = vadd.f32 %v4405_v25, %v4022_v37  ;;  %v4478_v40 = vadd.f32 %v4477_v16, %v10394_v10  ;;  %v8801_v16 = vmov 256.0  }
 0x307   : > { %8674 = vrcp.f32 %v8801_v16 }
 0x308   : > { %v4479_v48 = vadd.f32 %v4478_v40, %v10398_v27 }
 0x309   : > { %v3300_v28 = vpop.f32.mrf.mxu2 }
 0x30a   : > { %v3982_v2 = vpop.f32.mrf.mxu3  ;;  %v3341_v47 = vadd.f32 %v3300_v28, %v3026_v22  ;;  %v2995_v28 = vpop.f32.mrf.mxu1 }
 0x30b   : > { %v4410_v17 = vpop.f32.mrf.mxu0 }
 0x30c   : > { %v4023_v45 = vadd.f32 %v3982_v2, %v3341_v47  ;;  %v3030_v47 = vadd.f32 %v2995_v28, %v11701_v60 }
 0x30e   : > { %v4449_v55 = vadd.f32 %v4408_v36, %v4023_v45 }
 0x310   : > { %v4480_v31 = vadd.f32 %v4479_v48, %v4449_v55 }
 0x311   : > { %v3302_v59 = vpop.f32.mrf.mxu2 }
 0x312   : > { %v3984_v51 = vpop.f32.mrf.mxu3  ;;  %v3342_v24 = vadd.f32 %v3302_v59, %v3027_v50  ;;  %v2997_v49 = vpop.f32.mrf.mxu1 }
 0x313   : > { %v4413_v9 = vpop.f32.mrf.mxu0  ;;  %v3031_v59 = vadd.f32 %v2997_v49, %v11702_v26 }
 0x314   : > { %v4024_v6 = vadd.f32 %v3984_v51, %v3342_v24 }
 0x316   : > { %v4450_v33 = vadd.f32 %v4410_v17, %v4024_v6  ;;  %v8675_v6 = vpop.eup %8674 }
 0x317   : > { %vm4497_vm6 = vweird.f32 %v8675_v6 }
 0x318   : > { %v4481_v54 = vadd.f32 %v4480_v31, %v4450_v33 }
 0x319   : > { %v3305_v25 = vpop.f32.mrf.mxu2 }
 0x31a   : > { %v3987_v15 = vpop.f32.mrf.mxu3  ;;  %v3343_v23 = vadd.f32 %v3305_v25, %v3028_v7  ;;  %v4493_v7 = vmul.f32 256.0, %v8675_v6 }
 0x31b   : > { %v4415_v22 = vpop.f32.mrf.mxu0 }
 0x31c   : > { %v4025_v5 = vadd.f32 %v3987_v15, %v3343_v23  ;;  %v4494_v25 = vsub.f32 1.0, %v4493_v7 }
 0x31e   : > { %v4451_v58 = vadd.f32 %v4413_v9, %v4025_v5  ;;  %v4495_v5 = vmul.f32 %v8675_v6, %v4494_v25 }
 0x320   : > { %v4482_v36 = vadd.f32 %v4481_v54, %v4451_v58 }
 0x321   : > { %v3307_v39 = vpop.f32.mrf.mxu2 }
 0x322   : > { %v3989_v52 = vpop.f32.mrf.mxu3  ;;  %v3344_v32 = vadd.f32 %v3307_v39, %v3029_v18 }
 0x323   : > { %v4418_v46 = vpop.f32.mrf.mxu0 }
 0x324   : > { %v4026_v2 = vadd.f32 %v3989_v52, %v3344_v32 }
 0x326   : > { %v4452_v53 = vadd.f32 %v4415_v22, %v4026_v2 }
 0x328   : > { %v4483_v21 = vadd.f32 %v4482_v36, %v4452_v53  ;;  %v4496_v36 = vadd.f32 %v8675_v6, %v4495_v5 }
 0x329   : > { %v3310_v37 = vpop.f32.mrf.mxu2 }
 0x32a   : > { %v3992_v17 = vpop.f32.mrf.mxu3  ;;  %v3345_v41 = vadd.f32 %v3310_v37, %v3030_v47  ;;  %v10406_v39 = vsel %vm4497_vm6, %v8675_v6, %v4496_v36  ;;  %v11704_v37 = vld [vmem:[#allocation11_spill] sm:$0xff] }
 0x32b   : > { %v4420_v9 = vpop.f32.mrf.mxu0  ;;  %11703 = vst [vmem:[#allocation13_spill] sm:$0xff] %v10406_v39 }
 0x32c   : > { %v4027_v45 = vadd.f32 %v3992_v17, %v3345_v41 }
 0x32e   : > { %v4453_v50 = vadd.f32 %v4418_v46, %v4027_v45  ;;  %v11706_v46 = vld [vmem:[#allocation12_spill] sm:$0xff] }
 0x330   : > { %v4484_v51 = vadd.f32 %v4483_v21, %v4453_v50 }
 0x331   : > { %v3312_v40 = vpop.f32.mrf.mxu2 }
 0x332   : > { %v3346_v24 = vadd.f32 %v3312_v40, %v3031_v59  ;;  %v3994_v48 = vpop.f32.mrf.mxu3 }
 0x334   : > { %v4028_v31 = vadd.f32 %v3994_v48, %v3346_v24 }
 0x336   : > { %v4454_v14 = vadd.f32 %v4420_v9, %v4028_v31 }
 0x338   : > { %v4485_v4 = vadd.f32 %v4484_v51, %v4454_v14 }
 0x33a   : > { %v4486_v54 = vrot.slane %v4485_v4, 4 }
 0x33c   : > { %v4487_v15 = vadd.f32 %v4486_v54, %v4485_v4 }
 0x33e   : > { %v4488_v23 = vrot.slane %v4487_v15, 2 }
 0x340   : > { %v4489_v63 = vadd.f32 %v4488_v23, %v4487_v15 }
 0x342   : > { %v4490_v18 = vrot.slane %v4489_v63, 1 }
 0x344   : > { %v4491_v22 = vadd.f32 %v4490_v18, %v4489_v63 }
 0x346   : > { %v10409_v52 = vmul.f32 %v10406_v39, %v4491_v22 }
 0x348   : > { %v10412_v32 = vsub.f32 %v4449_v55, %v10409_v52  ;;  %v10415_v28 = vsub.f32 %v4450_v33, %v10409_v52  ;;  %v10418_v2 = vsub.f32 %v4451_v58, %v10409_v52  ;;  %v10421_v60 = vsub.f32 %v4452_v53, %v10409_v52  ;;  %v11705_v55 = vld [vmem:[#allocation20_spill] sm:$0xff] }
 0x349   : > { %v10424_v47 = vsub.f32 %v4453_v50, %v10409_v52  ;;  %v10427_v21 = vsub.f32 %v4454_v14, %v10409_v52  ;;  %v10431_v17 = vsub.f32 %v11704_v37, %v10409_v52  ;;  %v10435_v33 = vsub.f32 %v11705_v55, %v10409_v52 }
 0x34a   : > { %v10439_v58 = vsub.f32 %v10149_v11, %v10409_v52  ;;  %v10447_v45 = vsub.f32 %v11706_v46, %v10409_v52  ;;  %v10451_v49 = vsub.f32 %v10179_v19, %v10409_v52  ;;  %v10457_v11 = vsub.f32 %v10186_v8, %v10409_v52 }
 0x34b   : > { %v4532_v53 = vmul.f32 %v10431_v17, %v10431_v17  ;;  %v4533_v41 = vmul.f32 %v10435_v33, %v10435_v33  ;;  %v10463_v51 = vsub.f32 %v10199_v12, %v10409_v52  ;;  %v10469_v24 = vsub.f32 %v10205_v43, %v10409_v52 }
 0x34c   : > { %v4534_v50 = vmul.f32 %v10439_v58, %v10439_v58  ;;  %v4535_v26 = vmul.f32 %v10447_v45, %v10447_v45  ;;  %v4536_v19 = vmul.f32 %v10451_v49, %v10451_v49  ;;  %v4537_v8 = vmul.f32 %v10457_v11, %v10457_v11 }
 0x34d   : > { %v4564_v16 = vadd.f32 %v4533_v41, %v4532_v53  ;;  %v10475_v6 = vsub.f32 %v10220_v29, %v10409_v52  ;;  %v4538_v12 = vmul.f32 %v10463_v51, %v10463_v51  ;;  %v10481_v9 = vsub.f32 %v10329_v3, %v10409_v52 }
 0x34e   : > { %v4539_v43 = vmul.f32 %v10469_v24, %v10469_v24  ;;  %v10487_v7 = vsub.f32 %v10242_v42, %v10409_v52  ;;  %v10493_v54 = vsub.f32 %v10338_v35, %v10409_v52  ;;  %v10499_v15 = vsub.f32 %v10262_v57, %v10409_v52 }
 0x34f   : > { %v4565_v59 = vadd.f32 %v4564_v16, %v4534_v50  ;;  %v4540_v29 = vmul.f32 %v10475_v6, %v10475_v6  ;;  %v4541_v3 = vmul.f32 %v10481_v9, %v10481_v9  ;;  %v10505_v5 = vsub.f32 %v10347_v44, %v10409_v52 }
 0x350   : > { %v4542_v42 = vmul.f32 %v10487_v7, %v10487_v7  ;;  %v4543_v35 = vmul.f32 %v10493_v54, %v10493_v54  ;;  %v10511_v18 = vsub.f32 %v10272_v13, %v10409_v52  ;;  %v4544_v57 = vmul.f32 %v10499_v15, %v10499_v15 }
 0x351   : > { %v4566_v40 = vadd.f32 %v4565_v59, %v4535_v26  ;;  %v10517_v22 = vsub.f32 %v10356_v56, %v10409_v52  ;;  %v4545_v44 = vmul.f32 %v10505_v5, %v10505_v5  ;;  %v10523_v55 = vsub.f32 %v10281_v61, %v10409_v52 }
 0x352   : > { %v4546_v13 = vmul.f32 %v10511_v18, %v10511_v18  ;;  %v10529_v41 = vsub.f32 %v10366_v34, %v10409_v52  ;;  %v10535_v50 = vsub.f32 %v10292_v0, %v10409_v52  ;;  %v10541_v26 = vsub.f32 %v10375_v1, %v10409_v52 }
 0x353   : > { %v4567_v48 = vadd.f32 %v4566_v40, %v4536_v19  ;;  %v4547_v56 = vmul.f32 %v10517_v22, %v10517_v22  ;;  %v4548_v61 = vmul.f32 %v10523_v55, %v10523_v55  ;;  %v10547_v19 = vsub.f32 %v10303_v62, %v10409_v52 }
 0x354   : > { %v4549_v34 = vmul.f32 %v10529_v41, %v10529_v41  ;;  %v4550_v0 = vmul.f32 %v10535_v50, %v10535_v50  ;;  %v4551_v1 = vmul.f32 %v10541_v26, %v10541_v26 }
 0x355   : > { %v4568_v31 = vadd.f32 %v4567_v48, %v4537_v8  ;;  %v10553_v8 = vsub.f32 %v10383_v30, %v10409_v52  ;;  %v4552_v62 = vmul.f32 %v10547_v19, %v10547_v19 }
 0x357   : > { %v4569_v14 = vadd.f32 %v4568_v31, %v4538_v12  ;;  %v10559_v12 = vsub.f32 %v10387_v20, %v10409_v52  ;;  %v4553_v30 = vmul.f32 %v10553_v8, %v10553_v8 }
 0x359   : > { %v4570_v4 = vadd.f32 %v4569_v14, %v4539_v43  ;;  %v10565_v43 = vsub.f32 %v10391_v38, %v10409_v52  ;;  %v4554_v20 = vmul.f32 %v10559_v12, %v10559_v12 }
 0x35b   : > { %v4571_v25 = vadd.f32 %v4570_v4, %v4540_v29  ;;  %v10571_v29 = vsub.f32 %v10394_v10, %v10409_v52  ;;  %v4555_v38 = vmul.f32 %v10565_v43, %v10565_v43 }
 0x35d   : > { %v4572_v23 = vadd.f32 %v4571_v25, %v4541_v3  ;;  %v10577_v3 = vsub.f32 %v10398_v27, %v10409_v52  ;;  %v4559_v27 = vmul.f32 %v10415_v28, %v10415_v28 }
 0x35f   : > { %v4573_v63 = vadd.f32 %v4572_v23, %v4542_v42  ;;  %v4556_v42 = vmul.f32 %v10571_v29, %v10571_v29  ;;  %v4557_v10 = vmul.f32 %v10577_v3, %v10577_v3 }
 0x361   : > { %v4574_v36 = vadd.f32 %v4573_v63, %v4543_v35  ;;  %v4558_v63 = vmul.f32 %v10412_v32, %v10412_v32 }
 0x363   : > { %v4575_v37 = vadd.f32 %v4574_v36, %v4544_v57  ;;  %v4560_v36 = vmul.f32 %v10418_v2, %v10418_v2 }
 0x365   : > { %v4576_v53 = vadd.f32 %v4575_v37, %v4545_v44  ;;  %v4561_v37 = vmul.f32 %v10421_v60, %v10421_v60 }
 0x367   : > { %v4577_v46 = vadd.f32 %v4576_v53, %v4546_v13  ;;  %v4562_v53 = vmul.f32 %v10424_v47, %v10424_v47 }
 0x369   : > { %v4578_v16 = vadd.f32 %v4577_v46, %v4547_v56  ;;  %v4563_v46 = vmul.f32 %v10427_v21, %v10427_v21 }
 0x36b   : > { %v4579_v59 = vadd.f32 %v4578_v16, %v4548_v61  ;;  %v8531_v16 = vld [vmem:[#allocation3 + $0x38] sm:$0xff] }
 0x36c   : > { %5150 = vmatpush.bf16.msrb.mxu2 %v8531_v16  ;;  %v8697_v16 = vld [vmem:[#allocation2 + $0x18] sm:$0xff] }
 0x36d   : > { %v4580_v40 = vadd.f32 %v4579_v59, %v4549_v34  ;;  %v8547_v59 = vld [vmem:[#allocation3 + $0xb8] sm:$0xff] }
 0x36e   : > { %5352 = vmatpush.bf16.msrb.mxu3 %v8547_v59 }
 0x36f   : > { %v4581_v48 = vadd.f32 %v4580_v40, %v4550_v0  ;;  %v8530_v40 = vld [vmem:[#allocation3 + $0x30] sm:$0xff] }
 0x370   : > { %5151 = vmatpush.bf16.msrb.mxu2 %v8530_v40  ;;  %v5240_v40 = vld [vmem:[#allocation2 + $0xa] sm:$0xff] }
 0x371   : > { %v4582_v31 = vadd.f32 %v4581_v48, %v4551_v1  ;;  %v8546_v48 = vld [vmem:[#allocation3 + $0xb0] sm:$0xff] }
 0x372   : > { %5353 = vmatpush.bf16.msrb.mxu3 %v8546_v48 }
 0x373   : > { %v4583_v14 = vadd.f32 %v4582_v31, %v4552_v62  ;;  %v8529_v31 = vld [vmem:[#allocation3 + $0x28] sm:$0xff] }
 0x374   : > { %5152 = vmatpush.bf16.msrb.mxu2 %v8529_v31  ;;  %v10601_v31 = vld [vmem:[%s11653_s2] ss:$0 sm:$0xff] }
 0x375   : > { %v4584_v4 = vadd.f32 %v4583_v14, %v4553_v30  ;;  %v8545_v14 = vld [vmem:[#allocation3 + $0xa8] sm:$0xff] }
 0x376   : > { %5354 = vmatpush.bf16.msrb.mxu3 %v8545_v14  ;;  %v10608_v14 = vld [vmem:[%s11654_s3] ss:$0 sm:$0xff] }
 0x377   : > { %v4585_v25 = vadd.f32 %v4584_v4, %v4554_v20  ;;  %v8528_v4 = vld [vmem:[#allocation3 + $0x20] sm:$0xff] }
 0x378   : > { %5153 = vmatpush.bf16.msrb.mxu2 %v8528_v4  ;;  %v8555_v4 = vld [vmem:[#allocation3 + $0xf8] sm:$0xff] }
 0x379   : > { %v4586_v23 = vadd.f32 %v4585_v25, %v4555_v38  ;;  %v8544_v25 = vld [vmem:[#allocation3 + $0xa0] sm:$0xff]  ;;  %5586 = vmatpush.bf16.msrb.mxu0 %v8555_v4 }
 0x37a   : > { %5355 = vmatpush.bf16.msrb.mxu3 %v8544_v25 }
 0x37b   : > { %v4587_v35 = vadd.f32 %v4586_v23, %v4556_v42  ;;  %v8527_v23 = vld [vmem:[#allocation3 + $0x18] sm:$0xff] }
 0x37c   : > { %5154 = vmatpush.bf16.msrb.mxu2 %v8527_v23 }
 0x37d   : > { %v4588_v57 = vadd.f32 %v4587_v35, %v4557_v10  ;;  %v8543_v35 = vld [vmem:[#allocation3 + $0x98] sm:$0xff] }
 0x37e   : > { %5356 = vmatpush.bf16.msrb.mxu3 %v8543_v35 }
 0x37f   : > { %v4589_v52 = vadd.f32 %v4588_v57, %v4558_v63  ;;  %v8526_v63 = vld [vmem:[#allocation3 + $0x10] sm:$0xff] }
 0x380   : > { %5155 = vmatpush.bf16.msrb.mxu2 %v8526_v63  ;;  %v8542_v57 = vld [vmem:[#allocation3 + $0x90] sm:$0xff] }
 0x381   : > { %v4590_v44 = vadd.f32 %v4589_v52, %v4559_v27  ;;  %v8525_v27 = vld [vmem:[#allocation3 + $0x8] sm:$0xff] }
 0x382   : > { %5357 = vmatpush.bf16.msrb.mxu3 %v8542_v57 }
 0x383   : > { %v4591_v13 = vadd.f32 %v4590_v44, %v4560_v36  ;;  %v8534_v44 = vld [vmem:[#allocation3 + $0x50] sm:$0xff] }
 0x384   : > { %5156 = vmatpush.bf16.msrb.mxu2 %v8525_v27  ;;  %5018 = vmatpush.bf16.msra.mxu1 %v8534_v44  ;;  %v8554_v27 = vld [vmem:[#allocation3 + $0xf0] sm:$0xff] }
 0x385   : > { %v4592_v56 = vadd.f32 %v4591_v13, %v4561_v37  ;;  %v8541_v37 = vld [vmem:[#allocation3 + $0x88] sm:$0xff]  ;;  %5587 = vmatpush.bf16.msrb.mxu0 %v8554_v27 }
 0x386   : > { %5358 = vmatpush.bf16.msrb.mxu3 %v8541_v37 }
 0x387   : > { %v4593_v61 = vadd.f32 %v4592_v56, %v4562_v53  ;;  %v8524_v53 = vld [vmem:[#allocation3] sm:$0xff] }
 0x388   : > { %5157 = vmatpush.bf16.msrb.mxu2 %v8524_v53 }
 0x389   : > { %v4594_v34 = vadd.f32 %v4593_v61, %v4563_v46  ;;  %v8533_v46 = vld [vmem:[#allocation3 + $0x48] sm:$0xff]  ;;  %v8540_v61 = vld [vmem:[#allocation3 + $0x80] sm:$0xff] }
 0x38a   : > { %5019 = vmatpush.bf16.msra.mxu1 %v8533_v46  ;;  %5359 = vmatpush.bf16.msrb.mxu3 %v8540_v61 }
 0x38b   : > { %v4595_v0 = vrot.slane %v4594_v34, 4 }
 0x38d   : > { %v4596_v1 = vadd.f32 %v4595_v0, %v4594_v34  ;;  %v4868_v34 = vpack.c.bf16 %v8697_v16, %v8697_v16  ;;  %v5239_v0 = vld [vmem:[#allocation2 + $0x2] sm:$0xff] }
 0x38f   : > { %v4597_v62 = vrot.slane %v4596_v1, 2  ;;  %5158 = vmatmul.bf16.vlgmr.msrb.gmra.mxu2 %v4868_v34  ;;  %v8552_v34 = vld [vmem:[#allocation3 + $0xe0] sm:$0xff] }
 0x391   : > { %v4598_v30 = vadd.f32 %v4597_v62, %v4596_v1  ;;  %v5271_v1 = vpack.c.bf16 %v5240_v40, %v5239_v0  ;;  %v8532_v62 = vld [vmem:[#allocation3 + $0x40] sm:$0xff] }
 0x392   : > { %5020 = vmatpush.bf16.msra.mxu1 %v8532_v62 }
 0x393   : > { %v4599_v20 = vrot.slane %v4598_v30, 1  ;;  %5360 = vmatmul.bf16.vlgmr.msrb.gmra.mxu3 %v5271_v1 }
 0x395   : > { %v4600_v38 = vadd.f32 %v4599_v20, %v4598_v30 }
 0x397   : > { %v4601_v42 = vmul.f32 %v4600_v38, %v10406_v39 }
 0x399   : > { %v4602_v10 = vadd.f32 1e-05, %v4601_v42 }
 0x39b   : > { %8676 = vrsqrt.f32 %v4602_v10  ;;  %vm4609_vm8 = vweird.f32 %v4602_v10 }
 0x3a1   : > { %v8677_v52 = vpop.eup %8676 }
 0x3a2   : > { %v4604_v36 = vmul.f32 %v8677_v52, %v4602_v10  ;;  %vm4610_vm7 = vweird.f32 %v8677_v52 }
 0x3a3   : > { %vm4611_vm9 = vmor %vm4609_vm8, %vm4610_vm7 }
 0x3a4   : > { %v4605_v13 = vmul.f32 %v8677_v52, %v4604_v36  ;;  %v8553_v36 = vld [vmem:[#allocation3 + $0xe8] sm:$0xff] }
 0x3a5   : > { %5588 = vmatpush.bf16.msrb.mxu0 %v8553_v36 }
 0x3a6   : > { %v4606_v56 = vmul.f32 0.5, %v4605_v13 }
 0x3a8   : > { %v4607_v59 = vsub.f32 1.5, %v4606_v56 }
 0x3a9   : > { %5589 = vmatpush.bf16.msrb.mxu0 %v8552_v34 }
 0x3aa   : > { %v4608_v48 = vmul.f32 %v8677_v52, %v4607_v59 }
 0x3ac   : > { %v10603_v30 = vsel %vm4611_vm9, %v8677_v52, %v4608_v48 }
 0x3ad   : > { %v4644_v20 = vmul.f32 %v10603_v30, %v10427_v21  ;;  %v4613_v25 = vmul.f32 %v10603_v30, %v10431_v17  ;;  %v4614_v42 = vmul.f32 %v10603_v30, %v10435_v33  ;;  %v4615_v23 = vmul.f32 %v10603_v30, %v10439_v58 }
 0x3ae   : > { %v4616_v10 = vmul.f32 %v10603_v30, %v10447_v45  ;;  %v4617_v35 = vmul.f32 %v10603_v30, %v10451_v49  ;;  %v4618_v21 = vmul.f32 %v10603_v30, %v10457_v11  ;;  %v4619_v63 = vmul.f32 %v10603_v30, %v10463_v51 }
 0x3af   : > { %v4680_v38 = vmul.f32 %v10601_v31, %v4644_v20  ;;  %v4620_v33 = vmul.f32 %v10603_v30, %v10469_v24  ;;  %v4621_v58 = vmul.f32 %v10603_v30, %v10475_v6  ;;  %v4622_v45 = vmul.f32 %v10603_v30, %v10481_v9 }
 0x3b0   : > { %v4623_v49 = vmul.f32 %v10603_v30, %v10487_v7  ;;  %v4624_v11 = vmul.f32 %v10603_v30, %v10493_v54  ;;  %v4625_v51 = vmul.f32 %v10603_v30, %v10499_v15  ;;  %v4626_v57 = vmul.f32 %v10603_v30, %v10505_v5 }
 0x3b1   : > { %v4716_v17 = vadd.f32 %v10608_v14, %v4680_v38  ;;  %v4627_v6 = vmul.f32 %v10603_v30, %v10511_v18  ;;  %v4628_v9 = vmul.f32 %v10603_v30, %v10517_v22  ;;  %v4629_v7 = vmul.f32 %v10603_v30, %v10523_v55 }
 0x3b2   : > { %v4630_v54 = vmul.f32 %v10603_v30, %v10529_v41  ;;  %v4631_v15 = vmul.f32 %v10603_v30, %v10535_v50  ;;  %v4632_v5 = vmul.f32 %v10603_v30, %v10541_v26  ;;  %v4633_v52 = vmul.f32 %v10603_v30, %v10547_v19 }
 0x3b3   : > { %v4748_v24 = vmax.f32 %v4716_v17, 0.0  ;;  %v4634_v18 = vmul.f32 %v10603_v30, %v10553_v8  ;;  %v4635_v22 = vmul.f32 %v10603_v30, %v10559_v12  ;;  %v4636_v55 = vmul.f32 %v10603_v30, %v10565_v43  ;;  %v8551_v17 = vld [vmem:[#allocation3 + $0xd8] sm:$0xff] }
 0x3b4   : > { %v4637_v41 = vmul.f32 %v10603_v30, %v10571_v29  ;;  %v4638_v50 = vmul.f32 %v10603_v30, %v10577_v3  ;;  %v4639_v26 = vmul.f32 %v10603_v30, %v10412_v32  ;;  %v4640_v19 = vmul.f32 %v10603_v30, %v10415_v28  ;;  %5590 = vmatpush.bf16.msrb.mxu0 %v8551_v17 }
 0x3b5   : > { %4835 = vst [vmem:[#allocation2 + $0x189] sm:$0xff] %v4748_v24  ;;  %v4641_v8 = vmul.f32 %v10603_v30, %v10418_v2  ;;  %v4642_v12 = vmul.f32 %v10603_v30, %v10421_v60  ;;  %v4649_v43 = vmul.f32 %v10601_v31, %v4613_v25  ;;  %v4650_v29 = vmul.f32 %v10601_v31, %v4614_v42 }
 0x3b6   : > { %v4651_v44 = vmul.f32 %v10601_v31, %v4615_v23  ;;  %v4652_v3 = vmul.f32 %v10601_v31, %v4616_v10  ;;  %v4653_v32 = vmul.f32 %v10601_v31, %v4617_v35  ;;  %v4654_v37 = vmul.f32 %v10601_v31, %v4618_v21 }
 0x3b7   : > { %v4655_v28 = vmul.f32 %v10601_v31, %v4619_v63  ;;  %v4656_v2 = vmul.f32 %v10601_v31, %v4620_v33  ;;  %v4657_v13 = vmul.f32 %v10601_v31, %v4621_v58  ;;  %v4658_v60 = vmul.f32 %v10601_v31, %v4622_v45 }
 0x3b8   : > { %v4659_v53 = vmul.f32 %v10601_v31, %v4623_v49  ;;  %v4660_v56 = vmul.f32 %v10601_v31, %v4624_v11  ;;  %v4661_v46 = vmul.f32 %v10601_v31, %v4625_v51  ;;  %v4662_v61 = vmul.f32 %v10601_v31, %v4626_v57 }
 0x3b9   : > { %v4663_v16 = vmul.f32 %v10601_v31, %v4627_v6  ;;  %v4664_v59 = vmul.f32 %v10601_v31, %v4628_v9  ;;  %v4665_v0 = vmul.f32 %v10601_v31, %v4629_v7  ;;  %v4666_v40 = vmul.f32 %v10601_v31, %v4630_v54 }
 0x3ba   : > { %v4667_v1 = vmul.f32 %v10601_v31, %v4631_v15  ;;  %v4668_v48 = vmul.f32 %v10601_v31, %v4632_v5  ;;  %v4669_v62 = vmul.f32 %v10601_v31, %v4633_v52  ;;  %v4670_v20 = vmul.f32 %v10601_v31, %v4634_v18  ;;  %v8550_v18 = vld [vmem:[#allocation3 + $0xd0] sm:$0xff] }
 0x3bb   : > { %v4671_v4 = vmul.f32 %v10601_v31, %v4635_v22  ;;  %v4672_v38 = vmul.f32 %v10601_v31, %v4636_v55  ;;  %v4673_v25 = vmul.f32 %v10601_v31, %v4637_v41  ;;  %v4674_v42 = vmul.f32 %v10601_v31, %v4638_v50  ;;  %5591 = vmatpush.bf16.msrb.mxu0 %v8550_v18 }
 0x3bc   : > { %v4675_v23 = vmul.f32 %v10601_v31, %v4639_v26  ;;  %v4676_v10 = vmul.f32 %v10601_v31, %v4640_v19  ;;  %v4677_v35 = vmul.f32 %v10601_v31, %v4641_v8  ;;  %v4678_v21 = vmul.f32 %v10601_v31, %v4642_v12 }
 0x3bd   : > { %v10705_v63 = vadd.f32 %v10608_v14, %v4649_v43  ;;  %v10708_v33 = vadd.f32 %v10608_v14, %v4650_v29  ;;  %v10711_v58 = vadd.f32 %v10608_v14, %v4651_v44  ;;  %v10714_v45 = vadd.f32 %v10608_v14, %v4652_v3  ;;  %v8563_v3 = vld [vmem:[#allocation3 + $0x138] sm:$0xff] }
 0x3be   : > { %v10717_v49 = vadd.f32 %v10608_v14, %v4653_v32  ;;  %v10720_v11 = vadd.f32 %v10608_v14, %v4654_v37  ;;  %v10723_v51 = vadd.f32 %v10608_v14, %v4655_v28  ;;  %v10726_v57 = vadd.f32 %v10608_v14, %v4656_v2  ;;  %v8549_v32 = vld [vmem:[#allocation3 + $0xc8] sm:$0xff]  ;;  %5820 = vmatpush.bf16.msrb.mxu1 %v8563_v3  ;;  %v8562_v3 = vld [vmem:[#allocation3 + $0x130] sm:$0xff] }
 0x3bf   : > { %v10729_v27 = vadd.f32 %v10608_v14, %v4657_v13  ;;  %v10732_v24 = vadd.f32 %v10608_v14, %v4658_v60  ;;  %v10735_v6 = vadd.f32 %v10608_v14, %v4659_v53  ;;  %v10738_v9 = vadd.f32 %v10608_v14, %v4660_v56  ;;  %5592 = vmatpush.bf16.msrb.mxu0 %v8549_v32 }
 0x3c0   : > { %v10741_v7 = vadd.f32 %v10608_v14, %v4661_v46  ;;  %v10744_v54 = vadd.f32 %v10608_v14, %v4662_v61  ;;  %v10747_v15 = vadd.f32 %v10608_v14, %v4663_v16  ;;  %v10750_v5 = vadd.f32 %v10608_v14, %v4664_v59 }
 0x3c1   : > { %v10753_v52 = vadd.f32 %v10608_v14, %v4665_v0  ;;  %v10756_v22 = vadd.f32 %v10608_v14, %v4666_v40  ;;  %v10759_v55 = vadd.f32 %v10608_v14, %v4667_v1  ;;  %v10762_v41 = vadd.f32 %v10608_v14, %v4668_v48  ;;  %v8548_v0 = vld [vmem:[#allocation3 + $0xc0] sm:$0xff] }
 0x3c2   : > { %v10765_v50 = vadd.f32 %v10608_v14, %v4669_v62  ;;  %v10768_v26 = vadd.f32 %v10608_v14, %v4670_v20  ;;  %v10771_v19 = vadd.f32 %v10608_v14, %v4671_v4  ;;  %v10774_v8 = vadd.f32 %v10608_v14, %v4672_v38  ;;  %v4900_v20 = vld [vmem:[#allocation2 + $0x1] sm:$0xff]  ;;  %5821 = vmatpush.bf16.msrb.mxu1 %v8562_v3 }
 0x3c3   : > { %v10777_v36 = vadd.f32 %v10608_v14, %v4673_v25  ;;  %v10780_v12 = vadd.f32 %v10608_v14, %v4674_v42  ;;  %v4717_v43 = vmax.f32 %v10705_v63, 0.0  ;;  %v4718_v29 = vmax.f32 %v10708_v33, 0.0  ;;  %5593 = vmatpush.bf16.msrb.mxu0 %v8548_v0 }
 0x3c4   : > { %v4719_v44 = vmax.f32 %v10711_v58, 0.0  ;;  %v10786_v37 = vadd.f32 %v10608_v14, %v4675_v23  ;;  %v10789_v28 = vadd.f32 %v10608_v14, %v4676_v10  ;;  %v10792_v2 = vadd.f32 %v10608_v14, %v4677_v35  ;;  %v4901_v23 = vld [vmem:[#allocation2 + $0x9] sm:$0xff] }
 0x3c5   : > { %v4720_v13 = vmax.f32 %v10714_v45, 0.0  ;;  %v10796_v60 = vadd.f32 %v10608_v14, %v4678_v21  ;;  %v4721_v53 = vmax.f32 %v10717_v49, 0.0  ;;  %v4722_v56 = vmax.f32 %v10720_v11, 0.0  ;;  %4804 = vst [vmem:[#allocation2 + $0x19] sm:$0xff] %v4717_v43  ;;  %v8560_v49 = vld [vmem:[#allocation3 + $0x120] sm:$0xff] }
 0x3c6   : > { %v4723_v46 = vmax.f32 %v10723_v51, 0.0  ;;  %v4724_v61 = vmax.f32 %v10726_v57, 0.0  ;;  %v4725_v16 = vmax.f32 %v10729_v27, 0.0  ;;  %v4726_v34 = vmax.f32 %v10732_v24, 0.0  ;;  %4805 = vst [vmem:[#allocation2 + $0x21] sm:$0xff] %v4718_v29 }
 0x3c7   : > { %v4727_v59 = vmax.f32 %v10735_v6, 0.0  ;;  %v4728_v40 = vmax.f32 %v10738_v9, 0.0  ;;  %v4729_v1 = vmax.f32 %v10741_v7, 0.0  ;;  %v4730_v48 = vmax.f32 %v10744_v54, 0.0  ;;  %4806 = vst [vmem:[#allocation2 + $0x31] sm:$0xff] %v4719_v44 }
 0x3c8   : > { %v4731_v62 = vmax.f32 %v10747_v15, 0.0  ;;  %v4732_v4 = vmax.f32 %v10750_v5, 0.0  ;;  %v4733_v38 = vmax.f32 %v10753_v52, 0.0  ;;  %v4734_v25 = vmax.f32 %v10756_v22, 0.0  ;;  %4807 = vst [vmem:[#allocation2 + $0x39] sm:$0xff] %v4720_v13 }
 0x3c9   : > { %v4735_v42 = vmax.f32 %v10759_v55, 0.0  ;;  %v4736_v10 = vmax.f32 %v10762_v41, 0.0  ;;  %v4737_v35 = vmax.f32 %v10765_v50, 0.0  ;;  %v4738_v21 = vmax.f32 %v10768_v26, 0.0  ;;  %4808 = vst [vmem:[#allocation2 + $0x49] sm:$0xff] %v4721_v53 }
 0x3ca   : > { %v4739_v17 = vmax.f32 %v10771_v19, 0.0  ;;  %v4740_v51 = vmax.f32 %v10774_v8, 0.0  ;;  %v4741_v57 = vmax.f32 %v10777_v36, 0.0  ;;  %v4742_v27 = vmax.f32 %v10780_v12, 0.0  ;;  %4809 = vst [vmem:[#allocation2 + $0x51] sm:$0xff] %v4722_v56 }
 0x3cb   : > { %v4743_v24 = vmax.f32 %v10786_v37, 0.0  ;;  %v4744_v6 = vmax.f32 %v10789_v28, 0.0  ;;  %v4745_v9 = vmax.f32 %v10792_v2, 0.0  ;;  %v4746_v7 = vmax.f32 %v10796_v60, 0.0  ;;  %4810 = vst [vmem:[#allocation2 + $0x61] sm:$0xff] %v4723_v46 }
 0x3cc   : > { %v4932_v54 = vpack.c.bf16 %v4901_v23, %v4900_v20  ;;  %4811 = vst [vmem:[#allocation2 + $0x69] sm:$0xff] %v4724_v61  ;;  %v4838_v15 = vld [vmem:[#allocation2 + $0x18] sm:$0xff]  ;;  %v10836_v5 = vpack.c.bf16 %v4724_v61, %v4723_v46  ;;  %v10838_v52 = vpack.c.bf16 %v4726_v34, %v4725_v16  ;;  %v10840_v18 = vpack.c.bf16 %v4728_v40, %v4727_v59 }
 0x3cd   : > { %v10842_v22 = vpack.c.bf16 %v4730_v48, %v4729_v1  ;;  %4812 = vst [vmem:[#allocation2 + $0x79] sm:$0xff] %v4725_v16  ;;  %v4839_v55 = vld [vmem:[#allocation2 + $0x20] sm:$0xff]  ;;  %v10844_v26 = vpack.c.bf16 %v4732_v4, %v4731_v62  ;;  %v10846_v19 = vpack.c.bf16 %v4734_v25, %v4733_v38  ;;  %v10848_v8 = vpack.c.bf16 %v4736_v10, %v4735_v42 }
 0x3ce   : > { %5021 = vmatmul.bf16.vlgmr.msra.gmra.mxu1 %v4932_v54  ;;  %v5241_v41 = vld [vmem:[#allocation2 + $0x1a] sm:$0xff]  ;;  %v5242_v50 = vld [vmem:[#allocation2 + $0x22] sm:$0xff]  ;;  %4813 = vst [vmem:[#allocation2 + $0x81] sm:$0xff] %v4726_v34  ;;  %v4869_v36 = vpack.c.bf16 %v4839_v55, %v4838_v15  ;;  %v10852_v32 = vpack.c.bf16 %v4738_v21, %v4737_v35  ;;  %v10854_v37 = vpack.c.bf16 %v4740_v51, %v4739_v17 }
 0x3cf   : > { %v10850_v12 = vpack.c.bf16 %v5242_v50, %v5241_v41  ;;  %4814 = vst [vmem:[#allocation2 + $0x91] sm:$0xff] %v4727_v59  ;;  %v10856_v28 = vpack.c.bf16 %v4742_v27, %v4741_v57  ;;  %v10858_v2 = vpack.c.bf16 %v4744_v6, %v4743_v24  ;;  %v10862_v46 = vpack.c.bf16 %v4746_v7, %v4745_v9  ;;  %v4840_v59 = vld [vmem:[#allocation2 + $0x30] sm:$0xff] }
 0x3d0   : > { %4815 = vst [vmem:[#allocation2 + $0x99] sm:$0xff] %v4728_v40  ;;  %5163 = vmatmul.bf16.gmra.mxu2 %v4869_v36  ;;  %5594 = vmatmul.bf16.vlgmr.msrb.gmra.mxu0 %v4869_v36  ;;  %v4643_v61 = vmul.f32 %v10603_v30, %v10424_v47  ;;  %v4933_v34 = vpack.c.bf16 %v4718_v29, %v4717_v43  ;;  %v4841_v47 = vld [vmem:[#allocation2 + $0x38] sm:$0xff] }
 0x3d1   : > { %5365 = vmatmul.bf16.gmra.mxu3 %v10850_v12  ;;  %4816 = vst [vmem:[#allocation2 + $0xa9] sm:$0xff] %v4729_v1  ;;  %v5243_v30 = vld [vmem:[#allocation2 + $0x32] sm:$0xff]  ;;  %v5244_v40 = vld [vmem:[#allocation2 + $0x3a] sm:$0xff]  ;;  %v4934_v33 = vpack.c.bf16 %v4720_v13, %v4719_v44  ;;  %v5245_v29 = vld [vmem:[#allocation2 + $0x4a] sm:$0xff]  ;;  %v4935_v45 = vpack.c.bf16 %v4722_v56, %v4721_v53 }
 0x3d2   : > { %4817 = vst [vmem:[#allocation2 + $0xb1] sm:$0xff] %v4730_v48  ;;  %v4679_v16 = vmul.f32 %v10601_v31, %v4643_v61  ;;  %v10873_v31 = vpack.c.bf16 %v4841_v47, %v4840_v59  ;;  %v10875_v1 = vpack.c.bf16 %v5244_v40, %v5243_v30  ;;  %v4843_v43 = vld [vmem:[#allocation2 + $0x50] sm:$0xff]  ;;  %v4844_v58 = vld [vmem:[#allocation2 + $0x60] sm:$0xff] }
 0x3d3   : > { %4818 = vst [vmem:[#allocation2 + $0xc1] sm:$0xff] %v4731_v62  ;;  %v5246_v48 = vld [vmem:[#allocation2 + $0x52] sm:$0xff]  ;;  %v4845_v44 = vld [vmem:[#allocation2 + $0x68] sm:$0xff] }
 0x3d4   : > { %4819 = vst [vmem:[#allocation2 + $0xc9] sm:$0xff] %v4732_v4  ;;  %v4715_v0 = vadd.f32 %v10608_v14, %v4679_v16  ;;  %v4842_v14 = vld [vmem:[#allocation2 + $0x48] sm:$0xff]  ;;  %v8561_v62 = vld [vmem:[#allocation3 + $0x128] sm:$0xff]  ;;  %v10888_v4 = vpack.c.bf16 %v5246_v48, %v5245_v29 }
 0x3d5   : > { %4820 = vst [vmem:[#allocation2 + $0xd9] sm:$0xff] %v4733_v38  ;;  %v10886_v20 = vpack.c.bf16 %v4843_v43, %v4842_v14  ;;  %5822 = vmatpush.bf16.msrb.mxu1 %v8561_v62  ;;  %v5247_v13 = vld [vmem:[#allocation2 + $0x62] sm:$0xff]  ;;  %v5248_v60 = vld [vmem:[#allocation2 + $0x6a] sm:$0xff]  ;;  %v10897_v38 = vpack.c.bf16 %v4845_v44, %v4844_v58 }
 0x3d6   : > { %4821 = vst [vmem:[#allocation2 + $0xe1] sm:$0xff] %v4734_v25  ;;  %v4747_v63 = vmax.f32 %v4715_v0, 0.0  ;;  %v5275_v25 = vpack.c.bf16 %v5248_v60, %v5247_v13  ;;  %v4847_v23 = vld [vmem:[#allocation2 + $0x80] sm:$0xff]  ;;  %v4848_v56 = vld [vmem:[#allocation2 + $0x90] sm:$0xff] }
 0x3d7   : > { %4822 = vst [vmem:[#allocation2 + $0xf1] sm:$0xff] %v4735_v42  ;;  %v4846_v42 = vld [vmem:[#allocation2 + $0x78] sm:$0xff] }
 0x3d8   : > { %4823 = vst [vmem:[#allocation2 + $0xf9] sm:$0xff] %v4736_v10  ;;  %v5249_v10 = vld [vmem:[#allocation2 + $0x7a] sm:$0xff]  ;;  %v10902_v11 = vpack.c.bf16 %v4847_v23, %v4846_v42 }
 0x3d9   : > { %4824 = vst [vmem:[#allocation2 + $0x109] sm:$0xff] %v4737_v35  ;;  %v5250_v35 = vld [vmem:[#allocation2 + $0x82] sm:$0xff]  ;;  %5823 = vmatpush.bf16.msrb.mxu1 %v8560_v49 }
 0x3da   : > { %4825 = vst [vmem:[#allocation2 + $0x111] sm:$0xff] %v4738_v21  ;;  %v5276_v53 = vpack.c.bf16 %v5250_v35, %v5249_v10  ;;  %v4849_v21 = vld [vmem:[#allocation2 + $0x98] sm:$0xff]  ;;  %v4852_v55 = vld [vmem:[#allocation2 + $0xc0] sm:$0xff] }
 0x3db   : > { %4826 = vst [vmem:[#allocation2 + $0x121] sm:$0xff] %v4739_v17  ;;  %v5251_v17 = vld [vmem:[#allocation2 + $0x92] sm:$0xff]  ;;  %v5255_v41 = vld [vmem:[#allocation2 + $0xc2] sm:$0xff]  ;;  %v5256_v50 = vld [vmem:[#allocation2 + $0xca] sm:$0xff] }
 0x3dc   : > { %4827 = vst [vmem:[#allocation2 + $0x129] sm:$0xff] %v4740_v51  ;;  %v5252_v51 = vld [vmem:[#allocation2 + $0x9a] sm:$0xff]  ;;  %v5279_v3 = vpack.c.bf16 %v5256_v50, %v5255_v41 }
 0x3dd   : > { %4828 = vst [vmem:[#allocation2 + $0x139] sm:$0xff] %v4741_v57  ;;  %v4874_v57 = vpack.c.bf16 %v4849_v21, %v4848_v56  ;;  %v4855_v30 = vld [vmem:[#allocation2 + $0xe0] sm:$0xff] }
 0x3de   : > { %5026 = vmatmul.bf16.gmra.mxu1 %v4933_v34  ;;  %4829 = vst [vmem:[#allocation2 + $0x141] sm:$0xff] %v4742_v27  ;;  %v5277_v27 = vpack.c.bf16 %v5252_v51, %v5251_v17  ;;  %v4854_v34 = vld [vmem:[#allocation2 + $0xd8] sm:$0xff] }
 0x3df   : > { %4830 = vst [vmem:[#allocation2 + $0x151] sm:$0xff] %v4743_v24  ;;  %v4850_v24 = vld [vmem:[#allocation2 + $0xa8] sm:$0xff]  ;;  %v5257_v40 = vld [vmem:[#allocation2 + $0xda] sm:$0xff]  ;;  %v4877_v43 = vpack.c.bf16 %v4855_v30, %v4854_v34 }
 0x3e0   : > { %4831 = vst [vmem:[#allocation2 + $0x159] sm:$0xff] %v4744_v6  ;;  %5168 = vmatmul.bf16.gmra.mxu2 %v10873_v31  ;;  %5599 = vmatmul.bf16.gmra.mxu0 %v10873_v31  ;;  %v4851_v6 = vld [vmem:[#allocation2 + $0xb0] sm:$0xff]  ;;  %v4857_v49 = vld [vmem:[#allocation2 + $0xf8] sm:$0xff] }
 0x3e1   : > { %5370 = vmatmul.bf16.gmra.mxu3 %v10875_v1  ;;  %4832 = vst [vmem:[#allocation2 + $0x169] sm:$0xff] %v4745_v9  ;;  %v5253_v9 = vld [vmem:[#allocation2 + $0xaa] sm:$0xff]  ;;  %v4875_v54 = vpack.c.bf16 %v4851_v6, %v4850_v24  ;;  %v5260_v56 = vld [vmem:[#allocation2 + $0xfa] sm:$0xff] }
 0x3e2   : > { %4833 = vst [vmem:[#allocation2 + $0x171] sm:$0xff] %v4746_v7  ;;  %v5254_v7 = vld [vmem:[#allocation2 + $0xb2] sm:$0xff] }
 0x3e3   : > { %4834 = vst [vmem:[#allocation2 + $0x181] sm:$0xff] %v4747_v63  ;;  %v5278_v15 = vpack.c.bf16 %v5254_v7, %v5253_v9  ;;  %v5258_v63 = vld [vmem:[#allocation2 + $0xe2] sm:$0xff] }
 0x3e4   : > { %v5280_v29 = vpack.c.bf16 %v5258_v63, %v5257_v40 }
 0x3ee   : > { %5031 = vmatmul.bf16.gmra.mxu1 %v4934_v33  ;;  %v8558_v33 = vld [vmem:[#allocation3 + $0x110] sm:$0xff] }
 0x3f0   : > { %5173 = vmatmul.bf16.gmra.mxu2 %v10886_v20  ;;  %5604 = vmatmul.bf16.gmra.mxu0 %v10886_v20 }
 0x3f1   : > { %5375 = vmatmul.bf16.gmra.mxu3 %v10888_v4 }
 0x3fe   : > { %5036 = vmatmul.bf16.gmra.mxu1 %v4935_v45 }
 0x400   : > { %5178 = vmatmul.bf16.gmra.mxu2 %v10897_v38  ;;  %5609 = vmatmul.bf16.gmra.mxu0 %v10897_v38 }
 0x401   : > { %5380 = vmatmul.bf16.gmra.mxu3 %v5275_v25 }
 0x40e   : > { %5041 = vmatmul.bf16.gmra.mxu1 %v10836_v5  ;;  %v8559_v5 = vld [vmem:[#allocation3 + $0x118] sm:$0xff] }
 0x40f   : > { %5824 = vmatpush.bf16.msrb.mxu1 %v8559_v5 }
 0x410   : > { %5183 = vmatmul.bf16.gmra.mxu2 %v10902_v11  ;;  %5614 = vmatmul.bf16.gmra.mxu0 %v10902_v11 }
 0x411   : > { %5385 = vmatmul.bf16.gmra.mxu3 %v5276_v53  ;;  %v5259_v53 = vld [vmem:[#allocation2 + $0xf2] sm:$0xff] }
 0x412   : > { %v5159_v61 = vpop.f32.mrf.mxu2 }
 0x413   : > { %5825 = vmatpush.bf16.msrb.mxu1 %v8558_v33 }
 0x416   : > { %v5361_v16 = vpop.f32.mrf.mxu3 }
 0x41a   : > { %v5161_v0 = vpop.f32.mrf.mxu2 }
 0x41e   : > { %5046 = vmatmul.bf16.gmra.mxu1 %v10838_v52  ;;  %v4853_v52 = vld [vmem:[#allocation2 + $0xc8] sm:$0xff]  ;;  %v5363_v47 = vpop.f32.mrf.mxu3 }
 0x41f   : > { %v4876_v36 = vpack.c.bf16 %v4853_v52, %v4852_v55  ;;  %v4858_v52 = vld [vmem:[#allocation2 + $0x108] sm:$0xff] }
 0x420   : > { %5188 = vmatmul.bf16.gmra.mxu2 %v4874_v57  ;;  %5619 = vmatmul.bf16.gmra.mxu0 %v4874_v57  ;;  %v5281_v57 = vpack.c.bf16 %v5260_v56, %v5259_v53 }
 0x421   : > { %5390 = vmatmul.bf16.gmra.mxu3 %v5277_v27 }
 0x42e   : > { %5051 = vmatmul.bf16.gmra.mxu1 %v10840_v18 }
 0x430   : > { %5193 = vmatmul.bf16.gmra.mxu2 %v4875_v54  ;;  %5624 = vmatmul.bf16.gmra.mxu0 %v4875_v54 }
 0x431   : > { %5395 = vmatmul.bf16.gmra.mxu3 %v5278_v15 }
 0x43e   : > { %5056 = vmatmul.bf16.gmra.mxu1 %v10842_v22 }
 0x440   : > { %5198 = vmatmul.bf16.gmra.mxu2 %v4876_v36  ;;  %5629 = vmatmul.bf16.gmra.mxu0 %v4876_v36  ;;  %v4859_v36 = vld [vmem:[#allocation2 + $0x110] sm:$0xff] }
 0x441   : > { %5400 = vmatmul.bf16.gmra.mxu3 %v5279_v3  ;;  %v5261_v3 = vld [vmem:[#allocation2 + $0x10a] sm:$0xff] }
 0x44b   : > { %v5022_v18 = vpop.f32.mrf.mxu1 }
 0x44c   : > { %v5160_v59 = vadd.f32 %v5159_v61, %v5022_v18  ;;  %v5262_v61 = vld [vmem:[#allocation2 + $0x112] sm:$0xff] }
 0x44d   : > { %v5595_v22 = vpop.f32.mrf.mxu0  ;;  %v8557_v18 = vld [vmem:[#allocation3 + $0x108] sm:$0xff] }
 0x44e   : > { %v5441_v14 = vadd.f32 %v5361_v16, %v5160_v59  ;;  %5061 = vmatmul.bf16.gmra.mxu1 %v10844_v26  ;;  %v4856_v26 = vld [vmem:[#allocation2 + $0xf0] sm:$0xff]  ;;  %v4879_v59 = vpack.c.bf16 %v4859_v36, %v4858_v52 }
 0x44f   : > { %v4878_v51 = vpack.c.bf16 %v4857_v49, %v4856_v26  ;;  %5826 = vmatpush.bf16.msrb.mxu1 %v8557_v18 }
 0x450   : > { %v10910_v48 = vadd.f32 %v5595_v22, %v5441_v14  ;;  %5203 = vmatmul.bf16.gmra.mxu2 %v4877_v43  ;;  %5634 = vmatmul.bf16.gmra.mxu0 %v4877_v43 }
 0x451   : > { %5405 = vmatmul.bf16.gmra.mxu3 %v5280_v29  ;;  %v4860_v29 = vld [vmem:[#allocation2 + $0x120] sm:$0xff] }
 0x453   : > { %v5024_v62 = vpop.f32.mrf.mxu1  ;;  %v5164_v45 = vpop.f32.mrf.mxu2 }
 0x454   : > { %v5162_v58 = vadd.f32 %v5161_v0, %v5024_v62  ;;  %v5366_v44 = vpop.f32.mrf.mxu3  ;;  %v5282_v0 = vpack.c.bf16 %v5262_v61, %v5261_v3 }
 0x455   : > { %v5597_v60 = vpop.f32.mrf.mxu0 }
 0x456   : > { %v5442_v13 = vadd.f32 %v5363_v47, %v5162_v58 }
 0x458   : > { %v10912_v25 = vadd.f32 %v5597_v60, %v5442_v13  ;;  %v5263_v13 = vld [vmem:[#allocation2 + $0x122] sm:$0xff]  ;;  %v5264_v60 = vld [vmem:[#allocation2 + $0x12a] sm:$0xff] }
 0x45b   : > { %v5027_v42 = vpop.f32.mrf.mxu1  ;;  %v5166_v10 = vpop.f32.mrf.mxu2 }
 0x45c   : > { %v5165_v23 = vadd.f32 %v5164_v45, %v5027_v42  ;;  %v5368_v35 = vpop.f32.mrf.mxu3 }
 0x45d   : > { %v5600_v17 = vpop.f32.mrf.mxu0 }
 0x45e   : > { %5066 = vmatmul.bf16.gmra.mxu1 %v10846_v19  ;;  %v5443_v21 = vadd.f32 %v5366_v44, %v5165_v23  ;;  %v4861_v44 = vld [vmem:[#allocation2 + $0x128] sm:$0xff] }
 0x45f   : > { %v4880_v23 = vpack.c.bf16 %v4861_v44, %v4860_v29  ;;  %v4864_v29 = vld [vmem:[#allocation2 + $0x150] sm:$0xff] }
 0x460   : > { %v10915_v27 = vadd.f32 %v5600_v17, %v5443_v21  ;;  %5208 = vmatmul.bf16.gmra.mxu2 %v4878_v51  ;;  %5639 = vmatmul.bf16.gmra.mxu0 %v4878_v51 }
 0x461   : > { %5410 = vmatmul.bf16.gmra.mxu3 %v5281_v57 }
 0x463   : > { %v5029_v24 = vpop.f32.mrf.mxu1  ;;  %v5169_v9 = vpop.f32.mrf.mxu2 }
 0x464   : > { %v5167_v6 = vadd.f32 %v5166_v10, %v5029_v24  ;;  %v5371_v7 = vpop.f32.mrf.mxu3  ;;  %v5283_v10 = vpack.c.bf16 %v5264_v60, %v5263_v13  ;;  %v4865_v60 = vld [vmem:[#allocation2 + $0x158] sm:$0xff] }
 0x465   : > { %v5602_v15 = vpop.f32.mrf.mxu0 }
 0x466   : > { %v5444_v54 = vadd.f32 %v5368_v35, %v5167_v6  ;;  %v4862_v6 = vld [vmem:[#allocation2 + $0x138] sm:$0xff] }
 0x468   : > { %v10917_v5 = vadd.f32 %v5602_v15, %v5444_v54  ;;  %v4863_v54 = vld [vmem:[#allocation2 + $0x140] sm:$0xff] }
 0x469   : > { %v5265_v15 = vld [vmem:[#allocation2 + $0x13a] sm:$0xff]  ;;  %v4881_v3 = vpack.c.bf16 %v4863_v54, %v4862_v6 }
 0x46a   : > { %v8566_v6 = vld [vmem:[#allocation3 + $0x150] sm:$0xff] }
 0x46b   : > { %v5032_v55 = vpop.f32.mrf.mxu1  ;;  %v5171_v41 = vpop.f32.mrf.mxu2 }
 0x46c   : > { %v5170_v19 = vadd.f32 %v5169_v9, %v5032_v55  ;;  %v5373_v50 = vpop.f32.mrf.mxu3  ;;  %v5266_v55 = vld [vmem:[#allocation2 + $0x142] sm:$0xff] }
 0x46d   : > { %v5605_v34 = vpop.f32.mrf.mxu0  ;;  %v5284_v61 = vpack.c.bf16 %v5266_v55, %v5265_v15  ;;  %v8585_v15 = vld [vmem:[#allocation3 + $0x1e8] sm:$0xff] }
 0x46e   : > { %5071 = vmatmul.bf16.gmra.mxu1 %v10848_v8  ;;  %v5445_v16 = vadd.f32 %v5371_v7, %v5170_v19  ;;  %v8556_v19 = vld [vmem:[#allocation3 + $0x100] sm:$0xff] }
 0x46f   : > { %5827 = vmatpush.bf16.msrb.mxu1 %v8556_v19 }
 0x470   : > { %v10920_v47 = vadd.f32 %v5605_v34, %v5445_v16  ;;  %5213 = vmatmul.bf16.gmra.mxu2 %v4879_v59  ;;  %5644 = vmatmul.bf16.gmra.mxu0 %v4879_v59  ;;  %v8570_v34 = vld [vmem:[#allocation3 + $0x170] sm:$0xff] }
 0x471   : > { %5415 = vmatmul.bf16.gmra.mxu3 %v5282_v0  ;;  %v8578_v59 = vld [vmem:[#allocation3 + $0x1b0] sm:$0xff] }
 0x473   : > { %v5034_v30 = vpop.f32.mrf.mxu1  ;;  %v5174_v63 = vpop.f32.mrf.mxu2 }
 0x474   : > { %v5172_v40 = vadd.f32 %v5171_v41, %v5034_v30  ;;  %v5376_v14 = vpop.f32.mrf.mxu3  ;;  %v8571_v41 = vld [vmem:[#allocation3 + $0x178] sm:$0xff] }
 0x475   : > { %v5607_v22 = vpop.f32.mrf.mxu0  ;;  %6054 = vmatpush.bf16.msra.mxu2 %v8571_v41  ;;  %v8573_v41 = vld [vmem:[#allocation3 + $0x188] sm:$0xff] }
 0x476   : > { %v5446_v33 = vadd.f32 %v5373_v50, %v5172_v40  ;;  %v8579_v50 = vld [vmem:[#allocation3 + $0x1b8] sm:$0xff]  ;;  %v8569_v40 = vld [vmem:[#allocation3 + $0x168] sm:$0xff] }
 0x477   : > { %6289 = vmatpush.bf16.msra.mxu3 %v8579_v50 }
 0x478   : > { %v10922_v43 = vadd.f32 %v5607_v22, %v5446_v33 }
 0x479   : > { %6055 = vmatpush.bf16.msra.mxu2 %v8570_v34  ;;  %v8584_v34 = vld [vmem:[#allocation3 + $0x1e0] sm:$0xff] }
 0x47b   : > { %v5037_v8 = vpop.f32.mrf.mxu1  ;;  %v5176_v58 = vpop.f32.mrf.mxu2  ;;  %6290 = vmatpush.bf16.msra.mxu3 %v8578_v59 }
 0x47c   : > { %v5175_v62 = vadd.f32 %v5174_v63, %v5037_v8  ;;  %v5378_v45 = vpop.f32.mrf.mxu3 }
 0x47d   : > { %v5610_v26 = vpop.f32.mrf.mxu0  ;;  %6056 = vmatpush.bf16.msra.mxu2 %v8569_v40  ;;  %v5269_v40 = vld [vmem:[#allocation2 + $0x16a] sm:$0xff] }
 0x47e   : > { %5076 = vmatmul.bf16.gmra.mxu1 %v10852_v32  ;;  %v5447_v42 = vadd.f32 %v5376_v14, %v5175_v62  ;;  %v8577_v14 = vld [vmem:[#allocation3 + $0x1a8] sm:$0xff]  ;;  %v8568_v62 = vld [vmem:[#allocation3 + $0x160] sm:$0xff] }
 0x47f   : > { %6291 = vmatpush.bf16.msra.mxu3 %v8577_v14 }
 0x480   : > { %v10925_v35 = vadd.f32 %v5610_v26, %v5447_v42  ;;  %5218 = vmatmul.bf16.gmra.mxu2 %v4880_v23  ;;  %5649 = vmatmul.bf16.gmra.mxu0 %v4880_v23  ;;  %v5267_v42 = vld [vmem:[#allocation2 + $0x152] sm:$0xff]  ;;  %v5268_v26 = vld [vmem:[#allocation2 + $0x15a] sm:$0xff] }
 0x481   : > { %5420 = vmatmul.bf16.gmra.mxu3 %v5283_v10  ;;  %6057 = vmatpush.bf16.msra.mxu2 %v8568_v62  ;;  %v8567_v10 = vld [vmem:[#allocation3 + $0x158] sm:$0xff] }
 0x483   : > { %v5039_v49 = vpop.f32.mrf.mxu1  ;;  %v5179_v56 = vpop.f32.mrf.mxu2 }
 0x484   : > { %v5177_v53 = vadd.f32 %v5176_v58, %v5039_v49  ;;  %v5381_v21 = vpop.f32.mrf.mxu3  ;;  %v8576_v58 = vld [vmem:[#allocation3 + $0x1a0] sm:$0xff]  ;;  %v8587_v49 = vld [vmem:[#allocation3 + $0x1f8] sm:$0xff] }
 0x485   : > { %v5612_v51 = vpop.f32.mrf.mxu0  ;;  %6292 = vmatpush.bf16.msra.mxu3 %v8576_v58  ;;  %6523 = vmatpush.bf16.msra.mxu0 %v8587_v49  ;;  %v8583_v58 = vld [vmem:[#allocation3 + $0x1d8] sm:$0xff] }
 0x486   : > { %v5448_v17 = vadd.f32 %v5378_v45, %v5177_v53  ;;  %6058 = vmatpush.bf16.msra.mxu2 %v8567_v10  ;;  %v8581_v10 = vld [vmem:[#allocation3 + $0x1c8] sm:$0xff] }
 0x488   : > { %v10927_v57 = vadd.f32 %v5612_v51, %v5448_v17  ;;  %v8575_v17 = vld [vmem:[#allocation3 + $0x198] sm:$0xff] }
 0x489   : > { %6293 = vmatpush.bf16.msra.mxu3 %v8575_v17 }
 0x48a   : > { %6059 = vmatpush.bf16.msra.mxu2 %v8566_v6  ;;  %v5503_v6 = vld [vmem:[#allocation2 + $0x180] sm:$0xff] }
 0x48b   : > { %v5042_v24 = vpop.f32.mrf.mxu1  ;;  %v5181_v9 = vpop.f32.mrf.mxu2 }
 0x48c   : > { %v5180_v32 = vadd.f32 %v5179_v56, %v5042_v24  ;;  %v5383_v7 = vpop.f32.mrf.mxu3  ;;  %v4882_v56 = vpack.c.bf16 %v4865_v60, %v4864_v29 }
 0x48d   : > { %v5615_v36 = vpop.f32.mrf.mxu0 }
 0x48e   : > { %5081 = vmatmul.bf16.gmra.mxu1 %v10854_v37  ;;  %v5449_v52 = vadd.f32 %v5381_v21, %v5180_v32  ;;  %v5285_v21 = vpack.c.bf16 %v5268_v26, %v5267_v42  ;;  %v8574_v32 = vld [vmem:[#allocation3 + $0x190] sm:$0xff] }
 0x48f   : > { %6294 = vmatpush.bf16.msra.mxu3 %v8574_v32  ;;  %v5504_v32 = vld [vmem:[#allocation2 + $0x188] sm:$0xff] }
 0x490   : > { %v10930_v16 = vadd.f32 %v5615_v36, %v5449_v52  ;;  %5223 = vmatmul.bf16.gmra.mxu2 %v4881_v3  ;;  %5654 = vmatmul.bf16.gmra.mxu0 %v4881_v3  ;;  %v8565_v52 = vld [vmem:[#allocation3 + $0x148] sm:$0xff]  ;;  %v4866_v36 = vld [vmem:[#allocation2 + $0x168] sm:$0xff] }
 0x491   : > { %5425 = vmatmul.bf16.gmra.mxu3 %v5284_v61  ;;  %6060 = vmatpush.bf16.msra.mxu2 %v8565_v52  ;;  %v8564_v61 = vld [vmem:[#allocation3 + $0x140] sm:$0xff] }
 0x493   : > { %v5044_v18 = vpop.f32.mrf.mxu1  ;;  %v5184_v37 = vpop.f32.mrf.mxu2  ;;  %6295 = vmatpush.bf16.msra.mxu3 %v8573_v41 }
 0x494   : > { %v5182_v0 = vadd.f32 %v5181_v9, %v5044_v18  ;;  %v5386_v30 = vpop.f32.mrf.mxu3  ;;  %v8572_v18 = vld [vmem:[#allocation3 + $0x180] sm:$0xff] }
 0x495   : > { %v5617_v33 = vpop.f32.mrf.mxu0  ;;  %6061 = vmatpush.bf16.msra.mxu2 %v8564_v61  ;;  %v5708_v61 = vld [vmem:[#allocation2 + $0x21] sm:$0xff] }
 0x496   : > { %v5450_v63 = vadd.f32 %v5383_v7, %v5182_v0 }
 0x497   : > { %6296 = vmatpush.bf16.msra.mxu3 %v8572_v18 }
 0x498   : > { %v10932_v22 = vadd.f32 %v5617_v33, %v5450_v63  ;;  %v5270_v63 = vld [vmem:[#allocation2 + $0x172] sm:$0xff]  ;;  %v8595_v33 = vld [vmem:[#allocation3 + $0x238] sm:$0xff] }
 0x499   : > { %v5286_v62 = vpack.c.bf16 %v5270_v63, %v5269_v40  ;;  %6757 = vmatpush.bf16.msra.mxu1 %v8595_v33  ;;  %v8594_v40 = vld [vmem:[#allocation3 + $0x230] sm:$0xff] }
 0x49b   : > { %v5047_v8 = vpop.f32.mrf.mxu1  ;;  %v5186_v44 = vpop.f32.mrf.mxu2 }
 0x49c   : > { %v5185_v45 = vadd.f32 %v5184_v37, %v5047_v8  ;;  %v5388_v13 = vpop.f32.mrf.mxu3 }
 0x49d   : > { %v5620_v53 = vpop.f32.mrf.mxu0  ;;  %6758 = vmatpush.bf16.msra.mxu1 %v8594_v40 }
 0x49e   : > { %5086 = vmatmul.bf16.gmra.mxu1 %v10856_v28  ;;  %v5451_v23 = vadd.f32 %v5386_v30, %v5185_v45  ;;  %v8586_v28 = vld [vmem:[#allocation3 + $0x1f0] sm:$0xff]  ;;  %v4867_v30 = vld [vmem:[#allocation2 + $0x170] sm:$0xff] }
 0x49f   : > { %6524 = vmatpush.bf16.msra.mxu0 %v8586_v28  ;;  %v4883_v29 = vpack.c.bf16 %v4867_v30, %v4866_v36  ;;  %v5710_v30 = vld [vmem:[#allocation2 + $0x39] sm:$0xff] }
 0x4a0   : > { %v10935_v51 = vadd.f32 %v5620_v53, %v5451_v23  ;;  %5228 = vmatmul.bf16.gmra.mxu2 %v4882_v56  ;;  %5659 = vmatmul.bf16.gmra.mxu0 %v4882_v56  ;;  %v8580_v56 = vld [vmem:[#allocation3 + $0x1c0] sm:$0xff] }
 0x4a1   : > { %5430 = vmatmul.bf16.gmra.mxu3 %v5285_v21 }
 0x4a3   : > { %v5049_v24 = vpop.f32.mrf.mxu1  ;;  %v5189_v7 = vpop.f32.mrf.mxu2  ;;  %6525 = vmatpush.bf16.msra.mxu0 %v8585_v15 }
 0x4a4   : > { %v5187_v9 = vadd.f32 %v5186_v44, %v5049_v24  ;;  %v5391_v54 = vpop.f32.mrf.mxu3 }
 0x4a5   : > { %v5622_v19 = vpop.f32.mrf.mxu0 }
 0x4a6   : > { %v5452_v55 = vadd.f32 %v5388_v13, %v5187_v9  ;;  %v8582_v13 = vld [vmem:[#allocation3 + $0x1d0] sm:$0xff] }
 0x4a7   : > { %6526 = vmatpush.bf16.msra.mxu0 %v8584_v34 }
 0x4a8   : > { %v10937_v50 = vadd.f32 %v5622_v19, %v5452_v55 }
 0x4ab   : > { %v5052_v3 = vpop.f32.mrf.mxu1  ;;  %v5191_v0 = vpop.f32.mrf.mxu2  ;;  %6527 = vmatpush.bf16.msra.mxu0 %v8583_v58 }
 0x4ac   : > { %v5190_v59 = vadd.f32 %v5189_v7, %v5052_v3  ;;  %v5393_v37 = vpop.f32.mrf.mxu3  ;;  %v5707_v3 = vld [vmem:[#allocation2 + $0x19] sm:$0xff] }
 0x4ad   : > { %v5625_v8 = vpop.f32.mrf.mxu0  ;;  %v5739_v34 = vpack.c.bf16 %v5708_v61, %v5707_v3  ;;  %v5948_v3 = vld [vmem:[#allocation2 + $0x6a] sm:$0xff]  ;;  %v5713_v61 = vld [vmem:[#allocation2 + $0x61] sm:$0xff] }
 0x4ae   : > { %5091 = vmatmul.bf16.gmra.mxu1 %v10858_v2  ;;  %v5453_v14 = vadd.f32 %v5391_v54, %v5190_v59  ;;  %v10947_v54 = vpack.c.bf16 %v5504_v32, %v5503_v6 }
 0x4af   : > { %6528 = vmatpush.bf16.msra.mxu0 %v8582_v13 }
 0x4b0   : > { %v10940_v45 = vadd.f32 %v5625_v8, %v5453_v14  ;;  %5233 = vmatmul.bf16.gmra.mxu2 %v4883_v29  ;;  %5664 = vmatmul.bf16.gmra.mxu0 %v4883_v29 }
 0x4b1   : > { %5435 = vmatmul.bf16.gmra.mxu3 %v5286_v62 }
 0x4b3   : > { %v5054_v44 = vpop.f32.mrf.mxu1  ;;  %v5194_v42 = vpop.f32.mrf.mxu2  ;;  %6529 = vmatpush.bf16.msra.mxu0 %v8581_v10  ;;  %v5711_v10 = vld [vmem:[#allocation2 + $0x49] sm:$0xff] }
 0x4b4   : > { %v5192_v60 = vadd.f32 %v5191_v0, %v5054_v44  ;;  %v5396_v2 = vpop.f32.mrf.mxu3 }
 0x4b5   : > { %v5627_v23 = vpop.f32.mrf.mxu0 }
 0x4b6   : > { %v5454_v26 = vadd.f32 %v5393_v37, %v5192_v60 }
 0x4b7   : > { %6530 = vmatpush.bf16.msra.mxu0 %v8580_v56 }
 0x4b8   : > { %v10942_v49 = vadd.f32 %v5627_v23, %v5454_v26 }
 0x4bb   : > { %v5057_v53 = vpop.f32.mrf.mxu1  ;;  %v5196_v17 = vpop.f32.mrf.mxu2 }
 0x4bc   : > { %v5195_v21 = vadd.f32 %v5194_v42, %v5057_v53  ;;  %v5398_v24 = vpop.f32.mrf.mxu3  ;;  %v5712_v53 = vld [vmem:[#allocation2 + $0x51] sm:$0xff] }
 0x4bd   : > { %v5630_v9 = vpop.f32.mrf.mxu0 }
 0x4be   : > { %5096 = vmatmul.bf16.gmra.mxu1 %v10862_v46  ;;  %v5455_v28 = vadd.f32 %v5396_v2, %v5195_v21 }
 0x4c0   : > { %v10945_v7 = vadd.f32 %v5630_v9, %v5455_v28  ;;  %6062 = vmatmul.bf16.vlgmr.msra.gmra.mxu2 %v10850_v12  ;;  %5669 = vmatmul.bf16.gmra.mxu0 %v10947_v54  ;;  %v5709_v12 = vld [vmem:[#allocation2 + $0x31] sm:$0xff] }
 0x4c1   : > { %6297 = vmatmul.bf16.vlgmr.msra.gmra.mxu3 %v10873_v31  ;;  %v5740_v33 = vpack.c.bf16 %v5710_v30, %v5709_v12 }
 0x4c3   : > { %v5059_v15 = vpop.f32.mrf.mxu1  ;;  %v5199_v52 = vpop.f32.mrf.mxu2 }
 0x4c4   : > { %v5197_v55 = vadd.f32 %v5196_v17, %v5059_v15  ;;  %v5401_v19 = vpop.f32.mrf.mxu3 }
 0x4c5   : > { %v5632_v36 = vpop.f32.mrf.mxu0 }
 0x4c6   : > { %v5456_v41 = vadd.f32 %v5398_v24, %v5197_v55 }
 0x4c8   : > { %v10952_v46 = vadd.f32 %v5632_v36, %v5456_v41  ;;  %v5947_v36 = vld [vmem:[#allocation2 + $0x62] sm:$0xff] }
 0x4cb   : > { %v5062_v18 = vpop.f32.mrf.mxu1  ;;  %v5201_v0 = vpop.f32.mrf.mxu2 }
 0x4cc   : > { %v5200_v59 = vadd.f32 %v5199_v52, %v5062_v18  ;;  %v5403_v37 = vpop.f32.mrf.mxu3  ;;  %v5714_v18 = vld [vmem:[#allocation2 + $0x69] sm:$0xff] }
 0x4cd   : > { %v5635_v63 = vpop.f32.mrf.mxu0 }
 0x4ce   : > { %5828 = vmatmul.bf16.vlgmr.msrb.gmra.mxu1 %v5739_v34  ;;  %v5457_v31 = vadd.f32 %v5401_v19, %v5200_v59  ;;  %v10966_v59 = vpack.c.bf16 %v5948_v3, %v5947_v36 }
 0x4d0   : > { %v10954_v14 = vadd.f32 %v5635_v63, %v5457_v31  ;;  %6067 = vmatmul.bf16.gmra.mxu2 %v10875_v1  ;;  %6531 = vmatmul.bf16.vlgmr.msra.gmra.mxu0 %v5740_v33 }
 0x4d1   : > { %6302 = vmatmul.bf16.gmra.mxu3 %v10886_v20  ;;  %v5741_v20 = vpack.c.bf16 %v5712_v53, %v5711_v10  ;;  %v5716_v10 = vld [vmem:[#allocation2 + $0x81] sm:$0xff] }
 0x4d3   : > { %v5064_v8 = vpop.f32.mrf.mxu1  ;;  %v5204_v62 = vpop.f32.mrf.mxu2 }
 0x4d4   : > { %v5202_v29 = vadd.f32 %v5201_v0, %v5064_v8  ;;  %v5406_v58 = vpop.f32.mrf.mxu3 }
 0x4d5   : > { %v5637_v13 = vpop.f32.mrf.mxu0 }
 0x4d6   : > { %v5458_v44 = vadd.f32 %v5403_v37, %v5202_v29  ;;  %v5742_v37 = vpack.c.bf16 %v5714_v18, %v5713_v61  ;;  %v5952_v18 = vld [vmem:[#allocation2 + $0x9a] sm:$0xff] }
 0x4d8   : > { %v10958_v60 = vadd.f32 %v5637_v13, %v5458_v44 }
 0x4db   : > { %v5067_v42 = vpop.f32.mrf.mxu1  ;;  %v5206_v26 = vpop.f32.mrf.mxu2 }
 0x4dc   : > { %v5205_v2 = vadd.f32 %v5204_v62, %v5067_v42  ;;  %v5408_v23 = vpop.f32.mrf.mxu3  ;;  %v5949_v62 = vld [vmem:[#allocation2 + $0x7a] sm:$0xff]  ;;  %v5950_v42 = vld [vmem:[#allocation2 + $0x82] sm:$0xff] }
 0x4dd   : > { %v5640_v1 = vpop.f32.mrf.mxu0 }
 0x4de   : > { %5833 = vmatmul.bf16.gmra.mxu1 %v5740_v33  ;;  %v5459_v56 = vadd.f32 %v5406_v58, %v5205_v2  ;;  %v6184_v2 = vld [vmem:[#allocation2 + $0x90] sm:$0xff] }
 0x4e0   : > { %v10960_v21 = vadd.f32 %v5640_v1, %v5459_v56  ;;  %6072 = vmatmul.bf16.gmra.mxu2 %v10888_v4  ;;  %6536 = vmatmul.bf16.gmra.mxu0 %v5741_v20  ;;  %v10974_v56 = vpack.c.bf16 %v5950_v42, %v5949_v62 }
 0x4e1   : > { %6307 = vmatmul.bf16.gmra.mxu3 %v10897_v38  ;;  %v8593_v38 = vld [vmem:[#allocation3 + $0x228] sm:$0xff] }
 0x4e2   : > { %6759 = vmatpush.bf16.msra.mxu1 %v8593_v38  ;;  %v6187_v38 = vld [vmem:[#allocation2 + $0xb0] sm:$0xff] }
 0x4e3   : > { %v5069_v17 = vpop.f32.mrf.mxu1  ;;  %v5209_v6 = vpop.f32.mrf.mxu2 }
 0x4e4   : > { %v5207_v24 = vadd.f32 %v5206_v26, %v5069_v17  ;;  %v5411_v32 = vpop.f32.mrf.mxu3  ;;  %v6185_v26 = vld [vmem:[#allocation2 + $0x98] sm:$0xff] }
 0x4e5   : > { %v5642_v9 = vpop.f32.mrf.mxu0  ;;  %v6212_v1 = vpack.c.bf16 %v6185_v26, %v6184_v2 }
 0x4e6   : > { %v5460_v28 = vadd.f32 %v5408_v23, %v5207_v24  ;;  %v5715_v23 = vld [vmem:[#allocation2 + $0x79] sm:$0xff] }
 0x4e7   : > { %v5743_v17 = vpack.c.bf16 %v5716_v10, %v5715_v23  ;;  %v5953_v10 = vld [vmem:[#allocation2 + $0xaa] sm:$0xff] }
 0x4e8   : > { %v10964_v15 = vadd.f32 %v5642_v9, %v5460_v28 }
 0x4eb   : > { %v5072_v55 = vpop.f32.mrf.mxu1  ;;  %v5211_v19 = vpop.f32.mrf.mxu2 }
 0x4ec   : > { %v5210_v52 = vadd.f32 %v5209_v6, %v5072_v55  ;;  %v5413_v41 = vpop.f32.mrf.mxu3 }
 0x4ed   : > { %v5645_v34 = vpop.f32.mrf.mxu0 }
 0x4ee   : > { %5838 = vmatmul.bf16.gmra.mxu1 %v5741_v20  ;;  %v5461_v4 = vadd.f32 %v5411_v32, %v5210_v52 }
 0x4f0   : > { %v10968_v0 = vadd.f32 %v5645_v34, %v5461_v4  ;;  %6077 = vmatmul.bf16.gmra.mxu2 %v10966_v59  ;;  %6541 = vmatmul.bf16.gmra.mxu0 %v5742_v37  ;;  %v6186_v4 = vld [vmem:[#allocation2 + $0xa8] sm:$0xff]  ;;  %v5717_v34 = vld [vmem:[#allocation2 + $0x91] sm:$0xff] }
 0x4f1   : > { %6312 = vmatmul.bf16.gmra.mxu3 %v10902_v11 }
 0x4f3   : > { %v5074_v12 = vpop.f32.mrf.mxu1  ;;  %v5214_v31 = vpop.f32.mrf.mxu2 }
 0x4f4   : > { %v5212_v30 = vadd.f32 %v5211_v19, %v5074_v12  ;;  %v5416_v40 = vpop.f32.mrf.mxu3 }
 0x4f5   : > { %v5647_v33 = vpop.f32.mrf.mxu0 }
 0x4f6   : > { %v5462_v63 = vadd.f32 %v5413_v41, %v5212_v30  ;;  %v5951_v41 = vld [vmem:[#allocation2 + $0x92] sm:$0xff] }
 0x4f7   : > { %v8592_v30 = vld [vmem:[#allocation3 + $0x220] sm:$0xff] }
 0x4f8   : > { %v10972_v8 = vadd.f32 %v5647_v33, %v5462_v63  ;;  %v6213_v63 = vpack.c.bf16 %v6187_v38, %v6186_v4  ;;  %6760 = vmatpush.bf16.msra.mxu1 %v8592_v30 }
 0x4fb   : > { %v5077_v29 = vpop.f32.mrf.mxu1  ;;  %v5216_v44 = vpop.f32.mrf.mxu2 }
 0x4fc   : > { %v5215_v58 = vadd.f32 %v5214_v31, %v5077_v29  ;;  %v5418_v13 = vpop.f32.mrf.mxu3 }
 0x4fd   : > { %v5650_v53 = vpop.f32.mrf.mxu0 }
 0x4fe   : > { %5843 = vmatmul.bf16.gmra.mxu1 %v5742_v37  ;;  %v5463_v11 = vadd.f32 %v5416_v40, %v5215_v58  ;;  %v5718_v37 = vld [vmem:[#allocation2 + $0x99] sm:$0xff]  ;;  %v10981_v40 = vpack.c.bf16 %v5952_v18, %v5951_v41 }
 0x4ff   : > { %v5744_v29 = vpack.c.bf16 %v5718_v37, %v5717_v34 }
 0x500   : > { %v10976_v20 = vadd.f32 %v5650_v53, %v5463_v11  ;;  %6082 = vmatmul.bf16.gmra.mxu2 %v10974_v56  ;;  %6546 = vmatmul.bf16.gmra.mxu0 %v5743_v17 }
 0x501   : > { %6317 = vmatmul.bf16.gmra.mxu3 %v6212_v1 }
 0x503   : > { %v5079_v24 = vpop.f32.mrf.mxu1  ;;  %v5219_v32 = vpop.f32.mrf.mxu2 }
 0x504   : > { %v5217_v6 = vadd.f32 %v5216_v44, %v5079_v24  ;;  %v5421_v28 = vpop.f32.mrf.mxu3  ;;  %v6188_v24 = vld [vmem:[#allocation2 + $0xc0] sm:$0xff] }
 0x505   : > { %v5652_v55 = vpop.f32.mrf.mxu0 }
 0x506   : > { %v5464_v9 = vadd.f32 %v5418_v13, %v5217_v6  ;;  %v6189_v6 = vld [vmem:[#allocation2 + $0xc8] sm:$0xff] }
 0x507   : > { %v6214_v41 = vpack.c.bf16 %v6189_v6, %v6188_v24 }
 0x508   : > { %v10979_v52 = vadd.f32 %v5652_v55, %v5464_v9 }
 0x50b   : > { %v5082_v19 = vpop.f32.mrf.mxu1  ;;  %v5221_v3 = vpop.f32.mrf.mxu2 }
 0x50c   : > { %v5220_v36 = vadd.f32 %v5219_v32, %v5082_v19  ;;  %v5423_v61 = vpop.f32.mrf.mxu3  ;;  %v5719_v32 = vld [vmem:[#allocation2 + $0xa9] sm:$0xff] }
 0x50d   : > { %v5655_v31 = vpop.f32.mrf.mxu0 }
 0x50e   : > { %5848 = vmatmul.bf16.gmra.mxu1 %v5743_v17  ;;  %v5465_v12 = vadd.f32 %v5421_v28, %v5220_v36  ;;  %v5954_v17 = vld [vmem:[#allocation2 + $0xb2] sm:$0xff] }
 0x50f   : > { %v5720_v28 = vld [vmem:[#allocation2 + $0xb1] sm:$0xff]  ;;  %v10988_v19 = vpack.c.bf16 %v5954_v17, %v5953_v10  ;;  %v8591_v10 = vld [vmem:[#allocation3 + $0x218] sm:$0xff] }
 0x510   : > { %v10983_v33 = vadd.f32 %v5655_v31, %v5465_v12  ;;  %6087 = vmatmul.bf16.gmra.mxu2 %v10981_v40  ;;  %6551 = vmatmul.bf16.gmra.mxu0 %v5744_v29  ;;  %v5955_v31 = vld [vmem:[#allocation2 + $0xc2] sm:$0xff] }
 0x511   : > { %6322 = vmatmul.bf16.gmra.mxu3 %v6213_v63  ;;  %6761 = vmatpush.bf16.msra.mxu1 %v8591_v10 }
 0x513   : > { %v5084_v62 = vpop.f32.mrf.mxu1  ;;  %v5224_v44 = vpop.f32.mrf.mxu2 }
 0x514   : > { %v5222_v58 = vadd.f32 %v5221_v3, %v5084_v62  ;;  %v5426_v13 = vpop.f32.mrf.mxu3  ;;  %v5745_v3 = vpack.c.bf16 %v5720_v28, %v5719_v32 }
 0x515   : > { %v5657_v2 = vpop.f32.mrf.mxu0 }
 0x516   : > { %v5466_v42 = vadd.f32 %v5423_v61, %v5222_v58  ;;  %v5956_v58 = vld [vmem:[#allocation2 + $0xca] sm:$0xff] }
 0x518   : > { %v10986_v26 = vadd.f32 %v5657_v2, %v5466_v42  ;;  %v5721_v42 = vld [vmem:[#allocation2 + $0xc1] sm:$0xff]  ;;  %v5722_v2 = vld [vmem:[#allocation2 + $0xc9] sm:$0xff] }
 0x519   : > { %v5746_v24 = vpack.c.bf16 %v5722_v2, %v5721_v42 }
 0x51b   : > { %v5087_v23 = vpop.f32.mrf.mxu1  ;;  %v5226_v53 = vpop.f32.mrf.mxu2 }
 0x51c   : > { %v5225_v11 = vadd.f32 %v5224_v44, %v5087_v23  ;;  %v5428_v1 = vpop.f32.mrf.mxu3  ;;  %v6190_v44 = vld [vmem:[#allocation2 + $0xd8] sm:$0xff] }
 0x51d   : > { %v5660_v55 = vpop.f32.mrf.mxu0 }
 0x51e   : > { %5853 = vmatmul.bf16.gmra.mxu1 %v5744_v29  ;;  %v5467_v9 = vadd.f32 %v5426_v13, %v5225_v11  ;;  %v6191_v13 = vld [vmem:[#allocation2 + $0xe0] sm:$0xff] }
 0x520   : > { %v10990_v36 = vadd.f32 %v5660_v55, %v5467_v9  ;;  %6092 = vmatmul.bf16.gmra.mxu2 %v10988_v19  ;;  %6556 = vmatmul.bf16.gmra.mxu0 %v5745_v3 }
 0x521   : > { %6327 = vmatmul.bf16.gmra.mxu3 %v6214_v41 }
 0x523   : > { %v5089_v61 = vpop.f32.mrf.mxu1  ;;  %v5229_v4 = vpop.f32.mrf.mxu2 }
 0x524   : > { %v5227_v18 = vadd.f32 %v5226_v53, %v5089_v61  ;;  %v5431_v38 = vpop.f32.mrf.mxu3  ;;  %v10995_v53 = vpack.c.bf16 %v5956_v58, %v5955_v31  ;;  %v6193_v31 = vld [vmem:[#allocation2 + $0xf8] sm:$0xff]  ;;  %v5724_v58 = vld [vmem:[#allocation2 + $0xe1] sm:$0xff] }
 0x525   : > { %v5662_v37 = vpop.f32.mrf.mxu0 }
 0x526   : > { %v5468_v34 = vadd.f32 %v5428_v1, %v5227_v18  ;;  %v6215_v1 = vpack.c.bf16 %v6191_v13, %v6190_v44  ;;  %v5957_v18 = vld [vmem:[#allocation2 + $0xda] sm:$0xff] }
 0x528   : > { %v10993_v12 = vadd.f32 %v5662_v37, %v5468_v34  ;;  %v5958_v37 = vld [vmem:[#allocation2 + $0xe2] sm:$0xff] }
 0x52b   : > { %v5092_v30 = vpop.f32.mrf.mxu1  ;;  %v5231_v29 = vpop.f32.mrf.mxu2 }
 0x52c   : > { %v5230_v63 = vadd.f32 %v5229_v4, %v5092_v30  ;;  %v5433_v62 = vpop.f32.mrf.mxu3  ;;  %v6192_v30 = vld [vmem:[#allocation2 + $0xf0] sm:$0xff] }
 0x52d   : > { %v5665_v11 = vpop.f32.mrf.mxu0  ;;  %v6216_v42 = vpack.c.bf16 %v6193_v31, %v6192_v30  ;;  %v5725_v30 = vld [vmem:[#allocation2 + $0xf1] sm:$0xff]  ;;  %v5726_v31 = vld [vmem:[#allocation2 + $0xf9] sm:$0xff] }
 0x52e   : > { %5858 = vmatmul.bf16.gmra.mxu1 %v5745_v3  ;;  %v5469_v23 = vadd.f32 %v5431_v38, %v5230_v63  ;;  %v5723_v63 = vld [vmem:[#allocation2 + $0xd9] sm:$0xff] }
 0x52f   : > { %v5747_v2 = vpack.c.bf16 %v5724_v58, %v5723_v63 }
 0x530   : > { %v10997_v17 = vadd.f32 %v5665_v11, %v5469_v23  ;;  %6097 = vmatmul.bf16.gmra.mxu2 %v10995_v53  ;;  %6561 = vmatmul.bf16.gmra.mxu0 %v5746_v24 }
 0x531   : > { %6332 = vmatmul.bf16.gmra.mxu3 %v6215_v1 }
 0x533   : > { %v5094_v6 = vpop.f32.mrf.mxu1  ;;  %v5234_v28 = vpop.f32.mrf.mxu2 }
 0x534   : > { %v5232_v32 = vadd.f32 %v5231_v29, %v5094_v6  ;;  %v5436_v9 = vpop.f32.mrf.mxu3  ;;  %v11002_v29 = vpack.c.bf16 %v5958_v37, %v5957_v18  ;;  %v5960_v18 = vld [vmem:[#allocation2 + $0xfa] sm:$0xff]  ;;  %v6195_v37 = vld [vmem:[#allocation2 + $0x110] sm:$0xff] }
 0x535   : > { %v5667_v41 = vpop.f32.mrf.mxu0 }
 0x536   : > { %v5470_v55 = vadd.f32 %v5433_v62, %v5232_v32 }
 0x538   : > { %v11000_v3 = vadd.f32 %v5667_v41, %v5470_v55 }
 0x53b   : > { %v5097_v61 = vpop.f32.mrf.mxu1  ;;  %v5236_v38 = vpop.f32.mrf.mxu2 }
 0x53c   : > { %v5235_v4 = vadd.f32 %v5234_v28, %v5097_v61  ;;  %v5438_v34 = vpop.f32.mrf.mxu3 }
 0x53d   : > { %v5670_v13 = vpop.f32.mrf.mxu0 }
 0x53e   : > { %5863 = vmatmul.bf16.gmra.mxu1 %v5746_v24  ;;  %v5471_v44 = vadd.f32 %v5436_v9, %v5235_v4  ;;  %v5959_v9 = vld [vmem:[#allocation2 + $0xf2] sm:$0xff]  ;;  %v6194_v4 = vld [vmem:[#allocation2 + $0x108] sm:$0xff] }
 0x540   : > { %v11004_v62 = vadd.f32 %v5670_v13, %v5471_v44  ;;  %6102 = vmatmul.bf16.gmra.mxu2 %v11002_v29  ;;  %6566 = vmatmul.bf16.gmra.mxu0 %v5747_v2  ;;  %v11010_v44 = vpack.c.bf16 %v5960_v18, %v5959_v9 }
 0x541   : > { %6337 = vmatmul.bf16.gmra.mxu3 %v6216_v42  ;;  %v5748_v42 = vpack.c.bf16 %v5726_v31, %v5725_v30  ;;  %v5962_v30 = vld [vmem:[#allocation2 + $0x112] sm:$0xff]  ;;  %v6196_v31 = vld [vmem:[#allocation2 + $0x120] sm:$0xff] }
 0x543   : > { %v5099_v23 = vpop.f32.mrf.mxu1  ;;  %v6063_v11 = vpop.f32.mrf.mxu2 }
 0x544   : > { %v5237_v10 = vadd.f32 %v5236_v38, %v5099_v23  ;;  %v6298_v1 = vpop.f32.mrf.mxu3  ;;  %v8590_v38 = vld [vmem:[#allocation3 + $0x210] sm:$0xff] }
 0x545   : > { %v5672_v32 = vpop.f32.mrf.mxu0  ;;  %6762 = vmatpush.bf16.msra.mxu1 %v8590_v38  ;;  %v5727_v38 = vld [vmem:[#allocation2 + $0x109] sm:$0xff] }
 0x546   : > { %v5472_v6 = vadd.f32 %v5438_v34, %v5237_v10  ;;  %v6217_v34 = vpack.c.bf16 %v6195_v37, %v6194_v4 }
 0x548   : > { %v11007_v28 = vadd.f32 %v5672_v32, %v5472_v6 }
 0x54b   : > { %v5829_v24 = vpop.f32.mrf.mxu1  ;;  %v6065_v41 = vpop.f32.mrf.mxu2 }
 0x54c   : > { %v5909_v55 = vadd.f32 %v5829_v24, %v10910_v48  ;;  %v6300_v61 = vpop.f32.mrf.mxu3 }
 0x54d   : > { %v6532_v58 = vpop.f32.mrf.mxu0 }
 0x54e   : > { %5868 = vmatmul.bf16.gmra.mxu1 %v5747_v2  ;;  %v6143_v63 = vadd.f32 %v6063_v11, %v5909_v55 }
 0x550   : > { %v6378_v13 = vadd.f32 %v6298_v1, %v6143_v63  ;;  %6107 = vmatmul.bf16.gmra.mxu2 %v11010_v44  ;;  %6571 = vmatmul.bf16.gmra.mxu0 %v5748_v42  ;;  %v5961_v1 = vld [vmem:[#allocation2 + $0x10a] sm:$0xff] }
 0x551   : > { %6342 = vmatmul.bf16.gmra.mxu3 %v6217_v34  ;;  %v6197_v63 = vld [vmem:[#allocation2 + $0x128] sm:$0xff] }
 0x552   : > { %v11013_v48 = vadd.f32 %v6532_v58, %v6378_v13  ;;  %v5728_v58 = vld [vmem:[#allocation2 + $0x111] sm:$0xff]  ;;  %v11019_v13 = vpack.c.bf16 %v5962_v30, %v5961_v1  ;;  %v5963_v30 = vld [vmem:[#allocation2 + $0x122] sm:$0xff] }
 0x553   : > { %v5831_v23 = vpop.f32.mrf.mxu1  ;;  %v6068_v6 = vpop.f32.mrf.mxu2 }
 0x554   : > { %v5910_v10 = vadd.f32 %v5831_v23, %v10912_v25  ;;  %v6303_v2 = vpop.f32.mrf.mxu3  ;;  %v5749_v23 = vpack.c.bf16 %v5728_v58, %v5727_v38  ;;  %v5964_v38 = vld [vmem:[#allocation2 + $0x12a] sm:$0xff]  ;;  %v6198_v58 = vld [vmem:[#allocation2 + $0x138] sm:$0xff] }
 0x555   : > { %v6534_v32 = vpop.f32.mrf.mxu0 }
 0x556   : > { %v6144_v11 = vadd.f32 %v6065_v41, %v5910_v10  ;;  %v6218_v41 = vpack.c.bf16 %v6197_v63, %v6196_v31 }
 0x558   : > { %v6379_v24 = vadd.f32 %v6300_v61, %v6144_v11 }
 0x55a   : > { %v11016_v9 = vadd.f32 %v6534_v32, %v6379_v24 }
 0x55b   : > { %v5834_v55 = vpop.f32.mrf.mxu1  ;;  %v6070_v4 = vpop.f32.mrf.mxu2 }
 0x55c   : > { %v5911_v18 = vadd.f32 %v5834_v55, %v10915_v27  ;;  %v6305_v37 = vpop.f32.mrf.mxu3 }
 0x55d   : > { %v6537_v34 = vpop.f32.mrf.mxu0 }
 0x55e   : > { %5873 = vmatmul.bf16.gmra.mxu1 %v5748_v42  ;;  %v6145_v25 = vadd.f32 %v6068_v6, %v5911_v18 }
 0x560   : > { %v6380_v61 = vadd.f32 %v6303_v2, %v6145_v25  ;;  %6112 = vmatmul.bf16.gmra.mxu2 %v11019_v13  ;;  %6576 = vmatmul.bf16.gmra.mxu0 %v5749_v23  ;;  %v6199_v25 = vld [vmem:[#allocation2 + $0x140] sm:$0xff] }
 0x561   : > { %6347 = vmatmul.bf16.gmra.mxu3 %v6218_v41  ;;  %v5730_v41 = vld [vmem:[#allocation2 + $0x129] sm:$0xff] }
 0x562   : > { %v11022_v10 = vadd.f32 %v6537_v34, %v6380_v61  ;;  %v5729_v34 = vld [vmem:[#allocation2 + $0x121] sm:$0xff]  ;;  %v8589_v61 = vld [vmem:[#allocation3 + $0x208] sm:$0xff] }
 0x563   : > { %v5836_v27 = vpop.f32.mrf.mxu1  ;;  %v6073_v32 = vpop.f32.mrf.mxu2  ;;  %6763 = vmatpush.bf16.msra.mxu1 %v8589_v61  ;;  %v6201_v61 = vld [vmem:[#allocation2 + $0x158] sm:$0xff] }
 0x564   : > { %v5912_v11 = vadd.f32 %v5836_v27, %v10917_v5  ;;  %v6308_v24 = vpop.f32.mrf.mxu3 }
 0x565   : > { %v6539_v42 = vpop.f32.mrf.mxu0 }
 0x566   : > { %v6146_v55 = vadd.f32 %v6070_v4, %v5912_v11  ;;  %v11028_v4 = vpack.c.bf16 %v5964_v38, %v5963_v30 }
 0x568   : > { %v6381_v6 = vadd.f32 %v6305_v37, %v6146_v55  ;;  %v6219_v37 = vpack.c.bf16 %v6199_v25, %v6198_v58  ;;  %v5750_v55 = vpack.c.bf16 %v5730_v41, %v5729_v34  ;;  %v5966_v41 = vld [vmem:[#allocation2 + $0x142] sm:$0xff] }
 0x56a   : > { %v11025_v18 = vadd.f32 %v6539_v42, %v6381_v6 }
 0x56b   : > { %v5839_v1 = vpop.f32.mrf.mxu1  ;;  %v6075_v31 = vpop.f32.mrf.mxu2 }
 0x56c   : > { %v5913_v2 = vadd.f32 %v5839_v1, %v10920_v47  ;;  %v6310_v63 = vpop.f32.mrf.mxu3 }
 0x56d   : > { %v6542_v27 = vpop.f32.mrf.mxu0 }
 0x56e   : > { %5878 = vmatmul.bf16.gmra.mxu1 %v5749_v23  ;;  %v6147_v5 = vadd.f32 %v6073_v32, %v5913_v2 }
 0x570   : > { %v6382_v11 = vadd.f32 %v6308_v24, %v6147_v5  ;;  %6117 = vmatmul.bf16.gmra.mxu2 %v11028_v4  ;;  %6581 = vmatmul.bf16.gmra.mxu0 %v5750_v55  ;;  %v5965_v24 = vld [vmem:[#allocation2 + $0x13a] sm:$0xff]  ;;  %v6200_v5 = vld [vmem:[#allocation2 + $0x150] sm:$0xff] }
 0x571   : > { %6352 = vmatmul.bf16.gmra.mxu3 %v6219_v37  ;;  %v5732_v37 = vld [vmem:[#allocation2 + $0x141] sm:$0xff] }
 0x572   : > { %v11031_v47 = vadd.f32 %v6542_v27, %v6382_v11  ;;  %v5731_v27 = vld [vmem:[#allocation2 + $0x139] sm:$0xff] }
 0x573   : > { %v5841_v42 = vpop.f32.mrf.mxu1  ;;  %v6078_v1 = vpop.f32.mrf.mxu2 }
 0x574   : > { %v5914_v6 = vadd.f32 %v5841_v42, %v10922_v43  ;;  %v6313_v23 = vpop.f32.mrf.mxu3  ;;  %v11037_v42 = vpack.c.bf16 %v5966_v41, %v5965_v24  ;;  %v5967_v41 = vld [vmem:[#allocation2 + $0x152] sm:$0xff] }
 0x575   : > { %v6544_v2 = vpop.f32.mrf.mxu0 }
 0x576   : > { %v6148_v32 = vadd.f32 %v6075_v31, %v5914_v6  ;;  %v6220_v31 = vpack.c.bf16 %v6201_v61, %v6200_v5 }
 0x578   : > { %v6383_v39 = vadd.f32 %v6310_v63, %v6148_v32 }
 0x57a   : > { %v11034_v30 = vadd.f32 %v6544_v2, %v6383_v39  ;;  %v5751_v39 = vpack.c.bf16 %v5732_v37, %v5731_v27  ;;  %v5968_v27 = vld [vmem:[#allocation2 + $0x15a] sm:$0xff]  ;;  %v6202_v37 = vld [vmem:[#allocation2 + $0x168] sm:$0xff] }
 0x57b   : > { %v5844_v38 = vpop.f32.mrf.mxu1  ;;  %v6080_v25 = vpop.f32.mrf.mxu2 }
 0x57c   : > { %11707 = vst [vmem:[#allocation14_spill] sm:$0xff] %v11034_v30  ;;  %v5915_v58 = vadd.f32 %v5844_v38, %v10925_v35  ;;  %v6315_v34 = vpop.f32.mrf.mxu3 }
 0x57d   : > { %v6547_v11 = vpop.f32.mrf.mxu0 }
 0x57e   : > { %5883 = vmatmul.bf16.gmra.mxu1 %v5750_v55  ;;  %v6149_v43 = vadd.f32 %v6078_v1, %v5915_v58 }
 0x580   : > { %v6384_v63 = vadd.f32 %v6313_v23, %v6149_v43  ;;  %6122 = vmatmul.bf16.gmra.mxu2 %v11037_v42  ;;  %6586 = vmatmul.bf16.gmra.mxu0 %v5751_v39  ;;  %v6203_v43 = vld [vmem:[#allocation2 + $0x170] sm:$0xff] }
 0x581   : > { %6357 = vmatmul.bf16.gmra.mxu3 %v6220_v31  ;;  %v5734_v31 = vld [vmem:[#allocation2 + $0x159] sm:$0xff] }
 0x582   : > { %v11040_v6 = vadd.f32 %v6547_v11, %v6384_v63  ;;  %v5733_v11 = vld [vmem:[#allocation2 + $0x151] sm:$0xff] }
 0x583   : > { %v5846_v35 = vpop.f32.mrf.mxu1  ;;  %v6083_v2 = vpop.f32.mrf.mxu2  ;;  %v8588_v63 = vld [vmem:[#allocation3 + $0x200] sm:$0xff] }
 0x584   : > { %v5916_v32 = vadd.f32 %v5846_v35, %v10927_v57  ;;  %v6318_v38 = vpop.f32.mrf.mxu3  ;;  %6764 = vmatpush.bf16.msra.mxu1 %v8588_v63  ;;  %v5736_v63 = vld [vmem:[#allocation2 + $0x171] sm:$0xff] }
 0x585   : > { %v6549_v55 = vpop.f32.mrf.mxu0 }
 0x586   : > { %v6150_v30 = vadd.f32 %v6080_v25, %v5916_v32  ;;  %v11046_v25 = vpack.c.bf16 %v5968_v27, %v5967_v41  ;;  %v5752_v32 = vpack.c.bf16 %v5734_v31, %v5733_v11  ;;  %v5969_v11 = vld [vmem:[#allocation2 + $0x16a] sm:$0xff]  ;;  %v5970_v31 = vld [vmem:[#allocation2 + $0x172] sm:$0xff] }
 0x588   : > { %v6385_v1 = vadd.f32 %v6315_v34, %v6150_v30  ;;  %v6221_v30 = vpack.c.bf16 %v6203_v43, %v6202_v37 }
 0x58a   : > { %v11043_v58 = vadd.f32 %v6549_v55, %v6385_v1 }
 0x58b   : > { %v5849_v24 = vpop.f32.mrf.mxu1  ;;  %v6085_v5 = vpop.f32.mrf.mxu2 }
 0x58c   : > { %11708 = vst [vmem:[#allocation15_spill] sm:$0xff] %v11043_v58  ;;  %v5917_v23 = vadd.f32 %v5849_v24, %v10930_v16  ;;  %v6320_v61 = vpop.f32.mrf.mxu3 }
 0x58d   : > { %v6552_v35 = vpop.f32.mrf.mxu0 }
 0x58e   : > { %5888 = vmatmul.bf16.gmra.mxu1 %v5751_v39  ;;  %v6151_v57 = vadd.f32 %v6083_v2, %v5917_v23 }
 0x590   : > { %v6386_v34 = vadd.f32 %v6318_v38, %v6151_v57  ;;  %6127 = vmatmul.bf16.gmra.mxu2 %v11046_v25  ;;  %6591 = vmatmul.bf16.gmra.mxu0 %v5752_v32  ;;  %v5735_v57 = vld [vmem:[#allocation2 + $0x169] sm:$0xff] }
 0x591   : > { %6362 = vmatmul.bf16.gmra.mxu3 %v6221_v30 }
 0x592   : > { %v11049_v16 = vadd.f32 %v6552_v35, %v6386_v34 }
 0x593   : > { %v5851_v55 = vpop.f32.mrf.mxu1  ;;  %v6088_v24 = vpop.f32.mrf.mxu2 }
 0x594   : > { %v5918_v1 = vadd.f32 %v5851_v55, %v10932_v22  ;;  %v6323_v39 = vpop.f32.mrf.mxu3  ;;  %v11055_v22 = vpack.c.bf16 %v5970_v31, %v5969_v11  ;;  %v5971_v31 = vld [vmem:[#allocation2 + $0x182] sm:$0xff] }
 0x595   : > { %v6554_v23 = vpop.f32.mrf.mxu0 }
 0x596   : > { %v6152_v2 = vadd.f32 %v6085_v5, %v5918_v1  ;;  %v5753_v5 = vpack.c.bf16 %v5736_v63, %v5735_v57  ;;  %v5737_v57 = vld [vmem:[#allocation2 + $0x181] sm:$0xff]  ;;  %v5738_v63 = vld [vmem:[#allocation2 + $0x189] sm:$0xff] }
 0x598   : > { %v6387_v58 = vadd.f32 %v6320_v61, %v6152_v2 }
 0x59a   : > { %v11052_v41 = vadd.f32 %v6554_v23, %v6387_v58 }
 0x59b   : > { %v5854_v27 = vpop.f32.mrf.mxu1  ;;  %v6090_v37 = vpop.f32.mrf.mxu2 }
 0x59c   : > { %v5919_v38 = vadd.f32 %v5854_v27, %v10935_v51  ;;  %v6325_v43 = vpop.f32.mrf.mxu3 }
 0x59d   : > { %v6557_v30 = vpop.f32.mrf.mxu0 }
 0x59e   : > { %5893 = vmatmul.bf16.gmra.mxu1 %v5752_v32  ;;  %v6153_v35 = vadd.f32 %v6088_v24, %v5919_v38 }
 0x5a0   : > { %v6388_v34 = vadd.f32 %v6323_v39, %v6153_v35  ;;  %6132 = vmatmul.bf16.gmra.mxu2 %v11055_v22  ;;  %6596 = vmatmul.bf16.gmra.mxu0 %v5753_v5  ;;  %v8698_v35 = vld [vmem:[#allocation2] sm:$0xff] }
 0x5a1   : > { %6367 = vmatmul.bf16.gmra.mxu3 %v10947_v54  ;;  %v5972_v54 = vld [vmem:[#allocation2 + $0x18a] sm:$0xff] }
 0x5a2   : > { %v11059_v58 = vadd.f32 %v6557_v30, %v6388_v34  ;;  %v6223_v30 = vpack.c.bf16 %v8698_v35, %v8698_v35 }
 0x5a3   : > { %v5856_v51 = vpop.f32.mrf.mxu1  ;;  %v6093_v55 = vpop.f32.mrf.mxu2 }
 0x5a4   : > { %v5920_v61 = vadd.f32 %v5856_v51, %v10937_v50  ;;  %v6328_v1 = vpop.f32.mrf.mxu3  ;;  %v11065_v51 = vpack.c.bf16 %v5972_v54, %v5971_v31  ;;  %v6440_v31 = vld [vmem:[#allocation2 + $0x199] sm:$0xff] }
 0x5a5   : > { %v6559_v32 = vpop.f32.mrf.mxu0 }
 0x5a6   : > { %v6154_v2 = vadd.f32 %v6090_v37, %v5920_v61 }
 0x5a8   : > { %v6389_v24 = vadd.f32 %v6325_v43, %v6154_v2  ;;  %v5754_v43 = vpack.c.bf16 %v5738_v63, %v5737_v57 }
 0x5aa   : > { %v11062_v23 = vadd.f32 %v6559_v32, %v6389_v24 }
 0x5ab   : > { %v5859_v27 = vpop.f32.mrf.mxu1  ;;  %v6095_v38 = vpop.f32.mrf.mxu2 }
 0x5ac   : > { %v5921_v39 = vadd.f32 %v5859_v27, %v10940_v45  ;;  %v6330_v11 = vpop.f32.mrf.mxu3 }
 0x5ad   : > { %v6562_v34 = vpop.f32.mrf.mxu0 }
 0x5ae   : > { %5898 = vmatmul.bf16.gmra.mxu1 %v5753_v5  ;;  %v6155_v50 = vadd.f32 %v6093_v55, %v5921_v39 }
 0x5b0   : > { %v6390_v37 = vadd.f32 %v6328_v1, %v6155_v50  ;;  %6137 = vmatmul.bf16.gmra.mxu2 %v11065_v51  ;;  %6601 = vmatmul.bf16.gmra.mxu0 %v5754_v43  ;;  %v6441_v1 = vld [vmem:[#allocation2 + $0x1a1] sm:$0xff] }
 0x5b1   : > { %6372 = vmatmul.bf16.gmra.mxu3 %v6223_v30  ;;  %v6457_v50 = vpack.c.bf16 %v6441_v1, %v6440_v31 }
 0x5b2   : > { %v11068_v61 = vadd.f32 %v6562_v34, %v6390_v37 }
 0x5b3   : > { %v5861_v45 = vpop.f32.mrf.mxu1  ;;  %v6098_v32 = vpop.f32.mrf.mxu2 }
 0x5b4   : > { %v5922_v2 = vadd.f32 %v5861_v45, %v10942_v49  ;;  %v6333_v24 = vpop.f32.mrf.mxu3 }
 0x5b5   : > { %v6564_v35 = vpop.f32.mrf.mxu0 }
 0x5b6   : > { %v6156_v27 = vadd.f32 %v6095_v38, %v5922_v2 }
 0x5b8   : > { %v6391_v5 = vadd.f32 %v6330_v11, %v6156_v27 }
 0x5ba   : > { %v11071_v55 = vadd.f32 %v6564_v35, %v6391_v5 }
 0x5bb   : > { %v5864_v39 = vpop.f32.mrf.mxu1  ;;  %v6100_v57 = vpop.f32.mrf.mxu2 }
 0x5bc   : > { %11709 = vst [vmem:[#allocation16_spill] sm:$0xff] %v11071_v55  ;;  %v5923_v54 = vadd.f32 %v5864_v39, %v10945_v7  ;;  %v6335_v63 = vpop.f32.mrf.mxu3  ;;  %v6644_v55 = vld [vmem:[#allocation2 + $0x32] sm:$0xff]  ;;  %v6645_v7 = vld [vmem:[#allocation2 + $0x3a] sm:$0xff] }
 0x5bd   : > { %v6567_v34 = vpop.f32.mrf.mxu0  ;;  %v6676_v31 = vpack.c.bf16 %v6645_v7, %v6644_v55 }
 0x5be   : > { %5903 = vmatmul.bf16.gmra.mxu1 %v5754_v43  ;;  %v6157_v30 = vadd.f32 %v6098_v32, %v5923_v54 }
 0x5c0   : > { %v6392_v37 = vadd.f32 %v6333_v24, %v6157_v30  ;;  %6606 = vmatmul.bf16.gmra.mxu0 %v6457_v50 }
 0x5c2   : > { %v11074_v49 = vadd.f32 %v6567_v34, %v6392_v37 }
 0x5c3   : > { %v5866_v38 = vpop.f32.mrf.mxu1  ;;  %v6103_v45 = vpop.f32.mrf.mxu2 }
 0x5c4   : > { %v5924_v11 = vadd.f32 %v5866_v38, %v10952_v46  ;;  %v6338_v27 = vpop.f32.mrf.mxu3 }
 0x5c5   : > { %v6569_v35 = vpop.f32.mrf.mxu0 }
 0x5c6   : > { %v6158_v2 = vadd.f32 %v6100_v57, %v5924_v11 }
 0x5c8   : > { %v6393_v5 = vadd.f32 %v6335_v63, %v6158_v2  ;;  %v6646_v2 = vld [vmem:[#allocation2 + $0x4a] sm:$0xff] }
 0x5ca   : > { %v11077_v39 = vadd.f32 %v6569_v35, %v6393_v5  ;;  %v6647_v35 = vld [vmem:[#allocation2 + $0x52] sm:$0xff] }
 0x5cb   : > { %v5869_v43 = vpop.f32.mrf.mxu1  ;;  %v6105_v24 = vpop.f32.mrf.mxu2  ;;  %v6677_v7 = vpack.c.bf16 %v6647_v35, %v6646_v2 }
 0x5cc   : > { %v5925_v32 = vadd.f32 %v5869_v43, %v10954_v14  ;;  %v6340_v50 = vpop.f32.mrf.mxu3 }
 0x5cd   : > { %v6572_v54 = vpop.f32.mrf.mxu0 }
 0x5ce   : > { %6765 = vmatmul.bf16.vlgmr.msra.gmra.mxu1 %v6676_v31  ;;  %v6159_v1 = vadd.f32 %v6103_v45, %v5925_v32 }
 0x5d0   : > { %v6394_v30 = vadd.f32 %v6338_v27, %v6159_v1 }
 0x5d2   : > { %v11080_v46 = vadd.f32 %v6572_v54, %v6394_v30 }
 0x5d3   : > { %v5871_v57 = vpop.f32.mrf.mxu1  ;;  %v6108_v37 = vpop.f32.mrf.mxu2 }
 0x5d4   : > { %v5926_v34 = vadd.f32 %v5871_v57, %v10958_v60  ;;  %v6343_v55 = vpop.f32.mrf.mxu3 }
 0x5d5   : > { %v6574_v38 = vpop.f32.mrf.mxu0 }
 0x5d6   : > { %v6160_v63 = vadd.f32 %v6105_v24, %v5926_v34 }
 0x5d8   : > { %v6395_v11 = vadd.f32 %v6340_v50, %v6160_v63 }
 0x5da   : > { %v11083_v5 = vadd.f32 %v6574_v38, %v6395_v11 }
 0x5db   : > { %v5874_v14 = vpop.f32.mrf.mxu1  ;;  %v6110_v31 = vpop.f32.mrf.mxu2 }
 0x5dc   : > { %v5927_v45 = vadd.f32 %v5874_v14, %v10960_v21  ;;  %v6345_v54 = vpop.f32.mrf.mxu3 }
 0x5dd   : > { %v6577_v43 = vpop.f32.mrf.mxu0 }
 0x5de   : > { %6770 = vmatmul.bf16.gmra.mxu1 %v6677_v7  ;;  %v6161_v27 = vadd.f32 %v6108_v37, %v5927_v45 }
 0x5e0   : > { %v6396_v32 = vadd.f32 %v6343_v55, %v6161_v27 }
 0x5e2   : > { %v11086_v1 = vadd.f32 %v6577_v43, %v6396_v32 }
 0x5e3   : > { %v5876_v60 = vpop.f32.mrf.mxu1  ;;  %v6113_v38 = vpop.f32.mrf.mxu2 }
 0x5e4   : > { %v5928_v24 = vadd.f32 %v5876_v60, %v10964_v15  ;;  %v6348_v11 = vpop.f32.mrf.mxu3 }
 0x5e5   : > { %v6579_v50 = vpop.f32.mrf.mxu0 }
 0x5e6   : > { %v6162_v30 = vadd.f32 %v6110_v31, %v5928_v24 }
 0x5e8   : > { %v6397_v57 = vadd.f32 %v6345_v54, %v6162_v30 }
 0x5ea   : > { %v11089_v34 = vadd.f32 %v6579_v50, %v6397_v57  ;;  %v11710_v57 = vld [vmem:[#allocation14_spill] sm:$0xff] }
 0x5eb   : > { %v5879_v63 = vpop.f32.mrf.mxu1 }
 0x5ec   : > { %v5929_v21 = vadd.f32 %v5879_v63, %v10968_v0 }
 0x5ed   : > { %v6582_v2 = vpop.f32.mrf.mxu0 }
 0x5ee   : > { %6775 = vmatmul.bf16.gmra.mxu1 %v10966_v59  ;;  %v6163_v37 = vadd.f32 %v6113_v38, %v5929_v21  ;;  %v11711_v38 = vld [vmem:[#allocation15_spill] sm:$0xff] }
 0x5f0   : > { %v6398_v35 = vadd.f32 %v6348_v11, %v6163_v37 }
 0x5f2   : > { %v11093_v14 = vadd.f32 %v6582_v2, %v6398_v35 }
 0x5f3   : > { %v5881_v55 = vpop.f32.mrf.mxu1 }
 0x5f4   : > { %v11096_v15 = vadd.f32 %v5881_v55, %v10972_v8  ;;  %v11714_v55 = vld [vmem:[#allocation16_spill] sm:$0xff] }
 0x5fb   : > { %v5884_v45 = vpop.f32.mrf.mxu1 }
 0x5fc   : > { %v11099_v7 = vadd.f32 %v5884_v45, %v10976_v20  ;;  %v6674_v45 = vld [vmem:[#allocation2 + $0x19a] sm:$0xff] }
 0x5fe   : > { %6780 = vmatmul.bf16.gmra.mxu1 %v10974_v56 }
 0x603   : > { %v5886_v27 = vpop.f32.mrf.mxu1 }
 0x604   : > { %v11103_v0 = vadd.f32 %v5886_v27, %v10979_v52  ;;  %v6675_v27 = vld [vmem:[#allocation2 + $0x1a2] sm:$0xff] }
 0x60b   : > { %v5889_v59 = vpop.f32.mrf.mxu1 }
 0x60c   : > { %v11106_v43 = vadd.f32 %v5889_v59, %v10983_v33 }
 0x60e   : > { %6785 = vmatmul.bf16.gmra.mxu1 %v10981_v40 }
 0x613   : > { %v5891_v32 = vpop.f32.mrf.mxu1 }
 0x614   : > { %v11110_v8 = vadd.f32 %v5891_v32, %v10986_v26 }
 0x61b   : > { %v5894_v31 = vpop.f32.mrf.mxu1 }
 0x61c   : > { %v11113_v20 = vadd.f32 %v5894_v31, %v10990_v36 }
 0x61e   : > { %6790 = vmatmul.bf16.gmra.mxu1 %v10988_v19 }
 0x623   : > { %v5896_v56 = vpop.f32.mrf.mxu1 }
 0x624   : > { %v11117_v52 = vadd.f32 %v5896_v56, %v10993_v12 }
 0x62b   : > { %v5899_v60 = vpop.f32.mrf.mxu1 }
 0x62c   : > { %v11120_v33 = vadd.f32 %v5899_v60, %v10997_v17  ;;  %v6115_v60 = vpop.f32.mrf.mxu2 }
 0x62e   : > { %6795 = vmatmul.bf16.gmra.mxu1 %v10995_v53 }
 0x633   : > { %v5901_v40 = vpop.f32.mrf.mxu1 }
 0x634   : > { %v11124_v26 = vadd.f32 %v5901_v40, %v11000_v3  ;;  %v6350_v40 = vpop.f32.mrf.mxu3 }
 0x63b   : > { %v5904_v24 = vpop.f32.mrf.mxu1 }
 0x63c   : > { %v11127_v36 = vadd.f32 %v5904_v24, %v11004_v62  ;;  %v6584_v24 = vpop.f32.mrf.mxu0 }
 0x63e   : > { %6800 = vmatmul.bf16.gmra.mxu1 %v11002_v29 }
 0x643   : > { %v5906_v19 = vpop.f32.mrf.mxu1 }
 0x644   : > { %v11131_v12 = vadd.f32 %v5906_v19, %v11007_v28 }
 0x64b   : > { %v6766_v54 = vpop.f32.mrf.mxu1 }
 0x64c   : > { %v11134_v17 = vadd.f32 %v6766_v54, %v11013_v48  ;;  %v6118_v54 = vpop.f32.mrf.mxu2 }
 0x64e   : > { %6805 = vmatmul.bf16.gmra.mxu1 %v11010_v44 }
 0x653   : > { %v6768_v53 = vpop.f32.mrf.mxu1 }
 0x654   : > { %v11138_v3 = vadd.f32 %v6768_v53, %v11016_v9 }
 0x65b   : > { %v6771_v30 = vpop.f32.mrf.mxu1 }
 0x65c   : > { %v11141_v62 = vadd.f32 %v6771_v30, %v11022_v10  ;;  %v6353_v30 = vpop.f32.mrf.mxu3 }
 0x65e   : > { %6810 = vmatmul.bf16.gmra.mxu1 %v11019_v13 }
 0x663   : > { %v6773_v29 = vpop.f32.mrf.mxu1 }
 0x664   : > { %v11145_v28 = vadd.f32 %v6773_v29, %v11025_v18  ;;  %v6587_v29 = vpop.f32.mrf.mxu0 }
 0x66b   : > { %v6776_v50 = vpop.f32.mrf.mxu1 }
 0x66c   : > { %v11148_v48 = vadd.f32 %v6776_v50, %v11031_v47 }
 0x66e   : > { %6815 = vmatmul.bf16.gmra.mxu1 %v11028_v4 }
 0x673   : > { %v6778_v44 = vpop.f32.mrf.mxu1 }
 0x674   : > { %v11152_v9 = vadd.f32 %v6778_v44, %v11710_v57  ;;  %v6589_v57 = vpop.f32.mrf.mxu0 }
 0x67b   : > { %v6781_v63 = vpop.f32.mrf.mxu1 }
 0x67c   : > { %v11155_v10 = vadd.f32 %v6781_v63, %v11040_v6  ;;  %v6878_v63 = vadd.f32 %v11138_v3, %v11134_v17 }
 0x67e   : > { %6820 = vmatmul.bf16.gmra.mxu1 %v11037_v42 }
 0x683   : > { %v6783_v13 = vpop.f32.mrf.mxu1 }
 0x684   : > { %v11159_v18 = vadd.f32 %v6783_v13, %v11711_v38  ;;  %v6879_v38 = vadd.f32 %v6878_v63, %v11141_v62 }
 0x68b   : > { %v6786_v21 = vpop.f32.mrf.mxu1 }
 0x68c   : > { %v11162_v47 = vadd.f32 %v6786_v21, %v11049_v16  ;;  %v6880_v21 = vadd.f32 %v6879_v38, %v11145_v28 }
 0x68e   : > { %6825 = vmatmul.bf16.gmra.mxu1 %v11046_v25 }
 0x693   : > { %v6788_v4 = vpop.f32.mrf.mxu1 }
 0x694   : > { %v11166_v37 = vadd.f32 %v6788_v4, %v11052_v41 }
 0x69b   : > { %v6791_v11 = vpop.f32.mrf.mxu1 }
 0x69c   : > { %v11169_v6 = vadd.f32 %v6791_v11, %v11059_v58  ;;  %v6691_v58 = vpack.c.bf16 %v6675_v27, %v6674_v45  ;;  %v6592_v11 = vpop.f32.mrf.mxu0 }
 0x69e   : > { %6830 = vmatmul.bf16.gmra.mxu1 %v11055_v22 }
 0x6a3   : > { %v6793_v42 = vpop.f32.mrf.mxu1 }
 0x6a4   : > { %v11173_v2 = vadd.f32 %v6793_v42, %v11062_v23 }
 0x6a6   : > { %11712 = vst [vmem:[#allocation17_spill] sm:$0xff] %v11173_v2 }
 0x6ab   : > { %v6796_v35 = vpop.f32.mrf.mxu1 }
 0x6ac   : > { %v11176_v16 = vadd.f32 %v6796_v35, %v11068_v61 }
 0x6ae   : > { %11713 = vst [vmem:[#allocation18_spill] sm:$0xff] %v11176_v16  ;;  %6835 = vmatmul.bf16.gmra.mxu1 %v11065_v51 }
 0x6b3   : > { %v6798_v25 = vpop.f32.mrf.mxu1 }
 0x6b4   : > { %v11180_v41 = vadd.f32 %v6798_v25, %v11714_v55 }
 0x6b6   : > { %11715 = vst [vmem:[#allocation19_spill] sm:$0xff] %v11180_v41 }
 0x6bb   : > { %v6801_v59 = vpop.f32.mrf.mxu1 }
 0x6bc   : > { %v11183_v22 = vadd.f32 %v6801_v59, %v11074_v49  ;;  %v6594_v59 = vpop.f32.mrf.mxu0 }
 0x6be   : > { %11716 = vst [vmem:[#allocation9_spill] sm:$0xff] %v11183_v22  ;;  %6840 = vmatmul.bf16.gmra.mxu1 %v6691_v58 }
 0x6c3   : > { %v6803_v23 = vpop.f32.mrf.mxu1 }
 0x6c4   : > { %v11186_v32 = vadd.f32 %v6803_v23, %v11077_v39 }
 0x6cb   : > { %v6806_v61 = vpop.f32.mrf.mxu1 }
 0x6cc   : > { %v11189_v31 = vadd.f32 %v6806_v61, %v11080_v46  ;;  %v6120_v46 = vpop.f32.mrf.mxu2 }
 0x6d3   : > { %v6808_v51 = vpop.f32.mrf.mxu1 }
 0x6d4   : > { %v11192_v56 = vadd.f32 %v6808_v51, %v11083_v5  ;;  %v6355_v5 = vpop.f32.mrf.mxu3  ;;  %v6123_v13 = vpop.f32.mrf.mxu2 }
 0x6db   : > { %v6811_v19 = vpop.f32.mrf.mxu1 }
 0x6dc   : > { %v11195_v49 = vadd.f32 %v6811_v19, %v11086_v1  ;;  %v6358_v4 = vpop.f32.mrf.mxu3  ;;  %v6125_v25 = vpop.f32.mrf.mxu2 }
 0x6e3   : > { %v6813_v53 = vpop.f32.mrf.mxu1 }
 0x6e4   : > { %v11198_v39 = vadd.f32 %v6813_v53, %v11089_v34  ;;  %v6881_v34 = vadd.f32 %v6880_v21, %v11148_v48  ;;  %v6360_v27 = vpop.f32.mrf.mxu3  ;;  %v6128_v19 = vpop.f32.mrf.mxu2 }
 0x6e6   : > { %v6882_v42 = vadd.f32 %v6881_v34, %v11152_v9  ;;  %v6597_v34 = vpop.f32.mrf.mxu0 }
 0x6eb   : > { %v6816_v50 = vpop.f32.mrf.mxu1 }
 0x6ec   : > { %v11201_v44 = vadd.f32 %v6816_v50, %v11093_v14  ;;  %v6883_v14 = vadd.f32 %v6882_v42, %v11155_v10  ;;  %v6363_v38 = vpop.f32.mrf.mxu3  ;;  %v6164_v42 = vadd.f32 %v6115_v60, %v11096_v15  ;;  %v6168_v60 = vadd.f32 %v6125_v25, %v11110_v8 }
 0x6ee   : > { %v6884_v55 = vadd.f32 %v6883_v14, %v11159_v18 }
 0x6f0   : > { %v6885_v45 = vadd.f32 %v6884_v55, %v11162_v47  ;;  %v6165_v55 = vadd.f32 %v6118_v54, %v11099_v7 }
 0x6f2   : > { %v6886_v58 = vadd.f32 %v6885_v45, %v11166_v37 }
 0x6f3   : > { %v6818_v1 = vpop.f32.mrf.mxu1 }
 0x6f4   : > { %v6887_v61 = vadd.f32 %v6886_v58, %v11169_v6  ;;  %v6166_v58 = vadd.f32 %v6120_v46, %v11103_v0  ;;  %v6365_v7 = vpop.f32.mrf.mxu3 }
 0x6f6   : > { %v6888_v51 = vadd.f32 %v6887_v61, %v11173_v2  ;;  %v6130_v61 = vpop.f32.mrf.mxu2  ;;  %v6399_v2 = vadd.f32 %v6350_v40, %v6164_v42  ;;  %v6401_v15 = vadd.f32 %v6355_v5, %v6166_v58  ;;  %v6599_v40 = vpop.f32.mrf.mxu0  ;;  %v6169_v42 = vadd.f32 %v6128_v19, %v11113_v20 }
 0x6f8   : > { %v6889_v53 = vadd.f32 %v6888_v51, %v11176_v16  ;;  %v6633_v16 = vadd.f32 %v6584_v24, %v6399_v2  ;;  %v6635_v0 = vadd.f32 %v6589_v57, %v6401_v15  ;;  %v6170_v57 = vadd.f32 %v6130_v61, %v11117_v52 }
 0x6fa   : > { %v6890_v50 = vadd.f32 %v6889_v53, %v11180_v41  ;;  %v6400_v41 = vadd.f32 %v6353_v30, %v6165_v55 }
 0x6fb   : > { %v6821_v35 = vpop.f32.mrf.mxu1 }
 0x6fc   : > { %v6891_v21 = vadd.f32 %v6890_v50, %v11183_v22  ;;  %v6167_v50 = vadd.f32 %v6123_v13, %v11106_v43  ;;  %v6403_v43 = vadd.f32 %v6360_v27, %v6168_v60  ;;  %v6368_v25 = vpop.f32.mrf.mxu3 }
 0x6fe   : > { %v6892_v14 = vadd.f32 %v6891_v21, %v11186_v32  ;;  %v6634_v21 = vadd.f32 %v6587_v29, %v6400_v41  ;;  %v6402_v46 = vadd.f32 %v6358_v4, %v6167_v50  ;;  %v6637_v41 = vadd.f32 %v6594_v59, %v6403_v43  ;;  %v6133_v29 = vpop.f32.mrf.mxu2  ;;  %v6602_v59 = vpop.f32.mrf.mxu0 }
 0x6ff   : > { %v6171_v52 = vadd.f32 %v6133_v29, %v11120_v33 }
 0x700   : > { %v6893_v45 = vadd.f32 %v6892_v14, %v11189_v31  ;;  %v11228_v14 = vadd.f32 %v6818_v1, %v6633_v16  ;;  %v11232_v24 = vadd.f32 %v6821_v35, %v6634_v21  ;;  %v6636_v30 = vadd.f32 %v6592_v11, %v6402_v46 }
 0x701   : > { %v6404_v16 = vadd.f32 %v6363_v38, %v6169_v42  ;;  %v6405_v11 = vadd.f32 %v6365_v7, %v6170_v57  ;;  %v6406_v61 = vadd.f32 %v6368_v25, %v6171_v52 }
 0x702   : > { %v6894_v51 = vadd.f32 %v6893_v45, %v11192_v56 }
 0x703   : > { %v6823_v23 = vpop.f32.mrf.mxu1  ;;  %v6638_v20 = vadd.f32 %v6597_v34, %v6404_v16  ;;  %v6639_v19 = vadd.f32 %v6599_v40, %v6405_v11 }
 0x704   : > { %v6895_v22 = vadd.f32 %v6894_v51, %v11195_v49  ;;  %v11235_v8 = vadd.f32 %v6823_v23, %v6635_v0  ;;  %v6370_v51 = vpop.f32.mrf.mxu3 }
 0x706   : > { %v6896_v54 = vadd.f32 %v6895_v22, %v11198_v39  ;;  %v6135_v58 = vpop.f32.mrf.mxu2  ;;  %v6604_v50 = vpop.f32.mrf.mxu0 }
 0x707   : > { %v6172_v60 = vadd.f32 %v6135_v58, %v11124_v26  ;;  %v11717_v58 = vld [vmem:[#allocation13_spill] sm:$0xff] }
 0x708   : > { %v6897_v2 = vadd.f32 %v6896_v54, %v11201_v44 }
 0x709   : > { %v6407_v0 = vadd.f32 %v6370_v51, %v6172_v60 }
 0x70a   : > { %v6898_v5 = vadd.f32 %v6897_v2, %v11228_v14 }
 0x70b   : > { %v6826_v63 = vpop.f32.mrf.mxu1  ;;  %v6641_v40 = vadd.f32 %v6604_v50, %v6407_v0 }
 0x70c   : > { %v6899_v13 = vadd.f32 %v6898_v5, %v11232_v24  ;;  %v11239_v1 = vadd.f32 %v6826_v63, %v6636_v30  ;;  %v6373_v46 = vpop.f32.mrf.mxu3 }
 0x70e   : > { %v6900_v4 = vadd.f32 %v6899_v13, %v11235_v8  ;;  %v6138_v54 = vpop.f32.mrf.mxu2  ;;  %v6607_v43 = vpop.f32.mrf.mxu0 }
 0x70f   : > { %v6173_v33 = vadd.f32 %v6138_v54, %v11127_v36 }
 0x710   : > { %v6901_v27 = vadd.f32 %v6900_v4, %v11239_v1 }
 0x711   : > { %v6408_v5 = vadd.f32 %v6373_v46, %v6173_v33 }
 0x713   : > { %v6828_v53 = vpop.f32.mrf.mxu1  ;;  %v6642_v29 = vadd.f32 %v6607_v43, %v6408_v5 }
 0x714   : > { %v11242_v35 = vadd.f32 %v6828_v53, %v6637_v41  ;;  %v6640_v53 = vadd.f32 %v6602_v59, %v6406_v61  ;;  %v6375_v26 = vpop.f32.mrf.mxu3 }
 0x716   : > { %v6902_v38 = vadd.f32 %v6901_v27, %v11242_v35  ;;  %v6140_v41 = vpop.f32.mrf.mxu2 }
 0x717   : > { %v6174_v16 = vadd.f32 %v6140_v41, %v11131_v12 }
 0x719   : > { %v6409_v4 = vadd.f32 %v6375_v26, %v6174_v16  ;;  %v11718_v16 = vld [vmem:[#allocation17_spill] sm:$0xff] }
 0x71b   : > { %v6831_v22 = vpop.f32.mrf.mxu1 }
 0x71c   : > { %v6872_v23 = vadd.f32 %v6831_v22, %v6638_v20  ;;  %v6609_v20 = vpop.f32.mrf.mxu0 }
 0x71d   : > { %v6643_v11 = vadd.f32 %v6609_v20, %v6409_v4 }
 0x71e   : > { %v6903_v45 = vadd.f32 %v6902_v38, %v6872_v23 }
 0x723   : > { %v6833_v55 = vpop.f32.mrf.mxu1 }
 0x724   : > { %v6873_v63 = vadd.f32 %v6833_v55, %v6639_v19 }
 0x726   : > { %v6904_v34 = vadd.f32 %v6903_v45, %v6873_v63 }
 0x72b   : > { %v6836_v15 = vpop.f32.mrf.mxu1 }
 0x72c   : > { %v6874_v21 = vadd.f32 %v6836_v15, %v6640_v53 }
 0x72e   : > { %v6905_v7 = vadd.f32 %v6904_v34, %v6874_v21 }
 0x733   : > { %v6838_v42 = vpop.f32.mrf.mxu1 }
 0x734   : > { %v6875_v2 = vadd.f32 %v6838_v42, %v6641_v40 }
 0x736   : > { %v6906_v30 = vadd.f32 %v6905_v7, %v6875_v2 }
 0x73b   : > { %v6841_v22 = vpop.f32.mrf.mxu1 }
 0x73c   : > { %v6876_v57 = vadd.f32 %v6841_v22, %v6642_v29 }
 0x73e   : > { %v6907_v13 = vadd.f32 %v6906_v30, %v6876_v57 }
 0x743   : > { %v6843_v25 = vpop.f32.mrf.mxu1 }
 0x744   : > { %v6877_v27 = vadd.f32 %v6843_v25, %v6643_v11  ;;  %v11720_v11 = vld [vmem:[#allocation19_spill] sm:$0xff] }
 0x746   : > { %v6908_v59 = vadd.f32 %v6907_v13, %v6877_v27  ;;  %v11719_v13 = vld [vmem:[#allocation18_spill] sm:$0xff] }
 0x748   : > { %v6909_v19 = vrot.slane %v6908_v59, 4 }
 0x74a   : > { %v6910_v36 = vadd.f32 %v6909_v19, %v6908_v59  ;;  %v11721_v19 = vld [vmem:[#allocation9_spill] sm:$0xff] }
 0x74c   : > { %v6911_v38 = vrot.slane %v6910_v36, 2 }
 0x74e   : > { %v6912_v55 = vadd.f32 %v6911_v38, %v6910_v36 }
 0x750   : > { %v6913_v52 = vrot.slane %v6912_v55, 1 }
 0x752   : > { %v6914_v45 = vadd.f32 %v6913_v52, %v6912_v55 }
 0x754   : > { %v11251_v34 = vmul.f32 %v6914_v45, %v11717_v58 }
 0x756   : > { %v11254_v12 = vsub.f32 %v6872_v23, %v11251_v34  ;;  %v11257_v61 = vsub.f32 %v6873_v63, %v11251_v34  ;;  %v11260_v51 = vsub.f32 %v6874_v21, %v11251_v34  ;;  %v11263_v53 = vsub.f32 %v6875_v2, %v11251_v34 }
 0x757   : > { %v11266_v50 = vsub.f32 %v6876_v57, %v11251_v34  ;;  %v11269_v15 = vsub.f32 %v6877_v27, %v11251_v34  ;;  %v11273_v60 = vsub.f32 %v11134_v17, %v11251_v34  ;;  %v11277_v23 = vsub.f32 %v11138_v3, %v11251_v34 }
 0x758   : > { %v11281_v63 = vsub.f32 %v11141_v62, %v11251_v34  ;;  %v11289_v54 = vsub.f32 %v11145_v28, %v11251_v34  ;;  %v11293_v17 = vsub.f32 %v11148_v48, %v11251_v34  ;;  %v11299_v62 = vsub.f32 %v11152_v9, %v11251_v34 }
 0x759   : > { %v6948_v21 = vmul.f32 %v11273_v60, %v11273_v60  ;;  %v6949_v7 = vmul.f32 %v11277_v23, %v11277_v23  ;;  %v11305_v28 = vsub.f32 %v11155_v10, %v11251_v34  ;;  %v11311_v33 = vsub.f32 %v11159_v18, %v11251_v34 }
 0x75a   : > { %v6950_v3 = vmul.f32 %v11281_v63, %v11281_v63  ;;  %v6951_v40 = vmul.f32 %v11289_v54, %v11289_v54  ;;  %v6952_v48 = vmul.f32 %v11293_v17, %v11293_v17  ;;  %v6953_v9 = vmul.f32 %v11299_v62, %v11299_v62 }
 0x75b   : > { %v6980_v0 = vadd.f32 %v6949_v7, %v6948_v21  ;;  %v11317_v43 = vsub.f32 %v11162_v47, %v11251_v34  ;;  %v6954_v10 = vmul.f32 %v11305_v28, %v11305_v28  ;;  %v11323_v5 = vsub.f32 %v11166_v37, %v11251_v34 }
 0x75c   : > { %v6955_v18 = vmul.f32 %v11311_v33, %v11311_v33  ;;  %v11329_v29 = vsub.f32 %v11169_v6, %v11251_v34  ;;  %v11335_v57 = vsub.f32 %v11718_v16, %v11251_v34  ;;  %v11341_v20 = vsub.f32 %v11719_v13, %v11251_v34 }
 0x75d   : > { %v6981_v46 = vadd.f32 %v6980_v0, %v6950_v3  ;;  %v6956_v47 = vmul.f32 %v11317_v43, %v11317_v43  ;;  %v6957_v37 = vmul.f32 %v11323_v5, %v11323_v5  ;;  %v11347_v25 = vsub.f32 %v11720_v11, %v11251_v34 }
 0x75e   : > { %v6958_v6 = vmul.f32 %v11329_v29, %v11329_v29  ;;  %v6959_v27 = vmul.f32 %v11335_v57, %v11335_v57  ;;  %v11353_v36 = vsub.f32 %v11721_v19, %v11251_v34  ;;  %v6960_v38 = vmul.f32 %v11341_v20, %v11341_v20 }
 0x75f   : > { %v6982_v42 = vadd.f32 %v6981_v46, %v6951_v40  ;;  %v11359_v52 = vsub.f32 %v11186_v32, %v11251_v34  ;;  %v6961_v45 = vmul.f32 %v11347_v25, %v11347_v25  ;;  %v11365_v7 = vsub.f32 %v11189_v31, %v11251_v34 }
 0x760   : > { %v6962_v3 = vmul.f32 %v11353_v36, %v11353_v36  ;;  %v11371_v40 = vsub.f32 %v11192_v56, %v11251_v34  ;;  %v11407_v16 = vsub.f32 %v11235_v8, %v11251_v34  ;;  %v6974_v19 = vmul.f32 %v11254_v12, %v11254_v12 }
 0x761   : > { %v6983_v2 = vadd.f32 %v6982_v42, %v6952_v48  ;;  %v6963_v32 = vmul.f32 %v11359_v52, %v11359_v52  ;;  %v11377_v48 = vsub.f32 %v11195_v49, %v11251_v34  ;;  %v6964_v31 = vmul.f32 %v11365_v7, %v11365_v7 }
 0x762   : > { %v6965_v56 = vmul.f32 %v11371_v40, %v11371_v40  ;;  %v6971_v8 = vmul.f32 %v11407_v16, %v11407_v16 }
 0x763   : > { %v6984_v30 = vadd.f32 %v6983_v2, %v6953_v9  ;;  %v11383_v9 = vsub.f32 %v11198_v39, %v11251_v34  ;;  %v6966_v49 = vmul.f32 %v11377_v48, %v11377_v48 }
 0x765   : > { %v6985_v41 = vadd.f32 %v6984_v30, %v6954_v10  ;;  %v11389_v10 = vsub.f32 %v11201_v44, %v11251_v34  ;;  %v6967_v39 = vmul.f32 %v11383_v9, %v11383_v9 }
 0x767   : > { %v6986_v22 = vadd.f32 %v6985_v41, %v6955_v18  ;;  %v11395_v18 = vsub.f32 %v11228_v14, %v11251_v34  ;;  %v6968_v44 = vmul.f32 %v11389_v10, %v11389_v10 }
 0x769   : > { %v6987_v26 = vadd.f32 %v6986_v22, %v6956_v47  ;;  %v11401_v47 = vsub.f32 %v11232_v24, %v11251_v34  ;;  %v6969_v14 = vmul.f32 %v11395_v18, %v11395_v18 }
 0x76b   : > { %v6988_v4 = vadd.f32 %v6987_v26, %v6957_v37  ;;  %v11413_v26 = vsub.f32 %v11239_v1, %v11251_v34  ;;  %v6970_v24 = vmul.f32 %v11401_v47, %v11401_v47 }
 0x76d   : > { %v6989_v59 = vadd.f32 %v6988_v4, %v6958_v6  ;;  %v11419_v6 = vsub.f32 %v11242_v35, %v11251_v34  ;;  %v6972_v11 = vmul.f32 %v11413_v26, %v11413_v26  ;;  %v6975_v35 = vmul.f32 %v11257_v61, %v11257_v61 }
 0x76f   : > { %v6990_v55 = vadd.f32 %v6989_v59, %v6959_v27  ;;  %v6973_v1 = vmul.f32 %v11419_v6, %v11419_v6 }
 0x771   : > { %v6991_v21 = vadd.f32 %v6990_v55, %v6960_v38  ;;  %v6976_v55 = vmul.f32 %v11260_v51, %v11260_v51 }
 0x773   : > { %v6992_v0 = vadd.f32 %v6991_v21, %v6961_v45  ;;  %v6977_v21 = vmul.f32 %v11263_v53, %v11263_v53 }
 0x775   : > { %v6993_v46 = vadd.f32 %v6992_v0, %v6962_v3  ;;  %v6978_v0 = vmul.f32 %v11266_v50, %v11266_v50 }
 0x777   : > { %v6994_v42 = vadd.f32 %v6993_v46, %v6963_v32  ;;  %v6979_v46 = vmul.f32 %v11269_v15, %v11269_v15 }
 0x779   : > { %v6995_v2 = vadd.f32 %v6994_v42, %v6964_v31 }
 0x77b   : > { %v6996_v30 = vadd.f32 %v6995_v2, %v6965_v56 }
 0x77d   : > { %v6997_v41 = vadd.f32 %v6996_v30, %v6966_v49 }
 0x77f   : > { %v6998_v22 = vadd.f32 %v6997_v41, %v6967_v39 }
 0x781   : > { %v6999_v37 = vadd.f32 %v6998_v22, %v6968_v44 }
 0x783   : > { %v7000_v13 = vadd.f32 %v6999_v37, %v6969_v14 }
 0x785   : > { %v7001_v4 = vadd.f32 %v7000_v13, %v6970_v24 }
 0x787   : > { %v7002_v27 = vadd.f32 %v7001_v4, %v6971_v8 }
 0x789   : > { %v7003_v59 = vadd.f32 %v7002_v27, %v6972_v11  ;;  %v11444_v11 = vld [vmem:[%s11656_s5] ss:$0 sm:$0xff] }
 0x78b   : > { %v7004_v38 = vadd.f32 %v7003_v59, %v6973_v1 }
 0x78d   : > { %v7005_v34 = vadd.f32 %v7004_v38, %v6974_v19 }
 0x78f   : > { %v7006_v45 = vadd.f32 %v7005_v34, %v6975_v35 }
 0x791   : > { %v7007_v3 = vadd.f32 %v7006_v45, %v6976_v55 }
 0x793   : > { %v7008_v32 = vadd.f32 %v7007_v3, %v6977_v21 }
 0x795   : > { %v7009_v31 = vadd.f32 %v7008_v32, %v6978_v0 }
 0x797   : > { %v7010_v42 = vadd.f32 %v7009_v31, %v6979_v46 }
 0x799   : > { %v7011_v56 = vrot.slane %v7010_v42, 4 }
 0x79b   : > { %v7012_v2 = vadd.f32 %v7011_v56, %v7010_v42 }
 0x79d   : > { %v7013_v49 = vrot.slane %v7012_v2, 2 }
 0x79f   : > { %v7014_v30 = vadd.f32 %v7013_v49, %v7012_v2 }
 0x7a1   : > { %v7015_v39 = vrot.slane %v7014_v30, 1 }
 0x7a3   : > { %v7016_v41 = vadd.f32 %v7015_v39, %v7014_v30 }
 0x7a5   : > { %v7017_v44 = vmul.f32 %v7016_v41, %v11717_v58  ;;  %v11453_v58 = vld [vmem:[%s11657_s6] ss:$0 sm:$0xff] }
 0x7a7   : > { %v7018_v22 = vadd.f32 1e-05, %v7017_v44 }
 0x7a9   : > { %8678 = vrsqrt.f32 %v7018_v22  ;;  %vm7025_vm11 = vweird.f32 %v7018_v22 }
 0x7af   : > { %v8679_v14 = vpop.eup %8678 }
 0x7b0   : > { %v7020_v37 = vmul.f32 %v8679_v14, %v7018_v22  ;;  %vm7026_vm10 = vweird.f32 %v8679_v14 }
 0x7b1   : > { %vm7027_vm12 = vmor %vm7025_vm11, %vm7026_vm10 }
 0x7b2   : > { %v7021_v24 = vmul.f32 %v8679_v14, %v7020_v37 }
 0x7b4   : > { %v7022_v13 = vmul.f32 0.5, %v7021_v24 }
 0x7b6   : > { %v7023_v8 = vsub.f32 1.5, %v7022_v13 }
 0x7b8   : > { %v7024_v4 = vmul.f32 %v8679_v14, %v7023_v8 }
 0x7ba   : > { %v11446_v27 = vsel %vm7027_vm12, %v8679_v14, %v7024_v4 }
 0x7bb   : > { %v7060_v1 = vmul.f32 %v11446_v27, %v11269_v15  ;;  %v7029_v38 = vmul.f32 %v11446_v27, %v11273_v60  ;;  %v7030_v35 = vmul.f32 %v11446_v27, %v11277_v23  ;;  %v7031_v34 = vmul.f32 %v11446_v27, %v11281_v63 }
 0x7bc   : > { %v7032_v15 = vmul.f32 %v11446_v27, %v11289_v54  ;;  %v7033_v55 = vmul.f32 %v11446_v27, %v11293_v17  ;;  %v7034_v45 = vmul.f32 %v11446_v27, %v11299_v62  ;;  %v7035_v21 = vmul.f32 %v11446_v27, %v11305_v28 }
 0x7bd   : > { %v7096_v59 = vmul.f32 %v11444_v11, %v7060_v1  ;;  %v7065_v60 = vmul.f32 %v11444_v11, %v7029_v38  ;;  %v7066_v3 = vmul.f32 %v11444_v11, %v7030_v35  ;;  %v7067_v23 = vmul.f32 %v11444_v11, %v7031_v34 }
 0x7be   : > { %v7036_v63 = vmul.f32 %v11446_v27, %v11311_v33  ;;  %v7068_v54 = vmul.f32 %v11444_v11, %v7032_v15  ;;  %v7037_v17 = vmul.f32 %v11446_v27, %v11317_v43  ;;  %v7069_v62 = vmul.f32 %v11444_v11, %v7033_v55 }
 0x7bf   : > { %v7132_v19 = vadd.f32 %v11453_v58, %v7096_v59  ;;  %v7038_v28 = vmul.f32 %v11446_v27, %v11323_v5  ;;  %v7039_v0 = vmul.f32 %v11446_v27, %v11329_v29  ;;  %v7070_v32 = vmul.f32 %v11444_v11, %v7034_v45 }
 0x7c0   : > { %v7071_v46 = vmul.f32 %v11444_v11, %v7035_v21  ;;  %v7101_v33 = vadd.f32 %v11453_v58, %v7065_v60  ;;  %v7102_v31 = vadd.f32 %v11453_v58, %v7066_v3  ;;  %v7103_v43 = vadd.f32 %v11453_v58, %v7067_v23 }
 0x7c1   : > { %7164 = vst [vmem:[%s11459_s22 + $0xf8] sm:$0xff] %v7132_v19  ;;  %v7040_v42 = vmul.f32 %v11446_v27, %v11335_v57  ;;  %v7072_v5 = vmul.f32 %v11444_v11, %v7036_v63  ;;  %v7104_v56 = vadd.f32 %v11453_v58, %v7068_v54  ;;  %v7041_v29 = vmul.f32 %v11446_v27, %v11341_v20 }
 0x7c2   : > { %v7073_v2 = vmul.f32 %v11444_v11, %v7037_v17  ;;  %v7105_v49 = vadd.f32 %v11453_v58, %v7069_v62  ;;  %7133 = vst [vmem:[%s11459_s22] sm:$0xff] %v7101_v33  ;;  %v7042_v30 = vmul.f32 %v11446_v27, %v11347_v25  ;;  %v7074_v39 = vmul.f32 %v11444_v11, %v7038_v28 }
 0x7c3   : > { %v7106_v57 = vadd.f32 %v11453_v58, %v7070_v32  ;;  %7134 = vst [vmem:[%s11459_s22 + $0x8] sm:$0xff] %v7102_v31  ;;  %v7043_v41 = vmul.f32 %v11446_v27, %v11353_v36  ;;  %v7075_v20 = vmul.f32 %v11444_v11, %v7039_v0  ;;  %v7107_v44 = vadd.f32 %v11453_v58, %v7071_v46 }
 0x7c4   : > { %7135 = vst [vmem:[%s11459_s22 + $0x10] sm:$0xff] %v7103_v43  ;;  %v7044_v22 = vmul.f32 %v11446_v27, %v11359_v52  ;;  %v7076_v25 = vmul.f32 %v11444_v11, %v7040_v42  ;;  %v7108_v14 = vadd.f32 %v11453_v58, %v7072_v5  ;;  %v7045_v37 = vmul.f32 %v11446_v27, %v11365_v7 }
 0x7c5   : > { %7136 = vst [vmem:[%s11459_s22 + $0x18] sm:$0xff] %v7104_v56  ;;  %v7077_v36 = vmul.f32 %v11444_v11, %v7041_v29  ;;  %v7109_v24 = vadd.f32 %v11453_v58, %v7073_v2  ;;  %v7046_v13 = vmul.f32 %v11446_v27, %v11371_v40  ;;  %v7078_v52 = vmul.f32 %v11444_v11, %v7042_v30 }
 0x7c6   : > { %7137 = vst [vmem:[%s11459_s22 + $0x20] sm:$0xff] %v7105_v49  ;;  %v7110_v8 = vadd.f32 %v11453_v58, %v7074_v39  ;;  %v7047_v4 = vmul.f32 %v11446_v27, %v11377_v48  ;;  %v7079_v7 = vmul.f32 %v11444_v11, %v7043_v41  ;;  %v7111_v1 = vadd.f32 %v11453_v58, %v7075_v20 }
 0x7c7   : > { %7138 = vst [vmem:[%s11459_s22 + $0x28] sm:$0xff] %v7106_v57  ;;  %v7048_v59 = vmul.f32 %v11446_v27, %v11383_v9  ;;  %v7080_v40 = vmul.f32 %v11444_v11, %v7044_v22  ;;  %v7112_v19 = vadd.f32 %v11453_v58, %v7076_v25  ;;  %v7049_v38 = vmul.f32 %v11446_v27, %v11389_v10 }
 0x7c8   : > { %7139 = vst [vmem:[%s11459_s22 + $0x30] sm:$0xff] %v7107_v44  ;;  %v7081_v48 = vmul.f32 %v11444_v11, %v7045_v37  ;;  %v7113_v35 = vadd.f32 %v11453_v58, %v7077_v36  ;;  %v7050_v34 = vmul.f32 %v11446_v27, %v11395_v18  ;;  %v7082_v9 = vmul.f32 %v11444_v11, %v7046_v13 }
 0x7c9   : > { %7140 = vst [vmem:[%s11459_s22 + $0x38] sm:$0xff] %v7108_v14  ;;  %v7114_v15 = vadd.f32 %v11453_v58, %v7078_v52  ;;  %v7051_v55 = vmul.f32 %v11446_v27, %v11401_v47  ;;  %v7083_v10 = vmul.f32 %v11444_v11, %v7047_v4  ;;  %v7115_v45 = vadd.f32 %v11453_v58, %v7079_v7 }
 0x7ca   : > { %7141 = vst [vmem:[%s11459_s22 + $0x40] sm:$0xff] %v7109_v24  ;;  %v7052_v21 = vmul.f32 %v11446_v27, %v11407_v16  ;;  %v7084_v18 = vmul.f32 %v11444_v11, %v7048_v59  ;;  %v7116_v60 = vadd.f32 %v11453_v58, %v7080_v40  ;;  %v7053_v3 = vmul.f32 %v11446_v27, %v11413_v26 }
 0x7cb   : > { %7142 = vst [vmem:[%s11459_s22 + $0x48] sm:$0xff] %v7110_v8  ;;  %v7085_v47 = vmul.f32 %v11444_v11, %v7049_v38  ;;  %v7117_v23 = vadd.f32 %v11453_v58, %v7081_v48  ;;  %v7054_v63 = vmul.f32 %v11446_v27, %v11419_v6  ;;  %v7086_v16 = vmul.f32 %v11444_v11, %v7050_v34 }
 0x7cc   : > { %7143 = vst [vmem:[%s11459_s22 + $0x50] sm:$0xff] %v7111_v1  ;;  %v7118_v54 = vadd.f32 %v11453_v58, %v7082_v9  ;;  %v7055_v17 = vmul.f32 %v11446_v27, %v11254_v12  ;;  %v7087_v26 = vmul.f32 %v11444_v11, %v7051_v55  ;;  %v7119_v62 = vadd.f32 %v11453_v58, %v7083_v10 }
 0x7cd   : > { %7144 = vst [vmem:[%s11459_s22 + $0x58] sm:$0xff] %v7112_v19  ;;  %v7056_v28 = vmul.f32 %v11446_v27, %v11257_v61  ;;  %v7088_v6 = vmul.f32 %v11444_v11, %v7052_v21  ;;  %v7120_v0 = vadd.f32 %v11453_v58, %v7084_v18  ;;  %v7057_v32 = vmul.f32 %v11446_v27, %v11260_v51 }
 0x7ce   : > { %7145 = vst [vmem:[%s11459_s22 + $0x60] sm:$0xff] %v7113_v35  ;;  %v7089_v12 = vmul.f32 %v11444_v11, %v7053_v3  ;;  %v7121_v46 = vadd.f32 %v11453_v58, %v7085_v47  ;;  %v7058_v33 = vmul.f32 %v11446_v27, %v11263_v53  ;;  %v7090_v61 = vmul.f32 %v11444_v11, %v7054_v63 }
 0x7cf   : > { %7146 = vst [vmem:[%s11459_s22 + $0x68] sm:$0xff] %v7114_v15  ;;  %v7122_v31 = vadd.f32 %v11453_v58, %v7086_v16  ;;  %v7059_v43 = vmul.f32 %v11446_v27, %v11266_v50  ;;  %v7091_v51 = vmul.f32 %v11444_v11, %v7055_v17  ;;  %v7123_v42 = vadd.f32 %v11453_v58, %v7087_v26 }
 0x7d0   : > { %7147 = vst [vmem:[%s11459_s22 + $0x70] sm:$0xff] %v7115_v45  ;;  %v7092_v5 = vmul.f32 %v11444_v11, %v7056_v28  ;;  %v7124_v53 = vadd.f32 %v11453_v58, %v7088_v6  ;;  %v7093_v56 = vmul.f32 %v11444_v11, %v7057_v32  ;;  %v7125_v29 = vadd.f32 %v11453_v58, %v7089_v12 }
 0x7d1   : > { %7148 = vst [vmem:[%s11459_s22 + $0x78] sm:$0xff] %v7116_v60  ;;  %v7094_v50 = vmul.f32 %v11444_v11, %v7058_v33  ;;  %v7126_v27 = vadd.f32 %v11453_v58, %v7090_v61  ;;  %v7095_v2 = vmul.f32 %v11444_v11, %v7059_v43  ;;  %v7127_v49 = vadd.f32 %v11453_v58, %v7091_v51 }
 0x7d2   : > { %7149 = vst [vmem:[%s11459_s22 + $0x80] sm:$0xff] %v7117_v23  ;;  %v7128_v30 = vadd.f32 %v11453_v58, %v7092_v5  ;;  %v7129_v39 = vadd.f32 %v11453_v58, %v7093_v56 }
 0x7d3   : > { %7150 = vst [vmem:[%s11459_s22 + $0x88] sm:$0xff] %v7118_v54  ;;  %v7130_v57 = vadd.f32 %v11453_v58, %v7094_v50  ;;  %v7131_v11 = vadd.f32 %v11453_v58, %v7095_v2 }
 0x7d4   : > { %7151 = vst [vmem:[%s11459_s22 + $0x90] sm:$0xff] %v7119_v62 }
 0x7d5   : > { %7152 = vst [vmem:[%s11459_s22 + $0x98] sm:$0xff] %v7120_v0 }
 0x7d6   : > { %7153 = vst [vmem:[%s11459_s22 + $0xa0] sm:$0xff] %v7121_v46 }
 0x7d7   : > { %7154 = vst [vmem:[%s11459_s22 + $0xa8] sm:$0xff] %v7122_v31 }
 0x7d8   : > { %7155 = vst [vmem:[%s11459_s22 + $0xb0] sm:$0xff] %v7123_v42 }
 0x7d9   : > { %7156 = vst [vmem:[%s11459_s22 + $0xb8] sm:$0xff] %v7124_v53 }
 0x7da   : > { %7157 = vst [vmem:[%s11459_s22 + $0xc0] sm:$0xff] %v7125_v29 }
 0x7db   : > { %7158 = vst [vmem:[%s11459_s22 + $0xc8] sm:$0xff] %v7126_v27 }
 0x7dc   : > { %7159 = vst [vmem:[%s11459_s22 + $0xd0] sm:$0xff] %v7127_v49 }
 0x7dd   : > { %7160 = vst [vmem:[%s11459_s22 + $0xd8] sm:$0xff] %v7128_v30 }
 0x7de   : > { %7161 = vst [vmem:[%s11459_s22 + $0xe0] sm:$0xff] %v7129_v39 }
 0x7df   : > { %7162 = vst [vmem:[%s11459_s22 + $0xe8] sm:$0xff] %v7130_v57 }
 0x7e0   : > { %7163 = vst [vmem:[%s11459_s22 + $0xf0] sm:$0xff] %v7131_v11 }
 0x7e1   : > { %8756 = shalt.err (!%p8753_p8)
}
 0x7e2   : > { %s8802_s14 = smov 128   ;;  %s8803_s22 = smov 8  }
 0x7e3   : > { %8618 = dma.vmem_to_hbm [thread:$0]  (%p8882_p5), %s7179_s18, 4096, %s7181_s8, %s7166_s9, %s8802_s14, %s8802_s14, %s8803_s22  }
 0x7e4 PF: > { %p8630_p9 = scmp.ge.s32.totalorder %s8795_s27, 2  ;;  %s7195_s28 = sand.u32 1, %s8783_s24  }
 0x7e5   : > { %s7196_s21 = scalar_lea.sflag [#allocation5], %s7195_s28 }
 0x7e6   : > { %p8625_p10 = pnand %p8630_p9, %p8886_p6 }
 0x7e8   : > { %p8626_p11 = pneg %p8625_p10 }
 0x7ea   : > { %8778 = dma.done.wait (%p8626_p11), %s7196_s21, 4096  }
 0x7eb   : > { %8780 = vsyncadd (%p8626_p11), %s7196_s21, 4294963200  ;;  %p18_p12 = scmp.ge.s32.totalorder %s8869_s30, 4   ;;  %s11722_s24 = smov %s8787_s25 }
 0x7ec   : > { %s11723_s25 = smov %s8791_s26  ;;  %s11724_s26 = smov %s8880_s10 }
 0x7ed   : > { %s11725_s27 = smov %s8869_s30  ;;  %20 = sbr.rel (!%p18_p12) target bundleno = 4 (0x4), region = 108 }
 0x7f2   :  { %7202 = vsyncpa [#allocation4], 1 }
 0x7f3   :  { %7204 = vsyncpa [#allocation4 + $0x1], 1 }
 0x7f4   :  { %7205 = vsyncpa [#allocation5], 1 }
 0x7f5   :  { %7207 = vsyncpa [#allocation5 + $0x1], 1 }

</bundles_post_ra>
